<compile_context>
chip_gen: v7x
topology: tpu7x:2x2x1
jax: 0.10.0
libtpu: 0.0.40
codegen_flags: <defaults>
</compile_context>

<pallas_src>
import jax
import jax.numpy as jnp
from jax.experimental import pallas as pl
from jax.experimental.pallas import tpu as pltpu

# ---- small, deterministic configuration (scaled-down module defaults) ----
N_NODES = 4
EMBED_DIM = 8
IN_CHANNELS = 3
OUT_DIM = 10
N_KERNELS = 4
HIDDEN_DIM = 32
# n_hidden = 1 hard-coded: mlp = Linear(E,H) -> ReLU -> Linear(H,H)
# TODO(synk): generalize to arbitrary n_hidden (loop over hidden layers).

# (name, flat_size, target_shape) in the exact order of the OrderedDict in forward()
HEAD_SPECS = [
    ("conv1.weight", N_KERNELS * IN_CHANNELS * 5 * 5, (N_KERNELS, IN_CHANNELS, 5, 5)),
    ("conv1.bias", N_KERNELS, (N_KERNELS,)),
    ("conv2.weight", 2 * N_KERNELS * N_KERNELS * 5 * 5, (2 * N_KERNELS, N_KERNELS, 5, 5)),
    ("conv2.bias", 2 * N_KERNELS, (2 * N_KERNELS,)),
    ("fc1.weight", 120 * 2 * N_KERNELS * 5 * 5, (120, 2 * N_KERNELS * 5 * 5)),
    ("fc1.bias", 120, (120,)),
    ("fc2.weight", 84 * 120, (84, 120)),
    ("fc2.bias", 84, (84,)),
    ("fc3.weight", OUT_DIM * 84, (OUT_DIM, 84)),
    ("fc3.bias", OUT_DIM, (OUT_DIM,)),
]


def _ceil128(n):
    return ((n + 127) // 128) * 128


# 128-aligned packing of the 10 heads -> lane-aligned wrapper slices.
HEAD_PAD_SIZES = [_ceil128(s) for _, s, _ in HEAD_SPECS]
HEAD_OFFSETS = [sum(HEAD_PAD_SIZES[:i]) for i in range(len(HEAD_SPECS))]
ALIGNED_TOTAL = sum(HEAD_PAD_SIZES)                    # 36992

GRID_N = 2                                             # one tile per TC on v7x; 2 cheap
                                                       # serial steps on v5e/v6e.
TILE_N = _ceil128((ALIGNED_TOTAL + GRID_N - 1) // GRID_N)   # 18560 (multiple of 128)
TOTAL_PAD = GRID_N * TILE_N                            # 37120 (~0.3% padding waste)


def hypernet_kernel(idx_ref, emb_t_ref, w1_ref, b1_ref, w2t_ref, b2_ref,
                    wh_ref, bh_ref, out_ref):
    # Clamp idx: VMEM reads have no runtime OOB check, so never index with a raw value.
    idx = jnp.clip(idx_ref[0], 0, N_NODES - 1)

    # Embedding lookup as a one-hot masked lane-reduce on the transposed table (E, N).
    # Avoids dynamic slicing entirely; N_NODES is tiny.
    sel = jax.lax.broadcasted_iota(jnp.int32, (EMBED_DIM, N_NODES), 1) == idx
    e_col = jnp.sum(jnp.where(sel, emb_t_ref[...], 0.0), axis=1, keepdims=True)   # (E, 1)

    # Tiny 2-layer MLP entirely on VPU/XLU.  Orientation alternates column -> row ->
    # column so no transposes and no degenerate MXU mat-vecs are needed, and the final
    # features come out as an (H, 1) column ready for the head broadcast below.
    h_row = jnp.sum(e_col * w1_ref[...], axis=0, keepdims=True) + b1_ref[...]      # (1, H)
    h_row = jnp.maximum(h_row, 0.0)                                                # ReLU
    feat_col = jnp.sum(h_row * w2t_ref[...], axis=1, keepdims=True) + b2_ref[...]  # (H, 1)

    # Fused 10-head "mat-vec" on VPU/XLU (an M=1 MXU matmul would be weight-load bound):
    # lane-broadcast feat_col, multiply by the bf16 weight tile (promoted to f32),
    # sublane-reduce the HIDDEN_DIM rows -> lane-dense (1, TILE_N) output, add bias.
    prod = feat_col * wh_ref[...].astype(jnp.float32)                              # (H, TILE_N)
    out_ref[...] = (jnp.sum(prod, axis=0, keepdims=True)
                    + bh_ref[...]).astype(out_ref.dtype)


def hypernetwork_forward(idx, params):
    """idx: int32 array of shape (1,). Returns dict of generated weights (matches torch forward)."""
    emb_t, w1, b1, w2t, b2, wh_pad, bh_pad = params

    flat_pad = pl.pallas_call(
        hypernet_kernel,
        out_shape=jax.ShapeDtypeStruct((1, TOTAL_PAD), jnp.float32),
        grid_spec=pltpu.PrefetchScalarGridSpec(
            num_scalar_prefetch=1,
            grid=(GRID_N,),
            in_specs=[
                pl.BlockSpec((EMBED_DIM, N_NODES), lambda j, idx_ref: (0, 0)),
                pl.BlockSpec((EMBED_DIM, HIDDEN_DIM), lambda j, idx_ref: (0, 0)),
                pl.BlockSpec((1, HIDDEN_DIM), lambda j, idx_ref: (0, 0)),
                pl.BlockSpec((HIDDEN_DIM, HIDDEN_DIM), lambda j, idx_ref: (0, 0)),
                pl.BlockSpec((HIDDEN_DIM, 1), lambda j, idx_ref: (0, 0)),
                pl.BlockSpec((HIDDEN_DIM, TILE_N), lambda j, idx_ref: (0, j)),
                pl.BlockSpec((1, TILE_N), lambda j, idx_ref: (0, j)),
            ],
            out_specs=pl.BlockSpec((1, TILE_N), lambda j, idx_ref: (0, j)),
        ),
        compiler_params=pltpu.CompilerParams(
            dimension_semantics=("parallel",),          # 1 tile per TC on v7x
            vmem_limit_bytes=32 * 1024 * 1024,          # headroom for f32 temps of the
        ),                                              # (H, TILE_N) product on v5e
        cost_estimate=pl.CostEstimate(
            flops=2 * HIDDEN_DIM * TOTAL_PAD,
            transcendentals=0,
            bytes_accessed=HIDDEN_DIM * TOTAL_PAD * 2   # bf16 head weights (dominant)
                           + 2 * TOTAL_PAD * 4,         # f32 bias in + f32 out
        ),
    )(idx, emb_t, w1, b1, w2t, b2, wh_pad, bh_pad)

    flat = flat_pad[0]

    # Glue: lane-aligned static slices + reshape into the torch OrderedDict layout.
    weights = {}
    for (name, size, shape), off in zip(HEAD_SPECS, HEAD_OFFSETS):
        weights[name] = flat[off:off + size].reshape(shape)
    return weights


def init_params(key):
    """Deterministic params (PyTorch-style U(-1/sqrt(fan_in), 1/sqrt(fan_in)) for Linear)."""
    keys = jax.random.split(key, 25)
    ki = iter(range(25))

    def uniform(shape, fan_in):
        lim = 1.0 / (fan_in ** 0.5)
        return jax.random.uniform(keys[next(ki)], shape, jnp.float32, -lim, lim)

    emb = jax.random.normal(keys[next(ki)], (N_NODES, EMBED_DIM), jnp.float32)
    emb_t = emb.T                                        # (E, N_NODES) for the kernel

    w1 = uniform((EMBED_DIM, HIDDEN_DIM), EMBED_DIM)     # y = x @ W + b convention
    b1 = uniform((1, HIDDEN_DIM), EMBED_DIM)
    w2 = uniform((HIDDEN_DIM, HIDDEN_DIM), HIDDEN_DIM)
    b2 = uniform((1, HIDDEN_DIM), HIDDEN_DIM)
    w2t = w2.T                                           # (H_out, H_in) for the kernel
    b2_col = b2.T                                        # (H, 1)

    # Fused, 128-aligned head weights.  Stored bf16 (halves the dominant HBM read);
    # bias kept f32 (tiny, keeps precision).  Padding columns are zero.
    wh = jnp.zeros((HIDDEN_DIM, TOTAL_PAD), jnp.float32)
    bh = jnp.zeros((1, TOTAL_PAD), jnp.float32)
    for (name, size, shape), off in zip(HEAD_SPECS, HEAD_OFFSETS):
        hw = uniform((HIDDEN_DIM, size), HIDDEN_DIM)
        hb = uniform((1, size), HIDDEN_DIM)
        wh = wh.at[:, off:off + size].set(hw)
        bh = bh.at[:, off:off + size].set(hb)
    wh_bf16 = wh.astype(jnp.bfloat16)

    return emb_t, w1, b1, w2t, b2_col, wh_bf16, bh


def reference_forward(idx, params):
    """Plain-JAX reference matching the torch module semantics (same bf16 head weights)."""
    emb_t, w1, b1, w2t, b2_col, wh_bf16, bh = params
    hi = jax.lax.Precision.HIGHEST
    e = emb_t[:, idx[0]][None, :]                                        # (1, E)
    h = jnp.maximum(jnp.dot(e, w1, precision=hi) + b1, 0.0)              # (1, H)
    feat = jnp.dot(h, w2t.T, precision=hi) + b2_col.T                    # (1, H)
    flat = (jnp.dot(feat, wh_bf16.astype(jnp.float32), precision=hi) + bh)[0]
    out = {}
    for (name, size, shape), off in zip(HEAD_SPECS, HEAD_OFFSETS):
        out[name] = flat[off:off + size].reshape(shape)
    return out


if __name__ == "__main__":
    key = jax.random.PRNGKey(0)
    params = init_params(key)
    idx = jnp.array([1], dtype=jnp.int32)

    weights = hypernetwork_forward(idx, params)
    jax.block_until_ready(weights)

    ref = reference_forward(idx, params)
    for name, _, shape in HEAD_SPECS:
        assert weights[name].shape == tuple(shape), name
        # Both paths use identical bf16-quantized head weights; remaining difference is
        # f32 accumulation order only.
        assert jnp.allclose(weights[name], ref[name], rtol=1e-3, atol=1e-5), name

    print("KERNEL_OK")
</pallas_src>

<mosaic_0001>
module attributes {stable_mosaic.version = 11 : i64} {
  func.func @hypernet_kernel(%arg0: i32, %arg1: memref<1xi32, #tpu.memory_space<smem>>, %arg2: memref<8x4xf32, #tpu.memory_space<vmem>>, %arg3: memref<8x32xf32, #tpu.memory_space<vmem>>, %arg4: memref<1x32xf32, #tpu.memory_space<vmem>>, %arg5: memref<32x32xf32, #tpu.memory_space<vmem>>, %arg6: memref<32x1xf32, #tpu.memory_space<vmem>>, %arg7: memref<32x18560xbf16, #tpu.memory_space<vmem>>, %arg8: memref<1x18560xf32, #tpu.memory_space<vmem>>, %arg9: memref<1x18560xf32, #tpu.memory_space<vmem>>) attributes {dimension_semantics = [#tpu.dimension_semantics<parallel>], iteration_bounds = array<i64: 2>, scalar_prefetch = 1 : i64, scratch_operands = 0 : i64, tpu.core_type = #tpu.core_type<tc>, window_params = [{pipeline_mode = #tpu.pipeline_mode<synchronous>, transform_indices = @transform_0, window_bounds = array<i64: 8, 4>}, {pipeline_mode = #tpu.pipeline_mode<synchronous>, transform_indices = @transform_1, window_bounds = array<i64: 8, 32>}, {pipeline_mode = #tpu.pipeline_mode<synchronous>, transform_indices = @transform_2, window_bounds = array<i64: 1, 32>}, {pipeline_mode = #tpu.pipeline_mode<synchronous>, transform_indices = @transform_3, window_bounds = array<i64: 32, 32>}, {pipeline_mode = #tpu.pipeline_mode<synchronous>, transform_indices = @transform_4, window_bounds = array<i64: 32, 1>}, {transform_indices = @transform_5, window_bounds = array<i64: 32, 18560>}, {transform_indices = @transform_6, window_bounds = array<i64: 1, 18560>}, {transform_indices = @transform_7, window_bounds = array<i64: 1, 18560>}]} {
    %c0 = arith.constant 0 : index
    %0 = memref.load %arg1[%c0] : memref<1xi32, #tpu.memory_space<smem>>
    %c0_i32 = arith.constant 0 : i32
    %c3_i32 = arith.constant 3 : i32
    %1 = arith.maxsi %c0_i32, %0 : i32
    %2 = arith.minsi %c3_i32, %1 : i32
    %3 = tpu.iota {dimensions = array<i32: 1>} : vector<8x4xi32>
    %4 = vector.broadcast %2 : i32 to vector<8x4xi32>
    %5 = arith.cmpi eq, %3, %4 : vector<8x4xi32>
    %c0_0 = arith.constant 0 : index
    %c0_1 = arith.constant 0 : index
    %6 = vector.load %arg2[%c0_0, %c0_1] : memref<8x4xf32, #tpu.memory_space<vmem>>, vector<8x4xf32>
    %cst = arith.constant 0.000000e+00 : f32
    %7 = vector.broadcast %cst : f32 to vector<8x4xf32>
    %8 = arith.select %5, %6, %7 : vector<8x4xi1>, vector<8x4xf32>
    %cst_2 = arith.constant dense<0.000000e+00> : vector<8xf32>
    %9 = vector.multi_reduction <add>, %8, %cst_2 [1] : vector<8x4xf32> to vector<8xf32>
    %10 = vector.shape_cast %9 : vector<8xf32> to vector<8x1xf32>
    %c0_3 = arith.constant 0 : index
    %c0_4 = arith.constant 0 : index
    %11 = vector.load %arg3[%c0_3, %c0_4] : memref<8x32xf32, #tpu.memory_space<vmem>>, vector<8x32xf32>
    %12 = vector.broadcast %10 : vector<8x1xf32> to vector<8x32xf32>
    %13 = arith.mulf %12, %11 : vector<8x32xf32>
    %cst_5 = arith.constant dense<0.000000e+00> : vector<32xf32>
    %14 = vector.multi_reduction <add>, %13, %cst_5 [0] : vector<8x32xf32> to vector<32xf32>
    %15 = vector.shape_cast %14 : vector<32xf32> to vector<1x32xf32>
    %c0_6 = arith.constant 0 : index
    %c0_7 = arith.constant 0 : index
    %16 = vector.load %arg4[%c0_6, %c0_7] : memref<1x32xf32, #tpu.memory_space<vmem>>, vector<1x32xf32>
    %17 = arith.addf %15, %16 : vector<1x32xf32>
    %cst_8 = arith.constant 0.000000e+00 : f32
    %18 = vector.broadcast %cst_8 : f32 to vector<1x32xf32>
    %19 = arith.maximumf %17, %18 : vector<1x32xf32>
    %c0_9 = arith.constant 0 : index
    %c0_10 = arith.constant 0 : index
    %20 = vector.load %arg5[%c0_9, %c0_10] : memref<32x32xf32, #tpu.memory_space<vmem>>, vector<32x32xf32>
    %21 = vector.broadcast %19 : vector<1x32xf32> to vector<32x32xf32>
    %22 = arith.mulf %21, %20 : vector<32x32xf32>
    %cst_11 = arith.constant dense<0.000000e+00> : vector<32xf32>
    %23 = vector.multi_reduction <add>, %22, %cst_11 [1] : vector<32x32xf32> to vector<32xf32>
    %24 = vector.shape_cast %23 : vector<32xf32> to vector<32x1xf32>
    %c0_12 = arith.constant 0 : index
    %c0_13 = arith.constant 0 : index
    %25 = vector.load %arg6[%c0_12, %c0_13] : memref<32x1xf32, #tpu.memory_space<vmem>>, vector<32x1xf32>
    %26 = arith.addf %24, %25 : vector<32x1xf32>
    %c0_14 = arith.constant 0 : index
    %c0_15 = arith.constant 0 : index
    %27 = vector.load %arg7[%c0_14, %c0_15] : memref<32x18560xbf16, #tpu.memory_space<vmem>>, vector<32x18560xbf16>
    %28 = arith.extf %27 : vector<32x18560xbf16> to vector<32x18560xf32>
    %29 = vector.broadcast %26 : vector<32x1xf32> to vector<32x18560xf32>
    %30 = arith.mulf %29, %28 : vector<32x18560xf32>
    %cst_16 = arith.constant dense<0.000000e+00> : vector<18560xf32>
    %31 = vector.multi_reduction <add>, %30, %cst_16 [0] : vector<32x18560xf32> to vector<18560xf32>
    %32 = vector.shape_cast %31 : vector<18560xf32> to vector<1x18560xf32>
    %c0_17 = arith.constant 0 : index
    %c0_18 = arith.constant 0 : index
    %33 = vector.load %arg8[%c0_17, %c0_18] : memref<1x18560xf32, #tpu.memory_space<vmem>>, vector<1x18560xf32>
    %34 = arith.addf %32, %33 : vector<1x18560xf32>
    %c0_19 = arith.constant 0 : index
    %c0_20 = arith.constant 0 : index
    %35 = vector.load %arg9[%c0_19, %c0_20] : memref<1x18560xf32, #tpu.memory_space<vmem>>, vector<1x18560xf32>
    tpu.vector_store %arg9[%c0_19, %c0_20], %34 {strides = array<i32>} : memref<1x18560xf32, #tpu.memory_space<vmem>>, vector<1x18560xf32>,
    return
  }
  func.func @transform_0(%arg0: i32, %arg1: memref<1xi32, #tpu.memory_space<smem>>) -> (i32, i32) {
    %c0_i32 = arith.constant 0 : i32
    %c0_i32_0 = arith.constant 0 : i32
    %c0_i32_1 = arith.constant 0 : i32
    return %c0_i32, %c0_i32_0 : i32, i32
  }
  func.func @transform_1(%arg0: i32, %arg1: memref<1xi32, #tpu.memory_space<smem>>) -> (i32, i32) {
    %c0_i32 = arith.constant 0 : i32
    %c0_i32_0 = arith.constant 0 : i32
    %c0_i32_1 = arith.constant 0 : i32
    return %c0_i32, %c0_i32_0 : i32, i32
  }
  func.func @transform_2(%arg0: i32, %arg1: memref<1xi32, #tpu.memory_space<smem>>) -> (i32, i32) {
    %c0_i32 = arith.constant 0 : i32
    %c0_i32_0 = arith.constant 0 : i32
    %c0_i32_1 = arith.constant 0 : i32
    return %c0_i32, %c0_i32_0 : i32, i32
  }
  func.func @transform_3(%arg0: i32, %arg1: memref<1xi32, #tpu.memory_space<smem>>) -> (i32, i32) {
    %c0_i32 = arith.constant 0 : i32
    %c0_i32_0 = arith.constant 0 : i32
    %c0_i32_1 = arith.constant 0 : i32
    return %c0_i32, %c0_i32_0 : i32, i32
  }
  func.func @transform_4(%arg0: i32, %arg1: memref<1xi32, #tpu.memory_space<smem>>) -> (i32, i32) {
    %c0_i32 = arith.constant 0 : i32
    %c0_i32_0 = arith.constant 0 : i32
    %c0_i32_1 = arith.constant 0 : i32
    return %c0_i32, %c0_i32_0 : i32, i32
  }
  func.func @transform_5(%arg0: i32, %arg1: memref<1xi32, #tpu.memory_space<smem>>) -> (i32, i32) {
    %c0_i32 = arith.constant 0 : i32
    %c0_i32_0 = arith.constant 0 : i32
    return %c0_i32, %arg0 : i32, i32
  }
  func.func @transform_6(%arg0: i32, %arg1: memref<1xi32, #tpu.memory_space<smem>>) -> (i32, i32) {
    %c0_i32 = arith.constant 0 : i32
    %c0_i32_0 = arith.constant 0 : i32
    return %c0_i32, %arg0 : i32, i32
  }
  func.func @transform_7(%arg0: i32, %arg1: memref<1xi32, #tpu.memory_space<smem>>) -> (i32, i32) {
    %c0_i32 = arith.constant 0 : i32
    %c0_i32_0 = arith.constant 0 : i32
    return %c0_i32, %arg0 : i32, i32
  }
}

</mosaic_0001>

<bundles_post_ra>
// kernel: tpu_custom_call.1
= control target key start
LH: loop header
LB: loop body
LE: loop exit
PB: predicated region body
PF: predicated region fallthrough
CT: control target
= control target key end

     0   :  { %s12802_s0 = inlined_call_operand.<no memory space> [shape: s32[1], index: 0, kind: input, shape index: {}]   ;;  %s12803_s1 = inlined_call_operand.vmem [shape: f32[8,4], index: 1, kind: input, shape index: {}]   ;;  %s12804_s2 = inlined_call_operand.hbm [shape: f32[8,32], index: 2, kind: input, shape index: {}]   ;;  %s12805_s3 = inlined_call_operand.hbm [shape: f32[1,32], index: 3, kind: input, shape index: {}]   ;;  %s12806_s4 = inlined_call_operand.hbm [shape: f32[32,32], index: 4, kind: input, shape index: {}]   ;;  %s12807_s5 = inlined_call_operand.vmem [shape: f32[32,1], index: 5, kind: input, shape index: {}]   ;;  %s12808_s6 = inlined_call_operand.hbm [shape: bf16[32,37120], index: 6, kind: input, shape index: {}]   ;;  %s12809_s7 = inlined_call_operand.hbm [shape: f32[1,37120], index: 7, kind: input, shape index: {}]   ;;  %s12810_s8 = inlined_call_operand.hbm [shape: f32[1,37120], index: 8, kind: output, shape index: {}]  }
   0x1   :  { %13305 = sst [smem:[#allocation550_spill]] %s12805_s3 }
   0x2   :  { %13306 = sst [smem:[#allocation551_spill]] %s12808_s6 }
   0x3   :  { %13307 = sst [smem:[#allocation552_spill]] %s12810_s8 }
   0x4   :  { %13 = sst [smem:[#allocation3]] %s12802_s0 }
   0x5   :  { %14 = vsyncpa [#allocation5], 0 }
   0x6   :  { %15 = vsyncpa [#allocation8], 0 }
   0x7   :  { %16 = vsyncpa [#allocation11], 0 }
   0x8   :  { %18 = vsyncpa [#allocation11 + $0x1], 0 }
   0x9   :  { %19 = vsyncpa [#allocation6], 0 }
   0xa   :  { %21 = vsyncpa [#allocation6 + $0x1], 0  ;;  %s5743_s29 = smov 0   ;;  %s5745_s30 = smov 0  }
   0xb   :  { %s5747_s9 = smov 0   ;;  %s5749_s10 = smov 0  }
   0xc LB: > { %13308 = sst [smem:[#allocation18_spill]] %s5668_s29  ;;  %s5764_s0 = sadd.s32 4294967295, %s5680_s10   ;;  %s5680_s10 = sphi %s5749_s10, %s16038_s10   ;;  %s5676_s9 = sphi %s5747_s9, %s16042_s9   ;;  %s5672_s30 = sphi %s5745_s30, %s16041_s30   ;;  %s5668_s29 = sphi %s5743_s29, %s16040_s29  }
   0xd   : > { %s5341_s11 = sadd.s32 4294967294, %s5680_s10   ;;  %s5768_s12 = sadd.s32 1, %s5680_s10  }
   0xe   : > { %13309 = sst [smem:[#allocation19_spill]] %s5768_s12  ;;  %s139_s13 = sadd.s32 1, %s5676_s9 }
   0xf   : > { %s136_s14 = ssub.s32 %s5680_s10, %s5768_s12  ;;  %p146_p0 = scmp.ne.s32.totalorder %s5676_s9, %s5672_s30 }
  0x10   : > { %p137_p1 = scmp.eq.s32.totalorder %s136_s14, 0  ;;  %p147_p2 = scmp.eq.s32.totalorder %s5680_s10, 0 }
  0x11   : > { %p152_p3 = scmp.ne.s32.totalorder %s5672_s30, %s5668_s29  ;;  %p12811_p4 = scmp.eq.s32.totalorder %s5764_s0, 0 }
  0x12   : > { %s5780_s15 = scalar_select %p137_p1, %s5676_s9, %s139_s13  }
  0x13   : > { %p5782_p5 = por %p147_p2, %p146_p0  ;;  %p5788_p6 = por %p12811_p4, %p152_p3 }
  0x14   : > { %13310 = sst [smem:[#allocation20_spill]] %s5780_s15  ;;  %p202_p7 = scmp.eq.s32.totalorder %s5764_s0, 1 }
  0x15   : > { %s13312_s17 = scalar_select %p5788_p6, 1, 0 }
  0x16   : > { %p208_p8 = scmp.eq.s32.totalorder %s5341_s11, 1  ;;  %p5342_p9 = scmp.ge.s32.totalorder %s5680_s10, 1 }
  0x17   : > { %p215_p10 = scmp.lt.s32.totalorder %s5680_s10, 3  ;;  %p5795_p11 = por %p202_p7, %p146_p0 }
  0x18   : > { %p5799_p12 = por %p208_p8, %p152_p3  ;;  %s5682_s21 = smov [#allocation7]  }
  0x19   : > { %s13313_s18 = scalar_select %p5795_p11, 1, 0 }
  0x1a   : > { %s13314_s19 = scalar_select %p5799_p12, 1, 0 }
  0x1b   : > { %p5803_p13 = pnand %p5342_p9, %p215_p10  ;;  %s242_s22 = sshll.u32 %s5682_s21, 4  ;;  %s243_s22 = int_to_ptr.vmem [resolvable:$true] %s242_s22 }
  0x1c   : > { %13315 = sst [smem:[#allocation21_spill]] %s13314_s19  ;;  %p5413_p4 = scmp.lt.s32.totalorder %s5680_s10, 2 }
  0x1d   : > { %s13316_s20 = scalar_select %p5803_p13, 1, 0 }
  0x1e   : > { %p5389_p2 = pneg %p5803_p13  ;;  %p13317_p0 = scmp.eq.s32.totalorder %s5764_s0, 0 }
  0x1f   : > { %s269_s24 = sand.u32 1, %s5680_s10   ;;  %p5820_p3 = pnand %p5413_p4, %p5782_p5 }
  0x20   : > { %p5813_p7 = pnand %p5389_p2, %p13317_p0  ;;  %s12819_s26 = sand.u32 1, %s5676_s9  }
  0x21   : > { %s13319_s25 = scalar_select %p5820_p3, 1, 0 }
  0x22   : > { %s13318_s23 = scalar_select %p5813_p7, 1, 0 }
  0x23   : > { %s13320_s3 = sld [smem:[#allocation550_spill]]  ;;  %p5833_p9 = pneg %p5813_p7 }
  0x29   : > { %s5462_s11 = scalar_lea.hbm %s13320_s3, 16 }
  0x2a   : > { %p5463_p8 = scmp.ne.s32.totalorder %s13320_s3, %s5462_s11  ;;  %p5469_p10 = scmp.lt.u32.totalorder %s5462_s11, %s13320_s3 }
  0x2c   : > { %p5465_p4 = pnand %p5833_p9, %p5463_p8 }
  0x2e   : > { %p5466_p5 = pneg %p5465_p4 }
  0x30   : > { %p5471_p2 = pnand %p5469_p10, %p5466_p5 }
  0x32   : > { %5474 = shalt.err (!%p5471_p2)
}
  0x33   : > { %s5475_s27 = scalar_lea.vmem %s243_s22, 16  ;;  %s5482_s28 = scalar_lea.vmem %s243_s22, 32 }
  0x34   : > { %p5476_p0 = scmp.ne.s32.totalorder %s243_s22, %s5475_s27  ;;  %p5483_p11 = scmp.lt.s32.totalorder %s243_s22, %s243_s22 }
  0x35   : > { %p5484_p6 = scmp.lt.s32.totalorder %s5482_s28, %s5475_s27 }
  0x36   : > { %p5478_p1 = pnand %p5476_p0, %p5833_p9 }
  0x37   : > { %p5485_p13 = por %p5484_p6, %p5483_p11 }
  0x38   : > { %p5479_p12 = pneg %p5478_p1 }
  0x3a   : > { %p5486_p3 = pnand %p5485_p13, %p5479_p12 }
  0x3c   : > { %5489 = shalt.err (!%p5486_p3)
}
  0x3d   : > { %5395 = dma.hbm_to_vmem [thread:$0]  (!%p5813_p7), %s13320_s3, 16, %s243_s22, [#allocation8]  }
  0x3e   : > { %s5367_s15 = smul.u32 2320, %s12819_s26  ;;  %s13322_s6 = sld [smem:[#allocation551_spill]] }
  0x3f   : > { %s5362_s11 = smul.u32 9280, %s5680_s10  ;;  %s5859_s13 = scalar_lea.sflag [#allocation11], %s269_s24 }
  0x40   : > { %s273_s28 = scalar_lea.vmem [#allocation10], %s5367_s15  ;;  %p13323_p11 = scmp.ne.s32.totalorder %s13319_s25, 0 }
  0x41   : > { %s280_s19 = sshll.u32 %s273_s28, 4  ;;  %s5857_s19 = int_to_ptr.vmem [resolvable:$true] %s280_s19 }
  0x42   : > { %p12824_p12 = pneg %p13323_p11 }
  0x44   : > { %s5855_s27 = scalar_lea.hbm %s13322_s6, %s5362_s11  ;;  %s5495_s11 = scalar_lea.hbm %s13322_s6, 74240 }
  0x45   : > { %s5490_s14 = scalar_lea.hbm %s5855_s27, 37120  ;;  %p5496_p3 = scmp.lt.u32.totalorder %s5855_s27, %s13322_s6 }
  0x46   : > { %p5491_p6 = scmp.ne.s32.totalorder %s5855_s27, %s5490_s14  ;;  %p5497_p8 = scmp.lt.u32.totalorder %s5495_s11, %s5490_s14 }
  0x47   : > { %p5499_p5 = scmp.lt.u32.totalorder %s5490_s14, %s5855_s27 }
  0x48   : > { %p5493_p13 = pnand %p12824_p12, %p5491_p6  ;;  %p5498_p4 = por %p5497_p8, %p5496_p3 }
  0x4a   : > { %p5494_p1 = pneg %p5493_p13  ;;  %p5500_p10 = por %p5499_p5, %p5498_p4 }
  0x4c   : > { %p5501_p2 = pnand %p5500_p10, %p5494_p1 }
  0x4e   : > { %5504 = shalt.err (!%p5501_p2)
}
  0x4f   : > { %s5505_s24 = scalar_lea.vmem %s5857_s19, 37120  ;;  %s5683_s15 = smov [#allocation10]  }
  0x50   : > { %p5506_p0 = scmp.ne.s32.totalorder %s5857_s19, %s5505_s24  ;;  %s5510_s28 = sshll.u32 %s5683_s15, 4  ;;  %s5511_s28 = int_to_ptr.vmem [resolvable:$false] %s5510_s28 }
  0x51   : > { %s5512_s26 = scalar_lea.vmem %s5511_s28, 74240  ;;  %p5513_p7 = scmp.lt.s32.totalorder %s5857_s19, %s5511_s28 }
  0x52   : > { %p5508_p6 = pnand %p5506_p0, %p12824_p12  ;;  %p5514_p3 = scmp.lt.s32.totalorder %s5512_s26, %s5505_s24 }
  0x54   : > { %p5509_p13 = pneg %p5508_p6  ;;  %p5515_p8 = por %p5514_p3, %p5513_p7 }
  0x56   : > { %p5516_p4 = pnand %p5515_p8, %p5509_p13 }
  0x58   : > { %5519 = shalt.err (!%p5516_p4)
}
  0x59   : > { %s5684_s14 = smov 18560   ;;  %s5685_s12 = smov 9280  }
  0x5a   : > { %s5686_s22 = smov 580   ;;  %s5687_s11 = smov [#allocation4]  }
  0x5b   : > { %5402 = dma.hbm_to_vmem [thread:$0]  (!%p13323_p11), %s5855_s27, 37120, %s5857_s19, %s5859_s13, %s5684_s14, %s5685_s12, %s5686_s22  }
  0x5c   : > { %s231_s16 = sshll.u32 %s5687_s11, 4  ;;  %s5688_s15 = smov [#allocation9]   ;;  %s232_s16 = int_to_ptr.vmem [resolvable:$true] %s231_s16 }
  0x5d   : > { %s252_s3 = sshll.u32 %s5688_s15, 4  ;;  %s5520_s26 = scalar_lea.hbm %s12804_s2, 128  ;;  %s5887_s3 = int_to_ptr.vmem [resolvable:$true] %s252_s3 }
  0x5e   : > { %p5521_p7 = scmp.ne.s32.totalorder %s12804_s2, %s5520_s26  ;;  %p5527_p10 = scmp.lt.u32.totalorder %s5520_s26, %s12804_s2 }
  0x60   : > { %p5523_p1 = pnand %p5521_p7, %p5833_p9 }
  0x62   : > { %p5524_p5 = pneg %p5523_p1 }
  0x64   : > { %p5529_p2 = pnand %p5527_p10, %p5524_p5 }
  0x66   : > { %5532 = shalt.err (!%p5529_p2)
}
  0x67   : > { %s5533_s27 = scalar_lea.vmem %s232_s16, 128  ;;  %p5541_p3 = scmp.lt.s32.totalorder %s232_s16, %s232_s16 }
  0x68   : > { %p5534_p0 = scmp.ne.s32.totalorder %s232_s16, %s5533_s27  ;;  %p5542_p8 = scmp.lt.s32.totalorder %s5533_s27, %s5533_s27 }
  0x6a   : > { %p5536_p6 = pnand %p5534_p0, %p5833_p9  ;;  %p5543_p4 = por %p5542_p8, %p5541_p3 }
  0x6c   : > { %p5537_p13 = pneg %p5536_p6 }
  0x6e   : > { %p5544_p12 = pnand %p5543_p4, %p5537_p13 }
  0x70   : > { %5547 = shalt.err (!%p5544_p12)
}
  0x71   : > { %p13324_p7 = scmp.ne.s32.totalorder %s13318_s23, 0  ;;  %s5548_s12 = scalar_lea.hbm %s12806_s4, 512 }
  0x72   : > { %p5549_p1 = scmp.ne.s32.totalorder %s12806_s4, %s5548_s12  ;;  %p5555_p12 = scmp.lt.u32.totalorder %s5548_s12, %s12806_s4 }
  0x73   : > { %5392 = dma.hbm_to_vmem [thread:$0]  (!%p13324_p7), %s12804_s2, 128, %s232_s16, [#allocation5]  }
  0x74   : > { %p5551_p5 = pnand %p5549_p1, %p5833_p9 }
  0x76   : > { %p5552_p10 = pneg %p5551_p5 }
  0x78   : > { %p5557_p2 = pnand %p5555_p12, %p5552_p10 }
  0x7a   : > { %5560 = shalt.err (!%p5557_p2)
}
  0x7b   : > { %s5561_s16 = scalar_lea.vmem %s5887_s3, 512  ;;  %p5569_p3 = scmp.lt.s32.totalorder %s5887_s3, %s5887_s3 }
  0x7c   : > { %p5562_p0 = scmp.ne.s32.totalorder %s5887_s3, %s5561_s16  ;;  %p5570_p8 = scmp.lt.s32.totalorder %s5561_s16, %s5561_s16 }
  0x7e   : > { %p5564_p6 = pnand %p5562_p0, %p5833_p9  ;;  %p5571_p4 = por %p5570_p8, %p5569_p3 }
  0x80   : > { %p5565_p13 = pneg %p5564_p6 }
  0x82   : > { %p5572_p1 = pnand %p5571_p4, %p5565_p13 }
  0x84   : > { %5575 = shalt.err (!%p5572_p1)
}
  0x85   : > { %s5689_s28 = smov 128   ;;  %s5690_s26 = smov 8  }
  0x86   : > { %5398 = dma.hbm_to_vmem [thread:$0]  (!%p13324_p7), %s12806_s4, 512, %s5887_s3, [#allocation8], %s5689_s28, %s5689_s28, %s5690_s26  }
  0x87   : > { %s13325_s21 = sand.u32 1, %s5676_s9   ;;  %s5363_s29 = smul.u32 2320, %s5680_s10 }
  0x88   : > { %s5368_s6 = smul.u32 145, %s13325_s21  ;;  %p13326_p5 = pneg %p13323_p11 }
  0x89   : > { %s5936_s12 = scalar_lea.hbm %s12809_s7, %s5363_s29  ;;  %s5581_s24 = scalar_lea.hbm %s12809_s7, 4640 }
  0x8a   : > { %s294_s22 = scalar_lea.vmem [#allocation12], %s5368_s6  ;;  %s5576_s23 = scalar_lea.hbm %s5936_s12, 2320 }
  0x8b   : > { %s302_s11 = sshll.u32 %s294_s22, 4  ;;  %p5577_p9 = scmp.ne.s32.totalorder %s5936_s12, %s5576_s23  ;;  %s303_s11 = int_to_ptr.vmem [resolvable:$true] %s302_s11 }
  0x8c   : > { %p5582_p12 = scmp.lt.u32.totalorder %s5936_s12, %s12809_s7  ;;  %p5583_p2 = scmp.lt.u32.totalorder %s5581_s24, %s5576_s23 }
  0x8d   : > { %p5579_p7 = pnand %p5577_p9, %p13326_p5  ;;  %p5585_p6 = scmp.lt.u32.totalorder %s5576_s23, %s5936_s12 }
  0x8e   : > { %p5584_p0 = por %p5583_p2, %p5582_p12 }
  0x8f   : > { %p5580_p10 = pneg %p5579_p7 }
  0x90   : > { %p5586_p13 = por %p5585_p6, %p5584_p0 }
  0x92   : > { %p5587_p3 = pnand %p5586_p13, %p5580_p10 }
  0x94   : > { %5590 = shalt.err (!%p5587_p3)
}
  0x95   : > { %s5591_s26 = scalar_lea.vmem %s303_s11, 2320  ;;  %p13327_p4 = pmov %p13326_p5 }
  0x96   : > { %p5592_p8 = scmp.ne.s32.totalorder %s303_s11, %s5591_s26  ;;  %s5691_s19 = smov [#allocation12]  }
  0x97   : > { %s5596_s27 = sshll.u32 %s5691_s19, 4  ;;  %s5597_s27 = int_to_ptr.vmem [resolvable:$false] %s5596_s27 }
  0x98   : > { %p5594_p1 = pnand %p5592_p8, %p13327_p4  ;;  %s5598_s21 = scalar_lea.vmem %s5597_s27, 4640 }
  0x99   : > { %p5599_p5 = scmp.lt.s32.totalorder %s303_s11, %s5597_s27  ;;  %p5600_p7 = scmp.lt.s32.totalorder %s5598_s21, %s5591_s26 }
  0x9a   : > { %p5595_p9 = pneg %p5594_p1 }
  0x9b   : > { %p5601_p2 = por %p5600_p7, %p5599_p5 }
  0x9d   : > { %p5602_p12 = pnand %p5601_p2, %p5595_p9 }
  0x9f   : > { %5605 = shalt.err (!%p5602_p12)
}
  0xa0   : > { %5405 = dma.hbm_to_vmem [thread:$0]  (!%p13323_p11), %s5936_s12, 2320, %s303_s11, %s5859_s13  }
  0xa1   : > { %p13328_p10 = scmp.ne.s32.totalorder %s13316_s20, 0 }
  0xa3   : > { %311 = sbr.rel (%p13328_p10) target bundleno = 1585 (0x631), region = 48 }
  0xaa   : > { %p13329_p0 = scmp.eq.s32.totalorder %s5764_s0, 0 }
  0xac   : > { %5651 = dma.done.wait (%p13329_p0), [#allocation5], 128   ;;  %p13330_p6 = pmov %p13329_p0 }
  0xad   : > { %p13331_p13 = pmov %p13329_p0 }
  0xae   : > { %5653 = vsyncadd (%p13330_p6), [#allocation5], 4294967168 }
  0xaf   : > { %5655 = dma.done.wait (%p13331_p13), [#allocation8], 528   ;;  %p13332_p3 = pmov %p13329_p0 }
  0xb0   : > { %s325_s25 = sand.u32 1, %s5764_s0   ;;  %s5970_s13 = sand.u32 1, %s5672_s30  }
  0xb1   : > { %5657 = vsyncadd (%p13332_p3), [#allocation8], 4294966768  ;;  %s5369_s20 = smul.u32 2320, %s5970_s13  ;;  %s326_s6 = scalar_lea.sflag [#allocation11], %s325_s25 }
  0xb2   : > { %p13333_p11 = scmp.ne.s32.totalorder %s13312_s17, 0 }
  0xb3   : > { %s5973_s29 = scalar_lea.vmem [#allocation10], %s5369_s20 }
  0xb4   : > { %5659 = dma.done.wait (%p13333_p11), %s326_s6, 39440  }
  0xb5   : > { %5661 = vsyncadd (%p13333_p11), %s326_s6, 4294927856  ;;  %s377_s8 = sld [smem:[#allocation3]]  ;;  %v12825_v0 = vlaneseq  ;;  %v386_v2 = vld [vmem:[%s12803_s1] sm:$0xff]  ;;  %vm388_vm0 = vcmask 31744   ;;  %vm394_vm2 = vcmask 261120   ;;  %v406_v21 = vld [vmem:[#allocation9 + $0x8] sm:$0xff] }
  0xb6   : > { %v392_v6 = vld [vmem:[#allocation4] sm:$0xff]  ;;  %v402_v16 = vld [vmem:[#allocation7] sm:$0x1]  ;;  %v405_v22 = vld [vmem:[#allocation9] sm:$0xff]  ;;  %v5692_v34 = vmov 0   ;;  %s5370_s28 = smul.u32 145, %s5970_s13 }
  0xb7   : > { %v383_v1 = vand.u32 127, %v12825_v0  ;;  %v5985_v15 = vshrl.u32 %v12825_v0, 7  ;;  %v407_v24 = vld [vmem:[#allocation9 + $0x10] sm:$0xff]  ;;  %v408_v25 = vld [vmem:[#allocation9 + $0x18] sm:$0xff]  ;;  %5461 = vset.pattern.permute.xlu0 %v5692_v34  ;;  %5460 = vset.pattern.permute.xlu1 %v5692_v34  ;;  %v431_v39 = vld [vmem:[%s12807_s5 + $0x10] sm:$0xff]  ;;  %s5366_s27 = smul.u32 2320, %s5764_s0 }
  0xb8   : > { %v430_v35 = vld [vmem:[%s12807_s5 + $0x8] sm:$0xff]  ;;  %v429_v36 = vld [vmem:[%s12807_s5] sm:$0xff]  ;;  %v432_v50 = vld [vmem:[%s12807_s5 + $0x18] sm:$0xff]  ;;  %s11216_s26 = scalar_lea.vmem [#allocation12], %s5370_s28  ;;  %s12556_s19 = scalar_lea.vmem [#allocation13], %s5370_s28 }
  0xb9   : > { %13334 = vst [vmem:[#allocation22_spill] sm:$0xff] %v5985_v15  ;;  %v5988_v19 = vsub.s32 0, %v5985_v15  ;;  %v6005_v40 = vld [vmem:[%s5973_s29] sm:$0xff]  ;;  %v6008_v41 = vld [vmem:[%s5973_s29 + $0x8] sm:$0xff]  ;;  %v6011_v42 = vld [vmem:[%s5973_s29 + $0x10] sm:$0xff]  ;;  %s5220_s21 = sshll.u32 %s12556_s19, 4  ;;  %s12759_s21 = int_to_ptr.vmem [resolvable:$true] %s5220_s21 }
  0xba   : > { %v6014_v45 = vld [vmem:[%s5973_s29 + $0x18] sm:$0xff]  ;;  %v6017_v46 = vld [vmem:[%s5973_s29 + $0x20] sm:$0xff]  ;;  %v6020_v47 = vld [vmem:[%s5973_s29 + $0x28] sm:$0xff]  ;;  %s16032_s6 = sld [smem:[#allocation552_spill]]  ;;  %s5606_s0 = scalar_lea.vmem %s12759_s21, 2320 }
  0xbb   : > { %p378_p8 = scmp.gt.s32.totalorder %s377_s8, 0  ;;  %p5353_p4 = scmp.lt.s32.totalorder %s377_s8, 3  ;;  %13335 = vst [vmem:[#allocation23_spill] sm:$0xff] %v5988_v19  ;;  %v6028_v51 = vld [vmem:[%s5973_s29 + $0x30] sm:$0xff]  ;;  %v6031_v52 = vld [vmem:[%s5973_s29 + $0x38] sm:$0xff]  ;;  %v6038_v57 = vld [vmem:[%s5973_s29 + $0x40] sm:$0xff] }
  0xbc   : > { %v6041_v58 = vld [vmem:[%s5973_s29 + $0x48] sm:$0xff]  ;;  %v6096_v34 = vld [vmem:[%s5973_s29 + $0xa0] sm:$0xff]  ;;  %v6229_v61 = vld [vmem:[%s5973_s29 + $0x178] sm:$0xff]  ;;  %p5607_p1 = scmp.ne.s32.totalorder %s12759_s21, %s5606_s0  ;;  %p16033_p9 = scmp.ne.s32.totalorder %s13313_s18, 0 }
  0xbd   : > { %s16044_s8 = smov (!%p378_p8, %s377_s8), 0  ;;  %v6116_v0 = vld [vmem:[%s5973_s29 + $0xc0] sm:$0xff]  ;;  %13340 = vst [vmem:[#allocation28_spill] sm:$0xff] %v6229_v61  ;;  %v6239_v59 = vld [vmem:[%s5973_s29 + $0x188] sm:$0xff]  ;;  %v6249_v55 = vld [vmem:[%s5973_s29 + $0x198] sm:$0xff]  ;;  %s5694_s14 = smov [#allocation13]  }
  0xbe   : > { %s16046_s8 = smov (!%p5353_p4, %s16044_s8), 3  ;;  %13342 = vst [vmem:[#allocation30_spill] sm:$0xff] %v6239_v59  ;;  %13344 = vst [vmem:[#allocation32_spill] sm:$0xff] %v6249_v55  ;;  %v6259_v53 = vld [vmem:[%s5973_s29 + $0x1a8] sm:$0xff]  ;;  %v6269_v48 = vld [vmem:[%s5973_s29 + $0x1b8] sm:$0xff]  ;;  %p5608_p5 = pnand %p5607_p1, %p16033_p9 }
  0xbf   : > { %v384_v3 = vstv %s16046_s8  ;;  %13346 = vst [vmem:[#allocation34_spill] sm:$0xff] %v6259_v53  ;;  %13348 = vst [vmem:[#allocation36_spill] sm:$0xff] %v6269_v48  ;;  %v6286_v62 = vld [vmem:[%s5973_s29 + $0x1d0] sm:$0xff]  ;;  %v6296_v60 = vld [vmem:[%s5973_s29 + $0x1e0] sm:$0xff]  ;;  %s5206_s8 = scalar_lea.sflag [#allocation6], %s5970_s13  ;;  %s5610_s12 = sshll.u32 %s5694_s14, 4  ;;  %s5611_s12 = int_to_ptr.vmem [resolvable:$false] %s5610_s12 }
  0xc0   : > { %vm385_vm1 = vcmp.eq.s32.totalorder %v383_v1, %v384_v3  ;;  %v6051_v3 = vld [vmem:[%s5973_s29 + $0x58] sm:$0xff]  ;;  %13351 = vst [vmem:[#allocation39_spill] sm:$0xff] %v6286_v62  ;;  %13353 = vst [vmem:[#allocation41_spill] sm:$0xff] %v6296_v60  ;;  %v6306_v56 = vld [vmem:[%s5973_s29 + $0x1f0] sm:$0xff]  ;;  %p5609_p7 = pneg %p5608_p5  ;;  %s5612_s17 = scalar_lea.vmem %s5611_s12, 4640 }
  0xc1   : > { %v387_v4 = vsel %vm385_vm1, %v386_v2, 0.0  ;;  %v6048_v2 = vld [vmem:[%s5973_s29 + $0x50] sm:$0xff]  ;;  %13355 = vst [vmem:[#allocation43_spill] sm:$0xff] %v6306_v56  ;;  %v6316_v54 = vld [vmem:[%s5973_s29 + $0x200] sm:$0xff]  ;;  %v6339_v59 = vld [vmem:[%s5973_s29 + $0x228] sm:$0xff]  ;;  %p5613_p2 = scmp.lt.s32.totalorder %s12759_s21, %s5611_s12  ;;  %p5614_p12 = scmp.lt.s32.totalorder %s5612_s17, %s5606_s0 }
  0xc2   : > { %v389_v5 = vsel %vm388_vm0, %v387_v4, 0.0  ;;  %v6219_v4 = vld [vmem:[%s5973_s29 + $0x168] sm:$0xff]  ;;  %13357 = vst [vmem:[#allocation45_spill] sm:$0xff] %v6316_v54  ;;  %v6326_v49 = vld [vmem:[%s5973_s29 + $0x210] sm:$0xff]  ;;  %v6336_v62 = vld [vmem:[%s5973_s29 + $0x220] sm:$0xff] }
  0xc3   : > { %390 = vadd.xlane.f32.xlu0 %v389_v5  ;;  %13338 = vst [vmem:[#allocation26_spill] sm:$0xff] %v6219_v4  ;;  %v6276_v5 = vld [vmem:[%s5973_s29 + $0x1c0] sm:$0xff]  ;;  %13359 = vst [vmem:[#allocation47_spill] sm:$0xff] %v6326_v49  ;;  %v6346_v60 = vld [vmem:[%s5973_s29 + $0x230] sm:$0xff]  ;;  %p5615_p10 = por %p5614_p12, %p5613_p2 }
  0xc4   : > { %13349 = vst [vmem:[#allocation37_spill] sm:$0xff] %v6276_v5  ;;  %v6329_v5 = vld [vmem:[%s5973_s29 + $0x218] sm:$0xff]  ;;  %13361 = vst [vmem:[#allocation49_spill] sm:$0xff] %v6336_v62  ;;  %v6356_v48 = vld [vmem:[%s5973_s29 + $0x240] ss:$580 sps:$4 sm:$0xff]  }
  0xc5   : > { %13360 = vst [vmem:[#allocation48_spill] sm:$0xff] %v6329_v5  ;;  %13362 = vst [vmem:[#allocation50_spill] sm:$0xff] %v6339_v59  ;;  %v6349_v55 = vld [vmem:[%s5973_s29 + $0x238] sm:$0xff]  ;;  %v6359_v53 = vld [vmem:[%s5973_s29 + $0x244] sm:$0xff]  ;;  %p5616_p0 = pnand %p5615_p10, %p5609_p7 }
  0xc6   : > { %13363 = vst [vmem:[#allocation51_spill] sm:$0xff] %v6346_v60  ;;  %13364 = vst [vmem:[#allocation52_spill] sm:$0xff] %v6349_v55  ;;  %v6362_v56 = vld [vmem:[%s5973_s29 + $0x24c] sm:$0xff]  ;;  %v6372_v54 = vld [vmem:[%s5973_s29 + $0x25c] sm:$0xff] }
  0xc7   : > { %13365 = vst [vmem:[#allocation53_spill] sm:$0xff] %v6356_v48  ;;  %13366 = vst [vmem:[#allocation54_spill] sm:$0xff] %v6359_v53  ;;  %v6382_v49 = vld [vmem:[%s5973_s29 + $0x26c] sm:$0xff]  ;;  %v6392_v62 = vld [vmem:[%s5973_s29 + $0x27c] sm:$0xff] }
  0xc8   : > { %13367 = vst [vmem:[#allocation55_spill] sm:$0xff] %v6362_v56  ;;  %13369 = vst [vmem:[#allocation57_spill] sm:$0xff] %v6372_v54  ;;  %v6402_v60 = vld [vmem:[%s5973_s29 + $0x28c] sm:$0xff]  ;;  %v6409_v61 = vld [vmem:[%s5973_s29 + $0x294] sm:$0xff] }
  0xc9   : > { %13371 = vst [vmem:[#allocation59_spill] sm:$0xff] %v6382_v49  ;;  %13373 = vst [vmem:[#allocation61_spill] sm:$0xff] %v6392_v62  ;;  %v6412_v4 = vld [vmem:[%s5973_s29 + $0x29c] sm:$0xff]  ;;  %v6422_v53 = vld [vmem:[%s5973_s29 + $0x2ac] sm:$0xff] }
  0xca   : > { %13375 = vst [vmem:[#allocation63_spill] sm:$0xff] %v6402_v60  ;;  %13376 = vst [vmem:[#allocation64_spill] sm:$0xff] %v6409_v61  ;;  %v6429_v15 = vld [vmem:[%s5973_s29 + $0x2b4] sm:$0xff]  ;;  %v6459_v59 = vld [vmem:[%s5973_s29 + $0x2e4] sm:$0xff] }
  0xcb   : > { %13377 = vst [vmem:[#allocation65_spill] sm:$0xff] %v6412_v4  ;;  %13379 = vst [vmem:[#allocation67_spill] sm:$0xff] %v6422_v53  ;;  %v6449_v5 = vld [vmem:[%s5973_s29 + $0x2d4] sm:$0xff]  ;;  %v6472_v61 = vld [vmem:[%s5973_s29 + $0x2fc] sm:$0xff] }
  0xcc   : > { %13380 = vst [vmem:[#allocation68_spill] sm:$0xff] %v6429_v15  ;;  %13384 = vst [vmem:[#allocation72_spill] sm:$0xff] %v6449_v5  ;;  %v6469_v55 = vld [vmem:[%s5973_s29 + $0x2f4] sm:$0xff]  ;;  %v6479_v56 = vld [vmem:[%s5973_s29 + $0x304] sm:$0xff] }
  0xcd   : > { %13386 = vst [vmem:[#allocation74_spill] sm:$0xff] %v6459_v59  ;;  %13388 = vst [vmem:[#allocation76_spill] sm:$0xff] %v6469_v55  ;;  %v6489_v54 = vld [vmem:[%s5973_s29 + $0x314] sm:$0xff]  ;;  %v6492_v15 = vld [vmem:[%s5973_s29 + $0x31c] sm:$0xff] }
  0xce   : > { %13389 = vst [vmem:[#allocation77_spill] sm:$0xff] %v6472_v61  ;;  %13390 = vst [vmem:[#allocation78_spill] sm:$0xff] %v6479_v56  ;;  %v6499_v49 = vld [vmem:[%s5973_s29 + $0x324] sm:$0xff]  ;;  %v6509_v62 = vld [vmem:[%s5973_s29 + $0x334] sm:$0xff] }
  0xcf   : > { %13392 = vst [vmem:[#allocation80_spill] sm:$0xff] %v6489_v54  ;;  %13393 = vst [vmem:[#allocation81_spill] sm:$0xff] %v6492_v15  ;;  %v6512_v5 = vld [vmem:[%s5973_s29 + $0x33c] sm:$0xff]  ;;  %v6519_v60 = vld [vmem:[%s5973_s29 + $0x344] sm:$0xff] }
  0xd0   : > { %13394 = vst [vmem:[#allocation82_spill] sm:$0xff] %v6499_v49  ;;  %13396 = vst [vmem:[#allocation84_spill] sm:$0xff] %v6509_v62  ;;  %v6522_v59 = vld [vmem:[%s5973_s29 + $0x34c] sm:$0xff]  ;;  %v6529_v4 = vld [vmem:[%s5973_s29 + $0x354] sm:$0xff] }
  0xd1   : > { %13397 = vst [vmem:[#allocation85_spill] sm:$0xff] %v6512_v5  ;;  %13398 = vst [vmem:[#allocation86_spill] sm:$0xff] %v6519_v60  ;;  %v6532_v55 = vld [vmem:[%s5973_s29 + $0x35c] sm:$0xff]  ;;  %v6539_v53 = vld [vmem:[%s5973_s29 + $0x364] sm:$0xff] }
  0xd2   : > { %13399 = vst [vmem:[#allocation87_spill] sm:$0xff] %v6522_v59  ;;  %13400 = vst [vmem:[#allocation88_spill] sm:$0xff] %v6529_v4  ;;  %v6542_v56 = vld [vmem:[%s5973_s29 + $0x36c] sm:$0xff]  ;;  %v6552_v54 = vld [vmem:[%s5973_s29 + $0x37c] sm:$0xff] }
  0xd3   : > { %13401 = vst [vmem:[#allocation89_spill] sm:$0xff] %v6532_v55  ;;  %13402 = vst [vmem:[#allocation90_spill] sm:$0xff] %v6539_v53  ;;  %v6562_v49 = vld [vmem:[%s5973_s29 + $0x38c] sm:$0xff]  ;;  %v6572_v62 = vld [vmem:[%s5973_s29 + $0x39c] sm:$0xff] }
  0xd4   : > { %13403 = vst [vmem:[#allocation91_spill] sm:$0xff] %v6542_v56  ;;  %13405 = vst [vmem:[#allocation93_spill] sm:$0xff] %v6552_v54  ;;  %v6582_v60 = vld [vmem:[%s5973_s29 + $0x3ac] sm:$0xff]  ;;  %v6589_v61 = vld [vmem:[%s5973_s29 + $0x3b4] sm:$0xff] }
  0xd5   : > { %13407 = vst [vmem:[#allocation95_spill] sm:$0xff] %v6562_v49  ;;  %13409 = vst [vmem:[#allocation97_spill] sm:$0xff] %v6572_v62  ;;  %v6592_v4 = vld [vmem:[%s5973_s29 + $0x3bc] sm:$0xff]  ;;  %v6602_v53 = vld [vmem:[%s5973_s29 + $0x3cc] sm:$0xff] }
  0xd6   : > { %13411 = vst [vmem:[#allocation99_spill] sm:$0xff] %v6582_v60  ;;  %13412 = vst [vmem:[#allocation100_spill] sm:$0xff] %v6589_v61  ;;  %v6609_v15 = vld [vmem:[%s5973_s29 + $0x3d4] sm:$0xff]  ;;  %v6639_v59 = vld [vmem:[%s5973_s29 + $0x404] sm:$0xff] }
  0xd7   : > { %13413 = vst [vmem:[#allocation101_spill] sm:$0xff] %v6592_v4  ;;  %13415 = vst [vmem:[#allocation103_spill] sm:$0xff] %v6602_v53  ;;  %v6629_v5 = vld [vmem:[%s5973_s29 + $0x3f4] sm:$0xff]  ;;  %v6652_v61 = vld [vmem:[%s5973_s29 + $0x41c] sm:$0xff] }
  0xd8   : > { %13416 = vst [vmem:[#allocation104_spill] sm:$0xff] %v6609_v15  ;;  %13420 = vst [vmem:[#allocation108_spill] sm:$0xff] %v6629_v5  ;;  %v6649_v55 = vld [vmem:[%s5973_s29 + $0x414] sm:$0xff]  ;;  %v6659_v56 = vld [vmem:[%s5973_s29 + $0x424] sm:$0xff] }
  0xd9   : > { %13422 = vst [vmem:[#allocation110_spill] sm:$0xff] %v6639_v59  ;;  %13424 = vst [vmem:[#allocation112_spill] sm:$0xff] %v6649_v55  ;;  %v6669_v54 = vld [vmem:[%s5973_s29 + $0x434] sm:$0xff]  ;;  %v6672_v15 = vld [vmem:[%s5973_s29 + $0x43c] sm:$0xff] }
  0xda   : > { %13425 = vst [vmem:[#allocation113_spill] sm:$0xff] %v6652_v61  ;;  %13426 = vst [vmem:[#allocation114_spill] sm:$0xff] %v6659_v56  ;;  %v6679_v49 = vld [vmem:[%s5973_s29 + $0x444] sm:$0xff]  ;;  %v6689_v62 = vld [vmem:[%s5973_s29 + $0x454] sm:$0xff] }
  0xdb   : > { %13428 = vst [vmem:[#allocation116_spill] sm:$0xff] %v6669_v54  ;;  %13429 = vst [vmem:[#allocation117_spill] sm:$0xff] %v6672_v15  ;;  %v6692_v5 = vld [vmem:[%s5973_s29 + $0x45c] sm:$0xff]  ;;  %v6702_v60 = vld [vmem:[%s5973_s29 + $0x46c] sm:$0xff] }
  0xdc   : > { %13430 = vst [vmem:[#allocation118_spill] sm:$0xff] %v6679_v49  ;;  %13432 = vst [vmem:[#allocation120_spill] sm:$0xff] %v6689_v62  ;;  %v6709_v61 = vld [vmem:[%s5973_s29 + $0x474] sm:$0xff]  ;;  %v6712_v4 = vld [vmem:[%s5973_s29 + $0x47c] sm:$0xff] }
  0xdd   : > { %13433 = vst [vmem:[#allocation121_spill] sm:$0xff] %v6692_v5  ;;  %13435 = vst [vmem:[#allocation123_spill] sm:$0xff] %v6702_v60  ;;  %v6729_v15 = vld [vmem:[%s5973_s29 + $0x498] sm:$0xff]  ;;  %v6756_v53 = vld [vmem:[%s5973_s29 + $0x4c0] sm:$0xff] }
  0xde   : > { %13436 = vst [vmem:[#allocation124_spill] sm:$0xff] %v6709_v61  ;;  %13437 = vst [vmem:[#allocation125_spill] sm:$0xff] %v6712_v4  ;;  %v6749_v62 = vld [vmem:[%s5973_s29 + $0x4b8] sm:$0xff]  ;;  %v6766_v55 = vld [vmem:[%s5973_s29 + $0x4d0] sm:$0xff] }
  0xdf   : > { %13440 = vst [vmem:[#allocation128_spill] sm:$0xff] %v6729_v15  ;;  %13444 = vst [vmem:[#allocation132_spill] sm:$0xff] %v6749_v62  ;;  %v6769_v61 = vld [vmem:[%s5973_s29 + $0x4d8] sm:$0xff]  ;;  %v6776_v56 = vld [vmem:[%s5973_s29 + $0x4e0] sm:$0xff] }
  0xe0   : > { %13445 = vst [vmem:[#allocation133_spill] sm:$0xff] %v6756_v53  ;;  %13447 = vst [vmem:[#allocation135_spill] sm:$0xff] %v6766_v55  ;;  %v6786_v54 = vld [vmem:[%s5973_s29 + $0x4f0] sm:$0xff]  ;;  %v6796_v59 = vld [vmem:[%s5973_s29 + $0x500] sm:$0xff] }
  0xe1   : > { %13448 = vst [vmem:[#allocation136_spill] sm:$0xff] %v6769_v61  ;;  %13449 = vst [vmem:[#allocation137_spill] sm:$0xff] %v6776_v56  ;;  %v6806_v5 = vld [vmem:[%s5973_s29 + $0x510] sm:$0xff]  ;;  %v6809_v53 = vld [vmem:[%s5973_s29 + $0x518] sm:$0xff] }
  0xe2   : > { %13451 = vst [vmem:[#allocation139_spill] sm:$0xff] %v6786_v54  ;;  %13453 = vst [vmem:[#allocation141_spill] sm:$0xff] %v6796_v59  ;;  %v6816_v60 = vld [vmem:[%s5973_s29 + $0x520] sm:$0xff]  ;;  %v6819_v55 = vld [vmem:[%s5973_s29 + $0x528] sm:$0xff] }
  0xe3   : > { %13455 = vst [vmem:[#allocation143_spill] sm:$0xff] %v6806_v5  ;;  %13456 = vst [vmem:[#allocation144_spill] sm:$0xff] %v6809_v53  ;;  %v6826_v4 = vld [vmem:[%s5973_s29 + $0x530] sm:$0xff]  ;;  %v6829_v56 = vld [vmem:[%s5973_s29 + $0x538] sm:$0xff] }
  0xe4   : > { %13457 = vst [vmem:[#allocation145_spill] sm:$0xff] %v6816_v60  ;;  %13458 = vst [vmem:[#allocation146_spill] sm:$0xff] %v6819_v55  ;;  %v6839_v54 = vld [vmem:[%s5973_s29 + $0x548] sm:$0xff]  ;;  %v6846_v15 = vld [vmem:[%s5973_s29 + $0x550] sm:$0xff] }
  0xe5   : > { %13459 = vst [vmem:[#allocation147_spill] sm:$0xff] %v6826_v4  ;;  %13460 = vst [vmem:[#allocation148_spill] sm:$0xff] %v6829_v56  ;;  %v6849_v59 = vld [vmem:[%s5973_s29 + $0x558] sm:$0xff]  ;;  %v6859_v5 = vld [vmem:[%s5973_s29 + $0x568] sm:$0xff] }
  0xe6   : > { %13462 = vst [vmem:[#allocation150_spill] sm:$0xff] %v6839_v54  ;;  %13463 = vst [vmem:[#allocation151_spill] sm:$0xff] %v6846_v15  ;;  %v6866_v62 = vld [vmem:[%s5973_s29 + $0x570] sm:$0xff]  ;;  %v6869_v60 = vld [vmem:[%s5973_s29 + $0x578] sm:$0xff] }
  0xe7   : > { %13464 = vst [vmem:[#allocation152_spill] sm:$0xff] %v6849_v59  ;;  %13466 = vst [vmem:[#allocation154_spill] sm:$0xff] %v6859_v5  ;;  %v6879_v4 = vld [vmem:[%s5973_s29 + $0x588] sm:$0xff]  ;;  %v6886_v61 = vld [vmem:[%s5973_s29 + $0x590] sm:$0xff] }
  0xe8   : > { %13467 = vst [vmem:[#allocation155_spill] sm:$0xff] %v6866_v62  ;;  %13468 = vst [vmem:[#allocation156_spill] sm:$0xff] %v6869_v60  ;;  %v6899_v15 = vld [vmem:[%s5973_s29 + $0x5a8] sm:$0xff]  ;;  %v6926_v53 = vld [vmem:[%s5973_s29 + $0x5d0] sm:$0xff] }
  0xe9   : > { %13470 = vst [vmem:[#allocation158_spill] sm:$0xff] %v6879_v4  ;;  %13471 = vst [vmem:[#allocation159_spill] sm:$0xff] %v6886_v61  ;;  %v6919_v62 = vld [vmem:[%s5973_s29 + $0x5c8] sm:$0xff]  ;;  %v6936_v55 = vld [vmem:[%s5973_s29 + $0x5e0] sm:$0xff] }
  0xea   : > { %13474 = vst [vmem:[#allocation162_spill] sm:$0xff] %v6899_v15  ;;  %13478 = vst [vmem:[#allocation166_spill] sm:$0xff] %v6919_v62  ;;  %v6939_v61 = vld [vmem:[%s5973_s29 + $0x5e8] sm:$0xff]  ;;  %v6946_v56 = vld [vmem:[%s5973_s29 + $0x5f0] sm:$0xff] }
  0xeb   : > { %13479 = vst [vmem:[#allocation167_spill] sm:$0xff] %v6926_v53  ;;  %13481 = vst [vmem:[#allocation169_spill] sm:$0xff] %v6936_v55  ;;  %v6956_v54 = vld [vmem:[%s5973_s29 + $0x600] sm:$0xff]  ;;  %v6966_v59 = vld [vmem:[%s5973_s29 + $0x610] sm:$0xff] }
  0xec   : > { %13482 = vst [vmem:[#allocation170_spill] sm:$0xff] %v6939_v61  ;;  %13483 = vst [vmem:[#allocation171_spill] sm:$0xff] %v6946_v56  ;;  %v6976_v5 = vld [vmem:[%s5973_s29 + $0x620] sm:$0xff]  ;;  %v6979_v53 = vld [vmem:[%s5973_s29 + $0x628] sm:$0xff] }
  0xed   : > { %13485 = vst [vmem:[#allocation173_spill] sm:$0xff] %v6956_v54  ;;  %13487 = vst [vmem:[#allocation175_spill] sm:$0xff] %v6966_v59  ;;  %v6986_v60 = vld [vmem:[%s5973_s29 + $0x630] sm:$0xff]  ;;  %v6989_v55 = vld [vmem:[%s5973_s29 + $0x638] sm:$0xff] }
  0xee   : > { %13489 = vst [vmem:[#allocation177_spill] sm:$0xff] %v6976_v5  ;;  %13490 = vst [vmem:[#allocation178_spill] sm:$0xff] %v6979_v53  ;;  %v6996_v4 = vld [vmem:[%s5973_s29 + $0x640] sm:$0xff]  ;;  %v6999_v56 = vld [vmem:[%s5973_s29 + $0x648] sm:$0xff] }
  0xef   : > { %13491 = vst [vmem:[#allocation179_spill] sm:$0xff] %v6986_v60  ;;  %13492 = vst [vmem:[#allocation180_spill] sm:$0xff] %v6989_v55  ;;  %v7009_v54 = vld [vmem:[%s5973_s29 + $0x658] sm:$0xff]  ;;  %v7016_v15 = vld [vmem:[%s5973_s29 + $0x660] sm:$0xff] }
  0xf0   : > { %13493 = vst [vmem:[#allocation181_spill] sm:$0xff] %v6996_v4  ;;  %13494 = vst [vmem:[#allocation182_spill] sm:$0xff] %v6999_v56  ;;  %v7019_v59 = vld [vmem:[%s5973_s29 + $0x668] sm:$0xff]  ;;  %v7029_v5 = vld [vmem:[%s5973_s29 + $0x678] sm:$0xff] }
  0xf1   : > { %13496 = vst [vmem:[#allocation184_spill] sm:$0xff] %v7009_v54  ;;  %13497 = vst [vmem:[#allocation185_spill] sm:$0xff] %v7016_v15  ;;  %v7036_v62 = vld [vmem:[%s5973_s29 + $0x680] sm:$0xff]  ;;  %v7039_v60 = vld [vmem:[%s5973_s29 + $0x688] sm:$0xff] }
  0xf2   : > { %13498 = vst [vmem:[#allocation186_spill] sm:$0xff] %v7019_v59  ;;  %13500 = vst [vmem:[#allocation188_spill] sm:$0xff] %v7029_v5  ;;  %v7049_v4 = vld [vmem:[%s5973_s29 + $0x698] sm:$0xff]  ;;  %v7066_v15 = vld [vmem:[%s5973_s29 + $0x6b0] sm:$0xff] }
  0xf3   : > { %13501 = vst [vmem:[#allocation189_spill] sm:$0xff] %v7036_v62  ;;  %13502 = vst [vmem:[#allocation190_spill] sm:$0xff] %v7039_v60  ;;  %v7076_v55 = vld [vmem:[%s5973_s29 + $0x6c0] sm:$0xff]  ;;  %v7079_v53 = vld [vmem:[%s5973_s29 + $0x6c8] ss:$580 sps:$4 sm:$0xff]  }
  0xf4   : > { %13504 = vst [vmem:[#allocation192_spill] sm:$0xff] %v7049_v4  ;;  %13507 = vst [vmem:[#allocation195_spill] sm:$0xff] %v7066_v15  ;;  %v7089_v56 = vld [vmem:[%s5973_s29 + $0x6d4] sm:$0xff]  ;;  %v7092_v62 = vld [vmem:[%s5973_s29 + $0x6dc] sm:$0xff] }
  0xf5   : > { %13509 = vst [vmem:[#allocation197_spill] sm:$0xff] %v7076_v55  ;;  %13511 = vst [vmem:[#allocation199_spill] sm:$0xff] %v7089_v56  ;;  %v7099_v5 = vld [vmem:[%s5973_s29 + $0x6e4] sm:$0xff]  ;;  %v7109_v60 = vld [vmem:[%s5973_s29 + $0x6f4] sm:$0xff] }
  0xf6   : > { %13512 = vst [vmem:[#allocation200_spill] sm:$0xff] %v7092_v62  ;;  %13513 = vst [vmem:[#allocation201_spill] sm:$0xff] %v7099_v5  ;;  %v7119_v59 = vld [vmem:[%s5973_s29 + $0x704] sm:$0xff]  ;;  %v7122_v15 = vld [vmem:[%s5973_s29 + $0x70c] sm:$0xff] }
  0xf7   : > { %13515 = vst [vmem:[#allocation203_spill] sm:$0xff] %v7109_v60  ;;  %13517 = vst [vmem:[#allocation205_spill] sm:$0xff] %v7119_v59  ;;  %v7132_v55 = vld [vmem:[%s5973_s29 + $0x71c] sm:$0xff]  ;;  %v7139_v54 = vld [vmem:[%s5973_s29 + $0x724] sm:$0xff] }
  0xf8   : > { %13518 = vst [vmem:[#allocation206_spill] sm:$0xff] %v7122_v15  ;;  %13520 = vst [vmem:[#allocation208_spill] sm:$0xff] %v7132_v55  ;;  %v7142_v48 = vld [vmem:[%s5973_s29 + $0x72c] sm:$0xff]  ;;  %v7149_v61 = vld [vmem:[%s5973_s29 + $0x734] sm:$0xff] }
  0xf9   : > { %13521 = vst [vmem:[#allocation209_spill] sm:$0xff] %v7139_v54  ;;  %13522 = vst [vmem:[#allocation210_spill] sm:$0xff] %v7142_v48  ;;  %v7152_v56 = vld [vmem:[%s5973_s29 + $0x73c] sm:$0xff]  ;;  %v7159_v49 = vld [vmem:[%s5973_s29 + $0x744] sm:$0xff] }
  0xfa   : > { %13523 = vst [vmem:[#allocation211_spill] sm:$0xff] %v7149_v61  ;;  %13524 = vst [vmem:[#allocation212_spill] sm:$0xff] %v7152_v56  ;;  %v7162_v5 = vld [vmem:[%s5973_s29 + $0x74c] sm:$0xff]  ;;  %v7169_v4 = vld [vmem:[%s5973_s29 + $0x754] sm:$0xff] }
  0xfb   : > { %13525 = vst [vmem:[#allocation213_spill] sm:$0xff] %v7159_v49  ;;  %13526 = vst [vmem:[#allocation214_spill] sm:$0xff] %v7162_v5  ;;  %v7172_v60 = vld [vmem:[%s5973_s29 + $0x75c] sm:$0xff]  ;;  %v7182_v59 = vld [vmem:[%s5973_s29 + $0x76c] sm:$0xff] }
  0xfc   : > { %13527 = vst [vmem:[#allocation215_spill] sm:$0xff] %v7169_v4  ;;  %13528 = vst [vmem:[#allocation216_spill] sm:$0xff] %v7172_v60  ;;  %v7202_v54 = vld [vmem:[%s5973_s29 + $0x78c] sm:$0xff]  ;;  %v7209_v62 = vld [vmem:[%s5973_s29 + $0x794] sm:$0xff] }
  0xfd   : > { %13530 = vst [vmem:[#allocation218_spill] sm:$0xff] %v7182_v59  ;;  %13534 = vst [vmem:[#allocation222_spill] sm:$0xff] %v7202_v54  ;;  %v7212_v61 = vld [vmem:[%s5973_s29 + $0x79c] sm:$0xff]  ;;  %v7222_v49 = vld [vmem:[%s5973_s29 + $0x7ac] sm:$0xff] }
  0xfe   : > { %13535 = vst [vmem:[#allocation223_spill] sm:$0xff] %v7209_v62  ;;  %13536 = vst [vmem:[#allocation224_spill] sm:$0xff] %v7212_v61  ;;  %v7232_v4 = vld [vmem:[%s5973_s29 + $0x7bc] sm:$0xff]  ;;  %v7239_v15 = vld [vmem:[%s5973_s29 + $0x7c4] sm:$0xff] }
  0xff   : > { %13538 = vst [vmem:[#allocation226_spill] sm:$0xff] %v7222_v49  ;;  %13540 = vst [vmem:[#allocation228_spill] sm:$0xff] %v7232_v4  ;;  %v7249_v55 = vld [vmem:[%s5973_s29 + $0x7d4] sm:$0xff]  ;;  %v7259_v48 = vld [vmem:[%s5973_s29 + $0x7e4] sm:$0xff] }
 0x100   : > { %13541 = vst [vmem:[#allocation229_spill] sm:$0xff] %v7239_v15  ;;  %13543 = vst [vmem:[#allocation231_spill] sm:$0xff] %v7249_v55  ;;  %v7269_v56 = vld [vmem:[%s5973_s29 + $0x7f4] sm:$0xff]  ;;  %v7272_v62 = vld [vmem:[%s5973_s29 + $0x7fc] sm:$0xff] }
 0x101   : > { %13545 = vst [vmem:[#allocation233_spill] sm:$0xff] %v7259_v48  ;;  %13547 = vst [vmem:[#allocation235_spill] sm:$0xff] %v7269_v56  ;;  %v7279_v5 = vld [vmem:[%s5973_s29 + $0x804] sm:$0xff]  ;;  %v7289_v60 = vld [vmem:[%s5973_s29 + $0x814] sm:$0xff] }
 0x102   : > { %13548 = vst [vmem:[#allocation236_spill] sm:$0xff] %v7272_v62  ;;  %13549 = vst [vmem:[#allocation237_spill] sm:$0xff] %v7279_v5  ;;  %v7299_v59 = vld [vmem:[%s5973_s29 + $0x824] sm:$0xff]  ;;  %v7302_v15 = vld [vmem:[%s5973_s29 + $0x82c] sm:$0xff] }
 0x103   : > { %13551 = vst [vmem:[#allocation239_spill] sm:$0xff] %v7289_v60  ;;  %13553 = vst [vmem:[#allocation241_spill] sm:$0xff] %v7299_v59  ;;  %v7312_v55 = vld [vmem:[%s5973_s29 + $0x83c] sm:$0xff]  ;;  %v7319_v54 = vld [vmem:[%s5973_s29 + $0x844] sm:$0xff] }
 0x104   : > { %13554 = vst [vmem:[#allocation242_spill] sm:$0xff] %v7302_v15  ;;  %13556 = vst [vmem:[#allocation244_spill] sm:$0xff] %v7312_v55  ;;  %v7322_v48 = vld [vmem:[%s5973_s29 + $0x84c] sm:$0xff]  ;;  %v7329_v61 = vld [vmem:[%s5973_s29 + $0x854] sm:$0xff]  ;;  %v13573_v55 = vunpack.c.l.bf16 %v6005_v40 }
 0x105   : > { %13557 = vst [vmem:[#allocation245_spill] sm:$0xff] %v7319_v54  ;;  %13558 = vst [vmem:[#allocation246_spill] sm:$0xff] %v7322_v48  ;;  %v7332_v56 = vld [vmem:[%s5973_s29 + $0x85c] sm:$0xff]  ;;  %v7339_v49 = vld [vmem:[%s5973_s29 + $0x864] sm:$0xff] }
 0x106   : > { %13559 = vst [vmem:[#allocation247_spill] sm:$0xff] %v7329_v61  ;;  %13560 = vst [vmem:[#allocation248_spill] sm:$0xff] %v7332_v56  ;;  %v7342_v5 = vld [vmem:[%s5973_s29 + $0x86c] sm:$0xff]  ;;  %v7349_v4 = vld [vmem:[%s5973_s29 + $0x874] sm:$0xff]  ;;  %v13578_v56 = vunpack.c.l.bf16 %v6011_v42 }
 0x107   : > { %13561 = vst [vmem:[#allocation249_spill] sm:$0xff] %v7339_v49  ;;  %13562 = vst [vmem:[#allocation250_spill] sm:$0xff] %v7342_v5  ;;  %v7352_v60 = vld [vmem:[%s5973_s29 + $0x87c] sm:$0xff]  ;;  %v7362_v59 = vld [vmem:[%s5973_s29 + $0x88c] sm:$0xff] }
 0x108   : > { %13563 = vst [vmem:[#allocation251_spill] sm:$0xff] %v7349_v4  ;;  %13564 = vst [vmem:[#allocation252_spill] sm:$0xff] %v7352_v60  ;;  %v7382_v54 = vld [vmem:[%s5973_s29 + $0x8ac] sm:$0xff]  ;;  %v7389_v62 = vld [vmem:[%s5973_s29 + $0x8b4] sm:$0xff] }
 0x109   : > { %13566 = vst [vmem:[#allocation254_spill] sm:$0xff] %v7362_v59  ;;  %13570 = vst [vmem:[#allocation258_spill] sm:$0xff] %v7389_v62  ;;  %v7392_v61 = vld [vmem:[%s5973_s29 + $0x8bc] sm:$0xff]  ;;  %v7402_v49 = vld [vmem:[%s5973_s29 + $0x8cc] sm:$0xff] }
 0x10a   : > { %v7412_v4 = vld [vmem:[%s5973_s29 + $0x8dc] sm:$0xff]  ;;  %v7419_v59 = vld [vmem:[%s5973_s29 + $0x8e4] sm:$0xff]  ;;  %v7422_v15 = vld [vmem:[%s5973_s29 + $0x8ec] sm:$0xff] }
 0x10b   : > { %v7429_v5 = vld [vmem:[%s5973_s29 + $0x8f4] sm:$0xff] }
 0x150   : > { %v391_v7 = vpop.xlane.xlu0 %390 }
 0x151   : > { %v393_v8 = vmul.f32 %v392_v6, %v391_v7  ;;  %v6209_v6 = vld [vmem:[%s5973_s29 + $0x158] sm:$0xff]  ;;  %v6266_v7 = vld [vmem:[%s5973_s29 + $0x1b0] sm:$0xff] }
 0x152   : > { %13336 = vst [vmem:[#allocation24_spill] sm:$0xff] %v6209_v6  ;;  %13347 = vst [vmem:[#allocation35_spill] sm:$0xff] %v6266_v7  ;;  %v6319_v7 = vld [vmem:[%s5973_s29 + $0x208] sm:$0xff] }
 0x153   : > { %v395_v9 = vsel %vm394_vm2, %v393_v8, 0.0  ;;  %13358 = vst [vmem:[#allocation46_spill] sm:$0xff] %v6319_v7  ;;  %v6389_v7 = vld [vmem:[%s5973_s29 + $0x274] sm:$0xff]  ;;  %v7439_v6 = vld [vmem:[%s5973_s29 + $0x904] sm:$0xff] }
 0x154   : > { %v396_v10 = vrot.slane %v395_v9, 4  ;;  %13372 = vst [vmem:[#allocation60_spill] sm:$0xff] %v6389_v7  ;;  %v6452_v7 = vld [vmem:[%s5973_s29 + $0x2dc] sm:$0xff] }
 0x155   : > { %13385 = vst [vmem:[#allocation73_spill] sm:$0xff] %v6452_v7  ;;  %v6569_v7 = vld [vmem:[%s5973_s29 + $0x394] sm:$0xff] }
 0x156   : > { %v397_v11 = vadd.f32 %v396_v10, %v395_v9  ;;  %v6058_v10 = vld [vmem:[%s5973_s29 + $0x60] sm:$0xff]  ;;  %13408 = vst [vmem:[#allocation96_spill] sm:$0xff] %v6569_v7 }
 0x157   : > { %v6632_v7 = vld [vmem:[%s5973_s29 + $0x3fc] sm:$0xff] }
 0x158   : > { %v398_v12 = vrot.slane %v397_v11, 2  ;;  %13421 = vst [vmem:[#allocation109_spill] sm:$0xff] %v6632_v7  ;;  %v6746_v7 = vld [vmem:[%s5973_s29 + $0x4b0] sm:$0xff] }
 0x159   : > { %13443 = vst [vmem:[#allocation131_spill] sm:$0xff] %v6746_v7  ;;  %v6799_v7 = vld [vmem:[%s5973_s29 + $0x508] sm:$0xff] }
 0x15a   : > { %v399_v13 = vadd.f32 %v398_v12, %v397_v11  ;;  %v6061_v11 = vld [vmem:[%s5973_s29 + $0x68] sm:$0xff]  ;;  %13454 = vst [vmem:[#allocation142_spill] sm:$0xff] %v6799_v7  ;;  %v6916_v7 = vld [vmem:[%s5973_s29 + $0x5c0] sm:$0xff] }
 0x15b   : > { %v6199_v12 = vld [vmem:[%s5973_s29 + $0x148] sm:$0xff]  ;;  %13477 = vst [vmem:[#allocation165_spill] sm:$0xff] %v6916_v7  ;;  %v6969_v7 = vld [vmem:[%s5973_s29 + $0x618] sm:$0xff] }
 0x15c   : > { %v400_v14 = vrot.slane %v399_v13, 1  ;;  %13488 = vst [vmem:[#allocation176_spill] sm:$0xff] %v6969_v7  ;;  %v7069_v7 = vld [vmem:[%s5973_s29 + $0x6b8] sm:$0xff] }
 0x15d   : > { %13508 = vst [vmem:[#allocation196_spill] sm:$0xff] %v7069_v7  ;;  %v7189_v7 = vld [vmem:[%s5973_s29 + $0x774] sm:$0xff] }
 0x15e   : > { %v401_v17 = vadd.f32 %v400_v14, %v399_v13  ;;  %v6066_v14 = vld [vmem:[%s5973_s29 + $0x70] sm:$0xff]  ;;  %v6256_v13 = vld [vmem:[%s5973_s29 + $0x1a0] sm:$0xff]  ;;  %13531 = vst [vmem:[#allocation219_spill] sm:$0xff] %v7189_v7 }
 0x15f   : > { %13345 = vst [vmem:[#allocation33_spill] sm:$0xff] %v6256_v13  ;;  %v6309_v13 = vld [vmem:[%s5973_s29 + $0x1f8] sm:$0xff] }
 0x160   : > { %v403_v18 = vadd.f32 %v402_v16, %v401_v17  ;;  %v6069_v16 = vld [vmem:[%s5973_s29 + $0x78] sm:$0xff]  ;;  %13356 = vst [vmem:[#allocation44_spill] sm:$0xff] %v6309_v13  ;;  %v6379_v13 = vld [vmem:[%s5973_s29 + $0x264] sm:$0xff] }
 0x161   : > { %v6189_v17 = vld [vmem:[%s5973_s29 + $0x138] sm:$0xff]  ;;  %13370 = vst [vmem:[#allocation58_spill] sm:$0xff] %v6379_v13  ;;  %v6442_v13 = vld [vmem:[%s5973_s29 + $0x2cc] sm:$0xff] }
 0x162   : > { %v404_v20 = vmax.f32 %v403_v18, 0.0  ;;  %v6246_v18 = vld [vmem:[%s5973_s29 + $0x190] sm:$0xff]  ;;  %13383 = vst [vmem:[#allocation71_spill] sm:$0xff] %v6442_v13  ;;  %v6559_v13 = vld [vmem:[%s5973_s29 + $0x384] sm:$0xff]  ;;  %v7252_v7 = vld [vmem:[%s5973_s29 + $0x7dc] sm:$0xff] }
 0x163   : > { %13343 = vst [vmem:[#allocation31_spill] sm:$0xff] %v6246_v18  ;;  %v6299_v18 = vld [vmem:[%s5973_s29 + $0x1e8] sm:$0xff]  ;;  %13406 = vst [vmem:[#allocation94_spill] sm:$0xff] %v6559_v13 }
 0x164   : > { %v412_v23 = vrot.slane %v404_v20, %v5988_v19  ;;  %v6179_v20 = vld [vmem:[%s5973_s29 + $0x128] sm:$0xff]  ;;  %13354 = vst [vmem:[#allocation42_spill] sm:$0xff] %v6299_v18  ;;  %13544 = vst [vmem:[#allocation232_spill] sm:$0xff] %v7252_v7  ;;  %v7369_v7 = vld [vmem:[%s5973_s29 + $0x894] sm:$0xff] }
 0x165   : > { %v6279_v19 = vld [vmem:[%s5973_s29 + $0x1c8] sm:$0xff]  ;;  %13567 = vst [vmem:[#allocation255_spill] sm:$0xff] %v7369_v7  ;;  %v13581_v7 = vunpack.c.l.bf16 %v6014_v45 }
 0x166   : > { %v414_v26 = vmul.f32 %v412_v23, %v406_v21  ;;  %v413_v27 = vmul.f32 %v412_v23, %v405_v22  ;;  %v415_v30 = vmul.f32 %v412_v23, %v407_v24  ;;  %v416_v31 = vmul.f32 %v412_v23, %v408_v25  ;;  %v6076_v22 = vld [vmem:[%s5973_s29 + $0x80] sm:$0xff]  ;;  %v6079_v23 = vld [vmem:[%s5973_s29 + $0x88] sm:$0xff]  ;;  %v6169_v24 = vld [vmem:[%s5973_s29 + $0x118] sm:$0xff]  ;;  %13350 = vst [vmem:[#allocation38_spill] sm:$0xff] %v6279_v19 }
 0x167   : > { %v6226_v25 = vld [vmem:[%s5973_s29 + $0x170] sm:$0xff]  ;;  %v6236_v21 = vld [vmem:[%s5973_s29 + $0x180] sm:$0xff] }
 0x168   : > { %v420_v28 = vsel %vm394_vm2, %v414_v26, 0.0  ;;  %v417_v29 = vsel %vm394_vm2, %v413_v27, 0.0  ;;  %v423_v32 = vsel %vm394_vm2, %v415_v30, 0.0  ;;  %v426_v33 = vsel %vm394_vm2, %v416_v31, 0.0  ;;  %v6149_v30 = vld [vmem:[%s5973_s29 + $0xf8] sm:$0xff]  ;;  %v6159_v26 = vld [vmem:[%s5973_s29 + $0x108] sm:$0xff] }
 0x169   : > { %421 = vadd.xlane.f32.xlu1 %v420_v28  ;;  %418 = vadd.xlane.f32.xlu0 %v417_v29  ;;  %v6086_v28 = vld [vmem:[%s5973_s29 + $0x90] sm:$0xff]  ;;  %v6089_v29 = vld [vmem:[%s5973_s29 + $0x98] sm:$0xff]  ;;  %v6216_v27 = vld [vmem:[%s5973_s29 + $0x160] sm:$0xff]  ;;  %13339 = vst [vmem:[#allocation27_spill] sm:$0xff] %v6226_v25 }
 0x16a   : > { %v6206_v31 = vld [vmem:[%s5973_s29 + $0x150] sm:$0xff]  ;;  %13337 = vst [vmem:[#allocation25_spill] sm:$0xff] %v6216_v27  ;;  %13341 = vst [vmem:[#allocation29_spill] sm:$0xff] %v6236_v21  ;;  %v6289_v21 = vld [vmem:[%s5973_s29 + $0x1d8] sm:$0xff]  ;;  %v13575_v27 = vunpack.c.l.bf16 %v6008_v41 }
 0x16b   : > { %13352 = vst [vmem:[#allocation40_spill] sm:$0xff] %v6289_v21  ;;  %v6369_v19 = vld [vmem:[%s5973_s29 + $0x254] sm:$0xff]  ;;  %v6399_v18 = vld [vmem:[%s5973_s29 + $0x284] sm:$0xff]  ;;  %v6622_v13 = vld [vmem:[%s5973_s29 + $0x3ec] sm:$0xff] }
 0x16c   : > { %13368 = vst [vmem:[#allocation56_spill] sm:$0xff] %v6369_v19  ;;  %13374 = vst [vmem:[#allocation62_spill] sm:$0xff] %v6399_v18  ;;  %v6419_v21 = vld [vmem:[%s5973_s29 + $0x2a4] sm:$0xff]  ;;  %v6432_v19 = vld [vmem:[%s5973_s29 + $0x2bc] sm:$0xff] }
 0x16d   : > { %424 = vadd.xlane.f32.xlu1 %v423_v32  ;;  %427 = vadd.xlane.f32.xlu0 %v426_v33  ;;  %v6139_v32 = vld [vmem:[%s5973_s29 + $0xe8] sm:$0xff]  ;;  %v6196_v33 = vld [vmem:[%s5973_s29 + $0x140] sm:$0xff]  ;;  %13378 = vst [vmem:[#allocation66_spill] sm:$0xff] %v6419_v21  ;;  %13381 = vst [vmem:[#allocation69_spill] sm:$0xff] %v6432_v19 }
 0x16e   : > { %v6439_v25 = vld [vmem:[%s5973_s29 + $0x2c4] sm:$0xff]  ;;  %v6462_v18 = vld [vmem:[%s5973_s29 + $0x2ec] sm:$0xff]  ;;  %v6549_v19 = vld [vmem:[%s5973_s29 + $0x374] sm:$0xff]  ;;  %13419 = vst [vmem:[#allocation107_spill] sm:$0xff] %v6622_v13 }
 0x16f   : > { %13382 = vst [vmem:[#allocation70_spill] sm:$0xff] %v6439_v25  ;;  %13387 = vst [vmem:[#allocation75_spill] sm:$0xff] %v6462_v18  ;;  %v6482_v21 = vld [vmem:[%s5973_s29 + $0x30c] sm:$0xff]  ;;  %v6579_v18 = vld [vmem:[%s5973_s29 + $0x3a4] sm:$0xff] }
 0x170   : > { %13391 = vst [vmem:[#allocation79_spill] sm:$0xff] %v6482_v21  ;;  %v6502_v25 = vld [vmem:[%s5973_s29 + $0x32c] sm:$0xff]  ;;  %13404 = vst [vmem:[#allocation92_spill] sm:$0xff] %v6549_v19  ;;  %v6599_v21 = vld [vmem:[%s5973_s29 + $0x3c4] sm:$0xff] }
 0x171   : > { %13395 = vst [vmem:[#allocation83_spill] sm:$0xff] %v6502_v25  ;;  %13410 = vst [vmem:[#allocation98_spill] sm:$0xff] %v6579_v18  ;;  %v6612_v19 = vld [vmem:[%s5973_s29 + $0x3dc] sm:$0xff]  ;;  %v6619_v25 = vld [vmem:[%s5973_s29 + $0x3e4] sm:$0xff] }
 0x172   : > { %13414 = vst [vmem:[#allocation102_spill] sm:$0xff] %v6599_v21  ;;  %13417 = vst [vmem:[#allocation105_spill] sm:$0xff] %v6612_v19  ;;  %v6642_v18 = vld [vmem:[%s5973_s29 + $0x40c] sm:$0xff]  ;;  %v6736_v13 = vld [vmem:[%s5973_s29 + $0x4a0] sm:$0xff] }
 0x173   : > { %13418 = vst [vmem:[#allocation106_spill] sm:$0xff] %v6619_v25  ;;  %13423 = vst [vmem:[#allocation111_spill] sm:$0xff] %v6642_v18  ;;  %v6662_v21 = vld [vmem:[%s5973_s29 + $0x42c] sm:$0xff]  ;;  %v6699_v18 = vld [vmem:[%s5973_s29 + $0x464] sm:$0xff] }
 0x174   : > { %13427 = vst [vmem:[#allocation115_spill] sm:$0xff] %v6662_v21  ;;  %v6682_v25 = vld [vmem:[%s5973_s29 + $0x44c] sm:$0xff]  ;;  %13434 = vst [vmem:[#allocation122_spill] sm:$0xff] %v6699_v18 }
 0x175   : > { %13431 = vst [vmem:[#allocation119_spill] sm:$0xff] %v6682_v25  ;;  %v6719_v21 = vld [vmem:[%s5973_s29 + $0x488] sm:$0xff]  ;;  %v6726_v19 = vld [vmem:[%s5973_s29 + $0x490] sm:$0xff]  ;;  %13441 = vst [vmem:[#allocation129_spill] sm:$0xff] %v6736_v13 }
 0x176   : > { %13438 = vst [vmem:[#allocation126_spill] sm:$0xff] %v6719_v21  ;;  %13439 = vst [vmem:[#allocation127_spill] sm:$0xff] %v6726_v19  ;;  %v6739_v25 = vld [vmem:[%s5973_s29 + $0x4a8] sm:$0xff]  ;;  %v6789_v13 = vld [vmem:[%s5973_s29 + $0x4f8] sm:$0xff] }
 0x177   : > { %13442 = vst [vmem:[#allocation130_spill] sm:$0xff] %v6739_v25  ;;  %v6759_v18 = vld [vmem:[%s5973_s29 + $0x4c8] sm:$0xff]  ;;  %13452 = vst [vmem:[#allocation140_spill] sm:$0xff] %v6789_v13  ;;  %v6836_v21 = vld [vmem:[%s5973_s29 + $0x540] sm:$0xff] }
 0x178   : > { %13446 = vst [vmem:[#allocation134_spill] sm:$0xff] %v6759_v18  ;;  %v6779_v19 = vld [vmem:[%s5973_s29 + $0x4e8] sm:$0xff]  ;;  %13461 = vst [vmem:[#allocation149_spill] sm:$0xff] %v6836_v21  ;;  %v6856_v25 = vld [vmem:[%s5973_s29 + $0x560] sm:$0xff] }
 0x179   : > { %13450 = vst [vmem:[#allocation138_spill] sm:$0xff] %v6779_v19  ;;  %13465 = vst [vmem:[#allocation153_spill] sm:$0xff] %v6856_v25  ;;  %v6876_v18 = vld [vmem:[%s5973_s29 + $0x580] sm:$0xff]  ;;  %v6889_v21 = vld [vmem:[%s5973_s29 + $0x598] sm:$0xff] }
 0x17a   : > { %13469 = vst [vmem:[#allocation157_spill] sm:$0xff] %v6876_v18  ;;  %13472 = vst [vmem:[#allocation160_spill] sm:$0xff] %v6889_v21  ;;  %v6896_v19 = vld [vmem:[%s5973_s29 + $0x5a0] sm:$0xff]  ;;  %v6906_v13 = vld [vmem:[%s5973_s29 + $0x5b0] sm:$0xff] }
 0x17b   : > { %13473 = vst [vmem:[#allocation161_spill] sm:$0xff] %v6896_v19  ;;  %13475 = vst [vmem:[#allocation163_spill] sm:$0xff] %v6906_v13  ;;  %v6909_v25 = vld [vmem:[%s5973_s29 + $0x5b8] sm:$0xff]  ;;  %v6959_v13 = vld [vmem:[%s5973_s29 + $0x608] sm:$0xff] }
 0x17c   : > { %13476 = vst [vmem:[#allocation164_spill] sm:$0xff] %v6909_v25  ;;  %v6929_v18 = vld [vmem:[%s5973_s29 + $0x5d8] sm:$0xff]  ;;  %13486 = vst [vmem:[#allocation174_spill] sm:$0xff] %v6959_v13  ;;  %v7006_v21 = vld [vmem:[%s5973_s29 + $0x650] sm:$0xff] }
 0x17d   : > { %13480 = vst [vmem:[#allocation168_spill] sm:$0xff] %v6929_v18  ;;  %v6949_v19 = vld [vmem:[%s5973_s29 + $0x5f8] sm:$0xff]  ;;  %13495 = vst [vmem:[#allocation183_spill] sm:$0xff] %v7006_v21  ;;  %v7026_v25 = vld [vmem:[%s5973_s29 + $0x670] sm:$0xff] }
 0x17e   : > { %13484 = vst [vmem:[#allocation172_spill] sm:$0xff] %v6949_v19  ;;  %13499 = vst [vmem:[#allocation187_spill] sm:$0xff] %v7026_v25  ;;  %v7046_v18 = vld [vmem:[%s5973_s29 + $0x690] sm:$0xff]  ;;  %v7056_v21 = vld [vmem:[%s5973_s29 + $0x6a0] sm:$0xff] }
 0x17f   : > { %13503 = vst [vmem:[#allocation191_spill] sm:$0xff] %v7046_v18  ;;  %13505 = vst [vmem:[#allocation193_spill] sm:$0xff] %v7056_v21  ;;  %v7059_v13 = vld [vmem:[%s5973_s29 + $0x6a8] sm:$0xff]  ;;  %v7112_v21 = vld [vmem:[%s5973_s29 + $0x6fc] sm:$0xff] }
 0x180   : > { %13506 = vst [vmem:[#allocation194_spill] sm:$0xff] %v7059_v13  ;;  %v7082_v25 = vld [vmem:[%s5973_s29 + $0x6cc] sm:$0xff]  ;;  %13516 = vst [vmem:[#allocation204_spill] sm:$0xff] %v7112_v21  ;;  %v7129_v19 = vld [vmem:[%s5973_s29 + $0x714] sm:$0xff] }
 0x181   : > { %13510 = vst [vmem:[#allocation198_spill] sm:$0xff] %v7082_v25  ;;  %v7102_v18 = vld [vmem:[%s5973_s29 + $0x6ec] sm:$0xff]  ;;  %13519 = vst [vmem:[#allocation207_spill] sm:$0xff] %v7129_v19  ;;  %v7179_v13 = vld [vmem:[%s5973_s29 + $0x764] sm:$0xff] }
 0x182   : > { %13514 = vst [vmem:[#allocation202_spill] sm:$0xff] %v7102_v18  ;;  %13529 = vst [vmem:[#allocation217_spill] sm:$0xff] %v7179_v13  ;;  %v7192_v19 = vld [vmem:[%s5973_s29 + $0x77c] sm:$0xff]  ;;  %v7199_v25 = vld [vmem:[%s5973_s29 + $0x784] sm:$0xff] }
 0x183   : > { %13532 = vst [vmem:[#allocation220_spill] sm:$0xff] %v7192_v19  ;;  %13533 = vst [vmem:[#allocation221_spill] sm:$0xff] %v7199_v25  ;;  %v7219_v18 = vld [vmem:[%s5973_s29 + $0x7a4] sm:$0xff]  ;;  %v7229_v21 = vld [vmem:[%s5973_s29 + $0x7b4] sm:$0xff] }
 0x184   : > { %13537 = vst [vmem:[#allocation225_spill] sm:$0xff] %v7219_v18  ;;  %13539 = vst [vmem:[#allocation227_spill] sm:$0xff] %v7229_v21  ;;  %v7242_v13 = vld [vmem:[%s5973_s29 + $0x7cc] sm:$0xff]  ;;  %v7292_v21 = vld [vmem:[%s5973_s29 + $0x81c] sm:$0xff] }
 0x185   : > { %13542 = vst [vmem:[#allocation230_spill] sm:$0xff] %v7242_v13  ;;  %v7262_v25 = vld [vmem:[%s5973_s29 + $0x7ec] sm:$0xff]  ;;  %13552 = vst [vmem:[#allocation240_spill] sm:$0xff] %v7292_v21  ;;  %v7309_v19 = vld [vmem:[%s5973_s29 + $0x834] sm:$0xff] }
 0x186   : > { %13546 = vst [vmem:[#allocation234_spill] sm:$0xff] %v7262_v25  ;;  %v7282_v18 = vld [vmem:[%s5973_s29 + $0x80c] sm:$0xff]  ;;  %13555 = vst [vmem:[#allocation243_spill] sm:$0xff] %v7309_v19  ;;  %v7359_v13 = vld [vmem:[%s5973_s29 + $0x884] sm:$0xff] }
 0x187   : > { %13550 = vst [vmem:[#allocation238_spill] sm:$0xff] %v7282_v18  ;;  %13565 = vst [vmem:[#allocation253_spill] sm:$0xff] %v7359_v13  ;;  %v7372_v19 = vld [vmem:[%s5973_s29 + $0x89c] sm:$0xff]  ;;  %v7379_v25 = vld [vmem:[%s5973_s29 + $0x8a4] sm:$0xff] }
 0x188   : > { %13568 = vst [vmem:[#allocation256_spill] sm:$0xff] %v7372_v19  ;;  %13569 = vst [vmem:[#allocation257_spill] sm:$0xff] %v7379_v25  ;;  %v7399_v18 = vld [vmem:[%s5973_s29 + $0x8c4] sm:$0xff]  ;;  %v7409_v21 = vld [vmem:[%s5973_s29 + $0x8d4] sm:$0xff] }
 0x189   : > { %13571 = vst [vmem:[#allocation259_spill] sm:$0xff] %v7399_v18  ;;  %13572 = vst [vmem:[#allocation260_spill] sm:$0xff] %v7409_v21  ;;  %v7432_v19 = vld [vmem:[%s5973_s29 + $0x8fc] sm:$0xff]  ;;  %v13574_v18 = vunpack.c.h.bf16 %v6005_v40  ;;  %v13576_v21 = vunpack.c.h.bf16 %v6008_v41  ;;  %v13579_v40 = vunpack.c.h.bf16 %v6011_v42  ;;  %v13582_v41 = vunpack.c.h.bf16 %v6014_v45 }
 0x18a   : > { %v13585_v42 = vunpack.c.h.bf16 %v6017_v46  ;;  %v13588_v45 = vunpack.c.h.bf16 %v6020_v47 }
 0x1f6   : > { %v422_v37 = vpop.xlane.xlu1 %421  ;;  %v419_v38 = vpop.xlane.xlu0 %418 }
 0x1f7   : > { %v434_v43 = vadd.f32 %v430_v35, %v422_v37  ;;  %v433_v44 = vadd.f32 %v429_v36, %v419_v38  ;;  %v6099_v35 = vld [vmem:[%s5973_s29 + $0xa8] sm:$0xff]  ;;  %v6126_v36 = vld [vmem:[%s5973_s29 + $0xd0] sm:$0xff]  ;;  %v6136_v37 = vld [vmem:[%s5973_s29 + $0xe0] sm:$0xff] }
 0x1f8   : > { %v6119_v38 = vld [vmem:[%s5973_s29 + $0xc8] sm:$0xff] }
 0x1f9   : > { %1316 = vperm.xlu0 %5461, %v434_v43   ;;  %1311 = vperm.xlu1 %5460, %v433_v44   ;;  %v6106_v43 = vld [vmem:[%s5973_s29 + $0xb0] sm:$0xff]  ;;  %v6109_v44 = vld [vmem:[%s5973_s29 + $0xb8] sm:$0xff] }
 0x1fa   : > { %v425_v63 = vpop.xlane.xlu1 %424  ;;  %v428_v1 = vpop.xlane.xlu0 %427 }
 0x1fb   : > { %v435_v8 = vadd.f32 %v431_v39, %v425_v63  ;;  %v436_v9 = vadd.f32 %v432_v50, %v428_v1  ;;  %v6129_v1 = vld [vmem:[%s5973_s29 + $0xd8] sm:$0xff]  ;;  %v6156_v50 = vld [vmem:[%s5973_s29 + $0x100] sm:$0xff]  ;;  %v6166_v39 = vld [vmem:[%s5973_s29 + $0x110] sm:$0xff] }
 0x1fc   : > { %v6186_v63 = vld [vmem:[%s5973_s29 + $0x130] sm:$0xff] }
 0x1fd   : > { %1321 = vperm.xlu1 %5460, %v435_v8   ;;  %v6146_v8 = vld [vmem:[%s5973_s29 + $0xf0] sm:$0xff] }
 0x201   : > { %1326 = vperm.xlu1 %5460, %v436_v9   ;;  %v6176_v9 = vld [vmem:[%s5973_s29 + $0x120] sm:$0xff]  ;;  %s12757_s29 = scalar_lea.hbm %s16032_s6, %s5366_s27 }
 0x278   : > { %v7445_v62 = vpop.permute.xlu1 %1311 }
 0x279   : > { %v7462_v25 = vmul.f32 %v7445_v62, %v13573_v55  ;;  %v7467_v60 = vmul.f32 %v7445_v62, %v13574_v18  ;;  %v7472_v48 = vmul.f32 %v7445_v62, %v13575_v27  ;;  %v7477_v13 = vmul.f32 %v7445_v62, %v13576_v21 }
 0x27a   : > { %v7482_v55 = vmul.f32 %v7445_v62, %v13578_v56  ;;  %v7487_v18 = vmul.f32 %v7445_v62, %v13579_v40  ;;  %v7492_v27 = vmul.f32 %v7445_v62, %v13581_v7  ;;  %v7497_v21 = vmul.f32 %v7445_v62, %v13582_v41 }
 0x27b   : > { %13577 = vst [vmem:[#allocation261_spill] sm:$0xff] %v7477_v13  ;;  %v13584_v13 = vunpack.c.l.bf16 %v6017_v46  ;;  %v7507_v40 = vmul.f32 %v7445_v62, %v13585_v42  ;;  %v7517_v41 = vmul.f32 %v7445_v62, %v13588_v45  ;;  %v13591_v46 = vunpack.c.h.bf16 %v6028_v51 }
 0x27c   : > { %13580 = vst [vmem:[#allocation262_spill] sm:$0xff] %v7487_v18  ;;  %13583 = vst [vmem:[#allocation263_spill] sm:$0xff] %v7497_v21  ;;  %v13587_v18 = vunpack.c.l.bf16 %v6020_v47  ;;  %v13590_v21 = vunpack.c.l.bf16 %v6028_v51  ;;  %v13594_v47 = vunpack.c.h.bf16 %v6031_v52  ;;  %v13598_v51 = vunpack.c.h.bf16 %v6038_v57 }
 0x27d   : > { %v7502_v56 = vmul.f32 %v7445_v62, %v13584_v13  ;;  %13586 = vst [vmem:[#allocation264_spill] sm:$0xff] %v7507_v40  ;;  %13589 = vst [vmem:[#allocation265_spill] sm:$0xff] %v7517_v41  ;;  %v7527_v42 = vmul.f32 %v7445_v62, %v13591_v46  ;;  %v13593_v40 = vunpack.c.l.bf16 %v6031_v52  ;;  %v13596_v41 = vunpack.c.l.bf16 %v6038_v57 }
 0x27e   : > { %v7512_v7 = vmul.f32 %v7445_v62, %v13587_v18  ;;  %v7522_v13 = vmul.f32 %v7445_v62, %v13590_v21  ;;  %v7537_v45 = vmul.f32 %v7445_v62, %v13594_v47  ;;  %v7547_v46 = vmul.f32 %v7445_v62, %v13598_v51 }
 0x27f   : > { %13592 = vst [vmem:[#allocation266_spill] sm:$0xff] %v7527_v42  ;;  %v7532_v18 = vmul.f32 %v7445_v62, %v13593_v40  ;;  %v7542_v21 = vmul.f32 %v7445_v62, %v13596_v41  ;;  %v13600_v42 = vunpack.c.l.bf16 %v6041_v58  ;;  %v13602_v52 = vunpack.c.h.bf16 %v6041_v58 }
 0x280   : > { %13595 = vst [vmem:[#allocation267_spill] sm:$0xff] %v7537_v45  ;;  %13599 = vst [vmem:[#allocation269_spill] sm:$0xff] %v7547_v46  ;;  %v13604_v45 = vunpack.c.l.bf16 %v6048_v2  ;;  %v13606_v57 = vunpack.c.h.bf16 %v6048_v2  ;;  %v13608_v46 = vunpack.c.l.bf16 %v6051_v3  ;;  %v13610_v58 = vunpack.c.h.bf16 %v6051_v3 }
 0x281   : > { %13597 = vst [vmem:[#allocation268_spill] sm:$0xff] %v7542_v21  ;;  %v7552_v40 = vmul.f32 %v7445_v62, %v13600_v42  ;;  %v7557_v47 = vmul.f32 %v7445_v62, %v13602_v52  ;;  %v13614_v2 = vunpack.c.h.bf16 %v6058_v10  ;;  %v13618_v3 = vunpack.c.h.bf16 %v6061_v11 }
 0x282   : > { %v7562_v41 = vmul.f32 %v7445_v62, %v13604_v45  ;;  %v7567_v51 = vmul.f32 %v7445_v62, %v13606_v57  ;;  %v7572_v42 = vmul.f32 %v7445_v62, %v13608_v46  ;;  %v7577_v52 = vmul.f32 %v7445_v62, %v13610_v58 }
 0x283   : > { %13601 = vst [vmem:[#allocation270_spill] sm:$0xff] %v7552_v40  ;;  %13603 = vst [vmem:[#allocation271_spill] sm:$0xff] %v7557_v47  ;;  %v13612_v47 = vunpack.c.l.bf16 %v6058_v10  ;;  %v7587_v57 = vmul.f32 %v7445_v62, %v13614_v2  ;;  %v7597_v58 = vmul.f32 %v7445_v62, %v13618_v3  ;;  %v13622_v10 = vunpack.c.h.bf16 %v6066_v14  ;;  %v14267_v40 = vld [vmem:[#allocation135_spill] sm:$0xff] }
 0x284   : > { %13605 = vst [vmem:[#allocation272_spill] sm:$0xff] %v7562_v41  ;;  %13607 = vst [vmem:[#allocation273_spill] sm:$0xff] %v7567_v51  ;;  %v13616_v51 = vunpack.c.l.bf16 %v6061_v11  ;;  %v13626_v11 = vunpack.c.h.bf16 %v6069_v16 }
 0x285   : > { %13609 = vst [vmem:[#allocation274_spill] sm:$0xff] %v7572_v42  ;;  %13611 = vst [vmem:[#allocation275_spill] sm:$0xff] %v7577_v52  ;;  %v7582_v45 = vmul.f32 %v7445_v62, %v13612_v47  ;;  %v13620_v52 = vunpack.c.l.bf16 %v6066_v14  ;;  %v7607_v2 = vmul.f32 %v7445_v62, %v13622_v10  ;;  %v13630_v14 = vunpack.c.h.bf16 %v6076_v22  ;;  %v14252_v42 = vld [vmem:[#allocation132_spill] sm:$0xff] }
 0x286   : > { %13615 = vst [vmem:[#allocation277_spill] sm:$0xff] %v7587_v57  ;;  %v7592_v46 = vmul.f32 %v7445_v62, %v13616_v51  ;;  %13619 = vst [vmem:[#allocation279_spill] sm:$0xff] %v7597_v58  ;;  %v13624_v57 = vunpack.c.l.bf16 %v6069_v16  ;;  %v7617_v3 = vmul.f32 %v7445_v62, %v13626_v11  ;;  %v13628_v58 = vunpack.c.l.bf16 %v6076_v22 }
 0x287   : > { %13613 = vst [vmem:[#allocation276_spill] sm:$0xff] %v7582_v45  ;;  %v7602_v47 = vmul.f32 %v7445_v62, %v13620_v52  ;;  %13623 = vst [vmem:[#allocation281_spill] sm:$0xff] %v7607_v2  ;;  %v7627_v10 = vmul.f32 %v7445_v62, %v13630_v14  ;;  %v13632_v2 = vunpack.c.l.bf16 %v6079_v23  ;;  %v13634_v16 = vunpack.c.h.bf16 %v6079_v23 }
 0x288   : > { %13617 = vst [vmem:[#allocation278_spill] sm:$0xff] %v7592_v46  ;;  %v7612_v51 = vmul.f32 %v7445_v62, %v13624_v57  ;;  %13627 = vst [vmem:[#allocation283_spill] sm:$0xff] %v7617_v3  ;;  %v7622_v52 = vmul.f32 %v7445_v62, %v13628_v58  ;;  %v13636_v3 = vunpack.c.l.bf16 %v6086_v28  ;;  %v13638_v22 = vunpack.c.h.bf16 %v6086_v28 }
 0x289   : > { %13621 = vst [vmem:[#allocation280_spill] sm:$0xff] %v7602_v47  ;;  %13631 = vst [vmem:[#allocation285_spill] sm:$0xff] %v7627_v10  ;;  %v7632_v57 = vmul.f32 %v7445_v62, %v13632_v2  ;;  %v7637_v11 = vmul.f32 %v7445_v62, %v13634_v16  ;;  %v13640_v10 = vunpack.c.l.bf16 %v6089_v29  ;;  %v13642_v23 = vunpack.c.h.bf16 %v6089_v29  ;;  %v13943_v47 = vld [vmem:[#allocation69_spill] sm:$0xff] }
 0x28a   : > { %13625 = vst [vmem:[#allocation282_spill] sm:$0xff] %v7612_v51  ;;  %13629 = vst [vmem:[#allocation284_spill] sm:$0xff] %v7622_v52  ;;  %v7642_v58 = vmul.f32 %v7445_v62, %v13636_v3  ;;  %v7647_v14 = vmul.f32 %v7445_v62, %v13638_v22  ;;  %v13646_v28 = vunpack.c.h.bf16 %v6096_v34  ;;  %v13650_v29 = vunpack.c.h.bf16 %v6099_v35  ;;  %v13938_v52 = vld [vmem:[#allocation68_spill] sm:$0xff] }
 0x28b   : > { %13633 = vst [vmem:[#allocation286_spill] sm:$0xff] %v7632_v57  ;;  %13635 = vst [vmem:[#allocation287_spill] sm:$0xff] %v7637_v11  ;;  %v7652_v2 = vmul.f32 %v7445_v62, %v13640_v10  ;;  %v7657_v16 = vmul.f32 %v7445_v62, %v13642_v23  ;;  %v13644_v11 = vunpack.c.l.bf16 %v6096_v34  ;;  %v13654_v34 = vunpack.c.h.bf16 %v6106_v43 }
 0x28c   : > { %13637 = vst [vmem:[#allocation288_spill] sm:$0xff] %v7642_v58  ;;  %13639 = vst [vmem:[#allocation289_spill] sm:$0xff] %v7647_v14  ;;  %v7667_v22 = vmul.f32 %v7445_v62, %v13646_v28  ;;  %v13648_v14 = vunpack.c.l.bf16 %v6099_v35  ;;  %v7677_v23 = vmul.f32 %v7445_v62, %v13650_v29  ;;  %v13658_v35 = vunpack.c.h.bf16 %v6109_v44  ;;  %v13933_v58 = vld [vmem:[#allocation67_spill] sm:$0xff] }
 0x28d   : > { %13641 = vst [vmem:[#allocation290_spill] sm:$0xff] %v7652_v2  ;;  %13643 = vst [vmem:[#allocation291_spill] sm:$0xff] %v7657_v16  ;;  %v7662_v3 = vmul.f32 %v7445_v62, %v13644_v11  ;;  %v13652_v16 = vunpack.c.l.bf16 %v6106_v43  ;;  %v7687_v28 = vmul.f32 %v7445_v62, %v13654_v34  ;;  %v13662_v43 = vunpack.c.h.bf16 %v6116_v0 }
 0x28e   : > { %13647 = vst [vmem:[#allocation293_spill] sm:$0xff] %v7667_v22  ;;  %v7672_v10 = vmul.f32 %v7445_v62, %v13648_v14  ;;  %13651 = vst [vmem:[#allocation295_spill] sm:$0xff] %v7677_v23  ;;  %v13656_v22 = vunpack.c.l.bf16 %v6109_v44  ;;  %v7697_v29 = vmul.f32 %v7445_v62, %v13658_v35  ;;  %v13660_v23 = vunpack.c.l.bf16 %v6116_v0 }
 0x28f   : > { %13645 = vst [vmem:[#allocation292_spill] sm:$0xff] %v7662_v3  ;;  %v7682_v11 = vmul.f32 %v7445_v62, %v13652_v16  ;;  %13655 = vst [vmem:[#allocation297_spill] sm:$0xff] %v7687_v28  ;;  %v7707_v34 = vmul.f32 %v7445_v62, %v13662_v43  ;;  %v13664_v28 = vunpack.c.l.bf16 %v6119_v38  ;;  %v13666_v44 = vunpack.c.h.bf16 %v6119_v38  ;;  %v13928_v3 = vld [vmem:[#allocation66_spill] sm:$0xff] }
 0x290   : > { %13649 = vst [vmem:[#allocation294_spill] sm:$0xff] %v7672_v10  ;;  %v7692_v14 = vmul.f32 %v7445_v62, %v13656_v22  ;;  %13659 = vst [vmem:[#allocation299_spill] sm:$0xff] %v7697_v29  ;;  %v7702_v16 = vmul.f32 %v7445_v62, %v13660_v23  ;;  %v13668_v29 = vunpack.c.l.bf16 %v6126_v36  ;;  %v13670_v0 = vunpack.c.h.bf16 %v6126_v36 }
 0x291   : > { %13653 = vst [vmem:[#allocation296_spill] sm:$0xff] %v7682_v11  ;;  %13663 = vst [vmem:[#allocation301_spill] sm:$0xff] %v7707_v34  ;;  %v7712_v22 = vmul.f32 %v7445_v62, %v13664_v28  ;;  %v7717_v35 = vmul.f32 %v7445_v62, %v13666_v44  ;;  %v13672_v34 = vunpack.c.l.bf16 %v6129_v1  ;;  %v13674_v38 = vunpack.c.h.bf16 %v6129_v1  ;;  %v13923_v11 = vld [vmem:[#allocation65_spill] sm:$0xff] }
 0x292   : > { %13657 = vst [vmem:[#allocation298_spill] sm:$0xff] %v7692_v14  ;;  %13661 = vst [vmem:[#allocation300_spill] sm:$0xff] %v7702_v16  ;;  %v7722_v23 = vmul.f32 %v7445_v62, %v13668_v29  ;;  %v7727_v43 = vmul.f32 %v7445_v62, %v13670_v0  ;;  %v13678_v36 = vunpack.c.h.bf16 %v6136_v37  ;;  %v13682_v1 = vunpack.c.h.bf16 %v6139_v32  ;;  %v13918_v16 = vld [vmem:[#allocation64_spill] sm:$0xff] }
 0x293   : > { %13665 = vst [vmem:[#allocation302_spill] sm:$0xff] %v7712_v22  ;;  %13667 = vst [vmem:[#allocation303_spill] sm:$0xff] %v7717_v35  ;;  %v7732_v28 = vmul.f32 %v7445_v62, %v13672_v34  ;;  %v7737_v44 = vmul.f32 %v7445_v62, %v13674_v38  ;;  %v13676_v35 = vunpack.c.l.bf16 %v6136_v37  ;;  %v13686_v37 = vunpack.c.h.bf16 %v6146_v8 }
 0x294   : > { %13669 = vst [vmem:[#allocation304_spill] sm:$0xff] %v7722_v23  ;;  %13671 = vst [vmem:[#allocation305_spill] sm:$0xff] %v7727_v43  ;;  %v7747_v0 = vmul.f32 %v7445_v62, %v13678_v36  ;;  %v13680_v43 = vunpack.c.l.bf16 %v6139_v32  ;;  %v7757_v38 = vmul.f32 %v7445_v62, %v13682_v1  ;;  %v13690_v32 = vunpack.c.h.bf16 %v6149_v30  ;;  %v13913_v23 = vld [vmem:[#allocation63_spill] sm:$0xff] }
 0x295   : > { %13673 = vst [vmem:[#allocation306_spill] sm:$0xff] %v7732_v28  ;;  %13675 = vst [vmem:[#allocation307_spill] sm:$0xff] %v7737_v44  ;;  %v7742_v29 = vmul.f32 %v7445_v62, %v13676_v35  ;;  %v13684_v44 = vunpack.c.l.bf16 %v6146_v8  ;;  %v7767_v36 = vmul.f32 %v7445_v62, %v13686_v37  ;;  %v13694_v8 = vunpack.c.h.bf16 %v6156_v50 }
 0x296   : > { %13679 = vst [vmem:[#allocation309_spill] sm:$0xff] %v7747_v0  ;;  %v7752_v34 = vmul.f32 %v7445_v62, %v13680_v43  ;;  %13683 = vst [vmem:[#allocation311_spill] sm:$0xff] %v7757_v38  ;;  %v13688_v0 = vunpack.c.l.bf16 %v6149_v30  ;;  %v7777_v1 = vmul.f32 %v7445_v62, %v13690_v32  ;;  %v13692_v38 = vunpack.c.l.bf16 %v6156_v50 }
 0x297   : > { %13677 = vst [vmem:[#allocation308_spill] sm:$0xff] %v7742_v29  ;;  %v7762_v35 = vmul.f32 %v7445_v62, %v13684_v44  ;;  %13687 = vst [vmem:[#allocation313_spill] sm:$0xff] %v7767_v36  ;;  %v7787_v37 = vmul.f32 %v7445_v62, %v13694_v8  ;;  %v13696_v36 = vunpack.c.l.bf16 %v6159_v26  ;;  %v13698_v30 = vunpack.c.h.bf16 %v6159_v26  ;;  %v13908_v29 = vld [vmem:[#allocation62_spill] sm:$0xff] }
 0x298   : > { %13681 = vst [vmem:[#allocation310_spill] sm:$0xff] %v7752_v34  ;;  %v7772_v43 = vmul.f32 %v7445_v62, %v13688_v0  ;;  %13691 = vst [vmem:[#allocation315_spill] sm:$0xff] %v7777_v1  ;;  %v7782_v44 = vmul.f32 %v7445_v62, %v13692_v38  ;;  %v13700_v1 = vunpack.c.l.bf16 %v6166_v39  ;;  %v13702_v50 = vunpack.c.h.bf16 %v6166_v39 }
 0x299   : > { %13685 = vst [vmem:[#allocation312_spill] sm:$0xff] %v7762_v35  ;;  %13695 = vst [vmem:[#allocation317_spill] sm:$0xff] %v7787_v37  ;;  %v7792_v0 = vmul.f32 %v7445_v62, %v13696_v36  ;;  %v7797_v32 = vmul.f32 %v7445_v62, %v13698_v30  ;;  %v13704_v37 = vunpack.c.l.bf16 %v6169_v24  ;;  %v13706_v26 = vunpack.c.h.bf16 %v6169_v24  ;;  %v13905_v35 = vld [vmem:[#allocation61_spill] sm:$0xff] }
 0x29a   : > { %13689 = vst [vmem:[#allocation314_spill] sm:$0xff] %v7772_v43  ;;  %13693 = vst [vmem:[#allocation316_spill] sm:$0xff] %v7782_v44  ;;  %v7802_v38 = vmul.f32 %v7445_v62, %v13700_v1  ;;  %v7807_v8 = vmul.f32 %v7445_v62, %v13702_v50  ;;  %v13710_v39 = vunpack.c.h.bf16 %v6176_v9  ;;  %v13714_v24 = vunpack.c.h.bf16 %v6179_v20  ;;  %v13902_v44 = vld [vmem:[#allocation60_spill] sm:$0xff] }
 0x29b   : > { %13697 = vst [vmem:[#allocation318_spill] sm:$0xff] %v7792_v0  ;;  %13699 = vst [vmem:[#allocation319_spill] sm:$0xff] %v7797_v32  ;;  %v7812_v36 = vmul.f32 %v7445_v62, %v13704_v37  ;;  %v7817_v30 = vmul.f32 %v7445_v62, %v13706_v26  ;;  %v13708_v32 = vunpack.c.l.bf16 %v6176_v9  ;;  %v13718_v9 = vunpack.c.h.bf16 %v6186_v63 }
 0x29c   : > { %13701 = vst [vmem:[#allocation320_spill] sm:$0xff] %v7802_v38  ;;  %13703 = vst [vmem:[#allocation321_spill] sm:$0xff] %v7807_v8  ;;  %v7827_v50 = vmul.f32 %v7445_v62, %v13710_v39  ;;  %v13712_v8 = vunpack.c.l.bf16 %v6179_v20  ;;  %v7837_v26 = vmul.f32 %v7445_v62, %v13714_v24  ;;  %v13722_v20 = vunpack.c.h.bf16 %v6189_v17  ;;  %v13899_v38 = vld [vmem:[#allocation59_spill] sm:$0xff] }
 0x29d   : > { %13705 = vst [vmem:[#allocation322_spill] sm:$0xff] %v7812_v36  ;;  %13707 = vst [vmem:[#allocation323_spill] sm:$0xff] %v7817_v30  ;;  %v7822_v1 = vmul.f32 %v7445_v62, %v13708_v32  ;;  %v13716_v30 = vunpack.c.l.bf16 %v6186_v63  ;;  %v7847_v39 = vmul.f32 %v7445_v62, %v13718_v9  ;;  %v13726_v63 = vunpack.c.h.bf16 %v6196_v33 }
 0x29e   : > { %13711 = vst [vmem:[#allocation325_spill] sm:$0xff] %v7827_v50  ;;  %v7832_v37 = vmul.f32 %v7445_v62, %v13712_v8  ;;  %13715 = vst [vmem:[#allocation327_spill] sm:$0xff] %v7837_v26  ;;  %v13720_v50 = vunpack.c.l.bf16 %v6189_v17  ;;  %v7857_v24 = vmul.f32 %v7445_v62, %v13722_v20  ;;  %v13724_v26 = vunpack.c.l.bf16 %v6196_v33 }
 0x29f   : > { %13709 = vst [vmem:[#allocation324_spill] sm:$0xff] %v7822_v1  ;;  %v7842_v32 = vmul.f32 %v7445_v62, %v13716_v30  ;;  %13719 = vst [vmem:[#allocation329_spill] sm:$0xff] %v7847_v39  ;;  %v7867_v9 = vmul.f32 %v7445_v62, %v13726_v63  ;;  %v13728_v39 = vunpack.c.l.bf16 %v6199_v12  ;;  %v13730_v17 = vunpack.c.h.bf16 %v6199_v12  ;;  %v13896_v1 = vld [vmem:[#allocation58_spill] sm:$0xff] }
 0x2a0   : > { %13713 = vst [vmem:[#allocation326_spill] sm:$0xff] %v7832_v37  ;;  %v7852_v8 = vmul.f32 %v7445_v62, %v13720_v50  ;;  %13723 = vst [vmem:[#allocation331_spill] sm:$0xff] %v7857_v24  ;;  %v7862_v30 = vmul.f32 %v7445_v62, %v13724_v26  ;;  %v13732_v24 = vunpack.c.l.bf16 %v6206_v31  ;;  %v13734_v33 = vunpack.c.h.bf16 %v6206_v31 }
 0x2a1   : > { %13717 = vst [vmem:[#allocation328_spill] sm:$0xff] %v7842_v32  ;;  %13727 = vst [vmem:[#allocation333_spill] sm:$0xff] %v7867_v9  ;;  %v7872_v50 = vmul.f32 %v7445_v62, %v13728_v39  ;;  %v7877_v20 = vmul.f32 %v7445_v62, %v13730_v17  ;;  %v13736_v9 = vld [vmem:[#allocation24_spill] sm:$0xff]  ;;  %v13893_v32 = vld [vmem:[#allocation57_spill] sm:$0xff]  ;;  %v13897_v36 = vunpack.c.l.bf16 %v13896_v1  ;;  %v13900_v0 = vunpack.c.l.bf16 %v13899_v38 }
 0x2a2   : > { %13721 = vst [vmem:[#allocation330_spill] sm:$0xff] %v7852_v8  ;;  %13725 = vst [vmem:[#allocation332_spill] sm:$0xff] %v7862_v30  ;;  %v7882_v26 = vmul.f32 %v7445_v62, %v13732_v24  ;;  %v7887_v63 = vmul.f32 %v7445_v62, %v13734_v33  ;;  %v13737_v30 = vunpack.c.l.bf16 %v13736_v9  ;;  %v13739_v12 = vunpack.c.h.bf16 %v13736_v9 }
 0x2a3   : > { %13729 = vst [vmem:[#allocation334_spill] sm:$0xff] %v7872_v50  ;;  %13731 = vst [vmem:[#allocation335_spill] sm:$0xff] %v7877_v20  ;;  %v13741_v20 = vld [vmem:[#allocation25_spill] sm:$0xff]  ;;  %v13894_v37 = vunpack.c.l.bf16 %v13893_v32  ;;  %v13903_v43 = vunpack.c.l.bf16 %v13902_v44  ;;  %v13906_v34 = vunpack.c.l.bf16 %v13905_v35  ;;  %v13909_v28 = vunpack.c.l.bf16 %v13908_v29 }
 0x2a4   : > { %13733 = vst [vmem:[#allocation336_spill] sm:$0xff] %v7882_v26  ;;  %13735 = vst [vmem:[#allocation337_spill] sm:$0xff] %v7887_v63  ;;  %v7892_v39 = vmul.f32 %v7445_v62, %v13737_v30  ;;  %v7897_v17 = vmul.f32 %v7445_v62, %v13739_v12  ;;  %v13742_v50 = vunpack.c.l.bf16 %v13741_v20  ;;  %v13744_v31 = vunpack.c.h.bf16 %v13741_v20  ;;  %v13746_v63 = vld [vmem:[#allocation26_spill] sm:$0xff] }
 0x2a5   : > { %v13747_v26 = vunpack.c.l.bf16 %v13746_v63  ;;  %v13749_v9 = vunpack.c.h.bf16 %v13746_v63  ;;  %v13914_v22 = vunpack.c.l.bf16 %v13913_v23  ;;  %v13919_v14 = vunpack.c.l.bf16 %v13918_v16 }
 0x2a6   : > { %13738 = vst [vmem:[#allocation24_spill] sm:$0xff] %v7892_v39  ;;  %13740 = vst [vmem:[#allocation338_spill] sm:$0xff] %v7897_v17  ;;  %v7902_v24 = vmul.f32 %v7445_v62, %v13742_v50  ;;  %v7907_v33 = vmul.f32 %v7445_v62, %v13744_v31  ;;  %v13751_v17 = vld [vmem:[#allocation27_spill] sm:$0xff]  ;;  %v13924_v10 = vunpack.c.l.bf16 %v13923_v11  ;;  %v13929_v2 = vunpack.c.l.bf16 %v13928_v3 }
 0x2a7   : > { %v7912_v30 = vmul.f32 %v7445_v62, %v13747_v26  ;;  %v7917_v12 = vmul.f32 %v7445_v62, %v13749_v9  ;;  %v13752_v39 = vunpack.c.l.bf16 %v13751_v17  ;;  %v13754_v20 = vunpack.c.h.bf16 %v13751_v17 }
 0x2a8   : > { %13743 = vst [vmem:[#allocation25_spill] sm:$0xff] %v7902_v24  ;;  %13745 = vst [vmem:[#allocation339_spill] sm:$0xff] %v7907_v33  ;;  %v13756_v33 = vld [vmem:[#allocation28_spill] sm:$0xff]  ;;  %v13934_v57 = vunpack.c.l.bf16 %v13933_v58  ;;  %v13939_v51 = vunpack.c.l.bf16 %v13938_v52  ;;  %v13944_v46 = vunpack.c.l.bf16 %v13943_v47 }
 0x2a9   : > { %13748 = vst [vmem:[#allocation26_spill] sm:$0xff] %v7912_v30  ;;  %13750 = vst [vmem:[#allocation340_spill] sm:$0xff] %v7917_v12  ;;  %v7922_v50 = vmul.f32 %v7445_v62, %v13752_v39  ;;  %v7927_v31 = vmul.f32 %v7445_v62, %v13754_v20  ;;  %v13757_v24 = vunpack.c.l.bf16 %v13756_v33  ;;  %v13759_v63 = vunpack.c.h.bf16 %v13756_v33  ;;  %v13761_v12 = vld [vmem:[#allocation29_spill] sm:$0xff] }
 0x2aa   : > { %v13762_v30 = vunpack.c.l.bf16 %v13761_v12  ;;  %v13764_v17 = vunpack.c.h.bf16 %v13761_v12 }
 0x2ab   : > { %13753 = vst [vmem:[#allocation27_spill] sm:$0xff] %v7922_v50  ;;  %13755 = vst [vmem:[#allocation341_spill] sm:$0xff] %v7927_v31  ;;  %v7932_v26 = vmul.f32 %v7445_v62, %v13757_v24  ;;  %v7937_v9 = vmul.f32 %v7445_v62, %v13759_v63  ;;  %v13766_v31 = vld [vmem:[#allocation30_spill] sm:$0xff] }
 0x2ac   : > { %v7942_v39 = vmul.f32 %v7445_v62, %v13762_v30  ;;  %v7947_v20 = vmul.f32 %v7445_v62, %v13764_v17  ;;  %v13767_v50 = vunpack.c.l.bf16 %v13766_v31  ;;  %v13769_v33 = vunpack.c.h.bf16 %v13766_v31 }
 0x2ad   : > { %13758 = vst [vmem:[#allocation28_spill] sm:$0xff] %v7932_v26  ;;  %13760 = vst [vmem:[#allocation342_spill] sm:$0xff] %v7937_v9  ;;  %v13771_v9 = vld [vmem:[#allocation31_spill] sm:$0xff] }
 0x2ae   : > { %13763 = vst [vmem:[#allocation29_spill] sm:$0xff] %v7942_v39  ;;  %13765 = vst [vmem:[#allocation343_spill] sm:$0xff] %v7947_v20  ;;  %v7952_v24 = vmul.f32 %v7445_v62, %v13767_v50  ;;  %v7957_v63 = vmul.f32 %v7445_v62, %v13769_v33  ;;  %v13772_v26 = vunpack.c.l.bf16 %v13771_v9  ;;  %v13774_v12 = vunpack.c.h.bf16 %v13771_v9  ;;  %v13776_v20 = vld [vmem:[#allocation32_spill] sm:$0xff] }
 0x2af   : > { %v13777_v39 = vunpack.c.l.bf16 %v13776_v20  ;;  %v13779_v31 = vunpack.c.h.bf16 %v13776_v20 }
 0x2b0   : > { %13768 = vst [vmem:[#allocation30_spill] sm:$0xff] %v7952_v24  ;;  %13770 = vst [vmem:[#allocation344_spill] sm:$0xff] %v7957_v63  ;;  %v7962_v30 = vmul.f32 %v7445_v62, %v13772_v26  ;;  %v7967_v17 = vmul.f32 %v7445_v62, %v13774_v12  ;;  %v13781_v63 = vld [vmem:[#allocation33_spill] sm:$0xff] }
 0x2b1   : > { %v7972_v50 = vmul.f32 %v7445_v62, %v13777_v39  ;;  %v7977_v33 = vmul.f32 %v7445_v62, %v13779_v31  ;;  %v13782_v24 = vunpack.c.l.bf16 %v13781_v63  ;;  %v13784_v9 = vunpack.c.h.bf16 %v13781_v63 }
 0x2b2   : > { %13773 = vst [vmem:[#allocation31_spill] sm:$0xff] %v7962_v30  ;;  %13775 = vst [vmem:[#allocation345_spill] sm:$0xff] %v7967_v17  ;;  %v13786_v17 = vld [vmem:[#allocation34_spill] sm:$0xff] }
 0x2b3   : > { %13778 = vst [vmem:[#allocation32_spill] sm:$0xff] %v7972_v50  ;;  %13780 = vst [vmem:[#allocation346_spill] sm:$0xff] %v7977_v33  ;;  %v7982_v26 = vmul.f32 %v7445_v62, %v13782_v24  ;;  %v7987_v12 = vmul.f32 %v7445_v62, %v13784_v9  ;;  %v13787_v30 = vunpack.c.l.bf16 %v13786_v17  ;;  %v13789_v20 = vunpack.c.h.bf16 %v13786_v17  ;;  %v13791_v33 = vld [vmem:[#allocation35_spill] sm:$0xff] }
 0x2b4   : > { %v13792_v50 = vunpack.c.l.bf16 %v13791_v33  ;;  %v13794_v63 = vunpack.c.h.bf16 %v13791_v33 }
 0x2b5   : > { %13783 = vst [vmem:[#allocation33_spill] sm:$0xff] %v7982_v26  ;;  %13785 = vst [vmem:[#allocation347_spill] sm:$0xff] %v7987_v12  ;;  %v7992_v39 = vmul.f32 %v7445_v62, %v13787_v30  ;;  %v7997_v31 = vmul.f32 %v7445_v62, %v13789_v20  ;;  %v13796_v12 = vld [vmem:[#allocation36_spill] sm:$0xff] }
 0x2b6   : > { %v8002_v24 = vmul.f32 %v7445_v62, %v13792_v50  ;;  %v8007_v9 = vmul.f32 %v7445_v62, %v13794_v63  ;;  %v13797_v26 = vunpack.c.l.bf16 %v13796_v12  ;;  %v13799_v17 = vunpack.c.h.bf16 %v13796_v12 }
 0x2b7   : > { %13788 = vst [vmem:[#allocation34_spill] sm:$0xff] %v7992_v39  ;;  %13790 = vst [vmem:[#allocation348_spill] sm:$0xff] %v7997_v31  ;;  %v13801_v31 = vld [vmem:[#allocation37_spill] sm:$0xff] }
 0x2b8   : > { %13793 = vst [vmem:[#allocation35_spill] sm:$0xff] %v8002_v24  ;;  %13795 = vst [vmem:[#allocation349_spill] sm:$0xff] %v8007_v9  ;;  %v8012_v30 = vmul.f32 %v7445_v62, %v13797_v26  ;;  %v8017_v20 = vmul.f32 %v7445_v62, %v13799_v17  ;;  %v13802_v39 = vunpack.c.l.bf16 %v13801_v31  ;;  %v13804_v33 = vunpack.c.h.bf16 %v13801_v31  ;;  %v13806_v9 = vld [vmem:[#allocation38_spill] sm:$0xff] }
 0x2b9   : > { %v13807_v24 = vunpack.c.l.bf16 %v13806_v9  ;;  %v13809_v12 = vunpack.c.h.bf16 %v13806_v9 }
 0x2ba   : > { %13798 = vst [vmem:[#allocation36_spill] sm:$0xff] %v8012_v30  ;;  %13800 = vst [vmem:[#allocation350_spill] sm:$0xff] %v8017_v20  ;;  %v8022_v50 = vmul.f32 %v7445_v62, %v13802_v39  ;;  %v8027_v63 = vmul.f32 %v7445_v62, %v13804_v33  ;;  %v13811_v20 = vld [vmem:[#allocation39_spill] sm:$0xff] }
 0x2bb   : > { %v8032_v26 = vmul.f32 %v7445_v62, %v13807_v24  ;;  %v8037_v17 = vmul.f32 %v7445_v62, %v13809_v12  ;;  %v13812_v30 = vunpack.c.l.bf16 %v13811_v20  ;;  %v13814_v31 = vunpack.c.h.bf16 %v13811_v20 }
 0x2bc   : > { %13803 = vst [vmem:[#allocation37_spill] sm:$0xff] %v8022_v50  ;;  %13805 = vst [vmem:[#allocation351_spill] sm:$0xff] %v8027_v63  ;;  %v13816_v63 = vld [vmem:[#allocation40_spill] sm:$0xff] }
 0x2bd   : > { %13808 = vst [vmem:[#allocation38_spill] sm:$0xff] %v8032_v26  ;;  %13810 = vst [vmem:[#allocation352_spill] sm:$0xff] %v8037_v17  ;;  %v8042_v39 = vmul.f32 %v7445_v62, %v13812_v30  ;;  %v8047_v33 = vmul.f32 %v7445_v62, %v13814_v31  ;;  %v13817_v50 = vunpack.c.l.bf16 %v13816_v63  ;;  %v13819_v9 = vunpack.c.h.bf16 %v13816_v63  ;;  %v13821_v17 = vld [vmem:[#allocation41_spill] sm:$0xff] }
 0x2be   : > { %v13822_v26 = vunpack.c.l.bf16 %v13821_v17  ;;  %v13824_v20 = vunpack.c.h.bf16 %v13821_v17 }
 0x2bf   : > { %13813 = vst [vmem:[#allocation39_spill] sm:$0xff] %v8042_v39  ;;  %13815 = vst [vmem:[#allocation353_spill] sm:$0xff] %v8047_v33  ;;  %v8052_v24 = vmul.f32 %v7445_v62, %v13817_v50  ;;  %v8057_v12 = vmul.f32 %v7445_v62, %v13819_v9  ;;  %v13826_v33 = vld [vmem:[#allocation42_spill] sm:$0xff] }
 0x2c0   : > { %v8062_v30 = vmul.f32 %v7445_v62, %v13822_v26  ;;  %v8067_v31 = vmul.f32 %v7445_v62, %v13824_v20  ;;  %v13827_v39 = vunpack.c.l.bf16 %v13826_v33  ;;  %v13829_v63 = vunpack.c.h.bf16 %v13826_v33 }
 0x2c1   : > { %13818 = vst [vmem:[#allocation40_spill] sm:$0xff] %v8052_v24  ;;  %13820 = vst [vmem:[#allocation354_spill] sm:$0xff] %v8057_v12  ;;  %v13831_v12 = vld [vmem:[#allocation43_spill] sm:$0xff] }
 0x2c2   : > { %13823 = vst [vmem:[#allocation41_spill] sm:$0xff] %v8062_v30  ;;  %13825 = vst [vmem:[#allocation355_spill] sm:$0xff] %v8067_v31  ;;  %v8072_v50 = vmul.f32 %v7445_v62, %v13827_v39  ;;  %v8077_v9 = vmul.f32 %v7445_v62, %v13829_v63  ;;  %v13832_v24 = vunpack.c.l.bf16 %v13831_v12  ;;  %v13834_v17 = vunpack.c.h.bf16 %v13831_v12  ;;  %v13836_v31 = vld [vmem:[#allocation44_spill] sm:$0xff] }
 0x2c3   : > { %v13837_v30 = vunpack.c.l.bf16 %v13836_v31  ;;  %v13839_v33 = vunpack.c.h.bf16 %v13836_v31 }
 0x2c4   : > { %13828 = vst [vmem:[#allocation42_spill] sm:$0xff] %v8072_v50  ;;  %13830 = vst [vmem:[#allocation356_spill] sm:$0xff] %v8077_v9  ;;  %v8082_v26 = vmul.f32 %v7445_v62, %v13832_v24  ;;  %v8087_v20 = vmul.f32 %v7445_v62, %v13834_v17  ;;  %v13841_v9 = vld [vmem:[#allocation45_spill] sm:$0xff] }
 0x2c5   : > { %v8092_v39 = vmul.f32 %v7445_v62, %v13837_v30  ;;  %v8097_v63 = vmul.f32 %v7445_v62, %v13839_v33  ;;  %v13842_v50 = vunpack.c.l.bf16 %v13841_v9  ;;  %v13844_v12 = vunpack.c.h.bf16 %v13841_v9 }
 0x2c6   : > { %13833 = vst [vmem:[#allocation43_spill] sm:$0xff] %v8082_v26  ;;  %13835 = vst [vmem:[#allocation357_spill] sm:$0xff] %v8087_v20  ;;  %v13846_v20 = vld [vmem:[#allocation46_spill] sm:$0xff] }
 0x2c7   : > { %13838 = vst [vmem:[#allocation44_spill] sm:$0xff] %v8092_v39  ;;  %13840 = vst [vmem:[#allocation358_spill] sm:$0xff] %v8097_v63  ;;  %v8102_v24 = vmul.f32 %v7445_v62, %v13842_v50  ;;  %v8107_v17 = vmul.f32 %v7445_v62, %v13844_v12  ;;  %v13847_v26 = vunpack.c.l.bf16 %v13846_v20  ;;  %v13849_v31 = vunpack.c.h.bf16 %v13846_v20  ;;  %v8119_v63 = vpop.permute.xlu0 %1316  ;;  %v13851_v39 = vld [vmem:[#allocation47_spill] sm:$0xff] }
 0x2c8   : > { %v13852_v50 = vunpack.c.l.bf16 %v13851_v39  ;;  %v13854_v9 = vunpack.c.h.bf16 %v13851_v39 }
 0x2c9   : > { %13843 = vst [vmem:[#allocation45_spill] sm:$0xff] %v8102_v24  ;;  %13845 = vst [vmem:[#allocation359_spill] sm:$0xff] %v8107_v17  ;;  %v8112_v30 = vmul.f32 %v7445_v62, %v13847_v26  ;;  %v8117_v33 = vmul.f32 %v7445_v62, %v13849_v31  ;;  %v13856_v17 = vld [vmem:[#allocation48_spill] sm:$0xff] }
 0x2ca   : > { %v8124_v24 = vmul.f32 %v7445_v62, %v13852_v50  ;;  %v8129_v12 = vmul.f32 %v7445_v62, %v13854_v9  ;;  %v13857_v26 = vunpack.c.l.bf16 %v13856_v17  ;;  %v13859_v20 = vunpack.c.h.bf16 %v13856_v17 }
 0x2cb   : > { %13848 = vst [vmem:[#allocation46_spill] sm:$0xff] %v8112_v30  ;;  %13850 = vst [vmem:[#allocation360_spill] sm:$0xff] %v8117_v33  ;;  %v13861_v33 = vld [vmem:[#allocation49_spill] sm:$0xff] }
 0x2cc   : > { %13853 = vst [vmem:[#allocation47_spill] sm:$0xff] %v8124_v24  ;;  %13855 = vst [vmem:[#allocation361_spill] sm:$0xff] %v8129_v12  ;;  %v8134_v30 = vmul.f32 %v7445_v62, %v13857_v26  ;;  %v8139_v31 = vmul.f32 %v7445_v62, %v13859_v20  ;;  %v13862_v8 = vunpack.c.l.bf16 %v13861_v33  ;;  %v13864_v39 = vunpack.c.h.bf16 %v13861_v33  ;;  %v13866_v12 = vld [vmem:[#allocation50_spill] sm:$0xff] }
 0x2cd   : > { %v13867_v24 = vunpack.c.l.bf16 %v13866_v12  ;;  %v13869_v17 = vunpack.c.h.bf16 %v13866_v12 }
 0x2ce   : > { %13858 = vst [vmem:[#allocation48_spill] sm:$0xff] %v8134_v30  ;;  %13860 = vst [vmem:[#allocation362_spill] sm:$0xff] %v8139_v31  ;;  %v8144_v50 = vmul.f32 %v7445_v62, %v13862_v8  ;;  %v8149_v9 = vmul.f32 %v7445_v62, %v13864_v39  ;;  %v13871_v31 = vld [vmem:[#allocation51_spill] sm:$0xff] }
 0x2cf   : > { %v8154_v26 = vmul.f32 %v7445_v62, %v13867_v24  ;;  %v8159_v20 = vmul.f32 %v7445_v62, %v13869_v17  ;;  %v13872_v30 = vunpack.c.l.bf16 %v13871_v31  ;;  %v13874_v33 = vunpack.c.h.bf16 %v13871_v31 }
 0x2d0   : > { %13863 = vst [vmem:[#allocation49_spill] sm:$0xff] %v8144_v50  ;;  %13865 = vst [vmem:[#allocation363_spill] sm:$0xff] %v8149_v9  ;;  %v13876_v9 = vld [vmem:[#allocation52_spill] sm:$0xff] }
 0x2d1   : > { %13868 = vst [vmem:[#allocation50_spill] sm:$0xff] %v8154_v26  ;;  %13870 = vst [vmem:[#allocation364_spill] sm:$0xff] %v8159_v20  ;;  %v8164_v8 = vmul.f32 %v7445_v62, %v13872_v30  ;;  %v8169_v39 = vmul.f32 %v7445_v62, %v13874_v33  ;;  %v13877_v50 = vunpack.c.l.bf16 %v13876_v9  ;;  %v13879_v12 = vunpack.c.h.bf16 %v13876_v9  ;;  %v13881_v20 = vld [vmem:[#allocation53_spill] sm:$0xff] }
 0x2d2   : > { %v13882_v26 = vunpack.c.l.bf16 %v13881_v20 }
 0x2d3   : > { %13873 = vst [vmem:[#allocation51_spill] sm:$0xff] %v8164_v8  ;;  %13875 = vst [vmem:[#allocation365_spill] sm:$0xff] %v8169_v39  ;;  %v8174_v24 = vmul.f32 %v7445_v62, %v13877_v50  ;;  %v8179_v17 = vmul.f32 %v7445_v62, %v13879_v12  ;;  %v13884_v8 = vld [vmem:[#allocation54_spill] sm:$0xff] }
 0x2d4   : > { %v8184_v30 = vmul.f32 %v7445_v62, %v13882_v26  ;;  %v13885_v31 = vunpack.c.l.bf16 %v13884_v8  ;;  %v13886_v39 = vunpack.c.h.bf16 %v13884_v8  ;;  %v13890_v26 = vld [vmem:[#allocation56_spill] sm:$0xff] }
 0x2d5   : > { %13878 = vst [vmem:[#allocation52_spill] sm:$0xff] %v8174_v24  ;;  %13880 = vst [vmem:[#allocation366_spill] sm:$0xff] %v8179_v17  ;;  %v13887_v24 = vld [vmem:[#allocation55_spill] sm:$0xff]  ;;  %v13892_v8 = vunpack.c.h.bf16 %v13890_v26 }
 0x2d6   : > { %13883 = vst [vmem:[#allocation53_spill] sm:$0xff] %v8184_v30  ;;  %v8189_v33 = vmul.f32 %v8119_v63, %v13885_v31  ;;  %v8194_v50 = vmul.f32 %v8119_v63, %v13886_v39  ;;  %v13888_v9 = vunpack.c.l.bf16 %v13887_v24  ;;  %v13889_v17 = vunpack.c.h.bf16 %v13887_v24 }
 0x2d7   : > { %v13891_v30 = vunpack.c.l.bf16 %v13890_v26  ;;  %v8214_v39 = vmul.f32 %v8119_v63, %v13892_v8  ;;  %v13895_v24 = vunpack.c.h.bf16 %v13893_v32  ;;  %v13898_v26 = vunpack.c.h.bf16 %v13896_v1 }
 0x2d8   : > { %v8199_v12 = vmul.f32 %v8119_v63, %v13888_v9  ;;  %v8204_v62 = vmul.f32 %v8119_v63, %v13889_v17  ;;  %v8219_v9 = vmul.f32 %v8119_v63, %v13894_v37  ;;  %v8239_v37 = vmul.f32 %v8119_v63, %v13900_v0 }
 0x2d9   : > { %v8209_v31 = vmul.f32 %v8119_v63, %v13891_v30  ;;  %v8224_v17 = vmul.f32 %v8119_v63, %v13895_v24  ;;  %v8229_v30 = vmul.f32 %v8119_v63, %v13897_v36  ;;  %v8234_v8 = vmul.f32 %v8119_v63, %v13898_v26 }
 0x2da   : > { %v13901_v32 = vunpack.c.h.bf16 %v13899_v38  ;;  %v8249_v36 = vmul.f32 %v8119_v63, %v13903_v43  ;;  %v13904_v1 = vunpack.c.h.bf16 %v13902_v44  ;;  %v8259_v0 = vmul.f32 %v8119_v63, %v13906_v34 }
 0x2db   : > { %v13907_v38 = vunpack.c.h.bf16 %v13905_v35  ;;  %v8269_v43 = vmul.f32 %v8119_v63, %v13909_v28  ;;  %v13911_v44 = vunpack.c.h.bf16 %v13908_v29  ;;  %v8279_v34 = vmul.f32 %v8119_v63, %v13914_v22 }
 0x2dc   : > { %v8244_v24 = vmul.f32 %v8119_v63, %v13901_v32  ;;  %v8254_v26 = vmul.f32 %v8119_v63, %v13904_v1  ;;  %v13916_v35 = vunpack.c.h.bf16 %v13913_v23  ;;  %v8289_v28 = vmul.f32 %v8119_v63, %v13919_v14 }
 0x2dd   : > { %v8264_v32 = vmul.f32 %v8119_v63, %v13907_v38  ;;  %13910 = vst [vmem:[#allocation54_spill] sm:$0xff] %v8269_v43  ;;  %v8274_v1 = vmul.f32 %v8119_v63, %v13911_v44  ;;  %13915 = vst [vmem:[#allocation56_spill] sm:$0xff] %v8279_v34  ;;  %v13921_v29 = vunpack.c.h.bf16 %v13918_v16  ;;  %v8299_v22 = vmul.f32 %v8119_v63, %v13924_v10  ;;  %v14272_v43 = vld [vmem:[#allocation136_spill] sm:$0xff] }
 0x2de   : > { %v8284_v38 = vmul.f32 %v8119_v63, %v13916_v35  ;;  %13920 = vst [vmem:[#allocation58_spill] sm:$0xff] %v8289_v28  ;;  %v13926_v23 = vunpack.c.h.bf16 %v13923_v11  ;;  %v8309_v14 = vmul.f32 %v8119_v63, %v13929_v2  ;;  %v13931_v16 = vunpack.c.h.bf16 %v13928_v3  ;;  %v14257_v28 = vld [vmem:[#allocation133_spill] sm:$0xff] }
 0x2df   : > { %13912 = vst [vmem:[#allocation55_spill] sm:$0xff] %v8274_v1  ;;  %v8294_v44 = vmul.f32 %v8119_v63, %v13921_v29  ;;  %13925 = vst [vmem:[#allocation60_spill] sm:$0xff] %v8299_v22  ;;  %v8319_v10 = vmul.f32 %v8119_v63, %v13934_v57  ;;  %v13936_v11 = vunpack.c.h.bf16 %v13933_v58  ;;  %v8329_v2 = vmul.f32 %v8119_v63, %v13939_v51 }
 0x2e0   : > { %13917 = vst [vmem:[#allocation57_spill] sm:$0xff] %v8284_v38  ;;  %v8304_v35 = vmul.f32 %v8119_v63, %v13926_v23  ;;  %13930 = vst [vmem:[#allocation62_spill] sm:$0xff] %v8309_v14  ;;  %v8314_v29 = vmul.f32 %v8119_v63, %v13931_v16  ;;  %v13941_v3 = vunpack.c.h.bf16 %v13938_v52  ;;  %v8339_v57 = vmul.f32 %v8119_v63, %v13944_v46  ;;  %v14242_v14 = vld [vmem:[#allocation130_spill] sm:$0xff] }
 0x2e1   : > { %13922 = vst [vmem:[#allocation59_spill] sm:$0xff] %v8294_v44  ;;  %13935 = vst [vmem:[#allocation64_spill] sm:$0xff] %v8319_v10  ;;  %v8324_v23 = vmul.f32 %v8119_v63, %v13936_v11  ;;  %v13946_v58 = vunpack.c.h.bf16 %v13943_v47  ;;  %v14243_v45 = vunpack.c.l.bf16 %v14242_v14  ;;  %v14253_v44 = vunpack.c.l.bf16 %v14252_v42  ;;  %v14262_v38 = vld [vmem:[#allocation134_spill] sm:$0xff] }
 0x2e2   : > { %13927 = vst [vmem:[#allocation61_spill] sm:$0xff] %v8304_v35  ;;  %13932 = vst [vmem:[#allocation63_spill] sm:$0xff] %v8314_v29  ;;  %v8334_v16 = vmul.f32 %v8119_v63, %v13941_v3  ;;  %v14247_v35 = vld [vmem:[#allocation131_spill] sm:$0xff]  ;;  %v14258_v41 = vunpack.c.l.bf16 %v14257_v28  ;;  %v14263_v34 = vunpack.c.l.bf16 %v14262_v38  ;;  %v14268_v1 = vunpack.c.l.bf16 %v14267_v40 }
 0x2e3   : > { %13937 = vst [vmem:[#allocation65_spill] sm:$0xff] %v8324_v23  ;;  %13940 = vst [vmem:[#allocation66_spill] sm:$0xff] %v8329_v2  ;;  %v8344_v11 = vmul.f32 %v8119_v63, %v13946_v58  ;;  %v13948_v23 = vld [vmem:[#allocation70_spill] sm:$0xff]  ;;  %v14248_v22 = vunpack.c.l.bf16 %v14247_v35  ;;  %v14273_v21 = vunpack.c.l.bf16 %v14272_v43 }
 0x2e4   : > { %13942 = vst [vmem:[#allocation67_spill] sm:$0xff] %v8334_v16  ;;  %13945 = vst [vmem:[#allocation68_spill] sm:$0xff] %v8339_v57  ;;  %v13949_v10 = vunpack.c.l.bf16 %v13948_v23  ;;  %v13951_v52 = vunpack.c.h.bf16 %v13948_v23  ;;  %v13953_v16 = vld [vmem:[#allocation71_spill] sm:$0xff] }
 0x2e5   : > { %13947 = vst [vmem:[#allocation69_spill] sm:$0xff] %v8344_v11  ;;  %v13954_v2 = vunpack.c.l.bf16 %v13953_v16  ;;  %v13956_v47 = vunpack.c.h.bf16 %v13953_v16  ;;  %v13958_v11 = vld [vmem:[#allocation72_spill] sm:$0xff] }
 0x2e6   : > { %v8349_v51 = vmul.f32 %v8119_v63, %v13949_v10  ;;  %v8354_v3 = vmul.f32 %v8119_v63, %v13951_v52  ;;  %v13959_v57 = vunpack.c.l.bf16 %v13958_v11  ;;  %v13961_v23 = vunpack.c.h.bf16 %v13958_v11 }
 0x2e7   : > { %v8359_v46 = vmul.f32 %v8119_v63, %v13954_v2  ;;  %v8364_v58 = vmul.f32 %v8119_v63, %v13956_v47 }
 0x2e8   : > { %13950 = vst [vmem:[#allocation70_spill] sm:$0xff] %v8349_v51  ;;  %13952 = vst [vmem:[#allocation367_spill] sm:$0xff] %v8354_v3  ;;  %v8369_v10 = vmul.f32 %v8119_v63, %v13959_v57  ;;  %v8374_v52 = vmul.f32 %v8119_v63, %v13961_v23  ;;  %v13963_v3 = vld [vmem:[#allocation73_spill] sm:$0xff] }
 0x2e9   : > { %13955 = vst [vmem:[#allocation71_spill] sm:$0xff] %v8359_v46  ;;  %13957 = vst [vmem:[#allocation368_spill] sm:$0xff] %v8364_v58  ;;  %v13964_v51 = vunpack.c.l.bf16 %v13963_v3  ;;  %v13966_v16 = vunpack.c.h.bf16 %v13963_v3  ;;  %v13968_v58 = vld [vmem:[#allocation74_spill] sm:$0xff] }
 0x2ea   : > { %13960 = vst [vmem:[#allocation72_spill] sm:$0xff] %v8369_v10  ;;  %13962 = vst [vmem:[#allocation369_spill] sm:$0xff] %v8374_v52  ;;  %v13969_v46 = vunpack.c.l.bf16 %v13968_v58  ;;  %v13971_v11 = vunpack.c.h.bf16 %v13968_v58  ;;  %v13973_v52 = vld [vmem:[#allocation75_spill] sm:$0xff] }
 0x2eb   : > { %v8379_v2 = vmul.f32 %v8119_v63, %v13964_v51  ;;  %v8384_v47 = vmul.f32 %v8119_v63, %v13966_v16  ;;  %v13974_v10 = vunpack.c.l.bf16 %v13973_v52  ;;  %v13976_v3 = vunpack.c.h.bf16 %v13973_v52 }
 0x2ec   : > { %v8389_v57 = vmul.f32 %v8119_v63, %v13969_v46  ;;  %v8394_v23 = vmul.f32 %v8119_v63, %v13971_v11 }
 0x2ed   : > { %13965 = vst [vmem:[#allocation73_spill] sm:$0xff] %v8379_v2  ;;  %13967 = vst [vmem:[#allocation370_spill] sm:$0xff] %v8384_v47  ;;  %v8399_v51 = vmul.f32 %v8119_v63, %v13974_v10  ;;  %v8404_v16 = vmul.f32 %v8119_v63, %v13976_v3  ;;  %v13978_v47 = vld [vmem:[#allocation76_spill] sm:$0xff] }
 0x2ee   : > { %13970 = vst [vmem:[#allocation74_spill] sm:$0xff] %v8389_v57  ;;  %13972 = vst [vmem:[#allocation371_spill] sm:$0xff] %v8394_v23  ;;  %v13979_v2 = vunpack.c.l.bf16 %v13978_v47  ;;  %v13981_v58 = vunpack.c.h.bf16 %v13978_v47  ;;  %v13983_v23 = vld [vmem:[#allocation77_spill] sm:$0xff] }
 0x2ef   : > { %13975 = vst [vmem:[#allocation75_spill] sm:$0xff] %v8399_v51  ;;  %13977 = vst [vmem:[#allocation372_spill] sm:$0xff] %v8404_v16  ;;  %v13984_v57 = vunpack.c.l.bf16 %v13983_v23  ;;  %v13986_v52 = vunpack.c.h.bf16 %v13983_v23  ;;  %v13988_v16 = vld [vmem:[#allocation78_spill] sm:$0xff] }
 0x2f0   : > { %v8409_v46 = vmul.f32 %v8119_v63, %v13979_v2  ;;  %v8414_v11 = vmul.f32 %v8119_v63, %v13981_v58  ;;  %v13989_v51 = vunpack.c.l.bf16 %v13988_v16  ;;  %v13991_v47 = vunpack.c.h.bf16 %v13988_v16 }
 0x2f1   : > { %v8419_v10 = vmul.f32 %v8119_v63, %v13984_v57  ;;  %v8424_v3 = vmul.f32 %v8119_v63, %v13986_v52 }
 0x2f2   : > { %13980 = vst [vmem:[#allocation76_spill] sm:$0xff] %v8409_v46  ;;  %13982 = vst [vmem:[#allocation373_spill] sm:$0xff] %v8414_v11  ;;  %v8429_v2 = vmul.f32 %v8119_v63, %v13989_v51  ;;  %v8434_v58 = vmul.f32 %v8119_v63, %v13991_v47  ;;  %v13993_v11 = vld [vmem:[#allocation79_spill] sm:$0xff] }
 0x2f3   : > { %13985 = vst [vmem:[#allocation77_spill] sm:$0xff] %v8419_v10  ;;  %13987 = vst [vmem:[#allocation374_spill] sm:$0xff] %v8424_v3  ;;  %v13994_v46 = vunpack.c.l.bf16 %v13993_v11  ;;  %v13996_v23 = vunpack.c.h.bf16 %v13993_v11  ;;  %v13998_v3 = vld [vmem:[#allocation80_spill] sm:$0xff] }
 0x2f4   : > { %13990 = vst [vmem:[#allocation78_spill] sm:$0xff] %v8429_v2  ;;  %13992 = vst [vmem:[#allocation375_spill] sm:$0xff] %v8434_v58  ;;  %v13999_v10 = vunpack.c.l.bf16 %v13998_v3  ;;  %v14001_v16 = vunpack.c.h.bf16 %v13998_v3  ;;  %v14003_v58 = vld [vmem:[#allocation81_spill] sm:$0xff] }
 0x2f5   : > { %v8439_v57 = vmul.f32 %v8119_v63, %v13994_v46  ;;  %v8444_v52 = vmul.f32 %v8119_v63, %v13996_v23  ;;  %v14004_v2 = vunpack.c.l.bf16 %v14003_v58  ;;  %v14006_v11 = vunpack.c.h.bf16 %v14003_v58 }
 0x2f6   : > { %v8449_v51 = vmul.f32 %v8119_v63, %v13999_v10  ;;  %v8454_v47 = vmul.f32 %v8119_v63, %v14001_v16 }
 0x2f7   : > { %13995 = vst [vmem:[#allocation79_spill] sm:$0xff] %v8439_v57  ;;  %13997 = vst [vmem:[#allocation376_spill] sm:$0xff] %v8444_v52  ;;  %v8459_v46 = vmul.f32 %v8119_v63, %v14004_v2  ;;  %v8464_v23 = vmul.f32 %v8119_v63, %v14006_v11  ;;  %v14008_v52 = vld [vmem:[#allocation82_spill] sm:$0xff] }
 0x2f8   : > { %14000 = vst [vmem:[#allocation80_spill] sm:$0xff] %v8449_v51  ;;  %14002 = vst [vmem:[#allocation377_spill] sm:$0xff] %v8454_v47  ;;  %v14009_v57 = vunpack.c.l.bf16 %v14008_v52  ;;  %v14011_v3 = vunpack.c.h.bf16 %v14008_v52  ;;  %v14013_v47 = vld [vmem:[#allocation83_spill] sm:$0xff] }
 0x2f9   : > { %14005 = vst [vmem:[#allocation81_spill] sm:$0xff] %v8459_v46  ;;  %14007 = vst [vmem:[#allocation378_spill] sm:$0xff] %v8464_v23  ;;  %v14014_v51 = vunpack.c.l.bf16 %v14013_v47  ;;  %v14016_v58 = vunpack.c.h.bf16 %v14013_v47  ;;  %v14018_v23 = vld [vmem:[#allocation84_spill] sm:$0xff] }
 0x2fa   : > { %v8469_v10 = vmul.f32 %v8119_v63, %v14009_v57  ;;  %v8474_v16 = vmul.f32 %v8119_v63, %v14011_v3  ;;  %v14019_v46 = vunpack.c.l.bf16 %v14018_v23  ;;  %v14021_v52 = vunpack.c.h.bf16 %v14018_v23 }
 0x2fb   : > { %v8479_v2 = vmul.f32 %v8119_v63, %v14014_v51  ;;  %v8484_v11 = vmul.f32 %v8119_v63, %v14016_v58 }
 0x2fc   : > { %14010 = vst [vmem:[#allocation82_spill] sm:$0xff] %v8469_v10  ;;  %14012 = vst [vmem:[#allocation379_spill] sm:$0xff] %v8474_v16  ;;  %v8489_v57 = vmul.f32 %v8119_v63, %v14019_v46  ;;  %v8494_v3 = vmul.f32 %v8119_v63, %v14021_v52  ;;  %v14023_v16 = vld [vmem:[#allocation85_spill] sm:$0xff] }
 0x2fd   : > { %14015 = vst [vmem:[#allocation83_spill] sm:$0xff] %v8479_v2  ;;  %14017 = vst [vmem:[#allocation380_spill] sm:$0xff] %v8484_v11  ;;  %v14024_v10 = vunpack.c.l.bf16 %v14023_v16  ;;  %v14026_v47 = vunpack.c.h.bf16 %v14023_v16  ;;  %v14028_v11 = vld [vmem:[#allocation86_spill] sm:$0xff] }
 0x2fe   : > { %14020 = vst [vmem:[#allocation84_spill] sm:$0xff] %v8489_v57  ;;  %14022 = vst [vmem:[#allocation381_spill] sm:$0xff] %v8494_v3  ;;  %v14029_v2 = vunpack.c.l.bf16 %v14028_v11  ;;  %v14031_v23 = vunpack.c.h.bf16 %v14028_v11  ;;  %v14033_v3 = vld [vmem:[#allocation87_spill] sm:$0xff] }
 0x2ff   : > { %v8499_v51 = vmul.f32 %v8119_v63, %v14024_v10  ;;  %v8504_v58 = vmul.f32 %v8119_v63, %v14026_v47  ;;  %v14034_v57 = vunpack.c.l.bf16 %v14033_v3  ;;  %v14036_v16 = vunpack.c.h.bf16 %v14033_v3 }
 0x300   : > { %v8509_v46 = vmul.f32 %v8119_v63, %v14029_v2  ;;  %v8514_v52 = vmul.f32 %v8119_v63, %v14031_v23 }
 0x301   : > { %14025 = vst [vmem:[#allocation85_spill] sm:$0xff] %v8499_v51  ;;  %14027 = vst [vmem:[#allocation382_spill] sm:$0xff] %v8504_v58  ;;  %v8519_v10 = vmul.f32 %v8119_v63, %v14034_v57  ;;  %v8524_v47 = vmul.f32 %v8119_v63, %v14036_v16  ;;  %v14038_v58 = vld [vmem:[#allocation88_spill] sm:$0xff] }
 0x302   : > { %14030 = vst [vmem:[#allocation86_spill] sm:$0xff] %v8509_v46  ;;  %14032 = vst [vmem:[#allocation383_spill] sm:$0xff] %v8514_v52  ;;  %v14039_v51 = vunpack.c.l.bf16 %v14038_v58  ;;  %v14041_v11 = vunpack.c.h.bf16 %v14038_v58  ;;  %v14043_v52 = vld [vmem:[#allocation89_spill] sm:$0xff] }
 0x303   : > { %14035 = vst [vmem:[#allocation87_spill] sm:$0xff] %v8519_v10  ;;  %14037 = vst [vmem:[#allocation384_spill] sm:$0xff] %v8524_v47  ;;  %v14044_v46 = vunpack.c.l.bf16 %v14043_v52  ;;  %v14046_v3 = vunpack.c.h.bf16 %v14043_v52  ;;  %v14048_v47 = vld [vmem:[#allocation90_spill] sm:$0xff] }
 0x304   : > { %v8529_v2 = vmul.f32 %v8119_v63, %v14039_v51  ;;  %v8534_v23 = vmul.f32 %v8119_v63, %v14041_v11  ;;  %v14049_v10 = vunpack.c.l.bf16 %v14048_v47  ;;  %v14051_v58 = vunpack.c.h.bf16 %v14048_v47 }
 0x305   : > { %v8539_v57 = vmul.f32 %v8119_v63, %v14044_v46  ;;  %v8544_v16 = vmul.f32 %v8119_v63, %v14046_v3 }
 0x306   : > { %14040 = vst [vmem:[#allocation88_spill] sm:$0xff] %v8529_v2  ;;  %14042 = vst [vmem:[#allocation385_spill] sm:$0xff] %v8534_v23  ;;  %v8549_v51 = vmul.f32 %v8119_v63, %v14049_v10  ;;  %v8554_v11 = vmul.f32 %v8119_v63, %v14051_v58  ;;  %v14053_v23 = vld [vmem:[#allocation91_spill] sm:$0xff] }
 0x307   : > { %14045 = vst [vmem:[#allocation89_spill] sm:$0xff] %v8539_v57  ;;  %14047 = vst [vmem:[#allocation386_spill] sm:$0xff] %v8544_v16  ;;  %v14054_v2 = vunpack.c.l.bf16 %v14053_v23  ;;  %v14056_v52 = vunpack.c.h.bf16 %v14053_v23  ;;  %v14058_v16 = vld [vmem:[#allocation92_spill] sm:$0xff] }
 0x308   : > { %14050 = vst [vmem:[#allocation90_spill] sm:$0xff] %v8549_v51  ;;  %14052 = vst [vmem:[#allocation387_spill] sm:$0xff] %v8554_v11  ;;  %v14059_v57 = vunpack.c.l.bf16 %v14058_v16  ;;  %v14061_v47 = vunpack.c.h.bf16 %v14058_v16  ;;  %v14063_v11 = vld [vmem:[#allocation93_spill] sm:$0xff] }
 0x309   : > { %v8559_v46 = vmul.f32 %v8119_v63, %v14054_v2  ;;  %v8564_v3 = vmul.f32 %v8119_v63, %v14056_v52  ;;  %v14064_v51 = vunpack.c.l.bf16 %v14063_v11  ;;  %v14066_v23 = vunpack.c.h.bf16 %v14063_v11 }
 0x30a   : > { %v8569_v10 = vmul.f32 %v8119_v63, %v14059_v57  ;;  %v8574_v58 = vmul.f32 %v8119_v63, %v14061_v47 }
 0x30b   : > { %14055 = vst [vmem:[#allocation91_spill] sm:$0xff] %v8559_v46  ;;  %14057 = vst [vmem:[#allocation388_spill] sm:$0xff] %v8564_v3  ;;  %v8579_v2 = vmul.f32 %v8119_v63, %v14064_v51  ;;  %v8584_v52 = vmul.f32 %v8119_v63, %v14066_v23  ;;  %v14068_v3 = vld [vmem:[#allocation94_spill] sm:$0xff] }
 0x30c   : > { %14060 = vst [vmem:[#allocation92_spill] sm:$0xff] %v8569_v10  ;;  %14062 = vst [vmem:[#allocation389_spill] sm:$0xff] %v8574_v58  ;;  %v14069_v46 = vunpack.c.l.bf16 %v14068_v3  ;;  %v14071_v16 = vunpack.c.h.bf16 %v14068_v3  ;;  %v14073_v58 = vld [vmem:[#allocation95_spill] sm:$0xff] }
 0x30d   : > { %14065 = vst [vmem:[#allocation93_spill] sm:$0xff] %v8579_v2  ;;  %14067 = vst [vmem:[#allocation390_spill] sm:$0xff] %v8584_v52  ;;  %v14074_v10 = vunpack.c.l.bf16 %v14073_v58  ;;  %v14076_v11 = vunpack.c.h.bf16 %v14073_v58  ;;  %v14078_v52 = vld [vmem:[#allocation96_spill] sm:$0xff] }
 0x30e   : > { %v8589_v57 = vmul.f32 %v8119_v63, %v14069_v46  ;;  %v8594_v47 = vmul.f32 %v8119_v63, %v14071_v16  ;;  %v14079_v2 = vunpack.c.l.bf16 %v14078_v52  ;;  %v14081_v3 = vunpack.c.h.bf16 %v14078_v52 }
 0x30f   : > { %v8599_v51 = vmul.f32 %v8119_v63, %v14074_v10  ;;  %v8604_v23 = vmul.f32 %v8119_v63, %v14076_v11 }
 0x310   : > { %14070 = vst [vmem:[#allocation94_spill] sm:$0xff] %v8589_v57  ;;  %14072 = vst [vmem:[#allocation391_spill] sm:$0xff] %v8594_v47  ;;  %v8609_v46 = vmul.f32 %v8119_v63, %v14079_v2  ;;  %v8614_v16 = vmul.f32 %v8119_v63, %v14081_v3  ;;  %v14083_v47 = vld [vmem:[#allocation97_spill] sm:$0xff] }
 0x311   : > { %14075 = vst [vmem:[#allocation95_spill] sm:$0xff] %v8599_v51  ;;  %14077 = vst [vmem:[#allocation392_spill] sm:$0xff] %v8604_v23  ;;  %v14084_v57 = vunpack.c.l.bf16 %v14083_v47  ;;  %v14086_v58 = vunpack.c.h.bf16 %v14083_v47  ;;  %v14088_v23 = vld [vmem:[#allocation98_spill] sm:$0xff] }
 0x312   : > { %14080 = vst [vmem:[#allocation96_spill] sm:$0xff] %v8609_v46  ;;  %14082 = vst [vmem:[#allocation393_spill] sm:$0xff] %v8614_v16  ;;  %v14089_v51 = vunpack.c.l.bf16 %v14088_v23  ;;  %v14091_v52 = vunpack.c.h.bf16 %v14088_v23  ;;  %v14093_v16 = vld [vmem:[#allocation99_spill] sm:$0xff] }
 0x313   : > { %v8619_v10 = vmul.f32 %v8119_v63, %v14084_v57  ;;  %v8624_v11 = vmul.f32 %v8119_v63, %v14086_v58  ;;  %v14094_v46 = vunpack.c.l.bf16 %v14093_v16  ;;  %v14096_v47 = vunpack.c.h.bf16 %v14093_v16 }
 0x314   : > { %v8629_v2 = vmul.f32 %v8119_v63, %v14089_v51  ;;  %v8634_v3 = vmul.f32 %v8119_v63, %v14091_v52 }
 0x315   : > { %14085 = vst [vmem:[#allocation97_spill] sm:$0xff] %v8619_v10  ;;  %14087 = vst [vmem:[#allocation394_spill] sm:$0xff] %v8624_v11  ;;  %v8639_v57 = vmul.f32 %v8119_v63, %v14094_v46  ;;  %v8644_v58 = vmul.f32 %v8119_v63, %v14096_v47  ;;  %v14098_v11 = vld [vmem:[#allocation100_spill] sm:$0xff] }
 0x316   : > { %14090 = vst [vmem:[#allocation98_spill] sm:$0xff] %v8629_v2  ;;  %14092 = vst [vmem:[#allocation395_spill] sm:$0xff] %v8634_v3  ;;  %v14099_v10 = vunpack.c.l.bf16 %v14098_v11  ;;  %v14101_v23 = vunpack.c.h.bf16 %v14098_v11  ;;  %v14103_v3 = vld [vmem:[#allocation101_spill] sm:$0xff] }
 0x317   : > { %14095 = vst [vmem:[#allocation99_spill] sm:$0xff] %v8639_v57  ;;  %14097 = vst [vmem:[#allocation396_spill] sm:$0xff] %v8644_v58  ;;  %v14104_v2 = vunpack.c.l.bf16 %v14103_v3  ;;  %v14106_v16 = vunpack.c.h.bf16 %v14103_v3  ;;  %v14108_v58 = vld [vmem:[#allocation102_spill] sm:$0xff] }
 0x318   : > { %v8649_v51 = vmul.f32 %v8119_v63, %v14099_v10  ;;  %v8654_v52 = vmul.f32 %v8119_v63, %v14101_v23  ;;  %v14109_v57 = vunpack.c.l.bf16 %v14108_v58  ;;  %v14111_v11 = vunpack.c.h.bf16 %v14108_v58 }
 0x319   : > { %v8659_v46 = vmul.f32 %v8119_v63, %v14104_v2  ;;  %v8664_v47 = vmul.f32 %v8119_v63, %v14106_v16 }
 0x31a   : > { %14100 = vst [vmem:[#allocation100_spill] sm:$0xff] %v8649_v51  ;;  %14102 = vst [vmem:[#allocation397_spill] sm:$0xff] %v8654_v52  ;;  %v8669_v10 = vmul.f32 %v8119_v63, %v14109_v57  ;;  %v8674_v23 = vmul.f32 %v8119_v63, %v14111_v11  ;;  %v14113_v52 = vld [vmem:[#allocation103_spill] sm:$0xff] }
 0x31b   : > { %14105 = vst [vmem:[#allocation101_spill] sm:$0xff] %v8659_v46  ;;  %14107 = vst [vmem:[#allocation398_spill] sm:$0xff] %v8664_v47  ;;  %v14114_v51 = vunpack.c.l.bf16 %v14113_v52  ;;  %v14116_v3 = vunpack.c.h.bf16 %v14113_v52  ;;  %v14118_v47 = vld [vmem:[#allocation104_spill] sm:$0xff] }
 0x31c   : > { %14110 = vst [vmem:[#allocation102_spill] sm:$0xff] %v8669_v10  ;;  %14112 = vst [vmem:[#allocation399_spill] sm:$0xff] %v8674_v23  ;;  %v14119_v46 = vunpack.c.l.bf16 %v14118_v47  ;;  %v14121_v58 = vunpack.c.h.bf16 %v14118_v47  ;;  %v14123_v23 = vld [vmem:[#allocation105_spill] sm:$0xff] }
 0x31d   : > { %v8679_v2 = vmul.f32 %v8119_v63, %v14114_v51  ;;  %v8684_v16 = vmul.f32 %v8119_v63, %v14116_v3  ;;  %v14124_v10 = vunpack.c.l.bf16 %v14123_v23  ;;  %v14126_v52 = vunpack.c.h.bf16 %v14123_v23 }
 0x31e   : > { %v8689_v57 = vmul.f32 %v8119_v63, %v14119_v46  ;;  %v8694_v11 = vmul.f32 %v8119_v63, %v14121_v58 }
 0x31f   : > { %14115 = vst [vmem:[#allocation103_spill] sm:$0xff] %v8679_v2  ;;  %14117 = vst [vmem:[#allocation400_spill] sm:$0xff] %v8684_v16  ;;  %v8699_v51 = vmul.f32 %v8119_v63, %v14124_v10  ;;  %v8704_v3 = vmul.f32 %v8119_v63, %v14126_v52  ;;  %v14128_v16 = vld [vmem:[#allocation106_spill] sm:$0xff] }
 0x320   : > { %14120 = vst [vmem:[#allocation104_spill] sm:$0xff] %v8689_v57  ;;  %14122 = vst [vmem:[#allocation401_spill] sm:$0xff] %v8694_v11  ;;  %v14129_v2 = vunpack.c.l.bf16 %v14128_v16  ;;  %v14131_v47 = vunpack.c.h.bf16 %v14128_v16  ;;  %v14133_v11 = vld [vmem:[#allocation107_spill] sm:$0xff] }
 0x321   : > { %14125 = vst [vmem:[#allocation105_spill] sm:$0xff] %v8699_v51  ;;  %14127 = vst [vmem:[#allocation402_spill] sm:$0xff] %v8704_v3  ;;  %v14134_v57 = vunpack.c.l.bf16 %v14133_v11  ;;  %v14136_v23 = vunpack.c.h.bf16 %v14133_v11  ;;  %v14138_v3 = vld [vmem:[#allocation108_spill] sm:$0xff] }
 0x322   : > { %v8709_v46 = vmul.f32 %v8119_v63, %v14129_v2  ;;  %v8714_v58 = vmul.f32 %v8119_v63, %v14131_v47  ;;  %v14139_v51 = vunpack.c.l.bf16 %v14138_v3  ;;  %v14141_v16 = vunpack.c.h.bf16 %v14138_v3 }
 0x323   : > { %v8719_v10 = vmul.f32 %v8119_v63, %v14134_v57  ;;  %v8724_v52 = vmul.f32 %v8119_v63, %v14136_v23 }
 0x324   : > { %14130 = vst [vmem:[#allocation106_spill] sm:$0xff] %v8709_v46  ;;  %14132 = vst [vmem:[#allocation403_spill] sm:$0xff] %v8714_v58  ;;  %v8729_v2 = vmul.f32 %v8119_v63, %v14139_v51  ;;  %v8734_v47 = vmul.f32 %v8119_v63, %v14141_v16  ;;  %v14143_v58 = vld [vmem:[#allocation109_spill] sm:$0xff] }
 0x325   : > { %14135 = vst [vmem:[#allocation107_spill] sm:$0xff] %v8719_v10  ;;  %14137 = vst [vmem:[#allocation404_spill] sm:$0xff] %v8724_v52  ;;  %v14144_v46 = vunpack.c.l.bf16 %v14143_v58  ;;  %v14146_v11 = vunpack.c.h.bf16 %v14143_v58  ;;  %v14148_v52 = vld [vmem:[#allocation110_spill] sm:$0xff] }
 0x326   : > { %14140 = vst [vmem:[#allocation108_spill] sm:$0xff] %v8729_v2  ;;  %14142 = vst [vmem:[#allocation405_spill] sm:$0xff] %v8734_v47  ;;  %v14149_v10 = vunpack.c.l.bf16 %v14148_v52  ;;  %v14151_v3 = vunpack.c.h.bf16 %v14148_v52  ;;  %v14153_v47 = vld [vmem:[#allocation111_spill] sm:$0xff] }
 0x327   : > { %v8739_v57 = vmul.f32 %v8119_v63, %v14144_v46  ;;  %v8744_v23 = vmul.f32 %v8119_v63, %v14146_v11  ;;  %v14154_v2 = vunpack.c.l.bf16 %v14153_v47  ;;  %v14156_v58 = vunpack.c.h.bf16 %v14153_v47 }
 0x328   : > { %v8749_v51 = vmul.f32 %v8119_v63, %v14149_v10  ;;  %v8754_v16 = vmul.f32 %v8119_v63, %v14151_v3 }
 0x329   : > { %14145 = vst [vmem:[#allocation109_spill] sm:$0xff] %v8739_v57  ;;  %14147 = vst [vmem:[#allocation406_spill] sm:$0xff] %v8744_v23  ;;  %v8759_v46 = vmul.f32 %v8119_v63, %v14154_v2  ;;  %v8764_v11 = vmul.f32 %v8119_v63, %v14156_v58  ;;  %v14158_v23 = vld [vmem:[#allocation112_spill] sm:$0xff] }
 0x32a   : > { %14150 = vst [vmem:[#allocation110_spill] sm:$0xff] %v8749_v51  ;;  %14152 = vst [vmem:[#allocation407_spill] sm:$0xff] %v8754_v16  ;;  %v14159_v57 = vunpack.c.l.bf16 %v14158_v23  ;;  %v14161_v52 = vunpack.c.h.bf16 %v14158_v23  ;;  %v14163_v16 = vld [vmem:[#allocation113_spill] sm:$0xff] }
 0x32b   : > { %14155 = vst [vmem:[#allocation111_spill] sm:$0xff] %v8759_v46  ;;  %14157 = vst [vmem:[#allocation408_spill] sm:$0xff] %v8764_v11  ;;  %v14164_v51 = vunpack.c.l.bf16 %v14163_v16  ;;  %v14166_v47 = vunpack.c.h.bf16 %v14163_v16  ;;  %v14168_v11 = vld [vmem:[#allocation114_spill] sm:$0xff] }
 0x32c   : > { %v8769_v10 = vmul.f32 %v8119_v63, %v14159_v57  ;;  %v8774_v3 = vmul.f32 %v8119_v63, %v14161_v52  ;;  %v14169_v46 = vunpack.c.l.bf16 %v14168_v11  ;;  %v14171_v23 = vunpack.c.h.bf16 %v14168_v11 }
 0x32d   : > { %v8779_v2 = vmul.f32 %v8119_v63, %v14164_v51  ;;  %v8784_v58 = vmul.f32 %v8119_v63, %v14166_v47 }
 0x32e   : > { %14160 = vst [vmem:[#allocation112_spill] sm:$0xff] %v8769_v10  ;;  %14162 = vst [vmem:[#allocation409_spill] sm:$0xff] %v8774_v3  ;;  %v8789_v57 = vmul.f32 %v8119_v63, %v14169_v46  ;;  %v8794_v52 = vmul.f32 %v8119_v63, %v14171_v23  ;;  %v14173_v3 = vld [vmem:[#allocation115_spill] sm:$0xff] }
 0x32f   : > { %14165 = vst [vmem:[#allocation113_spill] sm:$0xff] %v8779_v2  ;;  %14167 = vst [vmem:[#allocation410_spill] sm:$0xff] %v8784_v58  ;;  %v14174_v10 = vunpack.c.l.bf16 %v14173_v3  ;;  %v14176_v16 = vunpack.c.h.bf16 %v14173_v3  ;;  %v14178_v58 = vld [vmem:[#allocation116_spill] sm:$0xff] }
 0x330   : > { %14170 = vst [vmem:[#allocation114_spill] sm:$0xff] %v8789_v57  ;;  %14172 = vst [vmem:[#allocation411_spill] sm:$0xff] %v8794_v52  ;;  %v14179_v2 = vunpack.c.l.bf16 %v14178_v58  ;;  %v14181_v11 = vunpack.c.h.bf16 %v14178_v58  ;;  %v14183_v52 = vld [vmem:[#allocation117_spill] sm:$0xff] }
 0x331   : > { %v8799_v51 = vmul.f32 %v8119_v63, %v14174_v10  ;;  %v8804_v47 = vmul.f32 %v8119_v63, %v14176_v16  ;;  %v14184_v57 = vunpack.c.l.bf16 %v14183_v52  ;;  %v14186_v3 = vunpack.c.h.bf16 %v14183_v52 }
 0x332   : > { %v8809_v46 = vmul.f32 %v8119_v63, %v14179_v2  ;;  %v8814_v23 = vmul.f32 %v8119_v63, %v14181_v11 }
 0x333   : > { %14175 = vst [vmem:[#allocation115_spill] sm:$0xff] %v8799_v51  ;;  %14177 = vst [vmem:[#allocation412_spill] sm:$0xff] %v8804_v47  ;;  %v8819_v10 = vmul.f32 %v8119_v63, %v14184_v57  ;;  %v8824_v16 = vmul.f32 %v8119_v63, %v14186_v3  ;;  %v14188_v47 = vld [vmem:[#allocation118_spill] sm:$0xff] }
 0x334   : > { %14180 = vst [vmem:[#allocation116_spill] sm:$0xff] %v8809_v46  ;;  %14182 = vst [vmem:[#allocation413_spill] sm:$0xff] %v8814_v23  ;;  %v14189_v51 = vunpack.c.l.bf16 %v14188_v47  ;;  %v14191_v58 = vunpack.c.h.bf16 %v14188_v47  ;;  %v14193_v23 = vld [vmem:[#allocation119_spill] sm:$0xff] }
 0x335   : > { %14185 = vst [vmem:[#allocation117_spill] sm:$0xff] %v8819_v10  ;;  %14187 = vst [vmem:[#allocation414_spill] sm:$0xff] %v8824_v16  ;;  %v14194_v46 = vunpack.c.l.bf16 %v14193_v23  ;;  %v8841_v10 = vpop.permute.xlu1 %1321  ;;  %v14196_v52 = vunpack.c.h.bf16 %v14193_v23  ;;  %v14198_v16 = vld [vmem:[#allocation120_spill] sm:$0xff] }
 0x336   : > { %v8829_v2 = vmul.f32 %v8119_v63, %v14189_v51  ;;  %v8834_v11 = vmul.f32 %v8119_v63, %v14191_v58  ;;  %v14199_v51 = vunpack.c.l.bf16 %v14198_v16  ;;  %v14201_v47 = vunpack.c.h.bf16 %v14198_v16 }
 0x337   : > { %v8839_v57 = vmul.f32 %v8119_v63, %v14194_v46  ;;  %v8846_v3 = vmul.f32 %v8119_v63, %v14196_v52 }
 0x338   : > { %14190 = vst [vmem:[#allocation118_spill] sm:$0xff] %v8829_v2  ;;  %14192 = vst [vmem:[#allocation415_spill] sm:$0xff] %v8834_v11  ;;  %v8851_v2 = vmul.f32 %v8119_v63, %v14199_v51  ;;  %v8856_v58 = vmul.f32 %v8119_v63, %v14201_v47  ;;  %v14203_v11 = vld [vmem:[#allocation121_spill] sm:$0xff] }
 0x339   : > { %14195 = vst [vmem:[#allocation119_spill] sm:$0xff] %v8839_v57  ;;  %14197 = vst [vmem:[#allocation416_spill] sm:$0xff] %v8846_v3  ;;  %v14204_v46 = vunpack.c.l.bf16 %v14203_v11  ;;  %v14206_v23 = vunpack.c.h.bf16 %v14203_v11  ;;  %v14208_v3 = vld [vmem:[#allocation122_spill] sm:$0xff] }
 0x33a   : > { %14200 = vst [vmem:[#allocation120_spill] sm:$0xff] %v8851_v2  ;;  %14202 = vst [vmem:[#allocation417_spill] sm:$0xff] %v8856_v58  ;;  %v14209_v29 = vunpack.c.l.bf16 %v14208_v3  ;;  %v14211_v16 = vunpack.c.h.bf16 %v14208_v3  ;;  %v14213_v58 = vld [vmem:[#allocation123_spill] sm:$0xff] }
 0x33b   : > { %v8861_v57 = vmul.f32 %v8119_v63, %v14204_v46  ;;  %v8866_v52 = vmul.f32 %v8119_v63, %v14206_v23  ;;  %v14214_v2 = vunpack.c.l.bf16 %v14213_v58  ;;  %v14216_v11 = vunpack.c.h.bf16 %v14213_v58 }
 0x33c   : > { %v8871_v51 = vmul.f32 %v8119_v63, %v14209_v29  ;;  %v8876_v47 = vmul.f32 %v8119_v63, %v14211_v16 }
 0x33d   : > { %14205 = vst [vmem:[#allocation121_spill] sm:$0xff] %v8861_v57  ;;  %14207 = vst [vmem:[#allocation418_spill] sm:$0xff] %v8866_v52  ;;  %v8881_v46 = vmul.f32 %v8119_v63, %v14214_v2  ;;  %v8886_v23 = vmul.f32 %v8119_v63, %v14216_v11  ;;  %v14218_v52 = vld [vmem:[#allocation124_spill] sm:$0xff] }
 0x33e   : > { %14210 = vst [vmem:[#allocation122_spill] sm:$0xff] %v8871_v51  ;;  %14212 = vst [vmem:[#allocation419_spill] sm:$0xff] %v8876_v47  ;;  %v14219_v57 = vunpack.c.l.bf16 %v14218_v52  ;;  %v14221_v3 = vunpack.c.h.bf16 %v14218_v52  ;;  %v14223_v47 = vld [vmem:[#allocation125_spill] sm:$0xff] }
 0x33f   : > { %14215 = vst [vmem:[#allocation123_spill] sm:$0xff] %v8881_v46  ;;  %14217 = vst [vmem:[#allocation420_spill] sm:$0xff] %v8886_v23  ;;  %v14224_v51 = vunpack.c.l.bf16 %v14223_v47  ;;  %v14226_v58 = vunpack.c.h.bf16 %v14223_v47  ;;  %v14228_v23 = vunpack.c.h.bf16 %v13881_v20 }
 0x340   : > { %v8891_v29 = vmul.f32 %v8119_v63, %v14219_v57  ;;  %v8896_v16 = vmul.f32 %v8119_v63, %v14221_v3 }
 0x341   : > { %v8901_v2 = vmul.f32 %v8119_v63, %v14224_v51  ;;  %v8906_v11 = vmul.f32 %v8119_v63, %v14226_v58  ;;  %v8911_v57 = vmul.f32 %v8119_v63, %v14228_v23  ;;  %v14236_v23 = vld [vmem:[#allocation128_spill] sm:$0xff] }
 0x342   : > { %14220 = vst [vmem:[#allocation124_spill] sm:$0xff] %v8891_v29  ;;  %14222 = vst [vmem:[#allocation421_spill] sm:$0xff] %v8896_v16  ;;  %v14230_v29 = vld [vmem:[#allocation126_spill] sm:$0xff] }
 0x343   : > { %14225 = vst [vmem:[#allocation125_spill] sm:$0xff] %v8901_v2  ;;  %14227 = vst [vmem:[#allocation422_spill] sm:$0xff] %v8906_v11  ;;  %v14231_v52 = vunpack.c.l.bf16 %v14230_v29  ;;  %v14232_v16 = vunpack.c.h.bf16 %v14230_v29  ;;  %v14233_v2 = vld [vmem:[#allocation127_spill] sm:$0xff]  ;;  %v14238_v29 = vunpack.c.h.bf16 %v14236_v23  ;;  %v14239_v11 = vld [vmem:[#allocation129_spill] sm:$0xff] }
 0x344   : > { %14229 = vst [vmem:[#allocation423_spill] sm:$0xff] %v8911_v57  ;;  %v14234_v47 = vunpack.c.l.bf16 %v14233_v2  ;;  %v14235_v20 = vunpack.c.h.bf16 %v14233_v2  ;;  %v14237_v57 = vunpack.c.l.bf16 %v14236_v23  ;;  %v14240_v46 = vunpack.c.l.bf16 %v14239_v11 }
 0x345   : > { %v8916_v3 = vmul.f32 %v8841_v10, %v14231_v52  ;;  %v8921_v51 = vmul.f32 %v8841_v10, %v14232_v16  ;;  %v8941_v16 = vmul.f32 %v8841_v10, %v14238_v29  ;;  %v14241_v2 = vunpack.c.h.bf16 %v14239_v11 }
 0x346   : > { %v8926_v58 = vmul.f32 %v8841_v10, %v14234_v47  ;;  %v8931_v63 = vmul.f32 %v8841_v10, %v14235_v20  ;;  %v8936_v52 = vmul.f32 %v8841_v10, %v14237_v57  ;;  %v8946_v47 = vmul.f32 %v8841_v10, %v14240_v46 }
 0x347   : > { %v8951_v20 = vmul.f32 %v8841_v10, %v14241_v2  ;;  %v8956_v57 = vmul.f32 %v8841_v10, %v14243_v45  ;;  %v14245_v23 = vunpack.c.h.bf16 %v14242_v14  ;;  %v8966_v46 = vmul.f32 %v8841_v10, %v14248_v22 }
 0x348   : > { %v14250_v11 = vunpack.c.h.bf16 %v14247_v35  ;;  %v8976_v45 = vmul.f32 %v8841_v10, %v14253_v44  ;;  %v14255_v14 = vunpack.c.h.bf16 %v14252_v42  ;;  %v8986_v22 = vmul.f32 %v8841_v10, %v14258_v41 }
 0x349   : > { %14244 = vst [vmem:[#allocation126_spill] sm:$0xff] %v8956_v57  ;;  %v8961_v29 = vmul.f32 %v8841_v10, %v14245_v23  ;;  %14249 = vst [vmem:[#allocation128_spill] sm:$0xff] %v8966_v46  ;;  %v14260_v35 = vunpack.c.h.bf16 %v14257_v28  ;;  %v8996_v44 = vmul.f32 %v8841_v10, %v14263_v34  ;;  %v14265_v42 = vunpack.c.h.bf16 %v14262_v38 }
 0x34a   : > { %v8971_v2 = vmul.f32 %v8841_v10, %v14250_v11  ;;  %14254 = vst [vmem:[#allocation130_spill] sm:$0xff] %v8976_v45  ;;  %v8981_v23 = vmul.f32 %v8841_v10, %v14255_v14  ;;  %14259 = vst [vmem:[#allocation132_spill] sm:$0xff] %v8986_v22  ;;  %v9006_v41 = vmul.f32 %v8841_v10, %v14268_v1  ;;  %v14270_v28 = vunpack.c.h.bf16 %v14267_v40 }
 0x34b   : > { %14246 = vst [vmem:[#allocation127_spill] sm:$0xff] %v8961_v29  ;;  %v8991_v11 = vmul.f32 %v8841_v10, %v14260_v35  ;;  %14264 = vst [vmem:[#allocation134_spill] sm:$0xff] %v8996_v44  ;;  %v9001_v14 = vmul.f32 %v8841_v10, %v14265_v42  ;;  %v9016_v34 = vmul.f32 %v8841_v10, %v14273_v21  ;;  %v14275_v38 = vunpack.c.h.bf16 %v14272_v43  ;;  %v14606_v29 = vld [vmem:[#allocation204_spill] sm:$0xff] }
 0x34c   : > { %14251 = vst [vmem:[#allocation129_spill] sm:$0xff] %v8971_v2  ;;  %14256 = vst [vmem:[#allocation131_spill] sm:$0xff] %v8981_v23  ;;  %v9011_v35 = vmul.f32 %v8841_v10, %v14270_v28  ;;  %v14596_v23 = vld [vmem:[#allocation202_spill] sm:$0xff]  ;;  %v14601_v2 = vld [vmem:[#allocation203_spill] sm:$0xff]  ;;  %v14607_v57 = vunpack.c.l.bf16 %v14606_v29 }
 0x34d   : > { %14261 = vst [vmem:[#allocation133_spill] sm:$0xff] %v8991_v11  ;;  %14266 = vst [vmem:[#allocation424_spill] sm:$0xff] %v9001_v14  ;;  %v9021_v42 = vmul.f32 %v8841_v10, %v14275_v38  ;;  %v14277_v14 = vld [vmem:[#allocation137_spill] sm:$0xff]  ;;  %v14597_v45 = vunpack.c.l.bf16 %v14596_v23  ;;  %v14602_v46 = vunpack.c.l.bf16 %v14601_v2 }
 0x34e   : > { %14269 = vst [vmem:[#allocation135_spill] sm:$0xff] %v9006_v41  ;;  %14271 = vst [vmem:[#allocation425_spill] sm:$0xff] %v9011_v35  ;;  %v14278_v44 = vunpack.c.l.bf16 %v14277_v14  ;;  %v14280_v40 = vunpack.c.h.bf16 %v14277_v14  ;;  %v14282_v35 = vld [vmem:[#allocation138_spill] sm:$0xff] }
 0x34f   : > { %14274 = vst [vmem:[#allocation136_spill] sm:$0xff] %v9016_v34  ;;  %14276 = vst [vmem:[#allocation426_spill] sm:$0xff] %v9021_v42  ;;  %v14283_v41 = vunpack.c.l.bf16 %v14282_v35  ;;  %v14285_v43 = vunpack.c.h.bf16 %v14282_v35  ;;  %v14287_v42 = vld [vmem:[#allocation139_spill] sm:$0xff] }
 0x350   : > { %v9026_v1 = vmul.f32 %v8841_v10, %v14278_v44  ;;  %v9031_v28 = vmul.f32 %v8841_v10, %v14280_v40  ;;  %v14288_v34 = vunpack.c.l.bf16 %v14287_v42  ;;  %v14290_v14 = vunpack.c.h.bf16 %v14287_v42 }
 0x351   : > { %v9036_v21 = vmul.f32 %v8841_v10, %v14283_v41  ;;  %v9041_v38 = vmul.f32 %v8841_v10, %v14285_v43 }
 0x352   : > { %14279 = vst [vmem:[#allocation137_spill] sm:$0xff] %v9026_v1  ;;  %14281 = vst [vmem:[#allocation427_spill] sm:$0xff] %v9031_v28  ;;  %v9046_v44 = vmul.f32 %v8841_v10, %v14288_v34  ;;  %v9051_v40 = vmul.f32 %v8841_v10, %v14290_v14  ;;  %v14292_v28 = vld [vmem:[#allocation140_spill] sm:$0xff] }
 0x353   : > { %14284 = vst [vmem:[#allocation138_spill] sm:$0xff] %v9036_v21  ;;  %14286 = vst [vmem:[#allocation428_spill] sm:$0xff] %v9041_v38  ;;  %v14293_v1 = vunpack.c.l.bf16 %v14292_v28  ;;  %v14295_v35 = vunpack.c.h.bf16 %v14292_v28  ;;  %v14297_v38 = vld [vmem:[#allocation141_spill] sm:$0xff] }
 0x354   : > { %14289 = vst [vmem:[#allocation139_spill] sm:$0xff] %v9046_v44  ;;  %14291 = vst [vmem:[#allocation429_spill] sm:$0xff] %v9051_v40  ;;  %v14298_v21 = vunpack.c.l.bf16 %v14297_v38  ;;  %v14300_v42 = vunpack.c.h.bf16 %v14297_v38  ;;  %v14302_v40 = vld [vmem:[#allocation142_spill] sm:$0xff] }
 0x355   : > { %v9056_v41 = vmul.f32 %v8841_v10, %v14293_v1  ;;  %v9061_v43 = vmul.f32 %v8841_v10, %v14295_v35  ;;  %v14303_v44 = vunpack.c.l.bf16 %v14302_v40  ;;  %v14305_v28 = vunpack.c.h.bf16 %v14302_v40 }
 0x356   : > { %v9066_v34 = vmul.f32 %v8841_v10, %v14298_v21  ;;  %v9071_v14 = vmul.f32 %v8841_v10, %v14300_v42 }
 0x357   : > { %14294 = vst [vmem:[#allocation140_spill] sm:$0xff] %v9056_v41  ;;  %14296 = vst [vmem:[#allocation430_spill] sm:$0xff] %v9061_v43  ;;  %v9076_v1 = vmul.f32 %v8841_v10, %v14303_v44  ;;  %v9081_v35 = vmul.f32 %v8841_v10, %v14305_v28  ;;  %v14307_v43 = vld [vmem:[#allocation143_spill] sm:$0xff] }
 0x358   : > { %14299 = vst [vmem:[#allocation141_spill] sm:$0xff] %v9066_v34  ;;  %14301 = vst [vmem:[#allocation431_spill] sm:$0xff] %v9071_v14  ;;  %v14308_v41 = vunpack.c.l.bf16 %v14307_v43  ;;  %v14310_v38 = vunpack.c.h.bf16 %v14307_v43  ;;  %v14312_v14 = vld [vmem:[#allocation144_spill] sm:$0xff] }
 0x359   : > { %14304 = vst [vmem:[#allocation142_spill] sm:$0xff] %v9076_v1  ;;  %14306 = vst [vmem:[#allocation432_spill] sm:$0xff] %v9081_v35  ;;  %v14313_v34 = vunpack.c.l.bf16 %v14312_v14  ;;  %v14315_v40 = vunpack.c.h.bf16 %v14312_v14  ;;  %v14317_v35 = vld [vmem:[#allocation145_spill] sm:$0xff] }
 0x35a   : > { %v9086_v21 = vmul.f32 %v8841_v10, %v14308_v41  ;;  %v9091_v42 = vmul.f32 %v8841_v10, %v14310_v38  ;;  %v14318_v1 = vunpack.c.l.bf16 %v14317_v35  ;;  %v14320_v43 = vunpack.c.h.bf16 %v14317_v35 }
 0x35b   : > { %v9096_v44 = vmul.f32 %v8841_v10, %v14313_v34  ;;  %v9101_v28 = vmul.f32 %v8841_v10, %v14315_v40 }
 0x35c   : > { %14309 = vst [vmem:[#allocation143_spill] sm:$0xff] %v9086_v21  ;;  %14311 = vst [vmem:[#allocation433_spill] sm:$0xff] %v9091_v42  ;;  %v9106_v41 = vmul.f32 %v8841_v10, %v14318_v1  ;;  %v9111_v38 = vmul.f32 %v8841_v10, %v14320_v43  ;;  %v14322_v42 = vld [vmem:[#allocation146_spill] sm:$0xff] }
 0x35d   : > { %14314 = vst [vmem:[#allocation144_spill] sm:$0xff] %v9096_v44  ;;  %14316 = vst [vmem:[#allocation434_spill] sm:$0xff] %v9101_v28  ;;  %v14323_v21 = vunpack.c.l.bf16 %v14322_v42  ;;  %v14325_v14 = vunpack.c.h.bf16 %v14322_v42  ;;  %v14327_v28 = vld [vmem:[#allocation147_spill] sm:$0xff] }
 0x35e   : > { %14319 = vst [vmem:[#allocation145_spill] sm:$0xff] %v9106_v41  ;;  %14321 = vst [vmem:[#allocation435_spill] sm:$0xff] %v9111_v38  ;;  %v14328_v44 = vunpack.c.l.bf16 %v14327_v28  ;;  %v14330_v35 = vunpack.c.h.bf16 %v14327_v28  ;;  %v14332_v38 = vld [vmem:[#allocation148_spill] sm:$0xff] }
 0x35f   : > { %v9116_v34 = vmul.f32 %v8841_v10, %v14323_v21  ;;  %v9121_v40 = vmul.f32 %v8841_v10, %v14325_v14  ;;  %v14333_v41 = vunpack.c.l.bf16 %v14332_v38  ;;  %v14335_v42 = vunpack.c.h.bf16 %v14332_v38 }
 0x360   : > { %v9126_v1 = vmul.f32 %v8841_v10, %v14328_v44  ;;  %v9131_v43 = vmul.f32 %v8841_v10, %v14330_v35 }
 0x361   : > { %14324 = vst [vmem:[#allocation146_spill] sm:$0xff] %v9116_v34  ;;  %14326 = vst [vmem:[#allocation436_spill] sm:$0xff] %v9121_v40  ;;  %v9136_v21 = vmul.f32 %v8841_v10, %v14333_v41  ;;  %v9141_v14 = vmul.f32 %v8841_v10, %v14335_v42  ;;  %v14337_v40 = vld [vmem:[#allocation149_spill] sm:$0xff] }
 0x362   : > { %14329 = vst [vmem:[#allocation147_spill] sm:$0xff] %v9126_v1  ;;  %14331 = vst [vmem:[#allocation437_spill] sm:$0xff] %v9131_v43  ;;  %v14338_v34 = vunpack.c.l.bf16 %v14337_v40  ;;  %v14340_v28 = vunpack.c.h.bf16 %v14337_v40  ;;  %v14342_v43 = vld [vmem:[#allocation150_spill] sm:$0xff] }
 0x363   : > { %14334 = vst [vmem:[#allocation148_spill] sm:$0xff] %v9136_v21  ;;  %14336 = vst [vmem:[#allocation438_spill] sm:$0xff] %v9141_v14  ;;  %v14343_v1 = vunpack.c.l.bf16 %v14342_v43  ;;  %v14345_v38 = vunpack.c.h.bf16 %v14342_v43  ;;  %v14347_v14 = vld [vmem:[#allocation151_spill] sm:$0xff] }
 0x364   : > { %v9146_v44 = vmul.f32 %v8841_v10, %v14338_v34  ;;  %v9151_v35 = vmul.f32 %v8841_v10, %v14340_v28  ;;  %v14348_v21 = vunpack.c.l.bf16 %v14347_v14  ;;  %v14350_v40 = vunpack.c.h.bf16 %v14347_v14 }
 0x365   : > { %v9156_v41 = vmul.f32 %v8841_v10, %v14343_v1  ;;  %v9161_v42 = vmul.f32 %v8841_v10, %v14345_v38 }
 0x366   : > { %14339 = vst [vmem:[#allocation149_spill] sm:$0xff] %v9146_v44  ;;  %14341 = vst [vmem:[#allocation439_spill] sm:$0xff] %v9151_v35  ;;  %v9166_v34 = vmul.f32 %v8841_v10, %v14348_v21  ;;  %v9171_v28 = vmul.f32 %v8841_v10, %v14350_v40  ;;  %v14352_v35 = vld [vmem:[#allocation152_spill] sm:$0xff] }
 0x367   : > { %14344 = vst [vmem:[#allocation150_spill] sm:$0xff] %v9156_v41  ;;  %14346 = vst [vmem:[#allocation440_spill] sm:$0xff] %v9161_v42  ;;  %v14353_v44 = vunpack.c.l.bf16 %v14352_v35  ;;  %v14355_v43 = vunpack.c.h.bf16 %v14352_v35  ;;  %v14357_v42 = vld [vmem:[#allocation153_spill] sm:$0xff] }
 0x368   : > { %14349 = vst [vmem:[#allocation151_spill] sm:$0xff] %v9166_v34  ;;  %14351 = vst [vmem:[#allocation441_spill] sm:$0xff] %v9171_v28  ;;  %v14358_v41 = vunpack.c.l.bf16 %v14357_v42  ;;  %v14360_v14 = vunpack.c.h.bf16 %v14357_v42  ;;  %v14362_v28 = vld [vmem:[#allocation154_spill] sm:$0xff] }
 0x369   : > { %v9176_v1 = vmul.f32 %v8841_v10, %v14353_v44  ;;  %v9181_v38 = vmul.f32 %v8841_v10, %v14355_v43  ;;  %v14363_v34 = vunpack.c.l.bf16 %v14362_v28  ;;  %v14365_v35 = vunpack.c.h.bf16 %v14362_v28 }
 0x36a   : > { %v9186_v21 = vmul.f32 %v8841_v10, %v14358_v41  ;;  %v9191_v40 = vmul.f32 %v8841_v10, %v14360_v14 }
 0x36b   : > { %14354 = vst [vmem:[#allocation152_spill] sm:$0xff] %v9176_v1  ;;  %14356 = vst [vmem:[#allocation442_spill] sm:$0xff] %v9181_v38  ;;  %v9196_v44 = vmul.f32 %v8841_v10, %v14363_v34  ;;  %v9201_v43 = vmul.f32 %v8841_v10, %v14365_v35  ;;  %v14367_v38 = vld [vmem:[#allocation155_spill] sm:$0xff] }
 0x36c   : > { %14359 = vst [vmem:[#allocation153_spill] sm:$0xff] %v9186_v21  ;;  %14361 = vst [vmem:[#allocation443_spill] sm:$0xff] %v9191_v40  ;;  %v14368_v1 = vunpack.c.l.bf16 %v14367_v38  ;;  %v14370_v42 = vunpack.c.h.bf16 %v14367_v38  ;;  %v14372_v40 = vld [vmem:[#allocation156_spill] sm:$0xff] }
 0x36d   : > { %14364 = vst [vmem:[#allocation154_spill] sm:$0xff] %v9196_v44  ;;  %14366 = vst [vmem:[#allocation444_spill] sm:$0xff] %v9201_v43  ;;  %v14373_v21 = vunpack.c.l.bf16 %v14372_v40  ;;  %v14375_v28 = vunpack.c.h.bf16 %v14372_v40  ;;  %v14377_v43 = vld [vmem:[#allocation157_spill] sm:$0xff] }
 0x36e   : > { %v9206_v41 = vmul.f32 %v8841_v10, %v14368_v1  ;;  %v9211_v14 = vmul.f32 %v8841_v10, %v14370_v42  ;;  %v14378_v44 = vunpack.c.l.bf16 %v14377_v43  ;;  %v14380_v38 = vunpack.c.h.bf16 %v14377_v43 }
 0x36f   : > { %v9216_v34 = vmul.f32 %v8841_v10, %v14373_v21  ;;  %v9221_v35 = vmul.f32 %v8841_v10, %v14375_v28 }
 0x370   : > { %14369 = vst [vmem:[#allocation155_spill] sm:$0xff] %v9206_v41  ;;  %14371 = vst [vmem:[#allocation445_spill] sm:$0xff] %v9211_v14  ;;  %v9226_v1 = vmul.f32 %v8841_v10, %v14378_v44  ;;  %v9231_v42 = vmul.f32 %v8841_v10, %v14380_v38  ;;  %v14382_v14 = vld [vmem:[#allocation158_spill] sm:$0xff] }
 0x371   : > { %14374 = vst [vmem:[#allocation156_spill] sm:$0xff] %v9216_v34  ;;  %14376 = vst [vmem:[#allocation446_spill] sm:$0xff] %v9221_v35  ;;  %v14383_v41 = vunpack.c.l.bf16 %v14382_v14  ;;  %v14385_v40 = vunpack.c.h.bf16 %v14382_v14  ;;  %v14387_v35 = vld [vmem:[#allocation159_spill] sm:$0xff] }
 0x372   : > { %14379 = vst [vmem:[#allocation157_spill] sm:$0xff] %v9226_v1  ;;  %14381 = vst [vmem:[#allocation447_spill] sm:$0xff] %v9231_v42  ;;  %v14388_v34 = vunpack.c.l.bf16 %v14387_v35  ;;  %v14390_v43 = vunpack.c.h.bf16 %v14387_v35  ;;  %v14392_v42 = vld [vmem:[#allocation160_spill] sm:$0xff] }
 0x373   : > { %v9236_v21 = vmul.f32 %v8841_v10, %v14383_v41  ;;  %v9241_v28 = vmul.f32 %v8841_v10, %v14385_v40  ;;  %v14393_v1 = vunpack.c.l.bf16 %v14392_v42  ;;  %v14395_v14 = vunpack.c.h.bf16 %v14392_v42 }
 0x374   : > { %v9246_v44 = vmul.f32 %v8841_v10, %v14388_v34  ;;  %v9251_v38 = vmul.f32 %v8841_v10, %v14390_v43 }
 0x375   : > { %14384 = vst [vmem:[#allocation158_spill] sm:$0xff] %v9236_v21  ;;  %14386 = vst [vmem:[#allocation448_spill] sm:$0xff] %v9241_v28  ;;  %v9256_v41 = vmul.f32 %v8841_v10, %v14393_v1  ;;  %v9261_v40 = vmul.f32 %v8841_v10, %v14395_v14  ;;  %v14397_v28 = vld [vmem:[#allocation161_spill] sm:$0xff] }
 0x376   : > { %14389 = vst [vmem:[#allocation159_spill] sm:$0xff] %v9246_v44  ;;  %14391 = vst [vmem:[#allocation449_spill] sm:$0xff] %v9251_v38  ;;  %v14398_v21 = vunpack.c.l.bf16 %v14397_v28  ;;  %v14400_v35 = vunpack.c.h.bf16 %v14397_v28  ;;  %v14402_v38 = vld [vmem:[#allocation162_spill] sm:$0xff] }
 0x377   : > { %14394 = vst [vmem:[#allocation160_spill] sm:$0xff] %v9256_v41  ;;  %14396 = vst [vmem:[#allocation450_spill] sm:$0xff] %v9261_v40  ;;  %v14403_v44 = vunpack.c.l.bf16 %v14402_v38  ;;  %v14405_v42 = vunpack.c.h.bf16 %v14402_v38  ;;  %v14407_v40 = vld [vmem:[#allocation163_spill] sm:$0xff] }
 0x378   : > { %v9266_v34 = vmul.f32 %v8841_v10, %v14398_v21  ;;  %v9271_v43 = vmul.f32 %v8841_v10, %v14400_v35  ;;  %v14408_v41 = vunpack.c.l.bf16 %v14407_v40  ;;  %v14410_v28 = vunpack.c.h.bf16 %v14407_v40 }
 0x379   : > { %v9276_v1 = vmul.f32 %v8841_v10, %v14403_v44  ;;  %v9281_v14 = vmul.f32 %v8841_v10, %v14405_v42 }
 0x37a   : > { %14399 = vst [vmem:[#allocation161_spill] sm:$0xff] %v9266_v34  ;;  %14401 = vst [vmem:[#allocation451_spill] sm:$0xff] %v9271_v43  ;;  %v9286_v21 = vmul.f32 %v8841_v10, %v14408_v41  ;;  %v9291_v35 = vmul.f32 %v8841_v10, %v14410_v28  ;;  %v14412_v43 = vld [vmem:[#allocation164_spill] sm:$0xff] }
 0x37b   : > { %14404 = vst [vmem:[#allocation162_spill] sm:$0xff] %v9276_v1  ;;  %14406 = vst [vmem:[#allocation452_spill] sm:$0xff] %v9281_v14  ;;  %v14413_v34 = vunpack.c.l.bf16 %v14412_v43  ;;  %v14415_v38 = vunpack.c.h.bf16 %v14412_v43  ;;  %v14417_v14 = vld [vmem:[#allocation165_spill] sm:$0xff] }
 0x37c   : > { %14409 = vst [vmem:[#allocation163_spill] sm:$0xff] %v9286_v21  ;;  %14411 = vst [vmem:[#allocation453_spill] sm:$0xff] %v9291_v35  ;;  %v14418_v1 = vunpack.c.l.bf16 %v14417_v14  ;;  %v14420_v40 = vunpack.c.h.bf16 %v14417_v14  ;;  %v14422_v35 = vld [vmem:[#allocation166_spill] sm:$0xff] }
 0x37d   : > { %v9296_v44 = vmul.f32 %v8841_v10, %v14413_v34  ;;  %v9301_v42 = vmul.f32 %v8841_v10, %v14415_v38  ;;  %v14423_v21 = vunpack.c.l.bf16 %v14422_v35  ;;  %v14425_v43 = vunpack.c.h.bf16 %v14422_v35 }
 0x37e   : > { %v9306_v41 = vmul.f32 %v8841_v10, %v14418_v1  ;;  %v9311_v28 = vmul.f32 %v8841_v10, %v14420_v40 }
 0x37f   : > { %14414 = vst [vmem:[#allocation164_spill] sm:$0xff] %v9296_v44  ;;  %14416 = vst [vmem:[#allocation454_spill] sm:$0xff] %v9301_v42  ;;  %v9316_v34 = vmul.f32 %v8841_v10, %v14423_v21  ;;  %v9321_v38 = vmul.f32 %v8841_v10, %v14425_v43  ;;  %v14427_v42 = vld [vmem:[#allocation167_spill] sm:$0xff] }
 0x380   : > { %14419 = vst [vmem:[#allocation165_spill] sm:$0xff] %v9306_v41  ;;  %14421 = vst [vmem:[#allocation455_spill] sm:$0xff] %v9311_v28  ;;  %v14428_v44 = vunpack.c.l.bf16 %v14427_v42  ;;  %v14430_v14 = vunpack.c.h.bf16 %v14427_v42  ;;  %v14432_v28 = vld [vmem:[#allocation168_spill] sm:$0xff] }
 0x381   : > { %14424 = vst [vmem:[#allocation166_spill] sm:$0xff] %v9316_v34  ;;  %14426 = vst [vmem:[#allocation456_spill] sm:$0xff] %v9321_v38  ;;  %v14433_v41 = vunpack.c.l.bf16 %v14432_v28  ;;  %v14435_v35 = vunpack.c.h.bf16 %v14432_v28  ;;  %v14437_v38 = vld [vmem:[#allocation169_spill] sm:$0xff] }
 0x382   : > { %v9326_v1 = vmul.f32 %v8841_v10, %v14428_v44  ;;  %v9331_v40 = vmul.f32 %v8841_v10, %v14430_v14  ;;  %v14438_v34 = vunpack.c.l.bf16 %v14437_v38  ;;  %v14440_v42 = vunpack.c.h.bf16 %v14437_v38 }
 0x383   : > { %v9336_v21 = vmul.f32 %v8841_v10, %v14433_v41  ;;  %v9341_v43 = vmul.f32 %v8841_v10, %v14435_v35 }
 0x384   : > { %14429 = vst [vmem:[#allocation167_spill] sm:$0xff] %v9326_v1  ;;  %14431 = vst [vmem:[#allocation457_spill] sm:$0xff] %v9331_v40  ;;  %v9346_v44 = vmul.f32 %v8841_v10, %v14438_v34  ;;  %v9351_v14 = vmul.f32 %v8841_v10, %v14440_v42  ;;  %v14442_v40 = vld [vmem:[#allocation170_spill] sm:$0xff] }
 0x385   : > { %14434 = vst [vmem:[#allocation168_spill] sm:$0xff] %v9336_v21  ;;  %14436 = vst [vmem:[#allocation458_spill] sm:$0xff] %v9341_v43  ;;  %v14443_v1 = vunpack.c.l.bf16 %v14442_v40  ;;  %v14445_v28 = vunpack.c.h.bf16 %v14442_v40  ;;  %v14447_v43 = vld [vmem:[#allocation171_spill] sm:$0xff] }
 0x386   : > { %14439 = vst [vmem:[#allocation169_spill] sm:$0xff] %v9346_v44  ;;  %14441 = vst [vmem:[#allocation459_spill] sm:$0xff] %v9351_v14  ;;  %v14448_v21 = vunpack.c.l.bf16 %v14447_v43  ;;  %v14450_v38 = vunpack.c.h.bf16 %v14447_v43  ;;  %v14452_v14 = vld [vmem:[#allocation172_spill] sm:$0xff] }
 0x387   : > { %v9356_v41 = vmul.f32 %v8841_v10, %v14443_v1  ;;  %v9361_v35 = vmul.f32 %v8841_v10, %v14445_v28  ;;  %v14453_v44 = vunpack.c.l.bf16 %v14452_v14  ;;  %v14455_v40 = vunpack.c.h.bf16 %v14452_v14 }
 0x388   : > { %v9366_v34 = vmul.f32 %v8841_v10, %v14448_v21  ;;  %v9371_v42 = vmul.f32 %v8841_v10, %v14450_v38 }
 0x389   : > { %14444 = vst [vmem:[#allocation170_spill] sm:$0xff] %v9356_v41  ;;  %14446 = vst [vmem:[#allocation460_spill] sm:$0xff] %v9361_v35  ;;  %v9376_v1 = vmul.f32 %v8841_v10, %v14453_v44  ;;  %v9381_v28 = vmul.f32 %v8841_v10, %v14455_v40  ;;  %v14457_v35 = vld [vmem:[#allocation173_spill] sm:$0xff] }
 0x38a   : > { %14449 = vst [vmem:[#allocation171_spill] sm:$0xff] %v9366_v34  ;;  %14451 = vst [vmem:[#allocation461_spill] sm:$0xff] %v9371_v42  ;;  %v14458_v41 = vunpack.c.l.bf16 %v14457_v35  ;;  %v14460_v43 = vunpack.c.h.bf16 %v14457_v35  ;;  %v14462_v42 = vld [vmem:[#allocation174_spill] sm:$0xff] }
 0x38b   : > { %14454 = vst [vmem:[#allocation172_spill] sm:$0xff] %v9376_v1  ;;  %14456 = vst [vmem:[#allocation462_spill] sm:$0xff] %v9381_v28  ;;  %v14463_v34 = vunpack.c.l.bf16 %v14462_v42  ;;  %v14465_v14 = vunpack.c.h.bf16 %v14462_v42  ;;  %v14467_v28 = vld [vmem:[#allocation175_spill] sm:$0xff] }
 0x38c   : > { %v9386_v21 = vmul.f32 %v8841_v10, %v14458_v41  ;;  %v9391_v38 = vmul.f32 %v8841_v10, %v14460_v43  ;;  %v14468_v1 = vunpack.c.l.bf16 %v14467_v28  ;;  %v14470_v35 = vunpack.c.h.bf16 %v14467_v28 }
 0x38d   : > { %v9396_v44 = vmul.f32 %v8841_v10, %v14463_v34  ;;  %v9401_v40 = vmul.f32 %v8841_v10, %v14465_v14 }
 0x38e   : > { %14459 = vst [vmem:[#allocation173_spill] sm:$0xff] %v9386_v21  ;;  %14461 = vst [vmem:[#allocation463_spill] sm:$0xff] %v9391_v38  ;;  %v9406_v41 = vmul.f32 %v8841_v10, %v14468_v1  ;;  %v9411_v43 = vmul.f32 %v8841_v10, %v14470_v35  ;;  %v14472_v38 = vld [vmem:[#allocation176_spill] sm:$0xff] }
 0x38f   : > { %14464 = vst [vmem:[#allocation174_spill] sm:$0xff] %v9396_v44  ;;  %14466 = vst [vmem:[#allocation464_spill] sm:$0xff] %v9401_v40  ;;  %v14473_v21 = vunpack.c.l.bf16 %v14472_v38  ;;  %v14475_v42 = vunpack.c.h.bf16 %v14472_v38  ;;  %v14477_v40 = vld [vmem:[#allocation177_spill] sm:$0xff] }
 0x390   : > { %14469 = vst [vmem:[#allocation175_spill] sm:$0xff] %v9406_v41  ;;  %14471 = vst [vmem:[#allocation465_spill] sm:$0xff] %v9411_v43  ;;  %v14478_v44 = vunpack.c.l.bf16 %v14477_v40  ;;  %v14480_v28 = vunpack.c.h.bf16 %v14477_v40  ;;  %v14482_v43 = vld [vmem:[#allocation178_spill] sm:$0xff] }
 0x391   : > { %v9416_v34 = vmul.f32 %v8841_v10, %v14473_v21  ;;  %v9421_v14 = vmul.f32 %v8841_v10, %v14475_v42  ;;  %v14483_v41 = vunpack.c.l.bf16 %v14482_v43  ;;  %v14485_v38 = vunpack.c.h.bf16 %v14482_v43 }
 0x392   : > { %v9426_v1 = vmul.f32 %v8841_v10, %v14478_v44  ;;  %v9431_v35 = vmul.f32 %v8841_v10, %v14480_v28 }
 0x393   : > { %14474 = vst [vmem:[#allocation176_spill] sm:$0xff] %v9416_v34  ;;  %14476 = vst [vmem:[#allocation466_spill] sm:$0xff] %v9421_v14  ;;  %v9436_v21 = vmul.f32 %v8841_v10, %v14483_v41  ;;  %v9441_v42 = vmul.f32 %v8841_v10, %v14485_v38  ;;  %v14487_v14 = vld [vmem:[#allocation179_spill] sm:$0xff] }
 0x394   : > { %14479 = vst [vmem:[#allocation177_spill] sm:$0xff] %v9426_v1  ;;  %14481 = vst [vmem:[#allocation467_spill] sm:$0xff] %v9431_v35  ;;  %v14488_v34 = vunpack.c.l.bf16 %v14487_v14  ;;  %v14490_v40 = vunpack.c.h.bf16 %v14487_v14  ;;  %v14492_v35 = vld [vmem:[#allocation180_spill] sm:$0xff] }
 0x395   : > { %14484 = vst [vmem:[#allocation178_spill] sm:$0xff] %v9436_v21  ;;  %14486 = vst [vmem:[#allocation468_spill] sm:$0xff] %v9441_v42  ;;  %v14493_v1 = vunpack.c.l.bf16 %v14492_v35  ;;  %v14495_v43 = vunpack.c.h.bf16 %v14492_v35  ;;  %v14497_v42 = vld [vmem:[#allocation181_spill] sm:$0xff] }
 0x396   : > { %v9446_v44 = vmul.f32 %v8841_v10, %v14488_v34  ;;  %v9451_v28 = vmul.f32 %v8841_v10, %v14490_v40  ;;  %v14498_v21 = vunpack.c.l.bf16 %v14497_v42  ;;  %v14500_v14 = vunpack.c.h.bf16 %v14497_v42 }
 0x397   : > { %v9456_v41 = vmul.f32 %v8841_v10, %v14493_v1  ;;  %v9461_v38 = vmul.f32 %v8841_v10, %v14495_v43 }
 0x398   : > { %14489 = vst [vmem:[#allocation179_spill] sm:$0xff] %v9446_v44  ;;  %14491 = vst [vmem:[#allocation469_spill] sm:$0xff] %v9451_v28  ;;  %v9466_v34 = vmul.f32 %v8841_v10, %v14498_v21  ;;  %v9471_v40 = vmul.f32 %v8841_v10, %v14500_v14  ;;  %v14502_v28 = vld [vmem:[#allocation182_spill] sm:$0xff] }
 0x399   : > { %14494 = vst [vmem:[#allocation180_spill] sm:$0xff] %v9456_v41  ;;  %14496 = vst [vmem:[#allocation470_spill] sm:$0xff] %v9461_v38  ;;  %v14503_v44 = vunpack.c.l.bf16 %v14502_v28  ;;  %v14505_v35 = vunpack.c.h.bf16 %v14502_v28  ;;  %v14507_v38 = vld [vmem:[#allocation183_spill] sm:$0xff] }
 0x39a   : > { %14499 = vst [vmem:[#allocation181_spill] sm:$0xff] %v9466_v34  ;;  %14501 = vst [vmem:[#allocation471_spill] sm:$0xff] %v9471_v40  ;;  %v14508_v41 = vunpack.c.l.bf16 %v14507_v38  ;;  %v14510_v42 = vunpack.c.h.bf16 %v14507_v38  ;;  %v14512_v40 = vld [vmem:[#allocation184_spill] sm:$0xff] }
 0x39b   : > { %v9476_v1 = vmul.f32 %v8841_v10, %v14503_v44  ;;  %v9481_v43 = vmul.f32 %v8841_v10, %v14505_v35  ;;  %v14513_v34 = vunpack.c.l.bf16 %v14512_v40  ;;  %v14515_v28 = vunpack.c.h.bf16 %v14512_v40 }
 0x39c   : > { %v9486_v21 = vmul.f32 %v8841_v10, %v14508_v41  ;;  %v9491_v14 = vmul.f32 %v8841_v10, %v14510_v42 }
 0x39d   : > { %14504 = vst [vmem:[#allocation182_spill] sm:$0xff] %v9476_v1  ;;  %14506 = vst [vmem:[#allocation472_spill] sm:$0xff] %v9481_v43  ;;  %v9496_v44 = vmul.f32 %v8841_v10, %v14513_v34  ;;  %v9501_v35 = vmul.f32 %v8841_v10, %v14515_v28  ;;  %v14517_v43 = vld [vmem:[#allocation185_spill] sm:$0xff] }
 0x39e   : > { %14509 = vst [vmem:[#allocation183_spill] sm:$0xff] %v9486_v21  ;;  %14511 = vst [vmem:[#allocation473_spill] sm:$0xff] %v9491_v14  ;;  %v14518_v1 = vunpack.c.l.bf16 %v14517_v43  ;;  %v14520_v38 = vunpack.c.h.bf16 %v14517_v43  ;;  %v14522_v14 = vld [vmem:[#allocation186_spill] sm:$0xff] }
 0x39f   : > { %14514 = vst [vmem:[#allocation184_spill] sm:$0xff] %v9496_v44  ;;  %14516 = vst [vmem:[#allocation474_spill] sm:$0xff] %v9501_v35  ;;  %v14523_v21 = vunpack.c.l.bf16 %v14522_v14  ;;  %v14525_v40 = vunpack.c.h.bf16 %v14522_v14  ;;  %v14527_v35 = vld [vmem:[#allocation187_spill] sm:$0xff] }
 0x3a0   : > { %v9506_v41 = vmul.f32 %v8841_v10, %v14518_v1  ;;  %v9511_v42 = vmul.f32 %v8841_v10, %v14520_v38  ;;  %v14528_v44 = vunpack.c.l.bf16 %v14527_v35  ;;  %v14530_v43 = vunpack.c.h.bf16 %v14527_v35 }
 0x3a1   : > { %v9516_v34 = vmul.f32 %v8841_v10, %v14523_v21  ;;  %v9521_v28 = vmul.f32 %v8841_v10, %v14525_v40 }
 0x3a2   : > { %14519 = vst [vmem:[#allocation185_spill] sm:$0xff] %v9506_v41  ;;  %14521 = vst [vmem:[#allocation475_spill] sm:$0xff] %v9511_v42  ;;  %v9526_v1 = vmul.f32 %v8841_v10, %v14528_v44  ;;  %v9531_v38 = vmul.f32 %v8841_v10, %v14530_v43  ;;  %v14532_v42 = vld [vmem:[#allocation188_spill] sm:$0xff] }
 0x3a3   : > { %14524 = vst [vmem:[#allocation186_spill] sm:$0xff] %v9516_v34  ;;  %14526 = vst [vmem:[#allocation476_spill] sm:$0xff] %v9521_v28  ;;  %v14533_v41 = vunpack.c.l.bf16 %v14532_v42  ;;  %v14535_v14 = vunpack.c.h.bf16 %v14532_v42  ;;  %v14537_v28 = vld [vmem:[#allocation189_spill] sm:$0xff] }
 0x3a4   : > { %14529 = vst [vmem:[#allocation187_spill] sm:$0xff] %v9526_v1  ;;  %14531 = vst [vmem:[#allocation477_spill] sm:$0xff] %v9531_v38  ;;  %v14538_v34 = vunpack.c.l.bf16 %v14537_v28  ;;  %v14540_v35 = vunpack.c.h.bf16 %v14537_v28  ;;  %v14542_v38 = vld [vmem:[#allocation190_spill] sm:$0xff] }
 0x3a5   : > { %v9536_v21 = vmul.f32 %v8841_v10, %v14533_v41  ;;  %v9541_v40 = vmul.f32 %v8841_v10, %v14535_v14  ;;  %v14543_v1 = vunpack.c.l.bf16 %v14542_v38  ;;  %v14545_v42 = vunpack.c.h.bf16 %v14542_v38 }
 0x3a6   : > { %v9546_v44 = vmul.f32 %v8841_v10, %v14538_v34  ;;  %v9551_v43 = vmul.f32 %v8841_v10, %v14540_v35 }
 0x3a7   : > { %14534 = vst [vmem:[#allocation188_spill] sm:$0xff] %v9536_v21  ;;  %14536 = vst [vmem:[#allocation478_spill] sm:$0xff] %v9541_v40  ;;  %v9556_v41 = vmul.f32 %v8841_v10, %v14543_v1  ;;  %v9561_v14 = vmul.f32 %v8841_v10, %v14545_v42  ;;  %v9563_v40 = vpop.permute.xlu1 %1326  ;;  %v14547_v21 = vld [vmem:[#allocation191_spill] sm:$0xff] }
 0x3a8   : > { %14539 = vst [vmem:[#allocation189_spill] sm:$0xff] %v9546_v44  ;;  %14541 = vst [vmem:[#allocation479_spill] sm:$0xff] %v9551_v43  ;;  %v14548_v34 = vunpack.c.l.bf16 %v14547_v21  ;;  %v14550_v28 = vunpack.c.h.bf16 %v14547_v21  ;;  %v14552_v43 = vld [vmem:[#allocation192_spill] sm:$0xff] }
 0x3a9   : > { %14544 = vst [vmem:[#allocation190_spill] sm:$0xff] %v9556_v41  ;;  %14546 = vst [vmem:[#allocation480_spill] sm:$0xff] %v9561_v14  ;;  %v14553_v1 = vunpack.c.l.bf16 %v14552_v43  ;;  %v14555_v38 = vunpack.c.h.bf16 %v14552_v43  ;;  %v14557_v14 = vld [vmem:[#allocation193_spill] sm:$0xff] }
 0x3aa   : > { %v9568_v44 = vmul.f32 %v8841_v10, %v14548_v34  ;;  %v9573_v35 = vmul.f32 %v8841_v10, %v14550_v28  ;;  %v14558_v11 = vunpack.c.l.bf16 %v14557_v14  ;;  %v14560_v21 = vunpack.c.h.bf16 %v14557_v14 }
 0x3ab   : > { %v9578_v41 = vmul.f32 %v8841_v10, %v14553_v1  ;;  %v9583_v42 = vmul.f32 %v8841_v10, %v14555_v38 }
 0x3ac   : > { %14549 = vst [vmem:[#allocation191_spill] sm:$0xff] %v9568_v44  ;;  %14551 = vst [vmem:[#allocation481_spill] sm:$0xff] %v9573_v35  ;;  %v9588_v34 = vmul.f32 %v8841_v10, %v14558_v11  ;;  %v9593_v28 = vmul.f32 %v8841_v10, %v14560_v21  ;;  %v14562_v35 = vld [vmem:[#allocation194_spill] sm:$0xff] }
 0x3ad   : > { %14554 = vst [vmem:[#allocation192_spill] sm:$0xff] %v9578_v41  ;;  %14556 = vst [vmem:[#allocation482_spill] sm:$0xff] %v9583_v42  ;;  %v14563_v44 = vunpack.c.l.bf16 %v14562_v35  ;;  %v14565_v43 = vunpack.c.h.bf16 %v14562_v35  ;;  %v14567_v42 = vld [vmem:[#allocation195_spill] sm:$0xff] }
 0x3ae   : > { %14559 = vst [vmem:[#allocation193_spill] sm:$0xff] %v9588_v34  ;;  %14561 = vst [vmem:[#allocation483_spill] sm:$0xff] %v9593_v28  ;;  %v14568_v41 = vunpack.c.l.bf16 %v14567_v42  ;;  %v14570_v14 = vunpack.c.h.bf16 %v14567_v42  ;;  %v14572_v28 = vld [vmem:[#allocation196_spill] sm:$0xff] }
 0x3af   : > { %v9598_v1 = vmul.f32 %v8841_v10, %v14563_v44  ;;  %v9603_v38 = vmul.f32 %v8841_v10, %v14565_v43  ;;  %v14573_v34 = vunpack.c.l.bf16 %v14572_v28  ;;  %v14575_v35 = vunpack.c.h.bf16 %v14572_v28 }
 0x3b0   : > { %v9608_v11 = vmul.f32 %v8841_v10, %v14568_v41  ;;  %v9613_v21 = vmul.f32 %v8841_v10, %v14570_v14 }
 0x3b1   : > { %14564 = vst [vmem:[#allocation194_spill] sm:$0xff] %v9598_v1  ;;  %14566 = vst [vmem:[#allocation484_spill] sm:$0xff] %v9603_v38  ;;  %v9618_v44 = vmul.f32 %v8841_v10, %v14573_v34  ;;  %v9623_v43 = vmul.f32 %v8841_v10, %v14575_v35  ;;  %v14577_v38 = vld [vmem:[#allocation197_spill] sm:$0xff] }
 0x3b2   : > { %14569 = vst [vmem:[#allocation195_spill] sm:$0xff] %v9608_v11  ;;  %14571 = vst [vmem:[#allocation485_spill] sm:$0xff] %v9613_v21  ;;  %v14578_v1 = vunpack.c.l.bf16 %v14577_v38  ;;  %v14580_v42 = vunpack.c.h.bf16 %v14577_v38  ;;  %v14582_v21 = vunpack.c.l.bf16 %v7079_v53  ;;  %v14593_v11 = vld [vmem:[#allocation201_spill] sm:$0xff] }
 0x3b3   : > { %14574 = vst [vmem:[#allocation196_spill] sm:$0xff] %v9618_v44  ;;  %14576 = vst [vmem:[#allocation486_spill] sm:$0xff] %v9623_v43  ;;  %v14584_v44 = vld [vmem:[#allocation198_spill] sm:$0xff]  ;;  %v14594_v22 = vunpack.c.l.bf16 %v14593_v11 }
 0x3b4   : > { %v9628_v41 = vmul.f32 %v8841_v10, %v14578_v1  ;;  %v9633_v14 = vmul.f32 %v8841_v10, %v14580_v42  ;;  %v9638_v34 = vmul.f32 %v8841_v10, %v14582_v21  ;;  %v14585_v28 = vunpack.c.l.bf16 %v14584_v44  ;;  %v14590_v21 = vld [vmem:[#allocation200_spill] sm:$0xff] }
 0x3b5   : > { %v14586_v43 = vunpack.c.h.bf16 %v14584_v44  ;;  %v14592_v44 = vunpack.c.h.bf16 %v14590_v21 }
 0x3b6   : > { %14579 = vst [vmem:[#allocation197_spill] sm:$0xff] %v9628_v41  ;;  %14581 = vst [vmem:[#allocation487_spill] sm:$0xff] %v9633_v14  ;;  %v9643_v35 = vmul.f32 %v9563_v40, %v14585_v28  ;;  %v14587_v41 = vld [vmem:[#allocation199_spill] sm:$0xff] }
 0x3b7   : > { %14583 = vst [vmem:[#allocation488_spill] sm:$0xff] %v9638_v34  ;;  %v9648_v1 = vmul.f32 %v9563_v40, %v14586_v43  ;;  %v14588_v38 = vunpack.c.l.bf16 %v14587_v41  ;;  %v14589_v14 = vunpack.c.h.bf16 %v14587_v41  ;;  %v14591_v34 = vunpack.c.l.bf16 %v14590_v21 }
 0x3b8   : > { %v9668_v43 = vmul.f32 %v9563_v40, %v14592_v44  ;;  %v14595_v41 = vunpack.c.h.bf16 %v14593_v11  ;;  %v14599_v21 = vunpack.c.h.bf16 %v14596_v23  ;;  %v14604_v11 = vunpack.c.h.bf16 %v14601_v2 }
 0x3b9   : > { %v9653_v42 = vmul.f32 %v9563_v40, %v14588_v38  ;;  %v9658_v10 = vmul.f32 %v9563_v40, %v14589_v14  ;;  %v9663_v28 = vmul.f32 %v9563_v40, %v14591_v34  ;;  %v9673_v38 = vmul.f32 %v9563_v40, %v14594_v22 }
 0x3ba   : > { %v9678_v14 = vmul.f32 %v9563_v40, %v14595_v41  ;;  %v9683_v34 = vmul.f32 %v9563_v40, %v14597_v45  ;;  %v9688_v44 = vmul.f32 %v9563_v40, %v14599_v21  ;;  %v9693_v22 = vmul.f32 %v9563_v40, %v14602_v46 }
 0x3bb   : > { %v9698_v41 = vmul.f32 %v9563_v40, %v14604_v11  ;;  %v9703_v45 = vmul.f32 %v9563_v40, %v14607_v57  ;;  %v14609_v23 = vunpack.c.h.bf16 %v14606_v29 }
 0x3bc   : > { %14598 = vst [vmem:[#allocation198_spill] sm:$0xff] %v9683_v34  ;;  %14600 = vst [vmem:[#allocation199_spill] sm:$0xff] %v9688_v44  ;;  %v14611_v44 = vld [vmem:[#allocation205_spill] sm:$0xff] }
 0x3bd   : > { %14603 = vst [vmem:[#allocation200_spill] sm:$0xff] %v9693_v22  ;;  %14605 = vst [vmem:[#allocation201_spill] sm:$0xff] %v9698_v41  ;;  %v9708_v21 = vmul.f32 %v9563_v40, %v14609_v23  ;;  %v14612_v34 = vunpack.c.l.bf16 %v14611_v44  ;;  %v14614_v2 = vunpack.c.h.bf16 %v14611_v44  ;;  %v14616_v41 = vld [vmem:[#allocation206_spill] sm:$0xff] }
 0x3be   : > { %14608 = vst [vmem:[#allocation202_spill] sm:$0xff] %v9703_v45  ;;  %v14617_v22 = vunpack.c.l.bf16 %v14616_v41  ;;  %v14619_v29 = vunpack.c.h.bf16 %v14616_v41 }
 0x3bf   : > { %14610 = vst [vmem:[#allocation203_spill] sm:$0xff] %v9708_v21  ;;  %v9713_v46 = vmul.f32 %v9563_v40, %v14612_v34  ;;  %v9718_v11 = vmul.f32 %v9563_v40, %v14614_v2  ;;  %v14621_v21 = vld [vmem:[#allocation207_spill] sm:$0xff] }
 0x3c0   : > { %v9723_v57 = vmul.f32 %v9563_v40, %v14617_v22  ;;  %v9728_v23 = vmul.f32 %v9563_v40, %v14619_v29  ;;  %v14622_v45 = vunpack.c.l.bf16 %v14621_v21  ;;  %v14624_v44 = vunpack.c.h.bf16 %v14621_v21 }
 0x3c1   : > { %14613 = vst [vmem:[#allocation204_spill] sm:$0xff] %v9713_v46  ;;  %14615 = vst [vmem:[#allocation205_spill] sm:$0xff] %v9718_v11  ;;  %v14626_v11 = vld [vmem:[#allocation208_spill] sm:$0xff] }
 0x3c2   : > { %14618 = vst [vmem:[#allocation206_spill] sm:$0xff] %v9723_v57  ;;  %14620 = vst [vmem:[#allocation489_spill] sm:$0xff] %v9728_v23  ;;  %v9733_v34 = vmul.f32 %v9563_v40, %v14622_v45  ;;  %v9738_v2 = vmul.f32 %v9563_v40, %v14624_v44  ;;  %v14627_v46 = vunpack.c.l.bf16 %v14626_v11  ;;  %v14629_v41 = vunpack.c.h.bf16 %v14626_v11  ;;  %v14631_v23 = vld [vmem:[#allocation209_spill] sm:$0xff] }
 0x3c3   : > { %v14632_v57 = vunpack.c.l.bf16 %v14631_v23  ;;  %v14634_v21 = vunpack.c.h.bf16 %v14631_v23 }
 0x3c4   : > { %14623 = vst [vmem:[#allocation207_spill] sm:$0xff] %v9733_v34  ;;  %14625 = vst [vmem:[#allocation490_spill] sm:$0xff] %v9738_v2  ;;  %v9743_v22 = vmul.f32 %v9563_v40, %v14627_v46  ;;  %v9748_v29 = vmul.f32 %v9563_v40, %v14629_v41  ;;  %v14636_v2 = vld [vmem:[#allocation210_spill] sm:$0xff] }
 0x3c5   : > { %v9753_v45 = vmul.f32 %v9563_v40, %v14632_v57  ;;  %v9758_v44 = vmul.f32 %v9563_v40, %v14634_v21  ;;  %v14637_v34 = vunpack.c.l.bf16 %v14636_v2  ;;  %v14639_v11 = vunpack.c.h.bf16 %v14636_v2 }
 0x3c6   : > { %14628 = vst [vmem:[#allocation208_spill] sm:$0xff] %v9743_v22  ;;  %14630 = vst [vmem:[#allocation491_spill] sm:$0xff] %v9748_v29  ;;  %v14641_v29 = vld [vmem:[#allocation211_spill] sm:$0xff] }
 0x3c7   : > { %14633 = vst [vmem:[#allocation209_spill] sm:$0xff] %v9753_v45  ;;  %14635 = vst [vmem:[#allocation492_spill] sm:$0xff] %v9758_v44  ;;  %v9763_v46 = vmul.f32 %v9563_v40, %v14637_v34  ;;  %v9768_v41 = vmul.f32 %v9563_v40, %v14639_v11  ;;  %v14642_v22 = vunpack.c.l.bf16 %v14641_v29  ;;  %v14644_v23 = vunpack.c.h.bf16 %v14641_v29  ;;  %v14646_v44 = vld [vmem:[#allocation212_spill] sm:$0xff] }
 0x3c8   : > { %v14647_v45 = vunpack.c.l.bf16 %v14646_v44  ;;  %v14649_v2 = vunpack.c.h.bf16 %v14646_v44 }
 0x3c9   : > { %14638 = vst [vmem:[#allocation210_spill] sm:$0xff] %v9763_v46  ;;  %14640 = vst [vmem:[#allocation493_spill] sm:$0xff] %v9768_v41  ;;  %v9773_v57 = vmul.f32 %v9563_v40, %v14642_v22  ;;  %v9778_v21 = vmul.f32 %v9563_v40, %v14644_v23  ;;  %v14651_v41 = vld [vmem:[#allocation213_spill] sm:$0xff] }
 0x3ca   : > { %v9783_v34 = vmul.f32 %v9563_v40, %v14647_v45  ;;  %v9788_v11 = vmul.f32 %v9563_v40, %v14649_v2  ;;  %v14652_v46 = vunpack.c.l.bf16 %v14651_v41  ;;  %v14654_v29 = vunpack.c.h.bf16 %v14651_v41 }
 0x3cb   : > { %14643 = vst [vmem:[#allocation211_spill] sm:$0xff] %v9773_v57  ;;  %14645 = vst [vmem:[#allocation494_spill] sm:$0xff] %v9778_v21  ;;  %v14656_v21 = vld [vmem:[#allocation214_spill] sm:$0xff] }
 0x3cc   : > { %14648 = vst [vmem:[#allocation212_spill] sm:$0xff] %v9783_v34  ;;  %14650 = vst [vmem:[#allocation495_spill] sm:$0xff] %v9788_v11  ;;  %v9793_v22 = vmul.f32 %v9563_v40, %v14652_v46  ;;  %v9798_v23 = vmul.f32 %v9563_v40, %v14654_v29  ;;  %v14657_v57 = vunpack.c.l.bf16 %v14656_v21  ;;  %v14659_v44 = vunpack.c.h.bf16 %v14656_v21  ;;  %v14661_v11 = vld [vmem:[#allocation215_spill] sm:$0xff] }
 0x3cd   : > { %v14662_v34 = vunpack.c.l.bf16 %v14661_v11  ;;  %v14664_v41 = vunpack.c.h.bf16 %v14661_v11 }
 0x3ce   : > { %14653 = vst [vmem:[#allocation213_spill] sm:$0xff] %v9793_v22  ;;  %14655 = vst [vmem:[#allocation496_spill] sm:$0xff] %v9798_v23  ;;  %v9803_v45 = vmul.f32 %v9563_v40, %v14657_v57  ;;  %v9808_v2 = vmul.f32 %v9563_v40, %v14659_v44  ;;  %v14666_v23 = vld [vmem:[#allocation216_spill] sm:$0xff] }
 0x3cf   : > { %v9813_v46 = vmul.f32 %v9563_v40, %v14662_v34  ;;  %v9818_v29 = vmul.f32 %v9563_v40, %v14664_v41  ;;  %v14667_v22 = vunpack.c.l.bf16 %v14666_v23  ;;  %v14669_v21 = vunpack.c.h.bf16 %v14666_v23 }
 0x3d0   : > { %14658 = vst [vmem:[#allocation214_spill] sm:$0xff] %v9803_v45  ;;  %14660 = vst [vmem:[#allocation497_spill] sm:$0xff] %v9808_v2  ;;  %v14671_v2 = vld [vmem:[#allocation217_spill] sm:$0xff] }
 0x3d1   : > { %14663 = vst [vmem:[#allocation215_spill] sm:$0xff] %v9813_v46  ;;  %14665 = vst [vmem:[#allocation498_spill] sm:$0xff] %v9818_v29  ;;  %v9823_v57 = vmul.f32 %v9563_v40, %v14667_v22  ;;  %v9828_v44 = vmul.f32 %v9563_v40, %v14669_v21  ;;  %v14672_v45 = vunpack.c.l.bf16 %v14671_v2  ;;  %v14674_v11 = vunpack.c.h.bf16 %v14671_v2  ;;  %v14676_v29 = vld [vmem:[#allocation218_spill] sm:$0xff] }
 0x3d2   : > { %v14677_v46 = vunpack.c.l.bf16 %v14676_v29  ;;  %v14679_v23 = vunpack.c.h.bf16 %v14676_v29 }
 0x3d3   : > { %14668 = vst [vmem:[#allocation216_spill] sm:$0xff] %v9823_v57  ;;  %14670 = vst [vmem:[#allocation499_spill] sm:$0xff] %v9828_v44  ;;  %v9833_v34 = vmul.f32 %v9563_v40, %v14672_v45  ;;  %v9838_v41 = vmul.f32 %v9563_v40, %v14674_v11  ;;  %v14681_v44 = vld [vmem:[#allocation219_spill] sm:$0xff] }
 0x3d4   : > { %v9843_v22 = vmul.f32 %v9563_v40, %v14677_v46  ;;  %v9848_v21 = vmul.f32 %v9563_v40, %v14679_v23  ;;  %v14682_v57 = vunpack.c.l.bf16 %v14681_v44  ;;  %v14684_v2 = vunpack.c.h.bf16 %v14681_v44 }
 0x3d5   : > { %14673 = vst [vmem:[#allocation217_spill] sm:$0xff] %v9833_v34  ;;  %14675 = vst [vmem:[#allocation500_spill] sm:$0xff] %v9838_v41  ;;  %v14686_v41 = vld [vmem:[#allocation220_spill] sm:$0xff] }
 0x3d6   : > { %14678 = vst [vmem:[#allocation218_spill] sm:$0xff] %v9843_v22  ;;  %14680 = vst [vmem:[#allocation501_spill] sm:$0xff] %v9848_v21  ;;  %v9853_v45 = vmul.f32 %v9563_v40, %v14682_v57  ;;  %v9858_v11 = vmul.f32 %v9563_v40, %v14684_v2  ;;  %v14687_v34 = vunpack.c.l.bf16 %v14686_v41  ;;  %v14689_v29 = vunpack.c.h.bf16 %v14686_v41  ;;  %v14691_v21 = vld [vmem:[#allocation221_spill] sm:$0xff] }
 0x3d7   : > { %v14692_v22 = vunpack.c.l.bf16 %v14691_v21  ;;  %v14694_v44 = vunpack.c.h.bf16 %v14691_v21 }
 0x3d8   : > { %14683 = vst [vmem:[#allocation219_spill] sm:$0xff] %v9853_v45  ;;  %14685 = vst [vmem:[#allocation502_spill] sm:$0xff] %v9858_v11  ;;  %v9863_v46 = vmul.f32 %v9563_v40, %v14687_v34  ;;  %v9868_v23 = vmul.f32 %v9563_v40, %v14689_v29  ;;  %v14696_v11 = vld [vmem:[#allocation222_spill] sm:$0xff] }
 0x3d9   : > { %v9873_v57 = vmul.f32 %v9563_v40, %v14692_v22  ;;  %v9878_v2 = vmul.f32 %v9563_v40, %v14694_v44  ;;  %v14697_v45 = vunpack.c.l.bf16 %v14696_v11  ;;  %v14699_v41 = vunpack.c.h.bf16 %v14696_v11 }
 0x3da   : > { %14688 = vst [vmem:[#allocation220_spill] sm:$0xff] %v9863_v46  ;;  %14690 = vst [vmem:[#allocation503_spill] sm:$0xff] %v9868_v23  ;;  %v14701_v23 = vld [vmem:[#allocation223_spill] sm:$0xff] }
 0x3db   : > { %14693 = vst [vmem:[#allocation221_spill] sm:$0xff] %v9873_v57  ;;  %14695 = vst [vmem:[#allocation504_spill] sm:$0xff] %v9878_v2  ;;  %v9883_v34 = vmul.f32 %v9563_v40, %v14697_v45  ;;  %v9888_v29 = vmul.f32 %v9563_v40, %v14699_v41  ;;  %v14702_v46 = vunpack.c.l.bf16 %v14701_v23  ;;  %v14704_v21 = vunpack.c.h.bf16 %v14701_v23  ;;  %v14706_v2 = vld [vmem:[#allocation224_spill] sm:$0xff] }
 0x3dc   : > { %v14707_v57 = vunpack.c.l.bf16 %v14706_v2  ;;  %v14709_v11 = vunpack.c.h.bf16 %v14706_v2 }
 0x3dd   : > { %14698 = vst [vmem:[#allocation222_spill] sm:$0xff] %v9883_v34  ;;  %14700 = vst [vmem:[#allocation505_spill] sm:$0xff] %v9888_v29  ;;  %v9893_v22 = vmul.f32 %v9563_v40, %v14702_v46  ;;  %v9898_v44 = vmul.f32 %v9563_v40, %v14704_v21  ;;  %v14711_v29 = vld [vmem:[#allocation225_spill] sm:$0xff] }
 0x3de   : > { %v9903_v45 = vmul.f32 %v9563_v40, %v14707_v57  ;;  %v9908_v41 = vmul.f32 %v9563_v40, %v14709_v11  ;;  %v14712_v34 = vunpack.c.l.bf16 %v14711_v29  ;;  %v14714_v23 = vunpack.c.h.bf16 %v14711_v29 }
 0x3df   : > { %14703 = vst [vmem:[#allocation223_spill] sm:$0xff] %v9893_v22  ;;  %14705 = vst [vmem:[#allocation506_spill] sm:$0xff] %v9898_v44  ;;  %v14716_v44 = vld [vmem:[#allocation226_spill] sm:$0xff] }
 0x3e0   : > { %14708 = vst [vmem:[#allocation224_spill] sm:$0xff] %v9903_v45  ;;  %14710 = vst [vmem:[#allocation507_spill] sm:$0xff] %v9908_v41  ;;  %v9913_v46 = vmul.f32 %v9563_v40, %v14712_v34  ;;  %v9918_v21 = vmul.f32 %v9563_v40, %v14714_v23  ;;  %v14717_v22 = vunpack.c.l.bf16 %v14716_v44  ;;  %v14719_v2 = vunpack.c.h.bf16 %v14716_v44  ;;  %v14721_v41 = vld [vmem:[#allocation227_spill] sm:$0xff] }
 0x3e1   : > { %v14722_v45 = vunpack.c.l.bf16 %v14721_v41  ;;  %v14724_v29 = vunpack.c.h.bf16 %v14721_v41 }
 0x3e2   : > { %14713 = vst [vmem:[#allocation225_spill] sm:$0xff] %v9913_v46  ;;  %14715 = vst [vmem:[#allocation508_spill] sm:$0xff] %v9918_v21  ;;  %v9923_v57 = vmul.f32 %v9563_v40, %v14717_v22  ;;  %v9928_v11 = vmul.f32 %v9563_v40, %v14719_v2  ;;  %v14726_v21 = vld [vmem:[#allocation228_spill] sm:$0xff] }
 0x3e3   : > { %v9933_v34 = vmul.f32 %v9563_v40, %v14722_v45  ;;  %v9938_v23 = vmul.f32 %v9563_v40, %v14724_v29  ;;  %v14727_v46 = vunpack.c.l.bf16 %v14726_v21  ;;  %v14729_v44 = vunpack.c.h.bf16 %v14726_v21 }
 0x3e4   : > { %14718 = vst [vmem:[#allocation226_spill] sm:$0xff] %v9923_v57  ;;  %14720 = vst [vmem:[#allocation509_spill] sm:$0xff] %v9928_v11  ;;  %v14731_v11 = vld [vmem:[#allocation229_spill] sm:$0xff] }
 0x3e5   : > { %14723 = vst [vmem:[#allocation227_spill] sm:$0xff] %v9933_v34  ;;  %14725 = vst [vmem:[#allocation510_spill] sm:$0xff] %v9938_v23  ;;  %v9943_v22 = vmul.f32 %v9563_v40, %v14727_v46  ;;  %v9948_v2 = vmul.f32 %v9563_v40, %v14729_v44  ;;  %v14732_v57 = vunpack.c.l.bf16 %v14731_v11  ;;  %v14734_v41 = vunpack.c.h.bf16 %v14731_v11  ;;  %v14736_v23 = vld [vmem:[#allocation230_spill] sm:$0xff] }
 0x3e6   : > { %v14737_v34 = vunpack.c.l.bf16 %v14736_v23  ;;  %v14739_v21 = vunpack.c.h.bf16 %v14736_v23 }
 0x3e7   : > { %14728 = vst [vmem:[#allocation228_spill] sm:$0xff] %v9943_v22  ;;  %14730 = vst [vmem:[#allocation511_spill] sm:$0xff] %v9948_v2  ;;  %v9953_v45 = vmul.f32 %v9563_v40, %v14732_v57  ;;  %v9958_v29 = vmul.f32 %v9563_v40, %v14734_v41  ;;  %v14741_v2 = vld [vmem:[#allocation231_spill] sm:$0xff] }
 0x3e8   : > { %v9963_v46 = vmul.f32 %v9563_v40, %v14737_v34  ;;  %v9968_v44 = vmul.f32 %v9563_v40, %v14739_v21  ;;  %v14742_v22 = vunpack.c.l.bf16 %v14741_v2  ;;  %v14744_v11 = vunpack.c.h.bf16 %v14741_v2 }
 0x3e9   : > { %14733 = vst [vmem:[#allocation229_spill] sm:$0xff] %v9953_v45  ;;  %14735 = vst [vmem:[#allocation512_spill] sm:$0xff] %v9958_v29  ;;  %v14746_v29 = vld [vmem:[#allocation232_spill] sm:$0xff] }
 0x3ea   : > { %14738 = vst [vmem:[#allocation230_spill] sm:$0xff] %v9963_v46  ;;  %14740 = vst [vmem:[#allocation513_spill] sm:$0xff] %v9968_v44  ;;  %v9973_v57 = vmul.f32 %v9563_v40, %v14742_v22  ;;  %v9978_v41 = vmul.f32 %v9563_v40, %v14744_v11  ;;  %v14747_v45 = vunpack.c.l.bf16 %v14746_v29  ;;  %v14749_v23 = vunpack.c.h.bf16 %v14746_v29  ;;  %v14751_v44 = vld [vmem:[#allocation233_spill] sm:$0xff] }
 0x3eb   : > { %v14752_v46 = vunpack.c.l.bf16 %v14751_v44  ;;  %v14754_v2 = vunpack.c.h.bf16 %v14751_v44 }
 0x3ec   : > { %14743 = vst [vmem:[#allocation231_spill] sm:$0xff] %v9973_v57  ;;  %14745 = vst [vmem:[#allocation514_spill] sm:$0xff] %v9978_v41  ;;  %v9983_v34 = vmul.f32 %v9563_v40, %v14747_v45  ;;  %v9988_v21 = vmul.f32 %v9563_v40, %v14749_v23  ;;  %v14756_v41 = vld [vmem:[#allocation234_spill] sm:$0xff] }
 0x3ed   : > { %v9993_v22 = vmul.f32 %v9563_v40, %v14752_v46  ;;  %v9998_v11 = vmul.f32 %v9563_v40, %v14754_v2  ;;  %v14757_v57 = vunpack.c.l.bf16 %v14756_v41  ;;  %v14759_v29 = vunpack.c.h.bf16 %v14756_v41 }
 0x3ee   : > { %14748 = vst [vmem:[#allocation232_spill] sm:$0xff] %v9983_v34  ;;  %14750 = vst [vmem:[#allocation515_spill] sm:$0xff] %v9988_v21  ;;  %v14761_v21 = vld [vmem:[#allocation235_spill] sm:$0xff] }
 0x3ef   : > { %14753 = vst [vmem:[#allocation233_spill] sm:$0xff] %v9993_v22  ;;  %14755 = vst [vmem:[#allocation516_spill] sm:$0xff] %v9998_v11  ;;  %v10003_v45 = vmul.f32 %v9563_v40, %v14757_v57  ;;  %v10008_v23 = vmul.f32 %v9563_v40, %v14759_v29  ;;  %v14762_v34 = vunpack.c.l.bf16 %v14761_v21  ;;  %v14764_v44 = vunpack.c.h.bf16 %v14761_v21  ;;  %v14766_v11 = vld [vmem:[#allocation236_spill] sm:$0xff] }
 0x3f0   : > { %v14767_v22 = vunpack.c.l.bf16 %v14766_v11  ;;  %v14769_v41 = vunpack.c.h.bf16 %v14766_v11 }
 0x3f1   : > { %14758 = vst [vmem:[#allocation234_spill] sm:$0xff] %v10003_v45  ;;  %14760 = vst [vmem:[#allocation517_spill] sm:$0xff] %v10008_v23  ;;  %v10013_v46 = vmul.f32 %v9563_v40, %v14762_v34  ;;  %v10018_v2 = vmul.f32 %v9563_v40, %v14764_v44  ;;  %v14771_v23 = vld [vmem:[#allocation237_spill] sm:$0xff] }
 0x3f2   : > { %v10023_v57 = vmul.f32 %v9563_v40, %v14767_v22  ;;  %v10028_v29 = vmul.f32 %v9563_v40, %v14769_v41  ;;  %v14772_v45 = vunpack.c.l.bf16 %v14771_v23  ;;  %v14774_v21 = vunpack.c.h.bf16 %v14771_v23 }
 0x3f3   : > { %14763 = vst [vmem:[#allocation235_spill] sm:$0xff] %v10013_v46  ;;  %14765 = vst [vmem:[#allocation518_spill] sm:$0xff] %v10018_v2  ;;  %v14776_v2 = vld [vmem:[#allocation238_spill] sm:$0xff] }
 0x3f4   : > { %14768 = vst [vmem:[#allocation236_spill] sm:$0xff] %v10023_v57  ;;  %14770 = vst [vmem:[#allocation519_spill] sm:$0xff] %v10028_v29  ;;  %v10033_v34 = vmul.f32 %v9563_v40, %v14772_v45  ;;  %v10038_v44 = vmul.f32 %v9563_v40, %v14774_v21  ;;  %v14777_v46 = vunpack.c.l.bf16 %v14776_v2  ;;  %v14779_v11 = vunpack.c.h.bf16 %v14776_v2  ;;  %v14781_v29 = vld [vmem:[#allocation239_spill] sm:$0xff] }
 0x3f5   : > { %v14782_v57 = vunpack.c.l.bf16 %v14781_v29  ;;  %v14784_v23 = vunpack.c.h.bf16 %v14781_v29 }
 0x3f6   : > { %14773 = vst [vmem:[#allocation237_spill] sm:$0xff] %v10033_v34  ;;  %14775 = vst [vmem:[#allocation520_spill] sm:$0xff] %v10038_v44  ;;  %v10043_v22 = vmul.f32 %v9563_v40, %v14777_v46  ;;  %v10048_v41 = vmul.f32 %v9563_v40, %v14779_v11  ;;  %v14786_v44 = vld [vmem:[#allocation240_spill] sm:$0xff] }
 0x3f7   : > { %v10053_v45 = vmul.f32 %v9563_v40, %v14782_v57  ;;  %v10058_v21 = vmul.f32 %v9563_v40, %v14784_v23  ;;  %v14787_v34 = vunpack.c.l.bf16 %v14786_v44  ;;  %v14789_v2 = vunpack.c.h.bf16 %v14786_v44 }
 0x3f8   : > { %14778 = vst [vmem:[#allocation238_spill] sm:$0xff] %v10043_v22  ;;  %14780 = vst [vmem:[#allocation521_spill] sm:$0xff] %v10048_v41  ;;  %v14791_v41 = vld [vmem:[#allocation241_spill] sm:$0xff] }
 0x3f9   : > { %14783 = vst [vmem:[#allocation239_spill] sm:$0xff] %v10053_v45  ;;  %14785 = vst [vmem:[#allocation522_spill] sm:$0xff] %v10058_v21  ;;  %v10063_v46 = vmul.f32 %v9563_v40, %v14787_v34  ;;  %v10068_v11 = vmul.f32 %v9563_v40, %v14789_v2  ;;  %v14792_v22 = vunpack.c.l.bf16 %v14791_v41  ;;  %v14794_v29 = vunpack.c.h.bf16 %v14791_v41  ;;  %v14796_v21 = vld [vmem:[#allocation242_spill] sm:$0xff] }
 0x3fa   : > { %v14797_v45 = vunpack.c.l.bf16 %v14796_v21  ;;  %v14799_v44 = vunpack.c.h.bf16 %v14796_v21 }
 0x3fb   : > { %14788 = vst [vmem:[#allocation240_spill] sm:$0xff] %v10063_v46  ;;  %14790 = vst [vmem:[#allocation523_spill] sm:$0xff] %v10068_v11  ;;  %v10073_v57 = vmul.f32 %v9563_v40, %v14792_v22  ;;  %v10078_v23 = vmul.f32 %v9563_v40, %v14794_v29  ;;  %v14801_v11 = vld [vmem:[#allocation243_spill] sm:$0xff] }
 0x3fc   : > { %v10083_v34 = vmul.f32 %v9563_v40, %v14797_v45  ;;  %v10088_v2 = vmul.f32 %v9563_v40, %v14799_v44  ;;  %v14802_v46 = vunpack.c.l.bf16 %v14801_v11  ;;  %v14804_v41 = vunpack.c.h.bf16 %v14801_v11 }
 0x3fd   : > { %14793 = vst [vmem:[#allocation241_spill] sm:$0xff] %v10073_v57  ;;  %14795 = vst [vmem:[#allocation524_spill] sm:$0xff] %v10078_v23  ;;  %v14806_v23 = vld [vmem:[#allocation244_spill] sm:$0xff] }
 0x3fe   : > { %14798 = vst [vmem:[#allocation242_spill] sm:$0xff] %v10083_v34  ;;  %14800 = vst [vmem:[#allocation525_spill] sm:$0xff] %v10088_v2  ;;  %v10093_v22 = vmul.f32 %v9563_v40, %v14802_v46  ;;  %v10098_v29 = vmul.f32 %v9563_v40, %v14804_v41  ;;  %v14807_v57 = vunpack.c.l.bf16 %v14806_v23  ;;  %v14809_v21 = vunpack.c.h.bf16 %v14806_v23  ;;  %v14811_v2 = vld [vmem:[#allocation245_spill] sm:$0xff] }
 0x3ff   : > { %v14812_v34 = vunpack.c.l.bf16 %v14811_v2  ;;  %v14814_v11 = vunpack.c.h.bf16 %v14811_v2 }
 0x400   : > { %14803 = vst [vmem:[#allocation243_spill] sm:$0xff] %v10093_v22  ;;  %14805 = vst [vmem:[#allocation526_spill] sm:$0xff] %v10098_v29  ;;  %v10103_v45 = vmul.f32 %v9563_v40, %v14807_v57  ;;  %v10108_v44 = vmul.f32 %v9563_v40, %v14809_v21  ;;  %v14816_v29 = vld [vmem:[#allocation246_spill] sm:$0xff] }
 0x401   : > { %v10113_v46 = vmul.f32 %v9563_v40, %v14812_v34  ;;  %v10118_v41 = vmul.f32 %v9563_v40, %v14814_v11  ;;  %v14817_v22 = vunpack.c.l.bf16 %v14816_v29  ;;  %v14819_v23 = vunpack.c.h.bf16 %v14816_v29 }
 0x402   : > { %14808 = vst [vmem:[#allocation244_spill] sm:$0xff] %v10103_v45  ;;  %14810 = vst [vmem:[#allocation527_spill] sm:$0xff] %v10108_v44  ;;  %v14821_v44 = vld [vmem:[#allocation247_spill] sm:$0xff] }
 0x403   : > { %14813 = vst [vmem:[#allocation245_spill] sm:$0xff] %v10113_v46  ;;  %14815 = vst [vmem:[#allocation528_spill] sm:$0xff] %v10118_v41  ;;  %v10123_v57 = vmul.f32 %v9563_v40, %v14817_v22  ;;  %v10128_v21 = vmul.f32 %v9563_v40, %v14819_v23  ;;  %v14822_v45 = vunpack.c.l.bf16 %v14821_v44  ;;  %v14824_v2 = vunpack.c.h.bf16 %v14821_v44  ;;  %v14826_v41 = vld [vmem:[#allocation248_spill] sm:$0xff] }
 0x404   : > { %v14827_v46 = vunpack.c.l.bf16 %v14826_v41  ;;  %v14829_v29 = vunpack.c.h.bf16 %v14826_v41 }
 0x405   : > { %14818 = vst [vmem:[#allocation246_spill] sm:$0xff] %v10123_v57  ;;  %14820 = vst [vmem:[#allocation529_spill] sm:$0xff] %v10128_v21  ;;  %v10133_v34 = vmul.f32 %v9563_v40, %v14822_v45  ;;  %v10138_v11 = vmul.f32 %v9563_v40, %v14824_v2  ;;  %v14831_v21 = vld [vmem:[#allocation249_spill] sm:$0xff] }
 0x406   : > { %v10143_v22 = vmul.f32 %v9563_v40, %v14827_v46  ;;  %v10148_v23 = vmul.f32 %v9563_v40, %v14829_v29  ;;  %v14832_v57 = vunpack.c.l.bf16 %v14831_v21  ;;  %v14834_v44 = vunpack.c.h.bf16 %v14831_v21 }
 0x407   : > { %14823 = vst [vmem:[#allocation247_spill] sm:$0xff] %v10133_v34  ;;  %14825 = vst [vmem:[#allocation530_spill] sm:$0xff] %v10138_v11  ;;  %v14836_v11 = vld [vmem:[#allocation250_spill] sm:$0xff] }
 0x408   : > { %14828 = vst [vmem:[#allocation248_spill] sm:$0xff] %v10143_v22  ;;  %14830 = vst [vmem:[#allocation531_spill] sm:$0xff] %v10148_v23  ;;  %v10153_v45 = vmul.f32 %v9563_v40, %v14832_v57  ;;  %v10158_v2 = vmul.f32 %v9563_v40, %v14834_v44  ;;  %v14837_v34 = vunpack.c.l.bf16 %v14836_v11  ;;  %v14839_v41 = vunpack.c.h.bf16 %v14836_v11  ;;  %v14841_v23 = vld [vmem:[#allocation251_spill] sm:$0xff] }
 0x409   : > { %v14842_v22 = vunpack.c.l.bf16 %v14841_v23  ;;  %v14844_v21 = vunpack.c.h.bf16 %v14841_v23 }
 0x40a   : > { %14833 = vst [vmem:[#allocation249_spill] sm:$0xff] %v10153_v45  ;;  %14835 = vst [vmem:[#allocation532_spill] sm:$0xff] %v10158_v2  ;;  %v10163_v46 = vmul.f32 %v9563_v40, %v14837_v34  ;;  %v10168_v29 = vmul.f32 %v9563_v40, %v14839_v41  ;;  %v14846_v2 = vld [vmem:[#allocation252_spill] sm:$0xff] }
 0x40b   : > { %v10173_v57 = vmul.f32 %v9563_v40, %v14842_v22  ;;  %v10178_v44 = vmul.f32 %v9563_v40, %v14844_v21  ;;  %v14847_v45 = vunpack.c.l.bf16 %v14846_v2  ;;  %v14849_v11 = vunpack.c.h.bf16 %v14846_v2 }
 0x40c   : > { %14838 = vst [vmem:[#allocation250_spill] sm:$0xff] %v10163_v46  ;;  %14840 = vst [vmem:[#allocation533_spill] sm:$0xff] %v10168_v29  ;;  %v14851_v29 = vld [vmem:[#allocation253_spill] sm:$0xff] }
 0x40d   : > { %14843 = vst [vmem:[#allocation251_spill] sm:$0xff] %v10173_v57  ;;  %14845 = vst [vmem:[#allocation534_spill] sm:$0xff] %v10178_v44  ;;  %v10183_v34 = vmul.f32 %v9563_v40, %v14847_v45  ;;  %v10188_v41 = vmul.f32 %v9563_v40, %v14849_v11  ;;  %v14852_v46 = vunpack.c.l.bf16 %v14851_v29  ;;  %v14854_v23 = vunpack.c.h.bf16 %v14851_v29  ;;  %v14856_v44 = vld [vmem:[#allocation254_spill] sm:$0xff] }
 0x40e   : > { %v14857_v57 = vunpack.c.l.bf16 %v14856_v44  ;;  %v14859_v2 = vunpack.c.h.bf16 %v14856_v44 }
 0x40f   : > { %14848 = vst [vmem:[#allocation252_spill] sm:$0xff] %v10183_v34  ;;  %14850 = vst [vmem:[#allocation535_spill] sm:$0xff] %v10188_v41  ;;  %v10193_v22 = vmul.f32 %v9563_v40, %v14852_v46  ;;  %v10198_v21 = vmul.f32 %v9563_v40, %v14854_v23  ;;  %v14861_v41 = vld [vmem:[#allocation255_spill] sm:$0xff] }
 0x410   : > { %v10203_v45 = vmul.f32 %v9563_v40, %v14857_v57  ;;  %v10208_v11 = vmul.f32 %v9563_v40, %v14859_v2  ;;  %v14862_v34 = vunpack.c.l.bf16 %v14861_v41  ;;  %v14863_v29 = vunpack.c.h.bf16 %v14861_v41 }
 0x411   : > { %14853 = vst [vmem:[#allocation253_spill] sm:$0xff] %v10193_v22  ;;  %14855 = vst [vmem:[#allocation536_spill] sm:$0xff] %v10198_v21  ;;  %v14865_v21 = vld [vmem:[#allocation256_spill] sm:$0xff] }
 0x412   : > { %14858 = vst [vmem:[#allocation254_spill] sm:$0xff] %v10203_v45  ;;  %14860 = vst [vmem:[#allocation537_spill] sm:$0xff] %v10208_v11  ;;  %v10213_v46 = vmul.f32 %v9563_v40, %v14862_v34  ;;  %v10218_v23 = vmul.f32 %v9563_v40, %v14863_v29  ;;  %v14866_v22 = vunpack.c.l.bf16 %v14865_v21  ;;  %v14868_v44 = vunpack.c.h.bf16 %v14865_v21  ;;  %v14870_v11 = vld [vmem:[#allocation257_spill] sm:$0xff] }
 0x413   : > { %v14871_v45 = vunpack.c.l.bf16 %v14870_v11  ;;  %v14872_v41 = vunpack.c.h.bf16 %v14870_v11  ;;  %v14876_v21 = vunpack.c.h.bf16 %v7382_v54 }
 0x414   : > { %14864 = vst [vmem:[#allocation255_spill] sm:$0xff] %v10218_v23  ;;  %v10223_v57 = vmul.f32 %v9563_v40, %v14866_v22  ;;  %v10228_v2 = vmul.f32 %v9563_v40, %v14868_v44  ;;  %v14874_v23 = vunpack.c.l.bf16 %v7382_v54  ;;  %v14884_v54 = vunpack.c.h.bf16 %v7392_v61 }
 0x415   : > { %v10233_v34 = vmul.f32 %v9563_v40, %v14871_v45  ;;  %v10238_v29 = vmul.f32 %v9563_v40, %v14872_v41  ;;  %v10248_v44 = vmul.f32 %v9563_v40, %v14876_v21 }
 0x416   : > { %14867 = vst [vmem:[#allocation256_spill] sm:$0xff] %v10223_v57  ;;  %14869 = vst [vmem:[#allocation538_spill] sm:$0xff] %v10228_v2  ;;  %v10243_v22 = vmul.f32 %v9563_v40, %v14874_v23  ;;  %v14878_v2 = vld [vmem:[#allocation258_spill] sm:$0xff]  ;;  %v10268_v21 = vmul.f32 %v9563_v40, %v14884_v54 }
 0x417   : > { %14873 = vst [vmem:[#allocation257_spill] sm:$0xff] %v10238_v29  ;;  %14877 = vst [vmem:[#allocation540_spill] sm:$0xff] %v10248_v44  ;;  %v14879_v57 = vunpack.c.l.bf16 %v14878_v2  ;;  %v14880_v11 = vunpack.c.h.bf16 %v14878_v2  ;;  %v14882_v29 = vunpack.c.l.bf16 %v7392_v61  ;;  %v14886_v44 = vld [vmem:[#allocation259_spill] sm:$0xff]  ;;  %v14891_v61 = vunpack.c.h.bf16 %v7402_v49 }
 0x418   : > { %14875 = vst [vmem:[#allocation539_spill] sm:$0xff] %v10243_v22  ;;  %14885 = vst [vmem:[#allocation542_spill] sm:$0xff] %v10268_v21  ;;  %v14887_v22 = vunpack.c.l.bf16 %v14886_v44  ;;  %v14888_v2 = vunpack.c.h.bf16 %v14886_v44  ;;  %v14893_v21 = vld [vmem:[#allocation260_spill] sm:$0xff] }
 0x419   : > { %v10253_v45 = vmul.f32 %v9563_v40, %v14879_v57  ;;  %v10258_v41 = vmul.f32 %v9563_v40, %v14880_v11  ;;  %v10263_v23 = vmul.f32 %v9563_v40, %v14882_v29  ;;  %v10288_v54 = vmul.f32 %v9563_v40, %v14891_v61 }
 0x41a   : > { %v10273_v57 = vmul.f32 %v9563_v40, %v14887_v22  ;;  %v10278_v11 = vmul.f32 %v9563_v40, %v14888_v2  ;;  %v14895_v44 = vunpack.c.h.bf16 %v14893_v21 }
 0x41b   : > { %14881 = vst [vmem:[#allocation258_spill] sm:$0xff] %v10258_v41  ;;  %14883 = vst [vmem:[#allocation541_spill] sm:$0xff] %v10263_v23  ;;  %v14890_v41 = vunpack.c.l.bf16 %v7402_v49  ;;  %v14894_v23 = vunpack.c.l.bf16 %v14893_v21  ;;  %v14898_v49 = vunpack.c.h.bf16 %v7412_v4  ;;  %v14901_v21 = vunpack.c.h.bf16 %v7419_v59 }
 0x41c   : > { %14889 = vst [vmem:[#allocation259_spill] sm:$0xff] %v10278_v11  ;;  %14892 = vst [vmem:[#allocation543_spill] sm:$0xff] %v10288_v54  ;;  %v10298_v2 = vmul.f32 %v9563_v40, %v14895_v44  ;;  %v14897_v11 = vunpack.c.l.bf16 %v7412_v4  ;;  %v14900_v54 = vunpack.c.l.bf16 %v7419_v59  ;;  %v14904_v4 = vunpack.c.h.bf16 %v7422_v15 }
 0x41d   : > { %v10283_v29 = vmul.f32 %v9563_v40, %v14890_v41  ;;  %v10293_v22 = vmul.f32 %v9563_v40, %v14894_v23  ;;  %v10308_v61 = vmul.f32 %v9563_v40, %v14898_v49  ;;  %v10318_v44 = vmul.f32 %v9563_v40, %v14901_v21 }
 0x41e   : > { %14896 = vst [vmem:[#allocation260_spill] sm:$0xff] %v10298_v2  ;;  %v10303_v41 = vmul.f32 %v9563_v40, %v14897_v11  ;;  %v10313_v23 = vmul.f32 %v9563_v40, %v14900_v54  ;;  %v14903_v2 = vunpack.c.l.bf16 %v7422_v15  ;;  %v10328_v49 = vmul.f32 %v9563_v40, %v14904_v4 }
 0x41f   : > { %14899 = vst [vmem:[#allocation544_spill] sm:$0xff] %v10308_v61  ;;  %14902 = vst [vmem:[#allocation545_spill] sm:$0xff] %v10318_v44  ;;  %v14906_v61 = vunpack.c.l.bf16 %v7429_v5  ;;  %v14907_v59 = vunpack.c.h.bf16 %v7429_v5  ;;  %v14909_v44 = vunpack.c.l.bf16 %v7432_v19  ;;  %v14910_v15 = vunpack.c.h.bf16 %v7432_v19 }
 0x420   : > { %v10323_v11 = vmul.f32 %v9563_v40, %v14903_v2  ;;  %14905 = vst [vmem:[#allocation546_spill] sm:$0xff] %v10328_v49  ;;  %v14911_v49 = vunpack.c.l.bf16 %v7439_v6  ;;  %v14913_v5 = vunpack.c.h.bf16 %v7439_v6  ;;  %v1909_v19 = vadd.f32 %v8189_v33, %v7462_v25 }
 0x421   : > { %v10333_v54 = vmul.f32 %v9563_v40, %v14906_v61  ;;  %v10338_v21 = vmul.f32 %v9563_v40, %v14907_v59  ;;  %v10343_v2 = vmul.f32 %v9563_v40, %v14909_v44  ;;  %v10348_v4 = vmul.f32 %v9563_v40, %v14910_v15 }
 0x422   : > { %v10353_v61 = vmul.f32 %v9563_v40, %v14911_v49  ;;  %v10358_v59 = vmul.f32 %v9563_v40, %v14913_v5  ;;  %v1918_v15 = vadd.f32 %v8194_v50, %v7467_v60  ;;  %v1927_v49 = vadd.f32 %v8199_v12, %v7472_v48 }
 0x423   : > { %14908 = vst [vmem:[#allocation547_spill] sm:$0xff] %v10338_v21  ;;  %v14915_v21 = vunpack.c.h.bf16 %v7079_v53  ;;  %v1945_v5 = vadd.f32 %v8209_v31, %v7482_v55  ;;  %v1910_v60 = vadd.f32 %v1909_v19, %v8916_v3 }
 0x424   : > { %14912 = vst [vmem:[#allocation548_spill] sm:$0xff] %v10353_v61  ;;  %14914 = vst [vmem:[#allocation549_spill] sm:$0xff] %v10358_v59  ;;  %v14916_v61 = vld [vmem:[#allocation261_spill] sm:$0xff]  ;;  %v14917_v59 = vld [vmem:[#allocation262_spill] sm:$0xff]  ;;  %v1919_v33 = vadd.f32 %v1918_v15, %v8921_v51  ;;  %v1928_v48 = vadd.f32 %v1927_v49, %v8926_v58 }
 0x425   : > { %v10363_v44 = vmul.f32 %v9563_v40, %v14915_v21  ;;  %v1936_v6 = vadd.f32 %v8204_v62, %v14916_v61  ;;  %v1954_v53 = vadd.f32 %v8214_v39, %v14917_v59  ;;  %v1963_v40 = vadd.f32 %v8219_v9, %v7492_v27  ;;  %v14918_v21 = vld [vmem:[#allocation263_spill] sm:$0xff] }
 0x426   : > { %v1972_v25 = vadd.f32 %v8224_v17, %v14918_v21  ;;  %v1946_v12 = vadd.f32 %v1945_v5, %v8936_v52  ;;  %v1911_v27 = vadd.f32 %v1910_v60, %v9643_v35  ;;  %v1920_v39 = vadd.f32 %v1919_v33, %v9648_v1 }
 0x427   : > { %v1937_v50 = vadd.f32 %v1936_v6, %v8931_v63  ;;  %v1955_v55 = vadd.f32 %v1954_v53, %v8941_v16  ;;  %v1964_v62 = vadd.f32 %v1963_v40, %v8946_v47  ;;  %v1929_v9 = vadd.f32 %v1928_v48, %v9653_v42 }
 0x428   : > { %v1973_v31 = vadd.f32 %v1972_v25, %v8951_v20  ;;  %v1947_v3 = vadd.f32 %v1946_v12, %v9663_v28  ;;  %v1912_v52 = vrot.slane %v1911_v27, 4  ;;  %v1921_v16 = vrot.slane %v1920_v39, 4 }
 0x429   : > { %v1938_v17 = vadd.f32 %v1937_v50, %v9658_v10  ;;  %v1956_v51 = vadd.f32 %v1955_v55, %v9668_v43  ;;  %v1965_v58 = vadd.f32 %v1964_v62, %v9673_v38  ;;  %v1930_v47 = vrot.slane %v1929_v9, 4 }
 0x42a   : > { %v1974_v63 = vadd.f32 %v1973_v31, %v9678_v14  ;;  %v1948_v61 = vrot.slane %v1947_v3, 4  ;;  %v1913_v19 = vadd.f32 %v1912_v52, %v1911_v27  ;;  %v1922_v42 = vadd.f32 %v1921_v16, %v1920_v39 }
 0x42b   : > { %v1939_v20 = vrot.slane %v1938_v17, 4  ;;  %v1957_v35 = vrot.slane %v1956_v51, 4  ;;  %v1966_v59 = vrot.slane %v1965_v58, 4  ;;  %v1931_v15 = vadd.f32 %v1930_v47, %v1929_v9 }
 0x42c   : > { %v1975_v1 = vrot.slane %v1974_v63, 4  ;;  %v1949_v49 = vadd.f32 %v1948_v61, %v1947_v3  ;;  %v1914_v5 = vrot.slane %v1913_v19, 2  ;;  %v1923_v38 = vrot.slane %v1922_v42, 2 }
 0x42d   : > { %v1940_v10 = vadd.f32 %v1939_v20, %v1938_v17  ;;  %v1958_v28 = vadd.f32 %v1957_v35, %v1956_v51  ;;  %v1967_v6 = vadd.f32 %v1966_v59, %v1965_v58  ;;  %v1932_v53 = vrot.slane %v1931_v15, 2 }
 0x42e   : > { %v1976_v43 = vadd.f32 %v1975_v1, %v1974_v63  ;;  %v1950_v40 = vrot.slane %v1949_v49, 2  ;;  %v1915_v33 = vadd.f32 %v1914_v5, %v1913_v19  ;;  %v1924_v48 = vadd.f32 %v1923_v38, %v1922_v42  ;;  %v14921_v5 = vld [vmem:[#allocation266_spill] sm:$0xff] }
 0x42f   : > { %v1941_v14 = vrot.slane %v1940_v10, 2  ;;  %v1959_v21 = vrot.slane %v1958_v28, 2  ;;  %v1968_v25 = vrot.slane %v1967_v6, 2  ;;  %v1933_v50 = vadd.f32 %v1932_v53, %v1931_v15  ;;  %v14919_v15 = vld [vmem:[#allocation264_spill] sm:$0xff] }
 0x430   : > { %v1977_v60 = vrot.slane %v1976_v43, 2  ;;  %v1951_v55 = vadd.f32 %v1950_v40, %v1949_v49  ;;  %v1916_v39 = vrot.slane %v1915_v33, 1  ;;  %v1925_v9 = vrot.slane %v1924_v48, 1  ;;  %v14924_v40 = vld [vmem:[#allocation127_spill] sm:$0xff] }
 0x431   : > { %v1942_v12 = vadd.f32 %v1941_v14, %v1940_v10  ;;  %v1960_v62 = vadd.f32 %v1959_v21, %v1958_v28  ;;  %v1969_v31 = vadd.f32 %v1968_v25, %v1967_v6  ;;  %v1934_v17 = vrot.slane %v1933_v50, 1  ;;  %v14920_v28 = vld [vmem:[#allocation265_spill] sm:$0xff]  ;;  %v14922_v14 = vld [vmem:[#allocation267_spill] sm:$0xff] }
 0x432   : > { %v1978_v27 = vadd.f32 %v1977_v60, %v1976_v43  ;;  %v1952_v51 = vrot.slane %v1951_v55, 1  ;;  %v10397_v16 = vadd.f32 %v1916_v39, %v1915_v33  ;;  %v10399_v47 = vadd.f32 %v1925_v9, %v1924_v48  ;;  %v14926_v25 = vld [vmem:[#allocation129_spill] sm:$0xff]  ;;  %v14927_v60 = vld [vmem:[#allocation130_spill] sm:$0xff]  ;;  %v14929_v48 = vld [vmem:[#allocation132_spill] sm:$0xff] }
 0x433   : > { %v1943_v3 = vrot.slane %v1942_v12, 1  ;;  %v1961_v58 = vrot.slane %v1960_v62, 1  ;;  %v1970_v63 = vrot.slane %v1969_v31, 1  ;;  %v10401_v20 = vadd.f32 %v1934_v17, %v1933_v50  ;;  %v14930_v50 = vld [vmem:[#allocation133_spill] sm:$0xff]  ;;  %v14935_v9 = vld [vmem:[#allocation202_spill] sm:$0xff] }
 0x434   : > { %v1979_v52 = vrot.slane %v1978_v27, 1  ;;  %v10405_v35 = vadd.f32 %v1952_v51, %v1951_v55  ;;  %v1981_v42 = vadd.f32 %v8229_v30, %v7502_v56  ;;  %v1990_v10 = vadd.f32 %v8234_v8, %v14919_v15  ;;  %v14923_v30 = vld [vmem:[#allocation126_spill] sm:$0xff]  ;;  %v14932_v55 = vld [vmem:[#allocation199_spill] sm:$0xff] }
 0x435   : > { %v10403_v61 = vadd.f32 %v1943_v3, %v1942_v12  ;;  %v10407_v59 = vadd.f32 %v1961_v58, %v1960_v62  ;;  %v10409_v1 = vadd.f32 %v1970_v63, %v1969_v31  ;;  %v1999_v49 = vadd.f32 %v8239_v37, %v7512_v7  ;;  %v14925_v7 = vld [vmem:[#allocation128_spill] sm:$0xff]  ;;  %v14936_v3 = vld [vmem:[#allocation203_spill] sm:$0xff] }
 0x436   : > { %v10411_v19 = vadd.f32 %v1979_v52, %v1978_v27  ;;  %v2008_v6 = vadd.f32 %v8244_v24, %v14920_v28  ;;  %v2017_v43 = vadd.f32 %v8249_v36, %v7522_v13  ;;  %v2026_v38 = vadd.f32 %v8254_v26, %v14921_v5  ;;  %v14928_v13 = vld [vmem:[#allocation131_spill] sm:$0xff]  ;;  %v14933_v62 = vld [vmem:[#allocation200_spill] sm:$0xff]  ;;  %v14934_v27 = vld [vmem:[#allocation201_spill] sm:$0xff] }
 0x437   : > { %v2035_v53 = vadd.f32 %v8259_v0, %v7532_v18  ;;  %v2044_v56 = vadd.f32 %v8264_v32, %v14922_v14  ;;  %v1982_v8 = vadd.f32 %v1981_v42, %v14923_v30  ;;  %v1991_v21 = vadd.f32 %v1990_v10, %v14924_v40  ;;  %v14931_v18 = vld [vmem:[#allocation198_spill] sm:$0xff]  ;;  %v14937_v58 = vld [vmem:[#allocation204_spill] sm:$0xff]  ;;  %v14938_v52 = vld [vmem:[#allocation205_spill] sm:$0xff] }
 0x438   : > { %v2000_v37 = vadd.f32 %v1999_v49, %v14925_v7  ;;  %v2009_v24 = vadd.f32 %v2008_v6, %v14926_v25  ;;  %v2018_v33 = vadd.f32 %v2017_v43, %v14927_v60  ;;  %v2027_v36 = vadd.f32 %v2026_v38, %v14928_v13 }
 0x439   : > { %v2036_v26 = vadd.f32 %v2035_v53, %v14929_v48  ;;  %v2045_v12 = vadd.f32 %v2044_v56, %v14930_v50  ;;  %v1983_v0 = vadd.f32 %v1982_v8, %v14931_v18  ;;  %v1992_v32 = vadd.f32 %v1991_v21, %v14932_v55 }
 0x43a   : > { %v2001_v31 = vadd.f32 %v2000_v37, %v14933_v62  ;;  %v2010_v39 = vadd.f32 %v2009_v24, %v14934_v27  ;;  %v2019_v17 = vadd.f32 %v2018_v33, %v14935_v9  ;;  %v2028_v51 = vadd.f32 %v2027_v36, %v14936_v3 }
 0x43b   : > { %v2037_v63 = vadd.f32 %v2036_v26, %v14937_v58  ;;  %v2046_v42 = vadd.f32 %v2045_v12, %v14938_v52  ;;  %v1984_v15 = vrot.slane %v1983_v0, 4  ;;  %v1993_v10 = vrot.slane %v1992_v32, 4 }
 0x43c   : > { %v2002_v49 = vrot.slane %v2001_v31, 4  ;;  %v2011_v28 = vrot.slane %v2010_v39, 4  ;;  %v2020_v6 = vrot.slane %v2019_v17, 4  ;;  %v2029_v43 = vrot.slane %v2028_v51, 4 }
 0x43d   : > { %v2038_v5 = vrot.slane %v2037_v63, 4  ;;  %v2047_v38 = vrot.slane %v2046_v42, 4  ;;  %v1985_v53 = vadd.f32 %v1984_v15, %v1983_v0  ;;  %v1994_v14 = vadd.f32 %v1993_v10, %v1992_v32 }
 0x43e   : > { %v2003_v56 = vadd.f32 %v2002_v49, %v2001_v31  ;;  %v2012_v30 = vadd.f32 %v2011_v28, %v2010_v39  ;;  %v2021_v8 = vadd.f32 %v2020_v6, %v2019_v17  ;;  %v2030_v40 = vadd.f32 %v2029_v43, %v2028_v51  ;;  %v14940_v43 = vld [vmem:[#allocation268_spill] sm:$0xff] }
 0x43f   : > { %v2039_v21 = vadd.f32 %v2038_v5, %v2037_v63  ;;  %v2048_v7 = vadd.f32 %v2047_v38, %v2046_v42  ;;  %v1986_v37 = vrot.slane %v1985_v53, 2  ;;  %v1995_v25 = vrot.slane %v1994_v14, 2  ;;  %v14941_v5 = vld [vmem:[#allocation54_spill] sm:$0xff] }
 0x440   : > { %v2004_v24 = vrot.slane %v2003_v56, 2  ;;  %v2013_v60 = vrot.slane %v2012_v30, 2  ;;  %v2022_v33 = vrot.slane %v2021_v8, 2  ;;  %v2031_v13 = vrot.slane %v2030_v40, 2 }
 0x441   : > { %v2040_v36 = vrot.slane %v2039_v21, 2  ;;  %v2049_v48 = vrot.slane %v2048_v7, 2  ;;  %v1987_v26 = vadd.f32 %v1986_v37, %v1985_v53  ;;  %v1996_v50 = vadd.f32 %v1995_v25, %v1994_v14  ;;  %v14942_v53 = vld [vmem:[#allocation269_spill] sm:$0xff]  ;;  %v14943_v14 = vld [vmem:[#allocation55_spill] sm:$0xff]  ;;  %v14948_v25 = vld [vmem:[#allocation272_spill] sm:$0xff] }
 0x442   : > { %v2005_v12 = vadd.f32 %v2004_v24, %v2003_v56  ;;  %v2014_v18 = vadd.f32 %v2013_v60, %v2012_v30  ;;  %v2023_v0 = vadd.f32 %v2022_v33, %v2021_v8  ;;  %v2032_v55 = vadd.f32 %v2031_v13, %v2030_v40  ;;  %v14944_v30 = vld [vmem:[#allocation270_spill] sm:$0xff]  ;;  %v14945_v8 = vld [vmem:[#allocation56_spill] sm:$0xff]  ;;  %v14950_v33 = vld [vmem:[#allocation273_spill] sm:$0xff] }
 0x443   : > { %v2041_v32 = vadd.f32 %v2040_v36, %v2039_v21  ;;  %v2050_v62 = vadd.f32 %v2049_v48, %v2048_v7  ;;  %v1988_v31 = vrot.slane %v1987_v26, 1  ;;  %v1997_v27 = vrot.slane %v1996_v50, 1  ;;  %v14946_v21 = vld [vmem:[#allocation271_spill] sm:$0xff]  ;;  %v14947_v7 = vld [vmem:[#allocation57_spill] sm:$0xff]  ;;  %v14949_v24 = vld [vmem:[#allocation58_spill] sm:$0xff] }
 0x444   : > { %v2006_v39 = vrot.slane %v2005_v12, 1  ;;  %v2015_v9 = vrot.slane %v2014_v18, 1  ;;  %v2024_v17 = vrot.slane %v2023_v0, 1  ;;  %v2033_v3 = vrot.slane %v2032_v55, 1  ;;  %v14951_v13 = vld [vmem:[#allocation59_spill] sm:$0xff]  ;;  %v14952_v48 = vld [vmem:[#allocation274_spill] sm:$0xff] }
 0x445   : > { %v2042_v51 = vrot.slane %v2041_v32, 1  ;;  %v2051_v58 = vrot.slane %v2050_v62, 1  ;;  %v10445_v63 = vadd.f32 %v1988_v31, %v1987_v26  ;;  %v10447_v52 = vadd.f32 %v1997_v27, %v1996_v50  ;;  %v14953_v26 = vld [vmem:[#allocation60_spill] sm:$0xff]  ;;  %v14958_v27 = vld [vmem:[#allocation135_spill] sm:$0xff] }
 0x446   : > { %v10449_v42 = vadd.f32 %v2006_v39, %v2005_v12  ;;  %v10451_v15 = vadd.f32 %v2015_v9, %v2014_v18  ;;  %v10453_v10 = vadd.f32 %v2024_v17, %v2023_v0  ;;  %v10455_v49 = vadd.f32 %v2033_v3, %v2032_v55  ;;  %v14954_v12 = vld [vmem:[#allocation275_spill] sm:$0xff]  ;;  %v14955_v18 = vld [vmem:[#allocation61_spill] sm:$0xff]  ;;  %v14956_v55 = vld [vmem:[#allocation134_spill] sm:$0xff] }
 0x447   : > { %v10457_v28 = vadd.f32 %v2042_v51, %v2041_v32  ;;  %v10459_v6 = vadd.f32 %v2051_v58, %v2050_v62  ;;  %v2053_v38 = vadd.f32 %v14941_v5, %v14940_v43  ;;  %v2062_v56 = vadd.f32 %v14943_v14, %v14942_v53  ;;  %v14957_v62 = vld [vmem:[#allocation424_spill] sm:$0xff]  ;;  %v14959_v9 = vld [vmem:[#allocation425_spill] sm:$0xff]  ;;  %v14961_v58 = vld [vmem:[#allocation426_spill] sm:$0xff] }
 0x448   : > { %v2071_v40 = vadd.f32 %v14945_v8, %v14944_v30  ;;  %v2080_v37 = vadd.f32 %v14947_v7, %v14946_v21  ;;  %v2089_v60 = vadd.f32 %v14949_v24, %v14948_v25  ;;  %v2098_v36 = vadd.f32 %v14951_v13, %v14950_v33  ;;  %v14960_v3 = vld [vmem:[#allocation136_spill] sm:$0xff]  ;;  %v14962_v5 = vld [vmem:[#allocation137_spill] sm:$0xff]  ;;  %v14963_v14 = vld [vmem:[#allocation427_spill] sm:$0xff] }
 0x449   : > { %14939 = vst [vmem:[#allocation261_spill] sm:$0xff] %v10459_v6  ;;  %v2107_v50 = vadd.f32 %v14953_v26, %v14952_v48  ;;  %v2116_v0 = vadd.f32 %v14955_v18, %v14954_v12  ;;  %v2054_v32 = vadd.f32 %v2053_v38, %v14956_v55  ;;  %v2063_v31 = vadd.f32 %v2062_v56, %v14957_v62  ;;  %v14964_v8 = vld [vmem:[#allocation206_spill] sm:$0xff]  ;;  %v14965_v7 = vld [vmem:[#allocation489_spill] sm:$0xff]  ;;  %v14966_v24 = vld [vmem:[#allocation207_spill] sm:$0xff] }
 0x44a   : > { %v2072_v39 = vadd.f32 %v2071_v40, %v14958_v27  ;;  %v2081_v17 = vadd.f32 %v2080_v37, %v14959_v9  ;;  %v2090_v51 = vadd.f32 %v2089_v60, %v14960_v3  ;;  %v2099_v43 = vadd.f32 %v2098_v36, %v14961_v58  ;;  %v14967_v33 = vld [vmem:[#allocation490_spill] sm:$0xff]  ;;  %v14968_v13 = vld [vmem:[#allocation208_spill] sm:$0xff]  ;;  %v14969_v48 = vld [vmem:[#allocation491_spill] sm:$0xff] }
 0x44b   : > { %v2108_v53 = vadd.f32 %v2107_v50, %v14962_v5  ;;  %v2117_v30 = vadd.f32 %v2116_v0, %v14963_v14  ;;  %v2055_v21 = vadd.f32 %v2054_v32, %v14964_v8  ;;  %v2064_v25 = vadd.f32 %v2063_v31, %v14965_v7  ;;  %v14970_v26 = vld [vmem:[#allocation209_spill] sm:$0xff]  ;;  %v14971_v12 = vld [vmem:[#allocation492_spill] sm:$0xff] }
 0x44c   : > { %v2073_v38 = vadd.f32 %v2072_v39, %v14966_v24  ;;  %v2082_v56 = vadd.f32 %v2081_v17, %v14967_v33  ;;  %v2091_v40 = vadd.f32 %v2090_v51, %v14968_v13  ;;  %v2100_v37 = vadd.f32 %v2099_v43, %v14969_v48 }
 0x44d   : > { %v2109_v60 = vadd.f32 %v2108_v53, %v14970_v26  ;;  %v2118_v36 = vadd.f32 %v2117_v30, %v14971_v12  ;;  %v2056_v18 = vrot.slane %v2055_v21, 4  ;;  %v2065_v50 = vrot.slane %v2064_v25, 4 }
 0x44e   : > { %v2074_v55 = vrot.slane %v2073_v38, 4  ;;  %v2083_v0 = vrot.slane %v2082_v56, 4  ;;  %v2092_v62 = vrot.slane %v2091_v40, 4  ;;  %v2101_v32 = vrot.slane %v2100_v37, 4 }
 0x44f   : > { %v2110_v27 = vrot.slane %v2109_v60, 4  ;;  %v2119_v31 = vrot.slane %v2118_v36, 4  ;;  %v2057_v9 = vadd.f32 %v2056_v18, %v2055_v21  ;;  %v2066_v39 = vadd.f32 %v2065_v50, %v2064_v25 }
 0x450   : > { %v2075_v3 = vadd.f32 %v2074_v55, %v2073_v38  ;;  %v2084_v17 = vadd.f32 %v2083_v0, %v2082_v56  ;;  %v2093_v58 = vadd.f32 %v2092_v62, %v2091_v40  ;;  %v2102_v51 = vadd.f32 %v2101_v32, %v2100_v37 }
 0x451   : > { %v2111_v5 = vadd.f32 %v2110_v27, %v2109_v60  ;;  %v2120_v43 = vadd.f32 %v2119_v31, %v2118_v36  ;;  %v2058_v14 = vrot.slane %v2057_v9, 2  ;;  %v2067_v53 = vrot.slane %v2066_v39, 2 }
 0x452   : > { %v2076_v8 = vrot.slane %v2075_v3, 2  ;;  %v2085_v30 = vrot.slane %v2084_v17, 2  ;;  %v2094_v7 = vrot.slane %v2093_v58, 2  ;;  %v2103_v24 = vrot.slane %v2102_v51, 2 }
 0x453   : > { %v2112_v33 = vrot.slane %v2111_v5, 2  ;;  %v2121_v13 = vrot.slane %v2120_v43, 2  ;;  %v2059_v48 = vadd.f32 %v2058_v14, %v2057_v9  ;;  %v2068_v26 = vadd.f32 %v2067_v53, %v2066_v39  ;;  %v14983_v14 = vld [vmem:[#allocation63_spill] sm:$0xff] }
 0x454   : > { %v2077_v12 = vadd.f32 %v2076_v8, %v2075_v3  ;;  %v2086_v6 = vadd.f32 %v2085_v30, %v2084_v17  ;;  %v2095_v21 = vadd.f32 %v2094_v7, %v2093_v58  ;;  %v2104_v25 = vadd.f32 %v2103_v24, %v2102_v51  ;;  %v14980_v58 = vld [vmem:[#allocation276_spill] sm:$0xff]  ;;  %v14981_v51 = vld [vmem:[#allocation62_spill] sm:$0xff]  ;;  %v14986_v24 = vld [vmem:[#allocation279_spill] sm:$0xff] }
 0x455   : > { %v2113_v38 = vadd.f32 %v2112_v33, %v2111_v5  ;;  %v2122_v56 = vadd.f32 %v2121_v13, %v2120_v43  ;;  %v2060_v40 = vrot.slane %v2059_v48, 1  ;;  %v2069_v37 = vrot.slane %v2068_v26, 1  ;;  %v14982_v43 = vld [vmem:[#allocation277_spill] sm:$0xff]  ;;  %v14984_v8 = vld [vmem:[#allocation278_spill] sm:$0xff]  ;;  %v14985_v30 = vld [vmem:[#allocation64_spill] sm:$0xff] }
 0x456   : > { %v2078_v60 = vrot.slane %v2077_v12, 1  ;;  %v2087_v36 = vrot.slane %v2086_v6, 1  ;;  %v2096_v18 = vrot.slane %v2095_v21, 1  ;;  %v2105_v50 = vrot.slane %v2104_v25, 1  ;;  %v14988_v13 = vld [vmem:[#allocation280_spill] sm:$0xff] }
 0x457   : > { %v2114_v55 = vrot.slane %v2113_v38, 1  ;;  %v2123_v0 = vrot.slane %v2122_v56, 1  ;;  %v10493_v62 = vadd.f32 %v2060_v40, %v2059_v48  ;;  %v10495_v32 = vadd.f32 %v2069_v37, %v2068_v26  ;;  %v14989_v48 = vld [vmem:[#allocation66_spill] sm:$0xff]  ;;  %v14994_v37 = vld [vmem:[#allocation283_spill] sm:$0xff] }
 0x458   : > { %v10497_v27 = vadd.f32 %v2078_v60, %v2077_v12  ;;  %v10499_v31 = vadd.f32 %v2087_v36, %v2086_v6  ;;  %v10501_v9 = vadd.f32 %v2096_v18, %v2095_v21  ;;  %v10503_v39 = vadd.f32 %v2105_v50, %v2104_v25  ;;  %v14987_v6 = vld [vmem:[#allocation65_spill] sm:$0xff]  ;;  %v14991_v21 = vld [vmem:[#allocation67_spill] sm:$0xff]  ;;  %v14996_v18 = vld [vmem:[#allocation138_spill] sm:$0xff] }
 0x459   : > { %14972 = vst [vmem:[#allocation262_spill] sm:$0xff] %v10493_v62  ;;  %14973 = vst [vmem:[#allocation263_spill] sm:$0xff] %v10495_v32  ;;  %v10505_v3 = vadd.f32 %v2114_v55, %v2113_v38  ;;  %v10507_v17 = vadd.f32 %v2123_v0, %v2122_v56  ;;  %v2125_v5 = vadd.f32 %v14981_v51, %v14980_v58  ;;  %v14990_v12 = vld [vmem:[#allocation281_spill] sm:$0xff]  ;;  %v14992_v38 = vld [vmem:[#allocation282_spill] sm:$0xff] }
 0x45a   : > { %14974 = vst [vmem:[#allocation264_spill] sm:$0xff] %v10497_v27  ;;  %14975 = vst [vmem:[#allocation265_spill] sm:$0xff] %v10499_v31  ;;  %v2134_v53 = vadd.f32 %v14983_v14, %v14982_v43  ;;  %v2143_v7 = vadd.f32 %v14985_v30, %v14984_v8  ;;  %v2152_v33 = vadd.f32 %v14987_v6, %v14986_v24  ;;  %v14993_v56 = vld [vmem:[#allocation68_spill] sm:$0xff]  ;;  %v14995_v60 = vld [vmem:[#allocation69_spill] sm:$0xff] }
 0x45b   : > { %14976 = vst [vmem:[#allocation266_spill] sm:$0xff] %v10501_v9  ;;  %14977 = vst [vmem:[#allocation267_spill] sm:$0xff] %v10503_v39  ;;  %v2161_v26 = vadd.f32 %v14989_v48, %v14988_v13  ;;  %v2170_v25 = vadd.f32 %v14991_v21, %v14990_v12  ;;  %v2179_v40 = vadd.f32 %v14993_v56, %v14992_v38  ;;  %v14997_v55 = vld [vmem:[#allocation428_spill] sm:$0xff]  ;;  %v14998_v58 = vld [vmem:[#allocation139_spill] sm:$0xff] }
 0x45c   : > { %14978 = vst [vmem:[#allocation126_spill] sm:$0xff] %v10505_v3  ;;  %14979 = vst [vmem:[#allocation127_spill] sm:$0xff] %v10507_v17  ;;  %v2188_v36 = vadd.f32 %v14995_v60, %v14994_v37  ;;  %v2126_v50 = vadd.f32 %v2125_v5, %v14996_v18  ;;  %v2135_v0 = vadd.f32 %v2134_v53, %v14997_v55  ;;  %v14999_v43 = vld [vmem:[#allocation429_spill] sm:$0xff]  ;;  %v15000_v8 = vld [vmem:[#allocation140_spill] sm:$0xff] }
 0x45d   : > { %v2144_v51 = vadd.f32 %v2143_v7, %v14998_v58  ;;  %v2153_v14 = vadd.f32 %v2152_v33, %v14999_v43  ;;  %v2162_v30 = vadd.f32 %v2161_v26, %v15000_v8  ;;  %v15001_v24 = vld [vmem:[#allocation430_spill] sm:$0xff]  ;;  %v15002_v13 = vld [vmem:[#allocation141_spill] sm:$0xff]  ;;  %v15003_v12 = vld [vmem:[#allocation431_spill] sm:$0xff] }
 0x45e   : > { %v2171_v6 = vadd.f32 %v2170_v25, %v15001_v24  ;;  %v2180_v48 = vadd.f32 %v2179_v40, %v15002_v13  ;;  %v2189_v21 = vadd.f32 %v2188_v36, %v15003_v12  ;;  %v15004_v38 = vld [vmem:[#allocation210_spill] sm:$0xff]  ;;  %v15005_v17 = vld [vmem:[#allocation493_spill] sm:$0xff]  ;;  %v15006_v60 = vld [vmem:[#allocation211_spill] sm:$0xff] }
 0x45f   : > { %v2127_v56 = vadd.f32 %v2126_v50, %v15004_v38  ;;  %v2136_v37 = vadd.f32 %v2135_v0, %v15005_v17  ;;  %v2145_v5 = vadd.f32 %v2144_v51, %v15006_v60  ;;  %v15007_v18 = vld [vmem:[#allocation494_spill] sm:$0xff]  ;;  %v15008_v55 = vld [vmem:[#allocation212_spill] sm:$0xff]  ;;  %v15009_v58 = vld [vmem:[#allocation495_spill] sm:$0xff] }
 0x460   : > { %v2154_v53 = vadd.f32 %v2153_v14, %v15007_v18  ;;  %v2163_v7 = vadd.f32 %v2162_v30, %v15008_v55  ;;  %v2172_v33 = vadd.f32 %v2171_v6, %v15009_v58  ;;  %v15010_v43 = vld [vmem:[#allocation213_spill] sm:$0xff]  ;;  %v15011_v8 = vld [vmem:[#allocation496_spill] sm:$0xff] }
 0x461   : > { %v2181_v26 = vadd.f32 %v2180_v48, %v15010_v43  ;;  %v2190_v25 = vadd.f32 %v2189_v21, %v15011_v8  ;;  %v2128_v24 = vrot.slane %v2127_v56, 4  ;;  %v2137_v40 = vrot.slane %v2136_v37, 4 }
 0x462   : > { %v2146_v13 = vrot.slane %v2145_v5, 4  ;;  %v2155_v36 = vrot.slane %v2154_v53, 4  ;;  %v2164_v12 = vrot.slane %v2163_v7, 4  ;;  %v2173_v50 = vrot.slane %v2172_v33, 4 }
 0x463   : > { %v2182_v38 = vrot.slane %v2181_v26, 4  ;;  %v2191_v17 = vrot.slane %v2190_v25, 4  ;;  %v2129_v0 = vadd.f32 %v2128_v24, %v2127_v56  ;;  %v2138_v51 = vadd.f32 %v2137_v40, %v2136_v37 }
 0x464   : > { %v2147_v60 = vadd.f32 %v2146_v13, %v2145_v5  ;;  %v2156_v14 = vadd.f32 %v2155_v36, %v2154_v53  ;;  %v2165_v18 = vadd.f32 %v2164_v12, %v2163_v7  ;;  %v2174_v30 = vadd.f32 %v2173_v50, %v2172_v33 }
 0x465   : > { %v2183_v55 = vadd.f32 %v2182_v38, %v2181_v26  ;;  %v2192_v6 = vadd.f32 %v2191_v17, %v2190_v25  ;;  %v2130_v58 = vrot.slane %v2129_v0, 2  ;;  %v2139_v48 = vrot.slane %v2138_v51, 2 }
 0x466   : > { %v2148_v43 = vrot.slane %v2147_v60, 2  ;;  %v2157_v21 = vrot.slane %v2156_v14, 2  ;;  %v2166_v8 = vrot.slane %v2165_v18, 2  ;;  %v2175_v3 = vrot.slane %v2174_v30, 2 }
 0x467   : > { %v2184_v39 = vrot.slane %v2183_v55, 2  ;;  %v2193_v9 = vrot.slane %v2192_v6, 2  ;;  %v2131_v31 = vadd.f32 %v2130_v58, %v2129_v0  ;;  %v2140_v27 = vadd.f32 %v2139_v48, %v2138_v51  ;;  %v15020_v51 = vld [vmem:[#allocation284_spill] sm:$0xff] }
 0x468   : > { %v2149_v32 = vadd.f32 %v2148_v43, %v2147_v60  ;;  %v2158_v62 = vadd.f32 %v2157_v21, %v2156_v14  ;;  %v2167_v56 = vadd.f32 %v2166_v8, %v2165_v18  ;;  %v2176_v37 = vadd.f32 %v2175_v3, %v2174_v30  ;;  %v15021_v60 = vld [vmem:[#allocation70_spill] sm:$0xff]  ;;  %v15022_v18 = vld [vmem:[#allocation285_spill] sm:$0xff]  ;;  %v15028_v48 = vld [vmem:[#allocation288_spill] sm:$0xff] }
 0x469   : > { %v2185_v5 = vadd.f32 %v2184_v39, %v2183_v55  ;;  %v2194_v53 = vadd.f32 %v2193_v9, %v2192_v6  ;;  %v2132_v7 = vrot.slane %v2131_v31, 1  ;;  %v2141_v33 = vrot.slane %v2140_v27, 1  ;;  %v15025_v55 = vld [vmem:[#allocation71_spill] sm:$0xff]  ;;  %v15029_v43 = vld [vmem:[#allocation72_spill] sm:$0xff]  ;;  %v15030_v8 = vld [vmem:[#allocation289_spill] sm:$0xff] }
 0x46a   : > { %v2150_v26 = vrot.slane %v2149_v32, 1  ;;  %v2159_v25 = vrot.slane %v2158_v62, 1  ;;  %v2168_v24 = vrot.slane %v2167_v56, 1  ;;  %v2177_v40 = vrot.slane %v2176_v37, 1  ;;  %v15026_v6 = vld [vmem:[#allocation287_spill] sm:$0xff] }
 0x46b   : > { %v2186_v13 = vrot.slane %v2185_v5, 1  ;;  %v2195_v36 = vrot.slane %v2194_v53, 1  ;;  %v10541_v12 = vadd.f32 %v2132_v7, %v2131_v31  ;;  %v10543_v50 = vadd.f32 %v2141_v33, %v2140_v27  ;;  %v15023_v31 = vld [vmem:[#allocation367_spill] sm:$0xff]  ;;  %v15024_v27 = vld [vmem:[#allocation286_spill] sm:$0xff] }
 0x46c   : > { %v10545_v38 = vadd.f32 %v2150_v26, %v2149_v32  ;;  %v10547_v17 = vadd.f32 %v2159_v25, %v2158_v62  ;;  %v10549_v0 = vadd.f32 %v2168_v24, %v2167_v56  ;;  %v10551_v39 = vadd.f32 %v2177_v40, %v2176_v37  ;;  %v15027_v62 = vld [vmem:[#allocation368_spill] sm:$0xff]  ;;  %v15031_v56 = vld [vmem:[#allocation369_spill] sm:$0xff]  ;;  %v15034_v33 = vld [vmem:[#allocation291_spill] sm:$0xff] }
 0x46d   : > { %15012 = vst [vmem:[#allocation128_spill] sm:$0xff] %v10541_v12  ;;  %15013 = vst [vmem:[#allocation129_spill] sm:$0xff] %v10543_v50  ;;  %v10553_v9 = vadd.f32 %v2186_v13, %v2185_v5  ;;  %v10555_v3 = vadd.f32 %v2195_v36, %v2194_v53  ;;  %v2197_v14 = vadd.f32 %v15021_v60, %v15020_v51  ;;  %v15032_v5 = vld [vmem:[#allocation290_spill] sm:$0xff]  ;;  %v15033_v53 = vld [vmem:[#allocation73_spill] sm:$0xff] }
 0x46e   : > { %15014 = vst [vmem:[#allocation130_spill] sm:$0xff] %v10545_v38  ;;  %15015 = vst [vmem:[#allocation131_spill] sm:$0xff] %v10547_v17  ;;  %v2206_v30 = vadd.f32 %v15023_v31, %v15022_v18  ;;  %v2215_v32 = vadd.f32 %v15025_v55, %v15024_v27  ;;  %v2224_v58 = vadd.f32 %v15027_v62, %v15026_v6  ;;  %v15035_v26 = vld [vmem:[#allocation370_spill] sm:$0xff]  ;;  %v15037_v13 = vld [vmem:[#allocation432_spill] sm:$0xff] }
 0x46f   : > { %15016 = vst [vmem:[#allocation132_spill] sm:$0xff] %v10549_v0  ;;  %15017 = vst [vmem:[#allocation133_spill] sm:$0xff] %v10551_v39  ;;  %v2233_v21 = vadd.f32 %v15029_v43, %v15028_v48  ;;  %v2242_v37 = vadd.f32 %v15031_v56, %v15030_v8  ;;  %v2251_v7 = vadd.f32 %v15033_v53, %v15032_v5  ;;  %v15036_v24 = vld [vmem:[#allocation142_spill] sm:$0xff]  ;;  %v15038_v51 = vld [vmem:[#allocation143_spill] sm:$0xff] }
 0x470   : > { %15018 = vst [vmem:[#allocation198_spill] sm:$0xff] %v10553_v9  ;;  %15019 = vst [vmem:[#allocation199_spill] sm:$0xff] %v10555_v3  ;;  %v2260_v25 = vadd.f32 %v15035_v26, %v15034_v33  ;;  %v2198_v40 = vadd.f32 %v2197_v14, %v15036_v24  ;;  %v2207_v36 = vadd.f32 %v2206_v30, %v15037_v13  ;;  %v15039_v18 = vld [vmem:[#allocation433_spill] sm:$0xff]  ;;  %v15040_v27 = vld [vmem:[#allocation144_spill] sm:$0xff] }
 0x471   : > { %v2216_v60 = vadd.f32 %v2215_v32, %v15038_v51  ;;  %v2225_v31 = vadd.f32 %v2224_v58, %v15039_v18  ;;  %v2234_v55 = vadd.f32 %v2233_v21, %v15040_v27  ;;  %v15041_v6 = vld [vmem:[#allocation434_spill] sm:$0xff]  ;;  %v15042_v48 = vld [vmem:[#allocation145_spill] sm:$0xff]  ;;  %v15043_v8 = vld [vmem:[#allocation435_spill] sm:$0xff] }
 0x472   : > { %v2243_v62 = vadd.f32 %v2242_v37, %v15041_v6  ;;  %v2252_v43 = vadd.f32 %v2251_v7, %v15042_v48  ;;  %v2261_v56 = vadd.f32 %v2260_v25, %v15043_v8  ;;  %v15044_v5 = vld [vmem:[#allocation214_spill] sm:$0xff]  ;;  %v15045_v3 = vld [vmem:[#allocation497_spill] sm:$0xff]  ;;  %v15046_v26 = vld [vmem:[#allocation215_spill] sm:$0xff] }
 0x473   : > { %v2199_v53 = vadd.f32 %v2198_v40, %v15044_v5  ;;  %v2208_v33 = vadd.f32 %v2207_v36, %v15045_v3  ;;  %v2217_v14 = vadd.f32 %v2216_v60, %v15046_v26  ;;  %v15047_v24 = vld [vmem:[#allocation498_spill] sm:$0xff]  ;;  %v15048_v13 = vld [vmem:[#allocation216_spill] sm:$0xff]  ;;  %v15049_v51 = vld [vmem:[#allocation499_spill] sm:$0xff] }
 0x474   : > { %v2226_v30 = vadd.f32 %v2225_v31, %v15047_v24  ;;  %v2235_v32 = vadd.f32 %v2234_v55, %v15048_v13  ;;  %v2244_v58 = vadd.f32 %v2243_v62, %v15049_v51  ;;  %v15050_v18 = vld [vmem:[#allocation217_spill] sm:$0xff]  ;;  %v15051_v27 = vld [vmem:[#allocation500_spill] sm:$0xff] }
 0x475   : > { %v2253_v21 = vadd.f32 %v2252_v43, %v15050_v18  ;;  %v2262_v37 = vadd.f32 %v2261_v56, %v15051_v27  ;;  %v2200_v6 = vrot.slane %v2199_v53, 4  ;;  %v2209_v7 = vrot.slane %v2208_v33, 4 }
 0x476   : > { %v2218_v48 = vrot.slane %v2217_v14, 4  ;;  %v2227_v25 = vrot.slane %v2226_v30, 4  ;;  %v2236_v8 = vrot.slane %v2235_v32, 4  ;;  %v2245_v40 = vrot.slane %v2244_v58, 4 }
 0x477   : > { %v2254_v5 = vrot.slane %v2253_v21, 4  ;;  %v2263_v3 = vrot.slane %v2262_v37, 4  ;;  %v2201_v36 = vadd.f32 %v2200_v6, %v2199_v53  ;;  %v2210_v60 = vadd.f32 %v2209_v7, %v2208_v33 }
 0x478   : > { %v2219_v26 = vadd.f32 %v2218_v48, %v2217_v14  ;;  %v2228_v31 = vadd.f32 %v2227_v25, %v2226_v30  ;;  %v2237_v24 = vadd.f32 %v2236_v8, %v2235_v32  ;;  %v2246_v55 = vadd.f32 %v2245_v40, %v2244_v58 }
 0x479   : > { %v2255_v13 = vadd.f32 %v2254_v5, %v2253_v21  ;;  %v2264_v62 = vadd.f32 %v2263_v3, %v2262_v37  ;;  %v2202_v51 = vrot.slane %v2201_v36, 2  ;;  %v2211_v43 = vrot.slane %v2210_v60, 2 }
 0x47a   : > { %v2220_v18 = vrot.slane %v2219_v26, 2  ;;  %v2229_v56 = vrot.slane %v2228_v31, 2  ;;  %v2238_v27 = vrot.slane %v2237_v24, 2  ;;  %v2247_v9 = vrot.slane %v2246_v55, 2 }
 0x47b   : > { %v2256_v39 = vrot.slane %v2255_v13, 2  ;;  %v2265_v0 = vrot.slane %v2264_v62, 2  ;;  %v2203_v17 = vadd.f32 %v2202_v51, %v2201_v36  ;;  %v2212_v38 = vadd.f32 %v2211_v43, %v2210_v60  ;;  %v15060_v60 = vld [vmem:[#allocation292_spill] sm:$0xff] }
 0x47c   : > { %v2221_v50 = vadd.f32 %v2220_v18, %v2219_v26  ;;  %v2230_v12 = vadd.f32 %v2229_v56, %v2228_v31  ;;  %v2239_v53 = vadd.f32 %v2238_v27, %v2237_v24  ;;  %v2248_v33 = vadd.f32 %v2247_v9, %v2246_v55  ;;  %v15061_v26 = vld [vmem:[#allocation74_spill] sm:$0xff]  ;;  %v15062_v24 = vld [vmem:[#allocation293_spill] sm:$0xff]  ;;  %v15068_v43 = vld [vmem:[#allocation296_spill] sm:$0xff] }
 0x47d   : > { %v2257_v14 = vadd.f32 %v2256_v39, %v2255_v13  ;;  %v2266_v30 = vadd.f32 %v2265_v0, %v2264_v62  ;;  %v2204_v32 = vrot.slane %v2203_v17, 1  ;;  %v2213_v58 = vrot.slane %v2212_v38, 1  ;;  %v15065_v13 = vld [vmem:[#allocation75_spill] sm:$0xff]  ;;  %v15069_v18 = vld [vmem:[#allocation76_spill] sm:$0xff]  ;;  %v15070_v27 = vld [vmem:[#allocation297_spill] sm:$0xff] }
 0x47e   : > { %v2222_v21 = vrot.slane %v2221_v50, 1  ;;  %v2231_v37 = vrot.slane %v2230_v12, 1  ;;  %v2240_v6 = vrot.slane %v2239_v53, 1  ;;  %v2249_v7 = vrot.slane %v2248_v33, 1  ;;  %v15066_v62 = vld [vmem:[#allocation295_spill] sm:$0xff] }
 0x47f   : > { %v2258_v48 = vrot.slane %v2257_v14, 1  ;;  %v2267_v25 = vrot.slane %v2266_v30, 1  ;;  %v10589_v8 = vadd.f32 %v2204_v32, %v2203_v17  ;;  %v10591_v40 = vadd.f32 %v2213_v58, %v2212_v38  ;;  %v15063_v17 = vld [vmem:[#allocation371_spill] sm:$0xff]  ;;  %v15064_v38 = vld [vmem:[#allocation294_spill] sm:$0xff] }
 0x480   : > { %v10593_v5 = vadd.f32 %v2222_v21, %v2221_v50  ;;  %v10595_v3 = vadd.f32 %v2231_v37, %v2230_v12  ;;  %v10597_v36 = vadd.f32 %v2240_v6, %v2239_v53  ;;  %v10599_v39 = vadd.f32 %v2249_v7, %v2248_v33  ;;  %v15067_v12 = vld [vmem:[#allocation372_spill] sm:$0xff]  ;;  %v15071_v53 = vld [vmem:[#allocation373_spill] sm:$0xff]  ;;  %v15074_v58 = vld [vmem:[#allocation299_spill] sm:$0xff] }
 0x481   : > { %15052 = vst [vmem:[#allocation200_spill] sm:$0xff] %v10589_v8  ;;  %15053 = vst [vmem:[#allocation201_spill] sm:$0xff] %v10591_v40  ;;  %v10601_v0 = vadd.f32 %v2258_v48, %v2257_v14  ;;  %v10603_v9 = vadd.f32 %v2267_v25, %v2266_v30  ;;  %v2269_v31 = vadd.f32 %v15061_v26, %v15060_v60  ;;  %v15072_v14 = vld [vmem:[#allocation298_spill] sm:$0xff]  ;;  %v15073_v30 = vld [vmem:[#allocation77_spill] sm:$0xff] }
 0x482   : > { %15054 = vst [vmem:[#allocation202_spill] sm:$0xff] %v10593_v5  ;;  %15055 = vst [vmem:[#allocation203_spill] sm:$0xff] %v10595_v3  ;;  %v2278_v55 = vadd.f32 %v15063_v17, %v15062_v24  ;;  %v2287_v50 = vadd.f32 %v15065_v13, %v15064_v38  ;;  %v2296_v51 = vadd.f32 %v15067_v12, %v15066_v62  ;;  %v15075_v21 = vld [vmem:[#allocation374_spill] sm:$0xff]  ;;  %v15077_v48 = vld [vmem:[#allocation436_spill] sm:$0xff] }
 0x483   : > { %15056 = vst [vmem:[#allocation204_spill] sm:$0xff] %v10597_v36  ;;  %15057 = vst [vmem:[#allocation205_spill] sm:$0xff] %v10599_v39  ;;  %v2305_v56 = vadd.f32 %v15069_v18, %v15068_v43  ;;  %v2314_v33 = vadd.f32 %v15071_v53, %v15070_v27  ;;  %v2323_v32 = vadd.f32 %v15073_v30, %v15072_v14  ;;  %v15076_v6 = vld [vmem:[#allocation146_spill] sm:$0xff]  ;;  %v15078_v60 = vld [vmem:[#allocation147_spill] sm:$0xff] }
 0x484   : > { %15058 = vst [vmem:[#allocation268_spill] sm:$0xff] %v10601_v0  ;;  %15059 = vst [vmem:[#allocation54_spill] sm:$0xff] %v10603_v9  ;;  %v2332_v37 = vadd.f32 %v15075_v21, %v15074_v58  ;;  %v2270_v7 = vadd.f32 %v2269_v31, %v15076_v6  ;;  %v2279_v25 = vadd.f32 %v2278_v55, %v15077_v48  ;;  %v15079_v24 = vld [vmem:[#allocation437_spill] sm:$0xff]  ;;  %v15080_v38 = vld [vmem:[#allocation148_spill] sm:$0xff] }
 0x485   : > { %v2288_v26 = vadd.f32 %v2287_v50, %v15078_v60  ;;  %v2297_v17 = vadd.f32 %v2296_v51, %v15079_v24  ;;  %v2306_v13 = vadd.f32 %v2305_v56, %v15080_v38  ;;  %v15081_v62 = vld [vmem:[#allocation438_spill] sm:$0xff]  ;;  %v15082_v43 = vld [vmem:[#allocation149_spill] sm:$0xff]  ;;  %v15083_v27 = vld [vmem:[#allocation439_spill] sm:$0xff] }
 0x486   : > { %v2315_v12 = vadd.f32 %v2314_v33, %v15081_v62  ;;  %v2324_v18 = vadd.f32 %v2323_v32, %v15082_v43  ;;  %v2333_v53 = vadd.f32 %v2332_v37, %v15083_v27  ;;  %v15084_v14 = vld [vmem:[#allocation218_spill] sm:$0xff]  ;;  %v15085_v9 = vld [vmem:[#allocation501_spill] sm:$0xff]  ;;  %v15086_v21 = vld [vmem:[#allocation219_spill] sm:$0xff] }
 0x487   : > { %v2271_v30 = vadd.f32 %v2270_v7, %v15084_v14  ;;  %v2280_v58 = vadd.f32 %v2279_v25, %v15085_v9  ;;  %v2289_v31 = vadd.f32 %v2288_v26, %v15086_v21  ;;  %v15087_v6 = vld [vmem:[#allocation502_spill] sm:$0xff]  ;;  %v15088_v48 = vld [vmem:[#allocation220_spill] sm:$0xff]  ;;  %v15089_v60 = vld [vmem:[#allocation503_spill] sm:$0xff] }
 0x488   : > { %v2298_v55 = vadd.f32 %v2297_v17, %v15087_v6  ;;  %v2307_v50 = vadd.f32 %v2306_v13, %v15088_v48  ;;  %v2316_v51 = vadd.f32 %v2315_v12, %v15089_v60  ;;  %v15090_v24 = vld [vmem:[#allocation221_spill] sm:$0xff]  ;;  %v15091_v38 = vld [vmem:[#allocation504_spill] sm:$0xff] }
 0x489   : > { %v2325_v56 = vadd.f32 %v2324_v18, %v15090_v24  ;;  %v2334_v33 = vadd.f32 %v2333_v53, %v15091_v38  ;;  %v2272_v62 = vrot.slane %v2271_v30, 4  ;;  %v2281_v32 = vrot.slane %v2280_v58, 4 }
 0x48a   : > { %v2290_v43 = vrot.slane %v2289_v31, 4  ;;  %v2299_v37 = vrot.slane %v2298_v55, 4  ;;  %v2308_v27 = vrot.slane %v2307_v50, 4  ;;  %v2317_v7 = vrot.slane %v2316_v51, 4 }
 0x48b   : > { %v2326_v14 = vrot.slane %v2325_v56, 4  ;;  %v2335_v9 = vrot.slane %v2334_v33, 4  ;;  %v2273_v25 = vadd.f32 %v2272_v62, %v2271_v30  ;;  %v2282_v26 = vadd.f32 %v2281_v32, %v2280_v58 }
 0x48c   : > { %v2291_v21 = vadd.f32 %v2290_v43, %v2289_v31  ;;  %v2300_v17 = vadd.f32 %v2299_v37, %v2298_v55  ;;  %v2309_v6 = vadd.f32 %v2308_v27, %v2307_v50  ;;  %v2318_v13 = vadd.f32 %v2317_v7, %v2316_v51 }
 0x48d   : > { %v2327_v48 = vadd.f32 %v2326_v14, %v2325_v56  ;;  %v2336_v12 = vadd.f32 %v2335_v9, %v2334_v33  ;;  %v2274_v60 = vrot.slane %v2273_v25, 2  ;;  %v2283_v18 = vrot.slane %v2282_v26, 2 }
 0x48e   : > { %v2292_v24 = vrot.slane %v2291_v21, 2  ;;  %v2301_v53 = vrot.slane %v2300_v17, 2  ;;  %v2310_v38 = vrot.slane %v2309_v6, 2  ;;  %v2319_v0 = vrot.slane %v2318_v13, 2 }
 0x48f   : > { %v2328_v39 = vrot.slane %v2327_v48, 2  ;;  %v2337_v36 = vrot.slane %v2336_v12, 2  ;;  %v2275_v3 = vadd.f32 %v2274_v60, %v2273_v25  ;;  %v2284_v5 = vadd.f32 %v2283_v18, %v2282_v26  ;;  %v15100_v26 = vld [vmem:[#allocation300_spill] sm:$0xff] }
 0x490   : > { %v2293_v40 = vadd.f32 %v2292_v24, %v2291_v21  ;;  %v2302_v8 = vadd.f32 %v2301_v53, %v2300_v17  ;;  %v2311_v30 = vadd.f32 %v2310_v38, %v2309_v6  ;;  %v2320_v58 = vadd.f32 %v2319_v0, %v2318_v13  ;;  %v15101_v21 = vld [vmem:[#allocation78_spill] sm:$0xff]  ;;  %v15102_v6 = vld [vmem:[#allocation301_spill] sm:$0xff]  ;;  %v15108_v18 = vld [vmem:[#allocation304_spill] sm:$0xff] }
 0x491   : > { %v2329_v31 = vadd.f32 %v2328_v39, %v2327_v48  ;;  %v2338_v55 = vadd.f32 %v2337_v36, %v2336_v12  ;;  %v2276_v50 = vrot.slane %v2275_v3, 1  ;;  %v2285_v51 = vrot.slane %v2284_v5, 1  ;;  %v15105_v48 = vld [vmem:[#allocation79_spill] sm:$0xff]  ;;  %v15109_v24 = vld [vmem:[#allocation80_spill] sm:$0xff]  ;;  %v15110_v38 = vld [vmem:[#allocation305_spill] sm:$0xff] }
 0x492   : > { %v2294_v56 = vrot.slane %v2293_v40, 1  ;;  %v2303_v33 = vrot.slane %v2302_v8, 1  ;;  %v2312_v62 = vrot.slane %v2311_v30, 1  ;;  %v2321_v32 = vrot.slane %v2320_v58, 1  ;;  %v15106_v12 = vld [vmem:[#allocation303_spill] sm:$0xff] }
 0x493   : > { %v2330_v43 = vrot.slane %v2329_v31, 1  ;;  %v2339_v37 = vrot.slane %v2338_v55, 1  ;;  %v10637_v27 = vadd.f32 %v2276_v50, %v2275_v3  ;;  %v10639_v7 = vadd.f32 %v2285_v51, %v2284_v5  ;;  %v15103_v3 = vld [vmem:[#allocation375_spill] sm:$0xff]  ;;  %v15104_v5 = vld [vmem:[#allocation302_spill] sm:$0xff] }
 0x494   : > { %v10641_v14 = vadd.f32 %v2294_v56, %v2293_v40  ;;  %v10643_v9 = vadd.f32 %v2303_v33, %v2302_v8  ;;  %v10645_v25 = vadd.f32 %v2312_v62, %v2311_v30  ;;  %v10647_v39 = vadd.f32 %v2321_v32, %v2320_v58  ;;  %v15107_v8 = vld [vmem:[#allocation376_spill] sm:$0xff]  ;;  %v15111_v30 = vld [vmem:[#allocation377_spill] sm:$0xff]  ;;  %v15114_v51 = vld [vmem:[#allocation307_spill] sm:$0xff] }
 0x495   : > { %15092 = vst [vmem:[#allocation269_spill] sm:$0xff] %v10637_v27  ;;  %15093 = vst [vmem:[#allocation55_spill] sm:$0xff] %v10639_v7  ;;  %v10649_v36 = vadd.f32 %v2330_v43, %v2329_v31  ;;  %v10651_v0 = vadd.f32 %v2339_v37, %v2338_v55  ;;  %v2341_v17 = vadd.f32 %v15101_v21, %v15100_v26  ;;  %v15112_v31 = vld [vmem:[#allocation306_spill] sm:$0xff]  ;;  %v15113_v55 = vld [vmem:[#allocation81_spill] sm:$0xff] }
 0x496   : > { %15094 = vst [vmem:[#allocation270_spill] sm:$0xff] %v10641_v14  ;;  %15095 = vst [vmem:[#allocation56_spill] sm:$0xff] %v10643_v9  ;;  %v2350_v13 = vadd.f32 %v15103_v3, %v15102_v6  ;;  %v2359_v40 = vadd.f32 %v15105_v48, %v15104_v5  ;;  %v2368_v60 = vadd.f32 %v15107_v8, %v15106_v12  ;;  %v15115_v56 = vld [vmem:[#allocation378_spill] sm:$0xff]  ;;  %v15117_v43 = vld [vmem:[#allocation440_spill] sm:$0xff] }
 0x497   : > { %15096 = vst [vmem:[#allocation271_spill] sm:$0xff] %v10645_v25  ;;  %15097 = vst [vmem:[#allocation57_spill] sm:$0xff] %v10647_v39  ;;  %v2377_v53 = vadd.f32 %v15109_v24, %v15108_v18  ;;  %v2386_v58 = vadd.f32 %v15111_v30, %v15110_v38  ;;  %v2395_v50 = vadd.f32 %v15113_v55, %v15112_v31  ;;  %v15116_v62 = vld [vmem:[#allocation150_spill] sm:$0xff]  ;;  %v15118_v26 = vld [vmem:[#allocation151_spill] sm:$0xff] }
 0x498   : > { %15098 = vst [vmem:[#allocation272_spill] sm:$0xff] %v10649_v36  ;;  %15099 = vst [vmem:[#allocation58_spill] sm:$0xff] %v10651_v0  ;;  %v2404_v33 = vadd.f32 %v15115_v56, %v15114_v51  ;;  %v2342_v32 = vadd.f32 %v2341_v17, %v15116_v62  ;;  %v2351_v37 = vadd.f32 %v2350_v13, %v15117_v43  ;;  %v15119_v6 = vld [vmem:[#allocation441_spill] sm:$0xff]  ;;  %v15120_v5 = vld [vmem:[#allocation152_spill] sm:$0xff] }
 0x499   : > { %v2360_v21 = vadd.f32 %v2359_v40, %v15118_v26  ;;  %v2369_v3 = vadd.f32 %v2368_v60, %v15119_v6  ;;  %v2378_v48 = vadd.f32 %v2377_v53, %v15120_v5  ;;  %v15121_v12 = vld [vmem:[#allocation442_spill] sm:$0xff]  ;;  %v15122_v18 = vld [vmem:[#allocation153_spill] sm:$0xff]  ;;  %v15123_v38 = vld [vmem:[#allocation443_spill] sm:$0xff] }
 0x49a   : > { %v2387_v8 = vadd.f32 %v2386_v58, %v15121_v12  ;;  %v2396_v24 = vadd.f32 %v2395_v50, %v15122_v18  ;;  %v2405_v30 = vadd.f32 %v2404_v33, %v15123_v38  ;;  %v15124_v31 = vld [vmem:[#allocation222_spill] sm:$0xff]  ;;  %v15125_v0 = vld [vmem:[#allocation505_spill] sm:$0xff]  ;;  %v15126_v56 = vld [vmem:[#allocation223_spill] sm:$0xff] }
 0x49b   : > { %v2343_v55 = vadd.f32 %v2342_v32, %v15124_v31  ;;  %v2352_v51 = vadd.f32 %v2351_v37, %v15125_v0  ;;  %v2361_v17 = vadd.f32 %v2360_v21, %v15126_v56  ;;  %v15127_v62 = vld [vmem:[#allocation506_spill] sm:$0xff]  ;;  %v15128_v43 = vld [vmem:[#allocation224_spill] sm:$0xff]  ;;  %v15129_v26 = vld [vmem:[#allocation507_spill] sm:$0xff] }
 0x49c   : > { %v2370_v13 = vadd.f32 %v2369_v3, %v15127_v62  ;;  %v2379_v40 = vadd.f32 %v2378_v48, %v15128_v43  ;;  %v2388_v60 = vadd.f32 %v2387_v8, %v15129_v26  ;;  %v15130_v6 = vld [vmem:[#allocation225_spill] sm:$0xff]  ;;  %v15131_v5 = vld [vmem:[#allocation508_spill] sm:$0xff] }
 0x49d   : > { %v2397_v53 = vadd.f32 %v2396_v24, %v15130_v6  ;;  %v2406_v58 = vadd.f32 %v2405_v30, %v15131_v5  ;;  %v2344_v12 = vrot.slane %v2343_v55, 4  ;;  %v2353_v50 = vrot.slane %v2352_v51, 4 }
 0x49e   : > { %v2362_v18 = vrot.slane %v2361_v17, 4  ;;  %v2371_v33 = vrot.slane %v2370_v13, 4  ;;  %v2380_v38 = vrot.slane %v2379_v40, 4  ;;  %v2389_v32 = vrot.slane %v2388_v60, 4 }
 0x49f   : > { %v2398_v31 = vrot.slane %v2397_v53, 4  ;;  %v2407_v0 = vrot.slane %v2406_v58, 4  ;;  %v2345_v37 = vadd.f32 %v2344_v12, %v2343_v55  ;;  %v2354_v21 = vadd.f32 %v2353_v50, %v2352_v51 }
 0x4a0   : > { %v2363_v56 = vadd.f32 %v2362_v18, %v2361_v17  ;;  %v2372_v3 = vadd.f32 %v2371_v33, %v2370_v13  ;;  %v2381_v62 = vadd.f32 %v2380_v38, %v2379_v40  ;;  %v2390_v48 = vadd.f32 %v2389_v32, %v2388_v60 }
 0x4a1   : > { %v2399_v43 = vadd.f32 %v2398_v31, %v2397_v53  ;;  %v2408_v8 = vadd.f32 %v2407_v0, %v2406_v58  ;;  %v2346_v26 = vrot.slane %v2345_v37, 2  ;;  %v2355_v24 = vrot.slane %v2354_v21, 2 }
 0x4a2   : > { %v2364_v6 = vrot.slane %v2363_v56, 2  ;;  %v2373_v30 = vrot.slane %v2372_v3, 2  ;;  %v2382_v5 = vrot.slane %v2381_v62, 2  ;;  %v2391_v36 = vrot.slane %v2390_v48, 2 }
 0x4a3   : > { %v2400_v39 = vrot.slane %v2399_v43, 2  ;;  %v2409_v25 = vrot.slane %v2408_v8, 2  ;;  %v2347_v9 = vadd.f32 %v2346_v26, %v2345_v37  ;;  %v2356_v14 = vadd.f32 %v2355_v24, %v2354_v21  ;;  %v15140_v21 = vld [vmem:[#allocation308_spill] sm:$0xff] }
 0x4a4   : > { %v2365_v7 = vadd.f32 %v2364_v6, %v2363_v56  ;;  %v2374_v27 = vadd.f32 %v2373_v30, %v2372_v3  ;;  %v2383_v55 = vadd.f32 %v2382_v5, %v2381_v62  ;;  %v2392_v51 = vadd.f32 %v2391_v36, %v2390_v48  ;;  %v15141_v56 = vld [vmem:[#allocation82_spill] sm:$0xff]  ;;  %v15142_v62 = vld [vmem:[#allocation309_spill] sm:$0xff]  ;;  %v15148_v24 = vld [vmem:[#allocation312_spill] sm:$0xff] }
 0x4a5   : > { %v2401_v17 = vadd.f32 %v2400_v39, %v2399_v43  ;;  %v2410_v13 = vadd.f32 %v2409_v25, %v2408_v8  ;;  %v2348_v40 = vrot.slane %v2347_v9, 1  ;;  %v2357_v60 = vrot.slane %v2356_v14, 1  ;;  %v15145_v43 = vld [vmem:[#allocation83_spill] sm:$0xff]  ;;  %v15149_v6 = vld [vmem:[#allocation84_spill] sm:$0xff]  ;;  %v15150_v5 = vld [vmem:[#allocation313_spill] sm:$0xff] }
 0x4a6   : > { %v2366_v53 = vrot.slane %v2365_v7, 1  ;;  %v2375_v58 = vrot.slane %v2374_v27, 1  ;;  %v2384_v12 = vrot.slane %v2383_v55, 1  ;;  %v2393_v50 = vrot.slane %v2392_v51, 1  ;;  %v15146_v8 = vld [vmem:[#allocation311_spill] sm:$0xff] }
 0x4a7   : > { %v2402_v18 = vrot.slane %v2401_v17, 1  ;;  %v2411_v33 = vrot.slane %v2410_v13, 1  ;;  %v10685_v38 = vadd.f32 %v2348_v40, %v2347_v9  ;;  %v10687_v32 = vadd.f32 %v2357_v60, %v2356_v14  ;;  %v15143_v9 = vld [vmem:[#allocation379_spill] sm:$0xff]  ;;  %v15144_v14 = vld [vmem:[#allocation310_spill] sm:$0xff] }
 0x4a8   : > { %v10689_v31 = vadd.f32 %v2366_v53, %v2365_v7  ;;  %v10691_v0 = vadd.f32 %v2375_v58, %v2374_v27  ;;  %v10693_v37 = vadd.f32 %v2384_v12, %v2383_v55  ;;  %v10695_v39 = vadd.f32 %v2393_v50, %v2392_v51  ;;  %v15147_v27 = vld [vmem:[#allocation380_spill] sm:$0xff]  ;;  %v15151_v55 = vld [vmem:[#allocation381_spill] sm:$0xff]  ;;  %v15154_v60 = vld [vmem:[#allocation315_spill] sm:$0xff] }
 0x4a9   : > { %15132 = vst [vmem:[#allocation273_spill] sm:$0xff] %v10685_v38  ;;  %15133 = vst [vmem:[#allocation59_spill] sm:$0xff] %v10687_v32  ;;  %v10697_v25 = vadd.f32 %v2402_v18, %v2401_v17  ;;  %v10699_v36 = vadd.f32 %v2411_v33, %v2410_v13  ;;  %v2413_v3 = vadd.f32 %v15141_v56, %v15140_v21  ;;  %v15152_v17 = vld [vmem:[#allocation314_spill] sm:$0xff]  ;;  %v15153_v13 = vld [vmem:[#allocation85_spill] sm:$0xff] }
 0x4aa   : > { %15134 = vst [vmem:[#allocation274_spill] sm:$0xff] %v10689_v31  ;;  %15135 = vst [vmem:[#allocation60_spill] sm:$0xff] %v10691_v0  ;;  %v2422_v48 = vadd.f32 %v15143_v9, %v15142_v62  ;;  %v2431_v7 = vadd.f32 %v15145_v43, %v15144_v14  ;;  %v2440_v26 = vadd.f32 %v15147_v27, %v15146_v8  ;;  %v15155_v53 = vld [vmem:[#allocation382_spill] sm:$0xff]  ;;  %v15157_v18 = vld [vmem:[#allocation444_spill] sm:$0xff] }
 0x4ab   : > { %15136 = vst [vmem:[#allocation275_spill] sm:$0xff] %v10693_v37  ;;  %15137 = vst [vmem:[#allocation61_spill] sm:$0xff] %v10695_v39  ;;  %v2449_v30 = vadd.f32 %v15149_v6, %v15148_v24  ;;  %v2458_v51 = vadd.f32 %v15151_v55, %v15150_v5  ;;  %v2467_v40 = vadd.f32 %v15153_v13, %v15152_v17  ;;  %v15156_v12 = vld [vmem:[#allocation154_spill] sm:$0xff]  ;;  %v15158_v21 = vld [vmem:[#allocation155_spill] sm:$0xff] }
 0x4ac   : > { %15138 = vst [vmem:[#allocation134_spill] sm:$0xff] %v10697_v25  ;;  %15139 = vst [vmem:[#allocation424_spill] sm:$0xff] %v10699_v36  ;;  %v2476_v58 = vadd.f32 %v15155_v53, %v15154_v60  ;;  %v2414_v50 = vadd.f32 %v2413_v3, %v15156_v12  ;;  %v2423_v33 = vadd.f32 %v2422_v48, %v15157_v18  ;;  %v15159_v62 = vld [vmem:[#allocation445_spill] sm:$0xff]  ;;  %v15160_v14 = vld [vmem:[#allocation156_spill] sm:$0xff] }
 0x4ad   : > { %v2432_v56 = vadd.f32 %v2431_v7, %v15158_v21  ;;  %v2441_v9 = vadd.f32 %v2440_v26, %v15159_v62  ;;  %v2450_v43 = vadd.f32 %v2449_v30, %v15160_v14  ;;  %v15161_v8 = vld [vmem:[#allocation446_spill] sm:$0xff]  ;;  %v15162_v24 = vld [vmem:[#allocation157_spill] sm:$0xff]  ;;  %v15163_v5 = vld [vmem:[#allocation447_spill] sm:$0xff] }
 0x4ae   : > { %v2459_v27 = vadd.f32 %v2458_v51, %v15161_v8  ;;  %v2468_v6 = vadd.f32 %v2467_v40, %v15162_v24  ;;  %v2477_v55 = vadd.f32 %v2476_v58, %v15163_v5  ;;  %v15164_v17 = vld [vmem:[#allocation226_spill] sm:$0xff]  ;;  %v15165_v36 = vld [vmem:[#allocation509_spill] sm:$0xff]  ;;  %v15166_v53 = vld [vmem:[#allocation227_spill] sm:$0xff] }
 0x4af   : > { %v2415_v13 = vadd.f32 %v2414_v50, %v15164_v17  ;;  %v2424_v60 = vadd.f32 %v2423_v33, %v15165_v36  ;;  %v2433_v3 = vadd.f32 %v2432_v56, %v15166_v53  ;;  %v15167_v12 = vld [vmem:[#allocation510_spill] sm:$0xff]  ;;  %v15168_v18 = vld [vmem:[#allocation228_spill] sm:$0xff]  ;;  %v15169_v21 = vld [vmem:[#allocation511_spill] sm:$0xff] }
 0x4b0   : > { %v2442_v48 = vadd.f32 %v2441_v9, %v15167_v12  ;;  %v2451_v7 = vadd.f32 %v2450_v43, %v15168_v18  ;;  %v2460_v26 = vadd.f32 %v2459_v27, %v15169_v21  ;;  %v15170_v62 = vld [vmem:[#allocation229_spill] sm:$0xff]  ;;  %v15171_v14 = vld [vmem:[#allocation512_spill] sm:$0xff] }
 0x4b1   : > { %v2469_v30 = vadd.f32 %v2468_v6, %v15170_v62  ;;  %v2478_v51 = vadd.f32 %v2477_v55, %v15171_v14  ;;  %v2416_v8 = vrot.slane %v2415_v13, 4  ;;  %v2425_v40 = vrot.slane %v2424_v60, 4 }
 0x4b2   : > { %v2434_v24 = vrot.slane %v2433_v3, 4  ;;  %v2443_v58 = vrot.slane %v2442_v48, 4  ;;  %v2452_v5 = vrot.slane %v2451_v7, 4  ;;  %v2461_v50 = vrot.slane %v2460_v26, 4 }
 0x4b3   : > { %v2470_v17 = vrot.slane %v2469_v30, 4  ;;  %v2479_v36 = vrot.slane %v2478_v51, 4  ;;  %v2417_v33 = vadd.f32 %v2416_v8, %v2415_v13  ;;  %v2426_v56 = vadd.f32 %v2425_v40, %v2424_v60 }
 0x4b4   : > { %v2435_v53 = vadd.f32 %v2434_v24, %v2433_v3  ;;  %v2444_v9 = vadd.f32 %v2443_v58, %v2442_v48  ;;  %v2453_v12 = vadd.f32 %v2452_v5, %v2451_v7  ;;  %v2462_v43 = vadd.f32 %v2461_v50, %v2460_v26 }
 0x4b5   : > { %v2471_v18 = vadd.f32 %v2470_v17, %v2469_v30  ;;  %v2480_v27 = vadd.f32 %v2479_v36, %v2478_v51  ;;  %v2418_v21 = vrot.slane %v2417_v33, 2  ;;  %v2427_v6 = vrot.slane %v2426_v56, 2 }
 0x4b6   : > { %v2436_v62 = vrot.slane %v2435_v53, 2  ;;  %v2445_v55 = vrot.slane %v2444_v9, 2  ;;  %v2454_v14 = vrot.slane %v2453_v12, 2  ;;  %v2463_v25 = vrot.slane %v2462_v43, 2 }
 0x4b7   : > { %v2472_v39 = vrot.slane %v2471_v18, 2  ;;  %v2481_v37 = vrot.slane %v2480_v27, 2  ;;  %v2419_v0 = vadd.f32 %v2418_v21, %v2417_v33  ;;  %v2428_v31 = vadd.f32 %v2427_v6, %v2426_v56  ;;  %v15180_v56 = vld [vmem:[#allocation316_spill] sm:$0xff] }
 0x4b8   : > { %v2437_v32 = vadd.f32 %v2436_v62, %v2435_v53  ;;  %v2446_v38 = vadd.f32 %v2445_v55, %v2444_v9  ;;  %v2455_v13 = vadd.f32 %v2454_v14, %v2453_v12  ;;  %v2464_v60 = vadd.f32 %v2463_v25, %v2462_v43  ;;  %v15181_v53 = vld [vmem:[#allocation86_spill] sm:$0xff]  ;;  %v15182_v12 = vld [vmem:[#allocation317_spill] sm:$0xff]  ;;  %v15188_v6 = vld [vmem:[#allocation320_spill] sm:$0xff] }
 0x4b9   : > { %v2473_v3 = vadd.f32 %v2472_v39, %v2471_v18  ;;  %v2482_v48 = vadd.f32 %v2481_v37, %v2480_v27  ;;  %v2420_v7 = vrot.slane %v2419_v0, 1  ;;  %v2429_v26 = vrot.slane %v2428_v31, 1  ;;  %v15185_v18 = vld [vmem:[#allocation87_spill] sm:$0xff]  ;;  %v15189_v62 = vld [vmem:[#allocation88_spill] sm:$0xff]  ;;  %v15190_v14 = vld [vmem:[#allocation321_spill] sm:$0xff] }
 0x4ba   : > { %v2438_v30 = vrot.slane %v2437_v32, 1  ;;  %v2447_v51 = vrot.slane %v2446_v38, 1  ;;  %v2456_v8 = vrot.slane %v2455_v13, 1  ;;  %v2465_v40 = vrot.slane %v2464_v60, 1  ;;  %v15186_v27 = vld [vmem:[#allocation319_spill] sm:$0xff] }
 0x4bb   : > { %v2474_v24 = vrot.slane %v2473_v3, 1  ;;  %v2483_v58 = vrot.slane %v2482_v48, 1  ;;  %v10733_v5 = vadd.f32 %v2420_v7, %v2419_v0  ;;  %v10735_v50 = vadd.f32 %v2429_v26, %v2428_v31  ;;  %v15183_v0 = vld [vmem:[#allocation383_spill] sm:$0xff]  ;;  %v15184_v31 = vld [vmem:[#allocation318_spill] sm:$0xff] }
 0x4bc   : > { %v10737_v17 = vadd.f32 %v2438_v30, %v2437_v32  ;;  %v10739_v36 = vadd.f32 %v2447_v51, %v2446_v38  ;;  %v10741_v33 = vadd.f32 %v2456_v8, %v2455_v13  ;;  %v10743_v39 = vadd.f32 %v2465_v40, %v2464_v60  ;;  %v15187_v38 = vld [vmem:[#allocation384_spill] sm:$0xff]  ;;  %v15191_v13 = vld [vmem:[#allocation385_spill] sm:$0xff]  ;;  %v15194_v26 = vld [vmem:[#allocation323_spill] sm:$0xff] }
 0x4bd   : > { %15172 = vst [vmem:[#allocation135_spill] sm:$0xff] %v10733_v5  ;;  %15173 = vst [vmem:[#allocation425_spill] sm:$0xff] %v10735_v50  ;;  %v10745_v37 = vadd.f32 %v2474_v24, %v2473_v3  ;;  %v10747_v25 = vadd.f32 %v2483_v58, %v2482_v48  ;;  %v2485_v9 = vadd.f32 %v15181_v53, %v15180_v56  ;;  %v15192_v3 = vld [vmem:[#allocation322_spill] sm:$0xff]  ;;  %v15193_v48 = vld [vmem:[#allocation89_spill] sm:$0xff] }
 0x4be   : > { %15174 = vst [vmem:[#allocation136_spill] sm:$0xff] %v10737_v17  ;;  %15175 = vst [vmem:[#allocation426_spill] sm:$0xff] %v10739_v36  ;;  %v2494_v43 = vadd.f32 %v15183_v0, %v15182_v12  ;;  %v2503_v32 = vadd.f32 %v15185_v18, %v15184_v31  ;;  %v2512_v21 = vadd.f32 %v15187_v38, %v15186_v27  ;;  %v15195_v30 = vld [vmem:[#allocation386_spill] sm:$0xff]  ;;  %v15197_v24 = vld [vmem:[#allocation448_spill] sm:$0xff] }
 0x4bf   : > { %15176 = vst [vmem:[#allocation137_spill] sm:$0xff] %v10741_v33  ;;  %15177 = vst [vmem:[#allocation427_spill] sm:$0xff] %v10743_v39  ;;  %v2521_v55 = vadd.f32 %v15189_v62, %v15188_v6  ;;  %v2530_v60 = vadd.f32 %v15191_v13, %v15190_v14  ;;  %v2539_v7 = vadd.f32 %v15193_v48, %v15192_v3  ;;  %v15196_v8 = vld [vmem:[#allocation158_spill] sm:$0xff]  ;;  %v15198_v56 = vld [vmem:[#allocation159_spill] sm:$0xff] }
 0x4c0   : > { %15178 = vst [vmem:[#allocation206_spill] sm:$0xff] %v10745_v37  ;;  %15179 = vst [vmem:[#allocation489_spill] sm:$0xff] %v10747_v25  ;;  %v2548_v51 = vadd.f32 %v15195_v30, %v15194_v26  ;;  %v2486_v40 = vadd.f32 %v2485_v9, %v15196_v8  ;;  %v2495_v58 = vadd.f32 %v2494_v43, %v15197_v24  ;;  %v15199_v12 = vld [vmem:[#allocation449_spill] sm:$0xff]  ;;  %v15200_v31 = vld [vmem:[#allocation160_spill] sm:$0xff] }
 0x4c1   : > { %v2504_v53 = vadd.f32 %v2503_v32, %v15198_v56  ;;  %v2513_v0 = vadd.f32 %v2512_v21, %v15199_v12  ;;  %v2522_v18 = vadd.f32 %v2521_v55, %v15200_v31  ;;  %v15201_v27 = vld [vmem:[#allocation450_spill] sm:$0xff]  ;;  %v15202_v6 = vld [vmem:[#allocation161_spill] sm:$0xff]  ;;  %v15203_v14 = vld [vmem:[#allocation451_spill] sm:$0xff] }
 0x4c2   : > { %v2531_v38 = vadd.f32 %v2530_v60, %v15201_v27  ;;  %v2540_v62 = vadd.f32 %v2539_v7, %v15202_v6  ;;  %v2549_v13 = vadd.f32 %v2548_v51, %v15203_v14  ;;  %v15204_v3 = vld [vmem:[#allocation230_spill] sm:$0xff]  ;;  %v15205_v25 = vld [vmem:[#allocation513_spill] sm:$0xff]  ;;  %v15206_v30 = vld [vmem:[#allocation231_spill] sm:$0xff] }
 0x4c3   : > { %v2487_v48 = vadd.f32 %v2486_v40, %v15204_v3  ;;  %v2496_v26 = vadd.f32 %v2495_v58, %v15205_v25  ;;  %v2505_v9 = vadd.f32 %v2504_v53, %v15206_v30  ;;  %v15207_v8 = vld [vmem:[#allocation514_spill] sm:$0xff]  ;;  %v15208_v24 = vld [vmem:[#allocation232_spill] sm:$0xff]  ;;  %v15209_v56 = vld [vmem:[#allocation515_spill] sm:$0xff] }
 0x4c4   : > { %v2514_v43 = vadd.f32 %v2513_v0, %v15207_v8  ;;  %v2523_v32 = vadd.f32 %v2522_v18, %v15208_v24  ;;  %v2532_v21 = vadd.f32 %v2531_v38, %v15209_v56  ;;  %v15210_v12 = vld [vmem:[#allocation233_spill] sm:$0xff]  ;;  %v15211_v31 = vld [vmem:[#allocation516_spill] sm:$0xff] }
 0x4c5   : > { %v2541_v55 = vadd.f32 %v2540_v62, %v15210_v12  ;;  %v2550_v60 = vadd.f32 %v2549_v13, %v15211_v31  ;;  %v2488_v27 = vrot.slane %v2487_v48, 4  ;;  %v2497_v7 = vrot.slane %v2496_v26, 4 }
 0x4c6   : > { %v2506_v6 = vrot.slane %v2505_v9, 4  ;;  %v2515_v51 = vrot.slane %v2514_v43, 4  ;;  %v2524_v14 = vrot.slane %v2523_v32, 4  ;;  %v2533_v40 = vrot.slane %v2532_v21, 4 }
 0x4c7   : > { %v2542_v3 = vrot.slane %v2541_v55, 4  ;;  %v2551_v25 = vrot.slane %v2550_v60, 4  ;;  %v2489_v58 = vadd.f32 %v2488_v27, %v2487_v48  ;;  %v2498_v53 = vadd.f32 %v2497_v7, %v2496_v26 }
 0x4c8   : > { %v2507_v30 = vadd.f32 %v2506_v6, %v2505_v9  ;;  %v2516_v0 = vadd.f32 %v2515_v51, %v2514_v43  ;;  %v2525_v8 = vadd.f32 %v2524_v14, %v2523_v32  ;;  %v2534_v18 = vadd.f32 %v2533_v40, %v2532_v21 }
 0x4c9   : > { %v2543_v24 = vadd.f32 %v2542_v3, %v2541_v55  ;;  %v2552_v38 = vadd.f32 %v2551_v25, %v2550_v60  ;;  %v2490_v56 = vrot.slane %v2489_v58, 2  ;;  %v2499_v62 = vrot.slane %v2498_v53, 2 }
 0x4ca   : > { %v2508_v12 = vrot.slane %v2507_v30, 2  ;;  %v2517_v13 = vrot.slane %v2516_v0, 2  ;;  %v2526_v31 = vrot.slane %v2525_v8, 2  ;;  %v2535_v37 = vrot.slane %v2534_v18, 2 }
 0x4cb   : > { %v2544_v39 = vrot.slane %v2543_v24, 2  ;;  %v2553_v33 = vrot.slane %v2552_v38, 2  ;;  %v2491_v36 = vadd.f32 %v2490_v56, %v2489_v58  ;;  %v2500_v17 = vadd.f32 %v2499_v62, %v2498_v53  ;;  %v15220_v53 = vld [vmem:[#allocation324_spill] sm:$0xff] }
 0x4cc   : > { %v2509_v50 = vadd.f32 %v2508_v12, %v2507_v30  ;;  %v2518_v5 = vadd.f32 %v2517_v13, %v2516_v0  ;;  %v2527_v48 = vadd.f32 %v2526_v31, %v2525_v8  ;;  %v2536_v26 = vadd.f32 %v2535_v37, %v2534_v18  ;;  %v15221_v30 = vld [vmem:[#allocation90_spill] sm:$0xff]  ;;  %v15222_v8 = vld [vmem:[#allocation325_spill] sm:$0xff]  ;;  %v15228_v62 = vld [vmem:[#allocation328_spill] sm:$0xff] }
 0x4cd   : > { %v2545_v9 = vadd.f32 %v2544_v39, %v2543_v24  ;;  %v2554_v43 = vadd.f32 %v2553_v33, %v2552_v38  ;;  %v2492_v32 = vrot.slane %v2491_v36, 1  ;;  %v2501_v21 = vrot.slane %v2500_v17, 1  ;;  %v15225_v24 = vld [vmem:[#allocation91_spill] sm:$0xff]  ;;  %v15229_v12 = vld [vmem:[#allocation92_spill] sm:$0xff]  ;;  %v15230_v31 = vld [vmem:[#allocation329_spill] sm:$0xff] }
 0x4ce   : > { %v2510_v55 = vrot.slane %v2509_v50, 1  ;;  %v2519_v60 = vrot.slane %v2518_v5, 1  ;;  %v2528_v27 = vrot.slane %v2527_v48, 1  ;;  %v2537_v7 = vrot.slane %v2536_v26, 1  ;;  %v15226_v38 = vld [vmem:[#allocation327_spill] sm:$0xff] }
 0x4cf   : > { %v2546_v6 = vrot.slane %v2545_v9, 1  ;;  %v2555_v51 = vrot.slane %v2554_v43, 1  ;;  %v10781_v14 = vadd.f32 %v2492_v32, %v2491_v36  ;;  %v10783_v40 = vadd.f32 %v2501_v21, %v2500_v17  ;;  %v15223_v36 = vld [vmem:[#allocation387_spill] sm:$0xff]  ;;  %v15224_v17 = vld [vmem:[#allocation326_spill] sm:$0xff] }
 0x4d0   : > { %v10785_v3 = vadd.f32 %v2510_v55, %v2509_v50  ;;  %v10787_v25 = vadd.f32 %v2519_v60, %v2518_v5  ;;  %v10789_v58 = vadd.f32 %v2528_v27, %v2527_v48  ;;  %v10791_v39 = vadd.f32 %v2537_v7, %v2536_v26  ;;  %v15227_v5 = vld [vmem:[#allocation388_spill] sm:$0xff]  ;;  %v15231_v48 = vld [vmem:[#allocation389_spill] sm:$0xff]  ;;  %v15234_v21 = vld [vmem:[#allocation331_spill] sm:$0xff] }
 0x4d1   : > { %15212 = vst [vmem:[#allocation207_spill] sm:$0xff] %v10781_v14  ;;  %15213 = vst [vmem:[#allocation490_spill] sm:$0xff] %v10783_v40  ;;  %v10793_v33 = vadd.f32 %v2546_v6, %v2545_v9  ;;  %v10795_v37 = vadd.f32 %v2555_v51, %v2554_v43  ;;  %v2557_v0 = vadd.f32 %v15221_v30, %v15220_v53  ;;  %v15232_v9 = vld [vmem:[#allocation330_spill] sm:$0xff]  ;;  %v15233_v43 = vld [vmem:[#allocation93_spill] sm:$0xff] }
 0x4d2   : > { %15214 = vst [vmem:[#allocation208_spill] sm:$0xff] %v10785_v3  ;;  %15215 = vst [vmem:[#allocation491_spill] sm:$0xff] %v10787_v25  ;;  %v2566_v18 = vadd.f32 %v15223_v36, %v15222_v8  ;;  %v2575_v50 = vadd.f32 %v15225_v24, %v15224_v17  ;;  %v2584_v56 = vadd.f32 %v15227_v5, %v15226_v38  ;;  %v15235_v55 = vld [vmem:[#allocation390_spill] sm:$0xff]  ;;  %v15237_v6 = vld [vmem:[#allocation452_spill] sm:$0xff] }
 0x4d3   : > { %15216 = vst [vmem:[#allocation209_spill] sm:$0xff] %v10789_v58  ;;  %15217 = vst [vmem:[#allocation492_spill] sm:$0xff] %v10791_v39  ;;  %v2593_v13 = vadd.f32 %v15229_v12, %v15228_v62  ;;  %v2602_v26 = vadd.f32 %v15231_v48, %v15230_v31  ;;  %v2611_v32 = vadd.f32 %v15233_v43, %v15232_v9  ;;  %v15236_v27 = vld [vmem:[#allocation162_spill] sm:$0xff]  ;;  %v15238_v53 = vld [vmem:[#allocation163_spill] sm:$0xff] }
 0x4d4   : > { %15218 = vst [vmem:[#allocation276_spill] sm:$0xff] %v10793_v33  ;;  %15219 = vst [vmem:[#allocation62_spill] sm:$0xff] %v10795_v37  ;;  %v2620_v60 = vadd.f32 %v15235_v55, %v15234_v21  ;;  %v2558_v7 = vadd.f32 %v2557_v0, %v15236_v27  ;;  %v2567_v51 = vadd.f32 %v2566_v18, %v15237_v6  ;;  %v15239_v8 = vld [vmem:[#allocation453_spill] sm:$0xff]  ;;  %v15240_v17 = vld [vmem:[#allocation164_spill] sm:$0xff] }
 0x4d5   : > { %v2576_v30 = vadd.f32 %v2575_v50, %v15238_v53  ;;  %v2585_v36 = vadd.f32 %v2584_v56, %v15239_v8  ;;  %v2594_v24 = vadd.f32 %v2593_v13, %v15240_v17  ;;  %v15241_v38 = vld [vmem:[#allocation454_spill] sm:$0xff]  ;;  %v15242_v62 = vld [vmem:[#allocation165_spill] sm:$0xff]  ;;  %v15243_v31 = vld [vmem:[#allocation455_spill] sm:$0xff] }
 0x4d6   : > { %v2603_v5 = vadd.f32 %v2602_v26, %v15241_v38  ;;  %v2612_v12 = vadd.f32 %v2611_v32, %v15242_v62  ;;  %v2621_v48 = vadd.f32 %v2620_v60, %v15243_v31  ;;  %v15244_v9 = vld [vmem:[#allocation234_spill] sm:$0xff]  ;;  %v15245_v37 = vld [vmem:[#allocation517_spill] sm:$0xff]  ;;  %v15246_v55 = vld [vmem:[#allocation235_spill] sm:$0xff] }
 0x4d7   : > { %v2559_v43 = vadd.f32 %v2558_v7, %v15244_v9  ;;  %v2568_v21 = vadd.f32 %v2567_v51, %v15245_v37  ;;  %v2577_v0 = vadd.f32 %v2576_v30, %v15246_v55  ;;  %v15247_v27 = vld [vmem:[#allocation518_spill] sm:$0xff]  ;;  %v15248_v6 = vld [vmem:[#allocation236_spill] sm:$0xff]  ;;  %v15249_v53 = vld [vmem:[#allocation519_spill] sm:$0xff] }
 0x4d8   : > { %v2586_v18 = vadd.f32 %v2585_v36, %v15247_v27  ;;  %v2595_v50 = vadd.f32 %v2594_v24, %v15248_v6  ;;  %v2604_v56 = vadd.f32 %v2603_v5, %v15249_v53  ;;  %v15250_v8 = vld [vmem:[#allocation237_spill] sm:$0xff]  ;;  %v15251_v17 = vld [vmem:[#allocation520_spill] sm:$0xff] }
 0x4d9   : > { %v2613_v13 = vadd.f32 %v2612_v12, %v15250_v8  ;;  %v2622_v26 = vadd.f32 %v2621_v48, %v15251_v17  ;;  %v2560_v38 = vrot.slane %v2559_v43, 4  ;;  %v2569_v32 = vrot.slane %v2568_v21, 4 }
 0x4da   : > { %v2578_v62 = vrot.slane %v2577_v0, 4  ;;  %v2587_v60 = vrot.slane %v2586_v18, 4  ;;  %v2596_v31 = vrot.slane %v2595_v50, 4  ;;  %v2605_v7 = vrot.slane %v2604_v56, 4 }
 0x4db   : > { %v2614_v9 = vrot.slane %v2613_v13, 4  ;;  %v2623_v37 = vrot.slane %v2622_v26, 4  ;;  %v2561_v51 = vadd.f32 %v2560_v38, %v2559_v43  ;;  %v2570_v30 = vadd.f32 %v2569_v32, %v2568_v21 }
 0x4dc   : > { %v2579_v55 = vadd.f32 %v2578_v62, %v2577_v0  ;;  %v2588_v36 = vadd.f32 %v2587_v60, %v2586_v18  ;;  %v2597_v27 = vadd.f32 %v2596_v31, %v2595_v50  ;;  %v2606_v24 = vadd.f32 %v2605_v7, %v2604_v56 }
 0x4dd   : > { %v2615_v6 = vadd.f32 %v2614_v9, %v2613_v13  ;;  %v2624_v5 = vadd.f32 %v2623_v37, %v2622_v26  ;;  %v2562_v53 = vrot.slane %v2561_v51, 2  ;;  %v2571_v12 = vrot.slane %v2570_v30, 2 }
 0x4de   : > { %v2580_v8 = vrot.slane %v2579_v55, 2  ;;  %v2589_v48 = vrot.slane %v2588_v36, 2  ;;  %v2598_v17 = vrot.slane %v2597_v27, 2  ;;  %v2607_v33 = vrot.slane %v2606_v24, 2 }
 0x4df   : > { %v2616_v39 = vrot.slane %v2615_v6, 2  ;;  %v2625_v58 = vrot.slane %v2624_v5, 2  ;;  %v2563_v25 = vadd.f32 %v2562_v53, %v2561_v51  ;;  %v2572_v3 = vadd.f32 %v2571_v12, %v2570_v30  ;;  %v15260_v30 = vld [vmem:[#allocation332_spill] sm:$0xff] }
 0x4e0   : > { %v2581_v40 = vadd.f32 %v2580_v8, %v2579_v55  ;;  %v2590_v14 = vadd.f32 %v2589_v48, %v2588_v36  ;;  %v2599_v43 = vadd.f32 %v2598_v17, %v2597_v27  ;;  %v2608_v21 = vadd.f32 %v2607_v33, %v2606_v24  ;;  %v15261_v55 = vld [vmem:[#allocation94_spill] sm:$0xff]  ;;  %v15262_v27 = vld [vmem:[#allocation333_spill] sm:$0xff]  ;;  %v15268_v12 = vld [vmem:[#allocation336_spill] sm:$0xff] }
 0x4e1   : > { %v2617_v0 = vadd.f32 %v2616_v39, %v2615_v6  ;;  %v2626_v18 = vadd.f32 %v2625_v58, %v2624_v5  ;;  %v2564_v50 = vrot.slane %v2563_v25, 1  ;;  %v2573_v56 = vrot.slane %v2572_v3, 1  ;;  %v15265_v6 = vld [vmem:[#allocation95_spill] sm:$0xff]  ;;  %v15269_v8 = vld [vmem:[#allocation96_spill] sm:$0xff]  ;;  %v15270_v17 = vld [vmem:[#allocation337_spill] sm:$0xff] }
 0x4e2   : > { %v2582_v13 = vrot.slane %v2581_v40, 1  ;;  %v2591_v26 = vrot.slane %v2590_v14, 1  ;;  %v2600_v38 = vrot.slane %v2599_v43, 1  ;;  %v2609_v32 = vrot.slane %v2608_v21, 1  ;;  %v15266_v5 = vld [vmem:[#allocation335_spill] sm:$0xff] }
 0x4e3   : > { %v2618_v62 = vrot.slane %v2617_v0, 1  ;;  %v2627_v60 = vrot.slane %v2626_v18, 1  ;;  %v10829_v31 = vadd.f32 %v2564_v50, %v2563_v25  ;;  %v10831_v7 = vadd.f32 %v2573_v56, %v2572_v3  ;;  %v15263_v25 = vld [vmem:[#allocation391_spill] sm:$0xff]  ;;  %v15264_v3 = vld [vmem:[#allocation334_spill] sm:$0xff] }
 0x4e4   : > { %v10833_v9 = vadd.f32 %v2582_v13, %v2581_v40  ;;  %v10835_v37 = vadd.f32 %v2591_v26, %v2590_v14  ;;  %v10837_v51 = vadd.f32 %v2600_v38, %v2599_v43  ;;  %v10839_v39 = vadd.f32 %v2609_v32, %v2608_v21  ;;  %v15267_v14 = vld [vmem:[#allocation392_spill] sm:$0xff]  ;;  %v15271_v43 = vld [vmem:[#allocation393_spill] sm:$0xff]  ;;  %v15274_v56 = vld [vmem:[#allocation338_spill] sm:$0xff] }
 0x4e5   : > { %15252 = vst [vmem:[#allocation277_spill] sm:$0xff] %v10829_v31  ;;  %15253 = vst [vmem:[#allocation63_spill] sm:$0xff] %v10831_v7  ;;  %v10841_v58 = vadd.f32 %v2618_v62, %v2617_v0  ;;  %v10843_v33 = vadd.f32 %v2627_v60, %v2626_v18  ;;  %v2629_v36 = vadd.f32 %v15261_v55, %v15260_v30  ;;  %v15272_v0 = vld [vmem:[#allocation24_spill] sm:$0xff]  ;;  %v15273_v18 = vld [vmem:[#allocation97_spill] sm:$0xff] }
 0x4e6   : > { %15254 = vst [vmem:[#allocation278_spill] sm:$0xff] %v10833_v9  ;;  %15255 = vst [vmem:[#allocation64_spill] sm:$0xff] %v10835_v37  ;;  %v2638_v24 = vadd.f32 %v15263_v25, %v15262_v27  ;;  %v2647_v40 = vadd.f32 %v15265_v6, %v15264_v3  ;;  %v2656_v53 = vadd.f32 %v15267_v14, %v15266_v5  ;;  %v15275_v13 = vld [vmem:[#allocation394_spill] sm:$0xff]  ;;  %v15277_v62 = vld [vmem:[#allocation456_spill] sm:$0xff] }
 0x4e7   : > { %15256 = vst [vmem:[#allocation279_spill] sm:$0xff] %v10837_v51  ;;  %15257 = vst [vmem:[#allocation65_spill] sm:$0xff] %v10839_v39  ;;  %v2665_v48 = vadd.f32 %v15269_v8, %v15268_v12  ;;  %v2674_v21 = vadd.f32 %v15271_v43, %v15270_v17  ;;  %v2683_v50 = vadd.f32 %v15273_v18, %v15272_v0  ;;  %v15276_v38 = vld [vmem:[#allocation166_spill] sm:$0xff]  ;;  %v15278_v30 = vld [vmem:[#allocation167_spill] sm:$0xff] }
 0x4e8   : > { %15258 = vst [vmem:[#allocation280_spill] sm:$0xff] %v10841_v58  ;;  %15259 = vst [vmem:[#allocation66_spill] sm:$0xff] %v10843_v33  ;;  %v2692_v26 = vadd.f32 %v15275_v13, %v15274_v56  ;;  %v2630_v32 = vadd.f32 %v2629_v36, %v15276_v38  ;;  %v2639_v60 = vadd.f32 %v2638_v24, %v15277_v62  ;;  %v15279_v27 = vld [vmem:[#allocation457_spill] sm:$0xff]  ;;  %v15280_v3 = vld [vmem:[#allocation168_spill] sm:$0xff] }
 0x4e9   : > { %v2648_v55 = vadd.f32 %v2647_v40, %v15278_v30  ;;  %v2657_v25 = vadd.f32 %v2656_v53, %v15279_v27  ;;  %v2666_v6 = vadd.f32 %v2665_v48, %v15280_v3  ;;  %v15281_v5 = vld [vmem:[#allocation458_spill] sm:$0xff]  ;;  %v15282_v12 = vld [vmem:[#allocation169_spill] sm:$0xff]  ;;  %v15283_v17 = vld [vmem:[#allocation459_spill] sm:$0xff] }
 0x4ea   : > { %v2675_v14 = vadd.f32 %v2674_v21, %v15281_v5  ;;  %v2684_v8 = vadd.f32 %v2683_v50, %v15282_v12  ;;  %v2693_v43 = vadd.f32 %v2692_v26, %v15283_v17  ;;  %v15284_v0 = vld [vmem:[#allocation238_spill] sm:$0xff]  ;;  %v15285_v33 = vld [vmem:[#allocation521_spill] sm:$0xff]  ;;  %v15286_v13 = vld [vmem:[#allocation239_spill] sm:$0xff] }
 0x4eb   : > { %v2631_v18 = vadd.f32 %v2630_v32, %v15284_v0  ;;  %v2640_v56 = vadd.f32 %v2639_v60, %v15285_v33  ;;  %v2649_v36 = vadd.f32 %v2648_v55, %v15286_v13  ;;  %v15287_v38 = vld [vmem:[#allocation522_spill] sm:$0xff]  ;;  %v15288_v62 = vld [vmem:[#allocation240_spill] sm:$0xff]  ;;  %v15289_v30 = vld [vmem:[#allocation523_spill] sm:$0xff] }
 0x4ec   : > { %v2658_v24 = vadd.f32 %v2657_v25, %v15287_v38  ;;  %v2667_v40 = vadd.f32 %v2666_v6, %v15288_v62  ;;  %v2676_v53 = vadd.f32 %v2675_v14, %v15289_v30  ;;  %v15290_v27 = vld [vmem:[#allocation241_spill] sm:$0xff]  ;;  %v15291_v3 = vld [vmem:[#allocation524_spill] sm:$0xff] }
 0x4ed   : > { %v2685_v48 = vadd.f32 %v2684_v8, %v15290_v27  ;;  %v2694_v21 = vadd.f32 %v2693_v43, %v15291_v3  ;;  %v2632_v5 = vrot.slane %v2631_v18, 4  ;;  %v2641_v50 = vrot.slane %v2640_v56, 4 }
 0x4ee   : > { %v2650_v12 = vrot.slane %v2649_v36, 4  ;;  %v2659_v26 = vrot.slane %v2658_v24, 4  ;;  %v2668_v17 = vrot.slane %v2667_v40, 4  ;;  %v2677_v32 = vrot.slane %v2676_v53, 4 }
 0x4ef   : > { %v2686_v0 = vrot.slane %v2685_v48, 4  ;;  %v2695_v33 = vrot.slane %v2694_v21, 4  ;;  %v2633_v60 = vadd.f32 %v2632_v5, %v2631_v18  ;;  %v2642_v55 = vadd.f32 %v2641_v50, %v2640_v56 }
 0x4f0   : > { %v2651_v13 = vadd.f32 %v2650_v12, %v2649_v36  ;;  %v2660_v25 = vadd.f32 %v2659_v26, %v2658_v24  ;;  %v2669_v38 = vadd.f32 %v2668_v17, %v2667_v40  ;;  %v2678_v6 = vadd.f32 %v2677_v32, %v2676_v53 }
 0x4f1   : > { %v2687_v62 = vadd.f32 %v2686_v0, %v2685_v48  ;;  %v2696_v14 = vadd.f32 %v2695_v33, %v2694_v21  ;;  %v2634_v30 = vrot.slane %v2633_v60, 2  ;;  %v2643_v8 = vrot.slane %v2642_v55, 2 }
 0x4f2   : > { %v2652_v27 = vrot.slane %v2651_v13, 2  ;;  %v2661_v43 = vrot.slane %v2660_v25, 2  ;;  %v2670_v3 = vrot.slane %v2669_v38, 2  ;;  %v2679_v58 = vrot.slane %v2678_v6, 2 }
 0x4f3   : > { %v2688_v39 = vrot.slane %v2687_v62, 2  ;;  %v2697_v51 = vrot.slane %v2696_v14, 2  ;;  %v2635_v37 = vadd.f32 %v2634_v30, %v2633_v60  ;;  %v2644_v9 = vadd.f32 %v2643_v8, %v2642_v55  ;;  %v15300_v55 = vld [vmem:[#allocation25_spill] sm:$0xff]  ;;  %v15308_v8 = vld [vmem:[#allocation27_spill] sm:$0xff] }
 0x4f4   : > { %v2653_v7 = vadd.f32 %v2652_v27, %v2651_v13  ;;  %v2662_v31 = vadd.f32 %v2661_v43, %v2660_v25  ;;  %v2671_v18 = vadd.f32 %v2670_v3, %v2669_v38  ;;  %v2680_v56 = vadd.f32 %v2679_v58, %v2678_v6  ;;  %v15301_v13 = vld [vmem:[#allocation98_spill] sm:$0xff]  ;;  %v15302_v38 = vld [vmem:[#allocation339_spill] sm:$0xff]  ;;  %v15309_v27 = vld [vmem:[#allocation100_spill] sm:$0xff] }
 0x4f5   : > { %v2689_v36 = vadd.f32 %v2688_v39, %v2687_v62  ;;  %v2698_v24 = vadd.f32 %v2697_v51, %v2696_v14  ;;  %v2636_v40 = vrot.slane %v2635_v37, 1  ;;  %v2645_v53 = vrot.slane %v2644_v9, 1  ;;  %v15305_v62 = vld [vmem:[#allocation99_spill] sm:$0xff]  ;;  %v15306_v14 = vld [vmem:[#allocation340_spill] sm:$0xff]  ;;  %v15310_v3 = vld [vmem:[#allocation341_spill] sm:$0xff] }
 0x4f6   : > { %v2654_v48 = vrot.slane %v2653_v7, 1  ;;  %v2663_v21 = vrot.slane %v2662_v31, 1  ;;  %v2672_v5 = vrot.slane %v2671_v18, 1  ;;  %v2681_v50 = vrot.slane %v2680_v56, 1 }
 0x4f7   : > { %v2690_v12 = vrot.slane %v2689_v36, 1  ;;  %v2699_v26 = vrot.slane %v2698_v24, 1  ;;  %v10877_v17 = vadd.f32 %v2636_v40, %v2635_v37  ;;  %v10879_v32 = vadd.f32 %v2645_v53, %v2644_v9  ;;  %v15303_v37 = vld [vmem:[#allocation395_spill] sm:$0xff]  ;;  %v15304_v9 = vld [vmem:[#allocation26_spill] sm:$0xff] }
 0x4f8   : > { %v10881_v0 = vadd.f32 %v2654_v48, %v2653_v7  ;;  %v10883_v33 = vadd.f32 %v2663_v21, %v2662_v31  ;;  %v10885_v60 = vadd.f32 %v2672_v5, %v2671_v18  ;;  %v10887_v39 = vadd.f32 %v2681_v50, %v2680_v56  ;;  %v15307_v31 = vld [vmem:[#allocation396_spill] sm:$0xff]  ;;  %v15311_v18 = vld [vmem:[#allocation397_spill] sm:$0xff]  ;;  %v15314_v53 = vld [vmem:[#allocation342_spill] sm:$0xff] }
 0x4f9   : > { %15292 = vst [vmem:[#allocation281_spill] sm:$0xff] %v10877_v17  ;;  %15293 = vst [vmem:[#allocation67_spill] sm:$0xff] %v10879_v32  ;;  %v10889_v51 = vadd.f32 %v2690_v12, %v2689_v36  ;;  %v10891_v58 = vadd.f32 %v2699_v26, %v2698_v24  ;;  %v2701_v25 = vadd.f32 %v15301_v13, %v15300_v55  ;;  %v15312_v36 = vld [vmem:[#allocation28_spill] sm:$0xff]  ;;  %v15313_v24 = vld [vmem:[#allocation101_spill] sm:$0xff] }
 0x4fa   : > { %15294 = vst [vmem:[#allocation282_spill] sm:$0xff] %v10881_v0  ;;  %15295 = vst [vmem:[#allocation68_spill] sm:$0xff] %v10883_v33  ;;  %v2710_v6 = vadd.f32 %v15303_v37, %v15302_v38  ;;  %v2719_v7 = vadd.f32 %v15305_v62, %v15304_v9  ;;  %v2728_v30 = vadd.f32 %v15307_v31, %v15306_v14  ;;  %v15315_v48 = vld [vmem:[#allocation398_spill] sm:$0xff]  ;;  %v15317_v12 = vld [vmem:[#allocation460_spill] sm:$0xff] }
 0x4fb   : > { %15296 = vst [vmem:[#allocation283_spill] sm:$0xff] %v10885_v60  ;;  %15297 = vst [vmem:[#allocation69_spill] sm:$0xff] %v10887_v39  ;;  %v2737_v43 = vadd.f32 %v15309_v27, %v15308_v8  ;;  %v2746_v56 = vadd.f32 %v15311_v18, %v15310_v3  ;;  %v2755_v40 = vadd.f32 %v15313_v24, %v15312_v36  ;;  %v15316_v5 = vld [vmem:[#allocation170_spill] sm:$0xff]  ;;  %v15318_v55 = vld [vmem:[#allocation171_spill] sm:$0xff] }
 0x4fc   : > { %15298 = vst [vmem:[#allocation138_spill] sm:$0xff] %v10889_v51  ;;  %15299 = vst [vmem:[#allocation428_spill] sm:$0xff] %v10891_v58  ;;  %v2764_v21 = vadd.f32 %v15315_v48, %v15314_v53  ;;  %v2702_v50 = vadd.f32 %v2701_v25, %v15316_v5  ;;  %v2711_v26 = vadd.f32 %v2710_v6, %v15317_v12  ;;  %v15319_v38 = vld [vmem:[#allocation461_spill] sm:$0xff]  ;;  %v15320_v9 = vld [vmem:[#allocation172_spill] sm:$0xff] }
 0x4fd   : > { %v2720_v13 = vadd.f32 %v2719_v7, %v15318_v55  ;;  %v2729_v37 = vadd.f32 %v2728_v30, %v15319_v38  ;;  %v2738_v62 = vadd.f32 %v2737_v43, %v15320_v9  ;;  %v15321_v14 = vld [vmem:[#allocation462_spill] sm:$0xff]  ;;  %v15322_v8 = vld [vmem:[#allocation173_spill] sm:$0xff]  ;;  %v15323_v3 = vld [vmem:[#allocation463_spill] sm:$0xff] }
 0x4fe   : > { %v2747_v31 = vadd.f32 %v2746_v56, %v15321_v14  ;;  %v2756_v27 = vadd.f32 %v2755_v40, %v15322_v8  ;;  %v2765_v18 = vadd.f32 %v2764_v21, %v15323_v3  ;;  %v15324_v36 = vld [vmem:[#allocation242_spill] sm:$0xff]  ;;  %v15325_v58 = vld [vmem:[#allocation525_spill] sm:$0xff]  ;;  %v15326_v48 = vld [vmem:[#allocation243_spill] sm:$0xff] }
 0x4ff   : > { %v2703_v24 = vadd.f32 %v2702_v50, %v15324_v36  ;;  %v2712_v53 = vadd.f32 %v2711_v26, %v15325_v58  ;;  %v2721_v25 = vadd.f32 %v2720_v13, %v15326_v48  ;;  %v15327_v5 = vld [vmem:[#allocation526_spill] sm:$0xff]  ;;  %v15328_v12 = vld [vmem:[#allocation244_spill] sm:$0xff]  ;;  %v15329_v55 = vld [vmem:[#allocation527_spill] sm:$0xff] }
 0x500   : > { %v2730_v6 = vadd.f32 %v2729_v37, %v15327_v5  ;;  %v2739_v7 = vadd.f32 %v2738_v62, %v15328_v12  ;;  %v2748_v30 = vadd.f32 %v2747_v31, %v15329_v55  ;;  %v15330_v38 = vld [vmem:[#allocation245_spill] sm:$0xff]  ;;  %v15331_v9 = vld [vmem:[#allocation528_spill] sm:$0xff] }
 0x501   : > { %v2757_v43 = vadd.f32 %v2756_v27, %v15330_v38  ;;  %v2766_v56 = vadd.f32 %v2765_v18, %v15331_v9  ;;  %v2704_v14 = vrot.slane %v2703_v24, 4  ;;  %v2713_v40 = vrot.slane %v2712_v53, 4 }
 0x502   : > { %v2722_v8 = vrot.slane %v2721_v25, 4  ;;  %v2731_v21 = vrot.slane %v2730_v6, 4  ;;  %v2740_v3 = vrot.slane %v2739_v7, 4  ;;  %v2749_v50 = vrot.slane %v2748_v30, 4 }
 0x503   : > { %v2758_v36 = vrot.slane %v2757_v43, 4  ;;  %v2767_v58 = vrot.slane %v2766_v56, 4  ;;  %v2705_v26 = vadd.f32 %v2704_v14, %v2703_v24  ;;  %v2714_v13 = vadd.f32 %v2713_v40, %v2712_v53 }
 0x504   : > { %v2723_v48 = vadd.f32 %v2722_v8, %v2721_v25  ;;  %v2732_v37 = vadd.f32 %v2731_v21, %v2730_v6  ;;  %v2741_v5 = vadd.f32 %v2740_v3, %v2739_v7  ;;  %v2750_v62 = vadd.f32 %v2749_v50, %v2748_v30 }
 0x505   : > { %v2759_v12 = vadd.f32 %v2758_v36, %v2757_v43  ;;  %v2768_v31 = vadd.f32 %v2767_v58, %v2766_v56  ;;  %v2706_v55 = vrot.slane %v2705_v26, 2  ;;  %v2715_v27 = vrot.slane %v2714_v13, 2 }
 0x506   : > { %v2724_v38 = vrot.slane %v2723_v48, 2  ;;  %v2733_v18 = vrot.slane %v2732_v37, 2  ;;  %v2742_v9 = vrot.slane %v2741_v5, 2  ;;  %v2751_v51 = vrot.slane %v2750_v62, 2 }
 0x507   : > { %v2760_v39 = vrot.slane %v2759_v12, 2  ;;  %v2769_v60 = vrot.slane %v2768_v31, 2  ;;  %v2707_v33 = vadd.f32 %v2706_v55, %v2705_v26  ;;  %v2716_v0 = vadd.f32 %v2715_v27, %v2714_v13  ;;  %v15340_v13 = vld [vmem:[#allocation29_spill] sm:$0xff]  ;;  %v15348_v27 = vld [vmem:[#allocation31_spill] sm:$0xff] }
 0x508   : > { %v2725_v32 = vadd.f32 %v2724_v38, %v2723_v48  ;;  %v2734_v17 = vadd.f32 %v2733_v18, %v2732_v37  ;;  %v2743_v24 = vadd.f32 %v2742_v9, %v2741_v5  ;;  %v2752_v53 = vadd.f32 %v2751_v51, %v2750_v62  ;;  %v15341_v48 = vld [vmem:[#allocation102_spill] sm:$0xff]  ;;  %v15342_v5 = vld [vmem:[#allocation343_spill] sm:$0xff]  ;;  %v15349_v38 = vld [vmem:[#allocation104_spill] sm:$0xff] }
 0x509   : > { %v2761_v25 = vadd.f32 %v2760_v39, %v2759_v12  ;;  %v2770_v6 = vadd.f32 %v2769_v60, %v2768_v31  ;;  %v2708_v7 = vrot.slane %v2707_v33, 1  ;;  %v2717_v30 = vrot.slane %v2716_v0, 1  ;;  %v15345_v12 = vld [vmem:[#allocation103_spill] sm:$0xff]  ;;  %v15346_v31 = vld [vmem:[#allocation344_spill] sm:$0xff]  ;;  %v15350_v9 = vld [vmem:[#allocation345_spill] sm:$0xff] }
 0x50a   : > { %v2726_v43 = vrot.slane %v2725_v32, 1  ;;  %v2735_v56 = vrot.slane %v2734_v17, 1  ;;  %v2744_v14 = vrot.slane %v2743_v24, 1  ;;  %v2753_v40 = vrot.slane %v2752_v53, 1 }
 0x50b   : > { %v2762_v8 = vrot.slane %v2761_v25, 1  ;;  %v2771_v21 = vrot.slane %v2770_v6, 1  ;;  %v10925_v3 = vadd.f32 %v2708_v7, %v2707_v33  ;;  %v10927_v50 = vadd.f32 %v2717_v30, %v2716_v0  ;;  %v15343_v33 = vld [vmem:[#allocation399_spill] sm:$0xff]  ;;  %v15344_v0 = vld [vmem:[#allocation30_spill] sm:$0xff] }
 0x50c   : > { %v10929_v36 = vadd.f32 %v2726_v43, %v2725_v32  ;;  %v10931_v58 = vadd.f32 %v2735_v56, %v2734_v17  ;;  %v10933_v26 = vadd.f32 %v2744_v14, %v2743_v24  ;;  %v10935_v39 = vadd.f32 %v2753_v40, %v2752_v53  ;;  %v15347_v17 = vld [vmem:[#allocation400_spill] sm:$0xff]  ;;  %v15351_v24 = vld [vmem:[#allocation401_spill] sm:$0xff]  ;;  %v15354_v30 = vld [vmem:[#allocation346_spill] sm:$0xff] }
 0x50d   : > { %15332 = vst [vmem:[#allocation139_spill] sm:$0xff] %v10925_v3  ;;  %15333 = vst [vmem:[#allocation429_spill] sm:$0xff] %v10927_v50  ;;  %v10937_v60 = vadd.f32 %v2762_v8, %v2761_v25  ;;  %v10939_v51 = vadd.f32 %v2771_v21, %v2770_v6  ;;  %v2773_v37 = vadd.f32 %v15341_v48, %v15340_v13  ;;  %v15352_v25 = vld [vmem:[#allocation32_spill] sm:$0xff]  ;;  %v15353_v6 = vld [vmem:[#allocation105_spill] sm:$0xff] }
 0x50e   : > { %15334 = vst [vmem:[#allocation140_spill] sm:$0xff] %v10929_v36  ;;  %15335 = vst [vmem:[#allocation430_spill] sm:$0xff] %v10931_v58  ;;  %v2782_v62 = vadd.f32 %v15343_v33, %v15342_v5  ;;  %v2791_v32 = vadd.f32 %v15345_v12, %v15344_v0  ;;  %v2800_v55 = vadd.f32 %v15347_v17, %v15346_v31  ;;  %v15355_v43 = vld [vmem:[#allocation402_spill] sm:$0xff]  ;;  %v15357_v8 = vld [vmem:[#allocation464_spill] sm:$0xff] }
 0x50f   : > { %15336 = vst [vmem:[#allocation141_spill] sm:$0xff] %v10933_v26  ;;  %15337 = vst [vmem:[#allocation431_spill] sm:$0xff] %v10935_v39  ;;  %v2809_v18 = vadd.f32 %v15349_v38, %v15348_v27  ;;  %v2818_v53 = vadd.f32 %v15351_v24, %v15350_v9  ;;  %v2827_v7 = vadd.f32 %v15353_v6, %v15352_v25  ;;  %v15356_v14 = vld [vmem:[#allocation174_spill] sm:$0xff]  ;;  %v15358_v13 = vld [vmem:[#allocation175_spill] sm:$0xff] }
 0x510   : > { %15338 = vst [vmem:[#allocation210_spill] sm:$0xff] %v10937_v60  ;;  %15339 = vst [vmem:[#allocation493_spill] sm:$0xff] %v10939_v51  ;;  %v2836_v56 = vadd.f32 %v15355_v43, %v15354_v30  ;;  %v2774_v40 = vadd.f32 %v2773_v37, %v15356_v14  ;;  %v2783_v21 = vadd.f32 %v2782_v62, %v15357_v8  ;;  %v15359_v5 = vld [vmem:[#allocation465_spill] sm:$0xff]  ;;  %v15360_v0 = vld [vmem:[#allocation176_spill] sm:$0xff] }
 0x511   : > { %v2792_v48 = vadd.f32 %v2791_v32, %v15358_v13  ;;  %v2801_v33 = vadd.f32 %v2800_v55, %v15359_v5  ;;  %v2810_v12 = vadd.f32 %v2809_v18, %v15360_v0  ;;  %v15361_v31 = vld [vmem:[#allocation466_spill] sm:$0xff]  ;;  %v15362_v27 = vld [vmem:[#allocation177_spill] sm:$0xff]  ;;  %v15363_v9 = vld [vmem:[#allocation467_spill] sm:$0xff] }
 0x512   : > { %v2819_v17 = vadd.f32 %v2818_v53, %v15361_v31  ;;  %v2828_v38 = vadd.f32 %v2827_v7, %v15362_v27  ;;  %v2837_v24 = vadd.f32 %v2836_v56, %v15363_v9  ;;  %v15364_v25 = vld [vmem:[#allocation246_spill] sm:$0xff]  ;;  %v15365_v51 = vld [vmem:[#allocation529_spill] sm:$0xff]  ;;  %v15366_v43 = vld [vmem:[#allocation247_spill] sm:$0xff] }
 0x513   : > { %v2775_v6 = vadd.f32 %v2774_v40, %v15364_v25  ;;  %v2784_v30 = vadd.f32 %v2783_v21, %v15365_v51  ;;  %v2793_v37 = vadd.f32 %v2792_v48, %v15366_v43  ;;  %v15367_v14 = vld [vmem:[#allocation530_spill] sm:$0xff]  ;;  %v15368_v8 = vld [vmem:[#allocation248_spill] sm:$0xff]  ;;  %v15369_v13 = vld [vmem:[#allocation531_spill] sm:$0xff] }
 0x514   : > { %v2802_v62 = vadd.f32 %v2801_v33, %v15367_v14  ;;  %v2811_v32 = vadd.f32 %v2810_v12, %v15368_v8  ;;  %v2820_v55 = vadd.f32 %v2819_v17, %v15369_v13  ;;  %v15370_v5 = vld [vmem:[#allocation249_spill] sm:$0xff]  ;;  %v15371_v0 = vld [vmem:[#allocation532_spill] sm:$0xff] }
 0x515   : > { %v2829_v18 = vadd.f32 %v2828_v38, %v15370_v5  ;;  %v2838_v53 = vadd.f32 %v2837_v24, %v15371_v0  ;;  %v2776_v31 = vrot.slane %v2775_v6, 4  ;;  %v2785_v7 = vrot.slane %v2784_v30, 4 }
 0x516   : > { %v2794_v27 = vrot.slane %v2793_v37, 4  ;;  %v2803_v56 = vrot.slane %v2802_v62, 4  ;;  %v2812_v9 = vrot.slane %v2811_v32, 4  ;;  %v2821_v40 = vrot.slane %v2820_v55, 4 }
 0x517   : > { %v2830_v25 = vrot.slane %v2829_v18, 4  ;;  %v2839_v51 = vrot.slane %v2838_v53, 4  ;;  %v2777_v21 = vadd.f32 %v2776_v31, %v2775_v6  ;;  %v2786_v48 = vadd.f32 %v2785_v7, %v2784_v30 }
 0x518   : > { %v2795_v43 = vadd.f32 %v2794_v27, %v2793_v37  ;;  %v2804_v33 = vadd.f32 %v2803_v56, %v2802_v62  ;;  %v2813_v14 = vadd.f32 %v2812_v9, %v2811_v32  ;;  %v2822_v12 = vadd.f32 %v2821_v40, %v2820_v55 }
 0x519   : > { %v2831_v8 = vadd.f32 %v2830_v25, %v2829_v18  ;;  %v2840_v17 = vadd.f32 %v2839_v51, %v2838_v53  ;;  %v2778_v13 = vrot.slane %v2777_v21, 2  ;;  %v2787_v38 = vrot.slane %v2786_v48, 2 }
 0x51a   : > { %v2796_v5 = vrot.slane %v2795_v43, 2  ;;  %v2805_v24 = vrot.slane %v2804_v33, 2  ;;  %v2814_v0 = vrot.slane %v2813_v14, 2  ;;  %v2823_v60 = vrot.slane %v2822_v12, 2 }
 0x51b   : > { %v2832_v39 = vrot.slane %v2831_v8, 2  ;;  %v2841_v26 = vrot.slane %v2840_v17, 2  ;;  %v2779_v58 = vadd.f32 %v2778_v13, %v2777_v21  ;;  %v2788_v36 = vadd.f32 %v2787_v38, %v2786_v48  ;;  %v15380_v48 = vld [vmem:[#allocation33_spill] sm:$0xff]  ;;  %v15388_v38 = vld [vmem:[#allocation35_spill] sm:$0xff] }
 0x51c   : > { %v2797_v50 = vadd.f32 %v2796_v5, %v2795_v43  ;;  %v2806_v3 = vadd.f32 %v2805_v24, %v2804_v33  ;;  %v2815_v6 = vadd.f32 %v2814_v0, %v2813_v14  ;;  %v2824_v30 = vadd.f32 %v2823_v60, %v2822_v12  ;;  %v15381_v43 = vld [vmem:[#allocation106_spill] sm:$0xff]  ;;  %v15382_v14 = vld [vmem:[#allocation347_spill] sm:$0xff]  ;;  %v15389_v5 = vld [vmem:[#allocation108_spill] sm:$0xff] }
 0x51d   : > { %v2833_v37 = vadd.f32 %v2832_v39, %v2831_v8  ;;  %v2842_v62 = vadd.f32 %v2841_v26, %v2840_v17  ;;  %v2780_v32 = vrot.slane %v2779_v58, 1  ;;  %v2789_v55 = vrot.slane %v2788_v36, 1  ;;  %v15385_v8 = vld [vmem:[#allocation107_spill] sm:$0xff]  ;;  %v15386_v17 = vld [vmem:[#allocation348_spill] sm:$0xff]  ;;  %v15390_v0 = vld [vmem:[#allocation349_spill] sm:$0xff] }
 0x51e   : > { %v2798_v18 = vrot.slane %v2797_v50, 1  ;;  %v2807_v53 = vrot.slane %v2806_v3, 1  ;;  %v2816_v31 = vrot.slane %v2815_v6, 1  ;;  %v2825_v7 = vrot.slane %v2824_v30, 1 }
 0x51f   : > { %v2834_v27 = vrot.slane %v2833_v37, 1  ;;  %v2843_v56 = vrot.slane %v2842_v62, 1  ;;  %v10973_v9 = vadd.f32 %v2780_v32, %v2779_v58  ;;  %v10975_v40 = vadd.f32 %v2789_v55, %v2788_v36  ;;  %v15383_v58 = vld [vmem:[#allocation403_spill] sm:$0xff]  ;;  %v15384_v36 = vld [vmem:[#allocation34_spill] sm:$0xff] }
 0x520   : > { %v10977_v25 = vadd.f32 %v2798_v18, %v2797_v50  ;;  %v10979_v51 = vadd.f32 %v2807_v53, %v2806_v3  ;;  %v10981_v21 = vadd.f32 %v2816_v31, %v2815_v6  ;;  %v10983_v39 = vadd.f32 %v2825_v7, %v2824_v30  ;;  %v15387_v3 = vld [vmem:[#allocation404_spill] sm:$0xff]  ;;  %v15391_v6 = vld [vmem:[#allocation405_spill] sm:$0xff]  ;;  %v15394_v55 = vld [vmem:[#allocation350_spill] sm:$0xff] }
 0x521   : > { %15372 = vst [vmem:[#allocation211_spill] sm:$0xff] %v10973_v9  ;;  %15373 = vst [vmem:[#allocation494_spill] sm:$0xff] %v10975_v40  ;;  %v10985_v26 = vadd.f32 %v2834_v27, %v2833_v37  ;;  %v10987_v60 = vadd.f32 %v2843_v56, %v2842_v62  ;;  %v2845_v33 = vadd.f32 %v15381_v43, %v15380_v48  ;;  %v15392_v37 = vld [vmem:[#allocation36_spill] sm:$0xff]  ;;  %v15393_v62 = vld [vmem:[#allocation109_spill] sm:$0xff] }
 0x522   : > { %15374 = vst [vmem:[#allocation212_spill] sm:$0xff] %v10977_v25  ;;  %15375 = vst [vmem:[#allocation495_spill] sm:$0xff] %v10979_v51  ;;  %v2854_v12 = vadd.f32 %v15383_v58, %v15382_v14  ;;  %v2863_v50 = vadd.f32 %v15385_v8, %v15384_v36  ;;  %v2872_v13 = vadd.f32 %v15387_v3, %v15386_v17  ;;  %v15395_v18 = vld [vmem:[#allocation406_spill] sm:$0xff]  ;;  %v15397_v27 = vld [vmem:[#allocation468_spill] sm:$0xff] }
 0x523   : > { %15376 = vst [vmem:[#allocation213_spill] sm:$0xff] %v10981_v21  ;;  %15377 = vst [vmem:[#allocation496_spill] sm:$0xff] %v10983_v39  ;;  %v2881_v24 = vadd.f32 %v15389_v5, %v15388_v38  ;;  %v2890_v30 = vadd.f32 %v15391_v6, %v15390_v0  ;;  %v2899_v32 = vadd.f32 %v15393_v62, %v15392_v37  ;;  %v15396_v31 = vld [vmem:[#allocation178_spill] sm:$0xff]  ;;  %v15398_v48 = vld [vmem:[#allocation179_spill] sm:$0xff] }
 0x524   : > { %15378 = vst [vmem:[#allocation284_spill] sm:$0xff] %v10985_v26  ;;  %15379 = vst [vmem:[#allocation70_spill] sm:$0xff] %v10987_v60  ;;  %v2908_v53 = vadd.f32 %v15395_v18, %v15394_v55  ;;  %v2846_v7 = vadd.f32 %v2845_v33, %v15396_v31  ;;  %v2855_v56 = vadd.f32 %v2854_v12, %v15397_v27  ;;  %v15399_v14 = vld [vmem:[#allocation469_spill] sm:$0xff]  ;;  %v15400_v36 = vld [vmem:[#allocation180_spill] sm:$0xff] }
 0x525   : > { %v2864_v43 = vadd.f32 %v2863_v50, %v15398_v48  ;;  %v2873_v58 = vadd.f32 %v2872_v13, %v15399_v14  ;;  %v2882_v8 = vadd.f32 %v2881_v24, %v15400_v36  ;;  %v15401_v17 = vld [vmem:[#allocation470_spill] sm:$0xff]  ;;  %v15402_v38 = vld [vmem:[#allocation181_spill] sm:$0xff]  ;;  %v15403_v0 = vld [vmem:[#allocation471_spill] sm:$0xff] }
 0x526   : > { %v2891_v3 = vadd.f32 %v2890_v30, %v15401_v17  ;;  %v2900_v5 = vadd.f32 %v2899_v32, %v15402_v38  ;;  %v2909_v6 = vadd.f32 %v2908_v53, %v15403_v0  ;;  %v15404_v37 = vld [vmem:[#allocation250_spill] sm:$0xff]  ;;  %v15405_v60 = vld [vmem:[#allocation533_spill] sm:$0xff]  ;;  %v15406_v18 = vld [vmem:[#allocation251_spill] sm:$0xff] }
 0x527   : > { %v2847_v62 = vadd.f32 %v2846_v7, %v15404_v37  ;;  %v2856_v55 = vadd.f32 %v2855_v56, %v15405_v60  ;;  %v2865_v33 = vadd.f32 %v2864_v43, %v15406_v18  ;;  %v15407_v31 = vld [vmem:[#allocation534_spill] sm:$0xff]  ;;  %v15408_v27 = vld [vmem:[#allocation252_spill] sm:$0xff]  ;;  %v15409_v48 = vld [vmem:[#allocation535_spill] sm:$0xff] }
 0x528   : > { %v2874_v12 = vadd.f32 %v2873_v58, %v15407_v31  ;;  %v2883_v50 = vadd.f32 %v2882_v8, %v15408_v27  ;;  %v2892_v13 = vadd.f32 %v2891_v3, %v15409_v48  ;;  %v15410_v14 = vld [vmem:[#allocation253_spill] sm:$0xff]  ;;  %v15411_v36 = vld [vmem:[#allocation536_spill] sm:$0xff] }
 0x529   : > { %v2901_v24 = vadd.f32 %v2900_v5, %v15410_v14  ;;  %v2910_v30 = vadd.f32 %v2909_v6, %v15411_v36  ;;  %v2848_v17 = vrot.slane %v2847_v62, 4  ;;  %v2857_v32 = vrot.slane %v2856_v55, 4 }
 0x52a   : > { %v2866_v38 = vrot.slane %v2865_v33, 4  ;;  %v2875_v53 = vrot.slane %v2874_v12, 4  ;;  %v2884_v0 = vrot.slane %v2883_v50, 4  ;;  %v2893_v7 = vrot.slane %v2892_v13, 4 }
 0x52b   : > { %v2902_v37 = vrot.slane %v2901_v24, 4  ;;  %v2911_v60 = vrot.slane %v2910_v30, 4  ;;  %v2849_v56 = vadd.f32 %v2848_v17, %v2847_v62  ;;  %v2858_v43 = vadd.f32 %v2857_v32, %v2856_v55 }
 0x52c   : > { %v2867_v18 = vadd.f32 %v2866_v38, %v2865_v33  ;;  %v2876_v58 = vadd.f32 %v2875_v53, %v2874_v12  ;;  %v2885_v31 = vadd.f32 %v2884_v0, %v2883_v50  ;;  %v2894_v8 = vadd.f32 %v2893_v7, %v2892_v13 }
 0x52d   : > { %v2903_v27 = vadd.f32 %v2902_v37, %v2901_v24  ;;  %v2912_v3 = vadd.f32 %v2911_v60, %v2910_v30  ;;  %v2850_v48 = vrot.slane %v2849_v56, 2  ;;  %v2859_v5 = vrot.slane %v2858_v43, 2 }
 0x52e   : > { %v2868_v14 = vrot.slane %v2867_v18, 2  ;;  %v2877_v6 = vrot.slane %v2876_v58, 2  ;;  %v2886_v36 = vrot.slane %v2885_v31, 2  ;;  %v2895_v26 = vrot.slane %v2894_v8, 2 }
 0x52f   : > { %v2904_v39 = vrot.slane %v2903_v27, 2  ;;  %v2913_v21 = vrot.slane %v2912_v3, 2  ;;  %v2851_v51 = vadd.f32 %v2850_v48, %v2849_v56  ;;  %v2860_v25 = vadd.f32 %v2859_v5, %v2858_v43  ;;  %v15418_v43 = vld [vmem:[#allocation37_spill] sm:$0xff]  ;;  %v15426_v5 = vld [vmem:[#allocation39_spill] sm:$0xff] }
 0x530   : > { %v2869_v40 = vadd.f32 %v2868_v14, %v2867_v18  ;;  %v2878_v9 = vadd.f32 %v2877_v6, %v2876_v58  ;;  %v2887_v62 = vadd.f32 %v2886_v36, %v2885_v31  ;;  %v2896_v55 = vadd.f32 %v2895_v26, %v2894_v8  ;;  %v15419_v18 = vld [vmem:[#allocation110_spill] sm:$0xff]  ;;  %v15420_v31 = vld [vmem:[#allocation351_spill] sm:$0xff]  ;;  %v15427_v14 = vld [vmem:[#allocation112_spill] sm:$0xff] }
 0x531   : > { %v2905_v33 = vadd.f32 %v2904_v39, %v2903_v27  ;;  %v2914_v12 = vadd.f32 %v2913_v21, %v2912_v3  ;;  %v2852_v50 = vrot.slane %v2851_v51, 1  ;;  %v2861_v13 = vrot.slane %v2860_v25, 1  ;;  %v15423_v27 = vld [vmem:[#allocation111_spill] sm:$0xff]  ;;  %v15424_v3 = vld [vmem:[#allocation352_spill] sm:$0xff]  ;;  %v15428_v36 = vld [vmem:[#allocation353_spill] sm:$0xff] }
 0x532   : > { %v2870_v24 = vrot.slane %v2869_v40, 1  ;;  %v2879_v30 = vrot.slane %v2878_v9, 1  ;;  %v2888_v17 = vrot.slane %v2887_v62, 1  ;;  %v2897_v32 = vrot.slane %v2896_v55, 1 }
 0x533   : > { %v2906_v38 = vrot.slane %v2905_v33, 1  ;;  %v2915_v53 = vrot.slane %v2914_v12, 1  ;;  %v11021_v0 = vadd.f32 %v2852_v50, %v2851_v51  ;;  %v11023_v7 = vadd.f32 %v2861_v13, %v2860_v25  ;;  %v15421_v51 = vld [vmem:[#allocation407_spill] sm:$0xff]  ;;  %v15422_v25 = vld [vmem:[#allocation38_spill] sm:$0xff] }
 0x534   : > { %v11025_v37 = vadd.f32 %v2870_v24, %v2869_v40  ;;  %v11027_v60 = vadd.f32 %v2879_v30, %v2878_v9  ;;  %v11029_v56 = vadd.f32 %v2888_v17, %v2887_v62  ;;  %v11031_v39 = vadd.f32 %v2897_v32, %v2896_v55  ;;  %v15425_v9 = vld [vmem:[#allocation408_spill] sm:$0xff]  ;;  %v15429_v62 = vld [vmem:[#allocation409_spill] sm:$0xff]  ;;  %v15432_v13 = vld [vmem:[#allocation354_spill] sm:$0xff] }
 0x535   : > { %v11033_v21 = vadd.f32 %v2906_v38, %v2905_v33  ;;  %v11035_v26 = vadd.f32 %v2915_v53, %v2914_v12  ;;  %v2917_v58 = vadd.f32 %v15419_v18, %v15418_v43  ;;  %v2926_v8 = vadd.f32 %v15421_v51, %v15420_v31  ;;  %v15430_v33 = vld [vmem:[#allocation40_spill] sm:$0xff]  ;;  %v15431_v12 = vld [vmem:[#allocation113_spill] sm:$0xff]  ;;  %v15433_v24 = vld [vmem:[#allocation410_spill] sm:$0xff] }
 0x536   : > { %15412 = vst [vmem:[#allocation285_spill] sm:$0xff] %v11025_v37  ;;  %15413 = vst [vmem:[#allocation367_spill] sm:$0xff] %v11027_v60  ;;  %v2935_v40 = vadd.f32 %v15423_v27, %v15422_v25  ;;  %v2944_v48 = vadd.f32 %v15425_v9, %v15424_v3  ;;  %v2953_v6 = vadd.f32 %v15427_v14, %v15426_v5  ;;  %v15434_v17 = vld [vmem:[#allocation182_spill] sm:$0xff]  ;;  %v15435_v38 = vld [vmem:[#allocation472_spill] sm:$0xff] }
 0x537   : > { %15414 = vst [vmem:[#allocation286_spill] sm:$0xff] %v11029_v56  ;;  %15415 = vst [vmem:[#allocation71_spill] sm:$0xff] %v11031_v39  ;;  %v2962_v55 = vadd.f32 %v15429_v62, %v15428_v36  ;;  %v2971_v50 = vadd.f32 %v15431_v12, %v15430_v33  ;;  %v2980_v30 = vadd.f32 %v15433_v24, %v15432_v13  ;;  %v15436_v43 = vld [vmem:[#allocation183_spill] sm:$0xff]  ;;  %v15437_v31 = vld [vmem:[#allocation473_spill] sm:$0xff] }
 0x538   : > { %15416 = vst [vmem:[#allocation287_spill] sm:$0xff] %v11033_v21  ;;  %15417 = vst [vmem:[#allocation368_spill] sm:$0xff] %v11035_v26  ;;  %v2918_v32 = vadd.f32 %v2917_v58, %v15434_v17  ;;  %v2927_v53 = vadd.f32 %v2926_v8, %v15435_v38  ;;  %v2936_v18 = vadd.f32 %v2935_v40, %v15436_v43  ;;  %v15438_v25 = vld [vmem:[#allocation184_spill] sm:$0xff]  ;;  %v15439_v3 = vld [vmem:[#allocation474_spill] sm:$0xff] }
 0x539   : > { %v2945_v51 = vadd.f32 %v2944_v48, %v15437_v31  ;;  %v2954_v27 = vadd.f32 %v2953_v6, %v15438_v25  ;;  %v2963_v9 = vadd.f32 %v2962_v55, %v15439_v3  ;;  %v15440_v5 = vld [vmem:[#allocation185_spill] sm:$0xff]  ;;  %v15441_v36 = vld [vmem:[#allocation475_spill] sm:$0xff]  ;;  %v15442_v33 = vld [vmem:[#allocation254_spill] sm:$0xff] }
 0x53a   : > { %v2972_v14 = vadd.f32 %v2971_v50, %v15440_v5  ;;  %v2981_v62 = vadd.f32 %v2980_v30, %v15441_v36  ;;  %v2919_v12 = vadd.f32 %v2918_v32, %v15442_v33  ;;  %v15443_v26 = vld [vmem:[#allocation537_spill] sm:$0xff]  ;;  %v2937_v58 = vadd.f32 %v2936_v18, %v10213_v46  ;;  %v15444_v24 = vld [vmem:[#allocation255_spill] sm:$0xff]  ;;  %v15445_v17 = vld [vmem:[#allocation256_spill] sm:$0xff] }
 0x53b   : > { %v2928_v13 = vadd.f32 %v2927_v53, %v15443_v26  ;;  %v2946_v8 = vadd.f32 %v2945_v51, %v15444_v24  ;;  %v2955_v40 = vadd.f32 %v2954_v27, %v15445_v17  ;;  %v15446_v38 = vld [vmem:[#allocation538_spill] sm:$0xff]  ;;  %v15447_v43 = vld [vmem:[#allocation257_spill] sm:$0xff] }
 0x53c   : > { %v2964_v48 = vadd.f32 %v2963_v9, %v15446_v38  ;;  %v2973_v6 = vadd.f32 %v2972_v14, %v10233_v34  ;;  %v2982_v55 = vadd.f32 %v2981_v62, %v15447_v43  ;;  %v2920_v31 = vrot.slane %v2919_v12, 4 }
 0x53d   : > { %v2929_v50 = vrot.slane %v2928_v13, 4  ;;  %v2938_v25 = vrot.slane %v2937_v58, 4  ;;  %v2947_v30 = vrot.slane %v2946_v8, 4  ;;  %v2956_v3 = vrot.slane %v2955_v40, 4 }
 0x53e   : > { %v2965_v32 = vrot.slane %v2964_v48, 4  ;;  %v2974_v5 = vrot.slane %v2973_v6, 4  ;;  %v2983_v26 = vrot.slane %v2982_v55, 4  ;;  %v2921_v53 = vadd.f32 %v2920_v31, %v2919_v12 }
 0x53f   : > { %v2930_v46 = vadd.f32 %v2929_v50, %v2928_v13  ;;  %v2939_v18 = vadd.f32 %v2938_v25, %v2937_v58  ;;  %v2948_v51 = vadd.f32 %v2947_v30, %v2946_v8  ;;  %v2957_v36 = vadd.f32 %v2956_v3, %v2955_v40 }
 0x540   : > { %v2966_v27 = vadd.f32 %v2965_v32, %v2964_v48  ;;  %v2975_v33 = vadd.f32 %v2974_v5, %v2973_v6  ;;  %v2984_v9 = vadd.f32 %v2983_v26, %v2982_v55  ;;  %v2922_v24 = vrot.slane %v2921_v53, 2 }
 0x541   : > { %v2931_v34 = vrot.slane %v2930_v46, 2  ;;  %v2940_v14 = vrot.slane %v2939_v18, 2  ;;  %v2949_v62 = vrot.slane %v2948_v51, 2  ;;  %v2958_v17 = vrot.slane %v2957_v36, 2 }
 0x542   : > { %v2967_v38 = vrot.slane %v2966_v27, 2  ;;  %v2976_v43 = vrot.slane %v2975_v33, 2  ;;  %v2985_v21 = vrot.slane %v2984_v9, 2  ;;  %v2923_v39 = vadd.f32 %v2922_v24, %v2921_v53  ;;  %v15459_v24 = vld [vmem:[#allocation115_spill] sm:$0xff] }
 0x543   : > { %v2932_v56 = vadd.f32 %v2931_v34, %v2930_v46  ;;  %v2941_v60 = vadd.f32 %v2940_v14, %v2939_v18  ;;  %v2950_v37 = vadd.f32 %v2949_v62, %v2948_v51  ;;  %v2959_v12 = vadd.f32 %v2958_v17, %v2957_v36  ;;  %v15454_v51 = vld [vmem:[#allocation41_spill] sm:$0xff]  ;;  %v15455_v36 = vld [vmem:[#allocation114_spill] sm:$0xff]  ;;  %v15460_v34 = vld [vmem:[#allocation356_spill] sm:$0xff] }
 0x544   : > { %v2968_v13 = vadd.f32 %v2967_v38, %v2966_v27  ;;  %v2977_v58 = vadd.f32 %v2976_v43, %v2975_v33  ;;  %v2986_v8 = vadd.f32 %v2985_v21, %v2984_v9  ;;  %v2924_v40 = vrot.slane %v2923_v39, 1  ;;  %v15456_v33 = vld [vmem:[#allocation355_spill] sm:$0xff]  ;;  %v15463_v17 = vld [vmem:[#allocation116_spill] sm:$0xff]  ;;  %v15464_v43 = vld [vmem:[#allocation357_spill] sm:$0xff] }
 0x545   : > { %v2933_v48 = vrot.slane %v2932_v56, 1  ;;  %v2942_v6 = vrot.slane %v2941_v60, 1  ;;  %v2951_v55 = vrot.slane %v2950_v37, 1  ;;  %v2960_v31 = vrot.slane %v2959_v12, 1  ;;  %v15462_v62 = vld [vmem:[#allocation43_spill] sm:$0xff] }
 0x546   : > { %v2969_v50 = vrot.slane %v2968_v13, 1  ;;  %v2978_v25 = vrot.slane %v2977_v58, 1  ;;  %v2987_v30 = vrot.slane %v2986_v8, 1  ;;  %v11069_v3 = vadd.f32 %v2924_v40, %v2923_v39  ;;  %v15457_v39 = vld [vmem:[#allocation411_spill] sm:$0xff] }
 0x547   : > { %v11071_v32 = vadd.f32 %v2933_v48, %v2932_v56  ;;  %v11073_v5 = vadd.f32 %v2942_v6, %v2941_v60  ;;  %v11075_v26 = vadd.f32 %v2951_v55, %v2950_v37  ;;  %v11077_v53 = vadd.f32 %v2960_v31, %v2959_v12  ;;  %v15458_v56 = vld [vmem:[#allocation42_spill] sm:$0xff]  ;;  %v15461_v37 = vld [vmem:[#allocation412_spill] sm:$0xff]  ;;  %v15465_v12 = vld [vmem:[#allocation413_spill] sm:$0xff] }
 0x548   : > { %v11079_v46 = vadd.f32 %v2969_v50, %v2968_v13  ;;  %v11081_v21 = vadd.f32 %v2978_v25, %v2977_v58  ;;  %v11083_v18 = vadd.f32 %v2987_v30, %v2986_v8  ;;  %v2989_v27 = vadd.f32 %v15455_v36, %v15454_v51  ;;  %v15466_v58 = vld [vmem:[#allocation44_spill] sm:$0xff]  ;;  %v15467_v8 = vld [vmem:[#allocation117_spill] sm:$0xff]  ;;  %v15468_v48 = vld [vmem:[#allocation358_spill] sm:$0xff] }
 0x549   : > { %15448 = vst [vmem:[#allocation288_spill] sm:$0xff] %v11073_v5  ;;  %15449 = vst [vmem:[#allocation72_spill] sm:$0xff] %v11075_v26  ;;  %v2998_v9 = vadd.f32 %v15457_v39, %v15456_v33  ;;  %v3007_v60 = vadd.f32 %v15459_v24, %v15458_v56  ;;  %v3016_v14 = vadd.f32 %v15461_v37, %v15460_v34  ;;  %v15469_v6 = vld [vmem:[#allocation414_spill] sm:$0xff]  ;;  %v15471_v25 = vld [vmem:[#allocation476_spill] sm:$0xff] }
 0x54a   : > { %15450 = vst [vmem:[#allocation289_spill] sm:$0xff] %v11077_v53  ;;  %15451 = vst [vmem:[#allocation369_spill] sm:$0xff] %v11079_v46  ;;  %v3025_v38 = vadd.f32 %v15463_v17, %v15462_v62  ;;  %v3034_v13 = vadd.f32 %v15465_v12, %v15464_v43  ;;  %v3043_v40 = vadd.f32 %v15467_v8, %v15466_v58  ;;  %v15470_v31 = vld [vmem:[#allocation186_spill] sm:$0xff]  ;;  %v15472_v51 = vld [vmem:[#allocation187_spill] sm:$0xff] }
 0x54b   : > { %15452 = vst [vmem:[#allocation290_spill] sm:$0xff] %v11081_v21  ;;  %15453 = vst [vmem:[#allocation73_spill] sm:$0xff] %v11083_v18  ;;  %v3052_v55 = vadd.f32 %v15469_v6, %v15468_v48  ;;  %v2990_v50 = vadd.f32 %v2989_v27, %v15470_v31  ;;  %v2999_v30 = vadd.f32 %v2998_v9, %v15471_v25  ;;  %v15473_v33 = vld [vmem:[#allocation477_spill] sm:$0xff]  ;;  %v15474_v56 = vld [vmem:[#allocation188_spill] sm:$0xff] }
 0x54c   : > { %v3008_v36 = vadd.f32 %v3007_v60, %v15472_v51  ;;  %v3017_v39 = vadd.f32 %v3016_v14, %v15473_v33  ;;  %v3026_v24 = vadd.f32 %v3025_v38, %v15474_v56  ;;  %v15475_v34 = vld [vmem:[#allocation478_spill] sm:$0xff]  ;;  %v15476_v62 = vld [vmem:[#allocation189_spill] sm:$0xff]  ;;  %v15477_v43 = vld [vmem:[#allocation479_spill] sm:$0xff] }
 0x54d   : > { %v3035_v37 = vadd.f32 %v3034_v13, %v15475_v34  ;;  %v3044_v17 = vadd.f32 %v3043_v40, %v15476_v62  ;;  %v3053_v12 = vadd.f32 %v3052_v55, %v15477_v43  ;;  %v15478_v58 = vld [vmem:[#allocation539_spill] sm:$0xff]  ;;  %v15479_v18 = vld [vmem:[#allocation540_spill] sm:$0xff]  ;;  %v15480_v6 = vld [vmem:[#allocation258_spill] sm:$0xff] }
 0x54e   : > { %v2991_v8 = vadd.f32 %v2990_v50, %v15478_v58  ;;  %v3000_v48 = vadd.f32 %v2999_v30, %v15479_v18  ;;  %v3009_v27 = vadd.f32 %v3008_v36, %v10253_v45  ;;  %v3018_v9 = vadd.f32 %v3017_v39, %v15480_v6  ;;  %v15481_v31 = vld [vmem:[#allocation541_spill] sm:$0xff]  ;;  %v15482_v25 = vld [vmem:[#allocation542_spill] sm:$0xff]  ;;  %v15483_v51 = vld [vmem:[#allocation259_spill] sm:$0xff] }
 0x54f   : > { %v3027_v60 = vadd.f32 %v3026_v24, %v15481_v31  ;;  %v3036_v14 = vadd.f32 %v3035_v37, %v15482_v25  ;;  %v3045_v38 = vadd.f32 %v3044_v17, %v10273_v57  ;;  %v3054_v13 = vadd.f32 %v3053_v12, %v15483_v51 }
 0x550   : > { %v2992_v33 = vrot.slane %v2991_v8, 4  ;;  %v3001_v40 = vrot.slane %v3000_v48, 4  ;;  %v3010_v56 = vrot.slane %v3009_v27, 4  ;;  %v3019_v55 = vrot.slane %v3018_v9, 4 }
 0x551   : > { %v3028_v34 = vrot.slane %v3027_v60, 4  ;;  %v3037_v50 = vrot.slane %v3036_v14, 4  ;;  %v3046_v62 = vrot.slane %v3045_v38, 4  ;;  %v3055_v18 = vrot.slane %v3054_v13, 4 }
 0x552   : > { %v2993_v30 = vadd.f32 %v2992_v33, %v2991_v8  ;;  %v3002_v45 = vadd.f32 %v3001_v40, %v3000_v48  ;;  %v3011_v36 = vadd.f32 %v3010_v56, %v3009_v27  ;;  %v3020_v39 = vadd.f32 %v3019_v55, %v3018_v9 }
 0x553   : > { %v3029_v43 = vadd.f32 %v3028_v34, %v3027_v60  ;;  %v3038_v24 = vadd.f32 %v3037_v50, %v3036_v14  ;;  %v3047_v58 = vadd.f32 %v3046_v62, %v3045_v38  ;;  %v3056_v37 = vadd.f32 %v3055_v18, %v3054_v13 }
 0x554   : > { %v2994_v6 = vrot.slane %v2993_v30, 2  ;;  %v3003_v57 = vrot.slane %v3002_v45, 2  ;;  %v3012_v17 = vrot.slane %v3011_v36, 2  ;;  %v3021_v12 = vrot.slane %v3020_v39, 2 }
 0x555   : > { %v3030_v31 = vrot.slane %v3029_v43, 2  ;;  %v3039_v25 = vrot.slane %v3038_v24, 2  ;;  %v3048_v51 = vrot.slane %v3047_v58, 2  ;;  %v3057_v21 = vrot.slane %v3056_v37, 2 }
 0x556   : > { %v2995_v46 = vadd.f32 %v2994_v6, %v2993_v30  ;;  %v3004_v53 = vadd.f32 %v3003_v57, %v3002_v45  ;;  %v3013_v26 = vadd.f32 %v3012_v17, %v3011_v36  ;;  %v3022_v5 = vadd.f32 %v3021_v12, %v3020_v39  ;;  %v15488_v39 = vld [vmem:[#allocation45_spill] sm:$0xff]  ;;  %v15493_v6 = vld [vmem:[#allocation119_spill] sm:$0xff]  ;;  %v15494_v57 = vld [vmem:[#allocation360_spill] sm:$0xff] }
 0x557   : > { %v3031_v8 = vadd.f32 %v3030_v31, %v3029_v43  ;;  %v3040_v48 = vadd.f32 %v3039_v25, %v3038_v24  ;;  %v3049_v27 = vadd.f32 %v3048_v51, %v3047_v58  ;;  %v3058_v9 = vadd.f32 %v3057_v21, %v3056_v37  ;;  %v15489_v43 = vld [vmem:[#allocation118_spill] sm:$0xff]  ;;  %v15490_v58 = vld [vmem:[#allocation359_spill] sm:$0xff]  ;;  %v15497_v31 = vld [vmem:[#allocation120_spill] sm:$0xff] }
 0x558   : > { %v2996_v60 = vrot.slane %v2995_v46, 1  ;;  %v3005_v14 = vrot.slane %v3004_v53, 1  ;;  %v3014_v38 = vrot.slane %v3013_v26, 1  ;;  %v3023_v13 = vrot.slane %v3022_v5, 1  ;;  %v15496_v12 = vld [vmem:[#allocation47_spill] sm:$0xff]  ;;  %v15498_v51 = vld [vmem:[#allocation361_spill] sm:$0xff] }
 0x559   : > { %v3032_v33 = vrot.slane %v3031_v8, 1  ;;  %v3041_v40 = vrot.slane %v3040_v48, 1  ;;  %v3050_v56 = vrot.slane %v3049_v27, 1  ;;  %v3059_v55 = vrot.slane %v3058_v9, 1 }
 0x55a   : > { %v11117_v34 = vadd.f32 %v2996_v60, %v2995_v46  ;;  %v11119_v50 = vadd.f32 %v3005_v14, %v3004_v53  ;;  %v11121_v62 = vadd.f32 %v3014_v38, %v3013_v26  ;;  %v11123_v18 = vadd.f32 %v3023_v13, %v3022_v5  ;;  %v15491_v46 = vld [vmem:[#allocation415_spill] sm:$0xff]  ;;  %v15492_v53 = vld [vmem:[#allocation46_spill] sm:$0xff]  ;;  %v15495_v5 = vld [vmem:[#allocation416_spill] sm:$0xff] }
 0x55b   : > { %v11125_v30 = vadd.f32 %v3032_v33, %v3031_v8  ;;  %v11127_v45 = vadd.f32 %v3041_v40, %v3040_v48  ;;  %v11129_v21 = vadd.f32 %v3050_v56, %v3049_v27  ;;  %v11131_v36 = vadd.f32 %v3059_v55, %v3058_v9  ;;  %v15499_v8 = vld [vmem:[#allocation417_spill] sm:$0xff]  ;;  %v15500_v27 = vld [vmem:[#allocation48_spill] sm:$0xff]  ;;  %v15502_v14 = vld [vmem:[#allocation362_spill] sm:$0xff] }
 0x55c   : > { %v3061_v24 = vadd.f32 %v15489_v43, %v15488_v39  ;;  %v3070_v37 = vadd.f32 %v15491_v46, %v15490_v58  ;;  %v3079_v26 = vadd.f32 %v15493_v6, %v15492_v53  ;;  %v3088_v17 = vadd.f32 %v15495_v5, %v15494_v57  ;;  %v15501_v9 = vld [vmem:[#allocation121_spill] sm:$0xff]  ;;  %v15503_v38 = vld [vmem:[#allocation418_spill] sm:$0xff]  ;;  %v15505_v56 = vld [vmem:[#allocation480_spill] sm:$0xff] }
 0x55d   : > { %15484 = vst [vmem:[#allocation291_spill] sm:$0xff] %v11125_v30  ;;  %15485 = vst [vmem:[#allocation370_spill] sm:$0xff] %v11127_v45  ;;  %v3097_v25 = vadd.f32 %v15497_v31, %v15496_v12  ;;  %v3106_v48 = vadd.f32 %v15499_v8, %v15498_v51  ;;  %v3115_v60 = vadd.f32 %v15501_v9, %v15500_v27  ;;  %v15504_v33 = vld [vmem:[#allocation190_spill] sm:$0xff]  ;;  %v15506_v39 = vld [vmem:[#allocation191_spill] sm:$0xff] }
 0x55e   : > { %15486 = vst [vmem:[#allocation142_spill] sm:$0xff] %v11129_v21  ;;  %15487 = vst [vmem:[#allocation432_spill] sm:$0xff] %v11131_v36  ;;  %v3124_v13 = vadd.f32 %v15503_v38, %v15502_v14  ;;  %v3062_v40 = vadd.f32 %v3061_v24, %v15504_v33  ;;  %v3071_v55 = vadd.f32 %v3070_v37, %v15505_v56  ;;  %v15507_v58 = vld [vmem:[#allocation481_spill] sm:$0xff]  ;;  %v15508_v53 = vld [vmem:[#allocation192_spill] sm:$0xff] }
 0x55f   : > { %v3080_v43 = vadd.f32 %v3079_v26, %v15506_v39  ;;  %v3089_v46 = vadd.f32 %v3088_v17, %v15507_v58  ;;  %v3098_v6 = vadd.f32 %v3097_v25, %v15508_v53  ;;  %v15509_v57 = vld [vmem:[#allocation482_spill] sm:$0xff]  ;;  %v15510_v12 = vld [vmem:[#allocation193_spill] sm:$0xff]  ;;  %v15511_v51 = vld [vmem:[#allocation483_spill] sm:$0xff] }
 0x560   : > { %v3107_v5 = vadd.f32 %v3106_v48, %v15509_v57  ;;  %v3116_v31 = vadd.f32 %v3115_v60, %v15510_v12  ;;  %v3125_v8 = vadd.f32 %v3124_v13, %v15511_v51  ;;  %v3063_v27 = vadd.f32 %v3062_v40, %v10283_v29  ;;  %v15512_v9 = vld [vmem:[#allocation543_spill] sm:$0xff]  ;;  %v15513_v38 = vld [vmem:[#allocation260_spill] sm:$0xff]  ;;  %v15515_v56 = vld [vmem:[#allocation545_spill] sm:$0xff] }
 0x561   : > { %v3072_v14 = vadd.f32 %v3071_v55, %v15512_v9  ;;  %v3081_v24 = vadd.f32 %v3080_v43, %v10293_v22  ;;  %v3090_v37 = vadd.f32 %v3089_v46, %v15513_v38  ;;  %v3099_v26 = vadd.f32 %v3098_v6, %v10303_v41  ;;  %v15514_v33 = vld [vmem:[#allocation544_spill] sm:$0xff] }
 0x562   : > { %v3108_v17 = vadd.f32 %v3107_v5, %v15514_v33  ;;  %v3117_v25 = vadd.f32 %v3116_v31, %v10313_v23  ;;  %v3126_v48 = vadd.f32 %v3125_v8, %v15515_v56  ;;  %v3064_v39 = vrot.slane %v3063_v27, 4 }
 0x563   : > { %v3073_v60 = vrot.slane %v3072_v14, 4  ;;  %v3082_v58 = vrot.slane %v3081_v24, 4  ;;  %v3091_v13 = vrot.slane %v3090_v37, 4  ;;  %v3100_v53 = vrot.slane %v3099_v26, 4 }
 0x564   : > { %v3109_v29 = vrot.slane %v3108_v17, 4  ;;  %v3118_v40 = vrot.slane %v3117_v25, 4  ;;  %v3127_v55 = vrot.slane %v3126_v48, 4  ;;  %v3065_v57 = vadd.f32 %v3064_v39, %v3063_v27 }
 0x565   : > { %v3074_v22 = vadd.f32 %v3073_v60, %v3072_v14  ;;  %v3083_v43 = vadd.f32 %v3082_v58, %v3081_v24  ;;  %v3092_v46 = vadd.f32 %v3091_v13, %v3090_v37  ;;  %v3101_v12 = vadd.f32 %v3100_v53, %v3099_v26 }
 0x566   : > { %v3110_v41 = vadd.f32 %v3109_v29, %v3108_v17  ;;  %v3119_v6 = vadd.f32 %v3118_v40, %v3117_v25  ;;  %v3128_v5 = vadd.f32 %v3127_v55, %v3126_v48  ;;  %v3066_v51 = vrot.slane %v3065_v57, 2 }
 0x567   : > { %v3075_v23 = vrot.slane %v3074_v22, 2  ;;  %v3084_v31 = vrot.slane %v3083_v43, 2  ;;  %v3093_v8 = vrot.slane %v3092_v46, 2  ;;  %v3102_v9 = vrot.slane %v3101_v12, 2 }
 0x568   : > { %v3111_v38 = vrot.slane %v3110_v41, 2  ;;  %v3120_v33 = vrot.slane %v3119_v6, 2  ;;  %v3129_v56 = vrot.slane %v3128_v5, 2  ;;  %v3067_v36 = vadd.f32 %v3066_v51, %v3065_v57 }
 0x569   : > { %v3076_v21 = vadd.f32 %v3075_v23, %v3074_v22  ;;  %v3085_v45 = vadd.f32 %v3084_v31, %v3083_v43  ;;  %v3094_v30 = vadd.f32 %v3093_v8, %v3092_v46  ;;  %v3103_v27 = vadd.f32 %v3102_v9, %v3101_v12  ;;  %v15519_v12 = vld [vmem:[#allocation49_spill] sm:$0xff]  ;;  %v15524_v23 = vld [vmem:[#allocation123_spill] sm:$0xff]  ;;  %v15525_v31 = vld [vmem:[#allocation364_spill] sm:$0xff] }
 0x56a   : > { %v3112_v14 = vadd.f32 %v3111_v38, %v3110_v41  ;;  %v3121_v24 = vadd.f32 %v3120_v33, %v3119_v6  ;;  %v3130_v37 = vadd.f32 %v3129_v56, %v3128_v5  ;;  %v3068_v26 = vrot.slane %v3067_v36, 1  ;;  %v15520_v41 = vld [vmem:[#allocation122_spill] sm:$0xff]  ;;  %v15521_v5 = vld [vmem:[#allocation363_spill] sm:$0xff]  ;;  %v15528_v38 = vld [vmem:[#allocation124_spill] sm:$0xff] }
 0x56b   : > { %v3077_v17 = vrot.slane %v3076_v21, 1  ;;  %v3086_v25 = vrot.slane %v3085_v45, 1  ;;  %v3095_v48 = vrot.slane %v3094_v30, 1  ;;  %v3104_v39 = vrot.slane %v3103_v27, 1  ;;  %v15527_v9 = vld [vmem:[#allocation51_spill] sm:$0xff]  ;;  %v15529_v56 = vld [vmem:[#allocation365_spill] sm:$0xff] }
 0x56c   : > { %v3113_v60 = vrot.slane %v3112_v14, 1  ;;  %v3122_v58 = vrot.slane %v3121_v24, 1  ;;  %v3131_v13 = vrot.slane %v3130_v37, 1  ;;  %v11165_v53 = vadd.f32 %v3068_v26, %v3067_v36  ;;  %v15522_v36 = vld [vmem:[#allocation419_spill] sm:$0xff] }
 0x56d   : > { %v11167_v29 = vadd.f32 %v3077_v17, %v3076_v21  ;;  %v11169_v40 = vadd.f32 %v3086_v25, %v3085_v45  ;;  %v11171_v55 = vadd.f32 %v3095_v48, %v3094_v30  ;;  %v11173_v57 = vadd.f32 %v3104_v39, %v3103_v27  ;;  %v15523_v21 = vld [vmem:[#allocation50_spill] sm:$0xff]  ;;  %v15526_v30 = vld [vmem:[#allocation420_spill] sm:$0xff]  ;;  %v15530_v27 = vld [vmem:[#allocation421_spill] sm:$0xff] }
 0x56e   : > { %v11175_v22 = vadd.f32 %v3113_v60, %v3112_v14  ;;  %v11177_v43 = vadd.f32 %v3122_v58, %v3121_v24  ;;  %v11179_v46 = vadd.f32 %v3131_v13, %v3130_v37  ;;  %v3133_v6 = vadd.f32 %v15520_v41, %v15519_v12  ;;  %v15531_v24 = vld [vmem:[#allocation52_spill] sm:$0xff]  ;;  %v15532_v37 = vld [vmem:[#allocation125_spill] sm:$0xff]  ;;  %v15533_v17 = vld [vmem:[#allocation366_spill] sm:$0xff] }
 0x56f   : > { %v3142_v51 = vadd.f32 %v15522_v36, %v15521_v5  ;;  %v3151_v45 = vadd.f32 %v15524_v23, %v15523_v21  ;;  %v3160_v8 = vadd.f32 %v15526_v30, %v15525_v31  ;;  %v3169_v33 = vadd.f32 %v15528_v38, %v15527_v9  ;;  %v15534_v25 = vld [vmem:[#allocation422_spill] sm:$0xff]  ;;  %v15536_v58 = vld [vmem:[#allocation484_spill] sm:$0xff]  ;;  %v15537_v12 = vld [vmem:[#allocation195_spill] sm:$0xff] }
 0x570   : > { %15516 = vst [vmem:[#allocation143_spill] sm:$0xff] %v11175_v22  ;;  %15517 = vst [vmem:[#allocation433_spill] sm:$0xff] %v11177_v43  ;;  %v3178_v14 = vadd.f32 %v15530_v27, %v15529_v56  ;;  %v3187_v26 = vadd.f32 %v15532_v37, %v15531_v24  ;;  %v3196_v48 = vadd.f32 %v15534_v25, %v15533_v17  ;;  %v15535_v39 = vld [vmem:[#allocation194_spill] sm:$0xff]  ;;  %v15538_v5 = vld [vmem:[#allocation485_spill] sm:$0xff] }
 0x571   : > { %15518 = vst [vmem:[#allocation144_spill] sm:$0xff] %v11179_v46  ;;  %v3134_v60 = vadd.f32 %v3133_v6, %v15535_v39  ;;  %v3143_v13 = vadd.f32 %v3142_v51, %v15536_v58  ;;  %v3152_v41 = vadd.f32 %v3151_v45, %v15537_v12  ;;  %v3161_v36 = vadd.f32 %v3160_v8, %v15538_v5  ;;  %v15539_v21 = vld [vmem:[#allocation196_spill] sm:$0xff]  ;;  %v15540_v31 = vld [vmem:[#allocation486_spill] sm:$0xff]  ;;  %v15541_v9 = vld [vmem:[#allocation197_spill] sm:$0xff] }
 0x572   : > { %v3170_v23 = vadd.f32 %v3169_v33, %v15539_v21  ;;  %v3179_v30 = vadd.f32 %v3178_v14, %v15540_v31  ;;  %v3188_v38 = vadd.f32 %v3187_v26, %v15541_v9  ;;  %v15542_v56 = vld [vmem:[#allocation487_spill] sm:$0xff]  ;;  %v15543_v37 = vld [vmem:[#allocation546_spill] sm:$0xff]  ;;  %v15545_v33 = vld [vmem:[#allocation548_spill] sm:$0xff] }
 0x573   : > { %v3197_v27 = vadd.f32 %v3196_v48, %v15542_v56  ;;  %v3135_v24 = vadd.f32 %v3134_v60, %v10323_v11  ;;  %v3144_v17 = vadd.f32 %v3143_v13, %v15543_v37  ;;  %v3153_v6 = vadd.f32 %v3152_v41, %v10333_v54  ;;  %v15544_v51 = vld [vmem:[#allocation547_spill] sm:$0xff]  ;;  %v15546_v14 = vld [vmem:[#allocation549_spill] sm:$0xff] }
 0x574   : > { %v3162_v25 = vadd.f32 %v3161_v36, %v15544_v51  ;;  %v3171_v45 = vadd.f32 %v3170_v23, %v10343_v2  ;;  %v3180_v8 = vadd.f32 %v3179_v30, %v10348_v4  ;;  %v3189_v39 = vadd.f32 %v3188_v38, %v15545_v33 }
 0x575   : > { %v3198_v58 = vadd.f32 %v3197_v27, %v15546_v14  ;;  %v3136_v26 = vrot.slane %v3135_v24, 4  ;;  %v3145_v12 = vrot.slane %v3144_v17, 4  ;;  %v3154_v48 = vrot.slane %v3153_v6, 4 }
 0x576   : > { %v3163_v5 = vrot.slane %v3162_v25, 4  ;;  %v3172_v11 = vrot.slane %v3171_v45, 4  ;;  %v3181_v60 = vrot.slane %v3180_v8, 4  ;;  %v3190_v21 = vrot.slane %v3189_v39, 4 }
 0x577   : > { %v3199_v13 = vrot.slane %v3198_v58, 4  ;;  %v3137_v54 = vadd.f32 %v3136_v26, %v3135_v24  ;;  %v3146_v41 = vadd.f32 %v3145_v12, %v3144_v17  ;;  %v3155_v36 = vadd.f32 %v3154_v48, %v3153_v6 }
 0x578   : > { %v3164_v31 = vadd.f32 %v3163_v5, %v3162_v25  ;;  %v3173_v2 = vadd.f32 %v3172_v11, %v3171_v45  ;;  %v3182_v23 = vadd.f32 %v3181_v60, %v3180_v8  ;;  %v3191_v4 = vadd.f32 %v3190_v21, %v3189_v39  ;;  %v11219_v60 = vld [vmem:[%s11216_s26] sm:$0xff] }
 0x579   : > { %v3200_v30 = vadd.f32 %v3199_v13, %v3198_v58  ;;  %v3138_v9 = vrot.slane %v3137_v54, 2  ;;  %v3147_v38 = vrot.slane %v3146_v41, 2  ;;  %v3156_v56 = vrot.slane %v3155_v36, 2 }
 0x57a   : > { %v3165_v27 = vrot.slane %v3164_v31, 2  ;;  %v3174_v37 = vrot.slane %v3173_v2, 2  ;;  %v3183_v51 = vrot.slane %v3182_v23, 2  ;;  %v3192_v33 = vrot.slane %v3191_v4, 2 }
 0x57b   : > { %v3201_v14 = vrot.slane %v3200_v30, 2  ;;  %v3139_v46 = vadd.f32 %v3138_v9, %v3137_v54  ;;  %v3148_v43 = vadd.f32 %v3147_v38, %v3146_v41  ;;  %v3157_v22 = vadd.f32 %v3156_v56, %v3155_v36  ;;  %v15556_v38 = vld [vmem:[#allocation22_spill] sm:$0xff] }
 0x57c   : > { %v3166_v24 = vadd.f32 %v3165_v27, %v3164_v31  ;;  %v3175_v17 = vadd.f32 %v3174_v37, %v3173_v2  ;;  %v3184_v6 = vadd.f32 %v3183_v51, %v3182_v23  ;;  %v3193_v25 = vadd.f32 %v3192_v33, %v3191_v4  ;;  %v15553_v4 = vld [vmem:[#allocation53_spill] sm:$0xff] }
 0x57d   : > { %v3202_v45 = vadd.f32 %v3201_v14, %v3200_v30  ;;  %v3140_v8 = vrot.slane %v3139_v46, 1  ;;  %v3149_v39 = vrot.slane %v3148_v43, 1  ;;  %v3158_v58 = vrot.slane %v3157_v22, 1  ;;  %v15554_v30 = vld [vmem:[#allocation423_spill] sm:$0xff] }
 0x57e   : > { %v3167_v26 = vrot.slane %v3166_v24, 1  ;;  %v3176_v12 = vrot.slane %v3175_v17, 1  ;;  %v3185_v48 = vrot.slane %v3184_v6, 1  ;;  %v3194_v5 = vrot.slane %v3193_v25, 1  ;;  %v11248_v27 = vld [vmem:[%s11216_s26 + $0x8] sm:$0xff] }
 0x57f   : > { %v3203_v11 = vrot.slane %v3202_v45, 1  ;;  %v11221_v21 = vadd.f32 %v3140_v8, %v3139_v46  ;;  %v11223_v13 = vadd.f32 %v3149_v39, %v3148_v43  ;;  %v11225_v54 = vadd.f32 %v3158_v58, %v3157_v22  ;;  %v15555_v46 = vld [vmem:[#allocation23_spill] sm:$0xff] }
 0x580   : > { %v11227_v41 = vadd.f32 %v3167_v26, %v3166_v24  ;;  %v11229_v36 = vadd.f32 %v3176_v12, %v3175_v17  ;;  %v11231_v31 = vadd.f32 %v3185_v48, %v3184_v6  ;;  %v11233_v2 = vadd.f32 %v3194_v5, %v3193_v25  ;;  %v15557_v24 = vld [vmem:[#allocation488_spill] sm:$0xff] }
 0x581   : > { %15547 = vst [vmem:[#allocation434_spill] sm:$0xff] %v11225_v54  ;;  %v11235_v23 = vadd.f32 %v3203_v11, %v3202_v45  ;;  %v3205_v9 = vadd.f32 %v15554_v30, %v15553_v4  ;;  %v11242_v22 = vsub.s32 1, %v15556_v38  ;;  %v11245_v56 = vsub.s32 2, %v15556_v38  ;;  %v11271_v8 = vld [vmem:[%s11216_s26 + $0x10] sm:$0xff]  ;;  %v11297_v5 = vld [vmem:[%s11216_s26 + $0x18] sm:$0xff]  ;;  %v11314_v26 = vld [vmem:[%s11216_s26 + $0x20] sm:$0xff] }
 0x582   : > { %15548 = vst [vmem:[#allocation145_spill] sm:$0xff] %v11227_v41  ;;  %15549 = vst [vmem:[#allocation435_spill] sm:$0xff] %v11229_v36  ;;  %v11251_v37 = vsub.s32 3, %v15556_v38  ;;  %v11254_v51 = vsub.s32 4, %v15556_v38  ;;  %v11257_v33 = vsub.s32 5, %v15556_v38  ;;  %v11260_v14 = vsub.s32 6, %v15556_v38 }
 0x583   : > { %15550 = vst [vmem:[#allocation214_spill] sm:$0xff] %v11231_v31  ;;  %15551 = vst [vmem:[#allocation497_spill] sm:$0xff] %v11233_v2  ;;  %v3206_v17 = vadd.f32 %v3205_v9, %v15557_v24  ;;  %v11268_v45 = vsub.s32 7, %v15556_v38  ;;  %v11331_v12 = vld [vmem:[%s11216_s26 + $0x28] sm:$0xff]  ;;  %v11348_v39 = vld [vmem:[%s11216_s26 + $0x30] sm:$0xff]  ;;  %v15559_v43 = vrot.slane %v11219_v60, %v15555_v46  ;;  %v15560_v38 = vrot.slane %v11219_v60, %v11242_v22 }
 0x584   : > { %15552 = vst [vmem:[#allocation215_spill] sm:$0xff] %v11235_v23  ;;  %v11371_v58 = vld [vmem:[%s11216_s26 + $0x38] sm:$0xff]  ;;  %v11390_v6 = vld [vmem:[%s11216_s26 + $0x40] sm:$0xff]  ;;  %v11561_v41 = vld [vmem:[%s11216_s26 + $0x88] sm:$0xff]  ;;  %v15562_v23 = vrot.slane %v11219_v60, %v11251_v37 }
 0x585   : > { %v3207_v48 = vadd.f32 %v3206_v17, %v10363_v44  ;;  %v11504_v44 = vld [vmem:[%s11216_s26 + $0x70] sm:$0xff]  ;;  %v11542_v24 = vld [vmem:[%s11216_s26 + $0x80] sm:$0xff]  ;;  %v11607_v2 = vadd.f32 %v15559_v43, %v10397_v16  ;;  %v11613_v31 = vadd.f32 %v15560_v38, %v10399_v47  ;;  %v15563_v16 = vrot.slane %v11219_v60, %v11254_v51 }
 0x586   : > { %v11625_v54 = vadd.f32 %v15562_v23, %v10403_v61  ;;  %v15564_v47 = vrot.slane %v11219_v60, %v11257_v33  ;;  %v15566_v61 = vrot.slane %v11219_v60, %v11268_v45 }
 0x587   : > { %v3208_v17 = vrot.slane %v3207_v48, 4  ;;  %v11631_v43 = vadd.f32 %v15563_v16, %v10405_v35  ;;  %v15567_v35 = vrot.slane %v11248_v27, %v15555_v46 }
 0x588   : > { %v11637_v38 = vadd.f32 %v15564_v47, %v10407_v59  ;;  %v11649_v23 = vadd.f32 %v15566_v61, %v10411_v19  ;;  %v15568_v59 = vrot.slane %v11248_v27, %v11242_v22  ;;  %v15570_v19 = vrot.slane %v11248_v27, %v11251_v37 }
 0x589   : > { %v3209_v11 = vadd.f32 %v3208_v17, %v3207_v48  ;;  %v11447_v17 = vld [vmem:[%s11216_s26 + $0x58] sm:$0xff]  ;;  %v11655_v16 = vadd.f32 %v15567_v35, %v10445_v63  ;;  %v15571_v63 = vrot.slane %v11248_v27, %v11254_v51 }
 0x58a   : > { %v11523_v48 = vld [vmem:[%s11216_s26 + $0x78] sm:$0xff]  ;;  %v11661_v47 = vadd.f32 %v15568_v59, %v10447_v52  ;;  %v15573_v52 = vrot.slane %v11248_v27, %v11257_v33 }
 0x58b   : > { %v3210_v4 = vrot.slane %v3209_v11, 2  ;;  %v11679_v61 = vadd.f32 %v15571_v63, %v10453_v10  ;;  %v15579_v10 = vld [vmem:[#allocation262_spill] sm:$0xff]  ;;  %v15580_v63 = vrot.slane %v11271_v8, %v15555_v46 }
 0x58c   : > { %v11685_v35 = vadd.f32 %v15573_v52, %v10455_v49  ;;  %v15582_v49 = vld [vmem:[#allocation263_spill] sm:$0xff]  ;;  %v15583_v52 = vrot.slane %v11271_v8, %v11242_v22 }
 0x58d   : > { %v3211_v30 = vadd.f32 %v3210_v4, %v3209_v11  ;;  %v11409_v4 = vld [vmem:[%s11216_s26 + $0x48] sm:$0xff]  ;;  %v11466_v11 = vld [vmem:[%s11216_s26 + $0x60] sm:$0xff]  ;;  %15572 = vst [vmem:[#allocation216_spill] sm:$0xff] %v11679_v61  ;;  %v11703_v61 = vadd.f32 %v15580_v63, %v15579_v10  ;;  %v15592_v63 = vrot.slane %v11271_v8, %v11254_v51 }
 0x58e   : > { %15574 = vst [vmem:[#allocation499_spill] sm:$0xff] %v11685_v35  ;;  %v11709_v35 = vadd.f32 %v15583_v52, %v15582_v49  ;;  %v15591_v10 = vld [vmem:[#allocation266_spill] sm:$0xff]  ;;  %v15594_v49 = vld [vmem:[#allocation267_spill] sm:$0xff]  ;;  %v15595_v52 = vrot.slane %v11271_v8, %v11257_v33 }
 0x58f   : > { %v3212_v9 = vrot.slane %v3211_v30, 1  ;;  %15581 = vst [vmem:[#allocation500_spill] sm:$0xff] %v11703_v61  ;;  %v11727_v61 = vadd.f32 %v15592_v63, %v15591_v10  ;;  %v15602_v10 = vld [vmem:[#allocation128_spill] sm:$0xff]  ;;  %v15603_v63 = vrot.slane %v11297_v5, %v15555_v46 }
 0x590   : > { %15584 = vst [vmem:[#allocation292_spill] sm:$0xff] %v11709_v35  ;;  %v11733_v35 = vadd.f32 %v15595_v52, %v15594_v49  ;;  %v15605_v49 = vld [vmem:[#allocation129_spill] sm:$0xff]  ;;  %v15606_v52 = vrot.slane %v11297_v5, %v11242_v22 }
 0x591   : > { %v11381_v25 = vadd.f32 %v3212_v9, %v3211_v30  ;;  %v11428_v9 = vld [vmem:[%s11216_s26 + $0x50] sm:$0xff]  ;;  %v11485_v30 = vld [vmem:[%s11216_s26 + $0x68] sm:$0xff]  ;;  %15593 = vst [vmem:[#allocation371_spill] sm:$0xff] %v11727_v61  ;;  %v11751_v61 = vadd.f32 %v15603_v63, %v15602_v10  ;;  %v15615_v63 = vrot.slane %v11297_v5, %v11254_v51 }
 0x592   : > { %15596 = vst [vmem:[#allocation294_spill] sm:$0xff] %v11733_v35  ;;  %v11757_v35 = vadd.f32 %v15606_v52, %v15605_v49  ;;  %v15614_v10 = vld [vmem:[#allocation132_spill] sm:$0xff]  ;;  %v15617_v49 = vld [vmem:[#allocation133_spill] sm:$0xff]  ;;  %v15618_v52 = vrot.slane %v11297_v5, %v11257_v33 }
 0x593   : > { %15558 = vst [vmem:[#allocation498_spill] sm:$0xff] %v11381_v25  ;;  %v15561_v25 = vrot.slane %v11219_v60, %v11245_v56  ;;  %15604 = vst [vmem:[#allocation295_spill] sm:$0xff] %v11751_v61  ;;  %v11775_v61 = vadd.f32 %v15615_v63, %v15614_v10  ;;  %v15625_v10 = vld [vmem:[#allocation200_spill] sm:$0xff]  ;;  %v15626_v63 = vrot.slane %v11314_v26, %v15555_v46 }
 0x594   : > { %15607 = vst [vmem:[#allocation372_spill] sm:$0xff] %v11757_v35  ;;  %v11781_v35 = vadd.f32 %v15618_v52, %v15617_v49  ;;  %v15628_v49 = vld [vmem:[#allocation201_spill] sm:$0xff]  ;;  %v15629_v52 = vrot.slane %v11314_v26, %v11242_v22 }
 0x595   : > { %v11619_v36 = vadd.f32 %v15561_v25, %v10401_v20  ;;  %v15565_v20 = vrot.slane %v11219_v60, %v11260_v14  ;;  %v11673_v60 = vadd.f32 %v15570_v19, %v10451_v15  ;;  %v15577_v15 = vld [vmem:[#allocation261_spill] sm:$0xff]  ;;  %15616 = vst [vmem:[#allocation297_spill] sm:$0xff] %v11775_v61  ;;  %v11799_v61 = vadd.f32 %v15626_v63, %v15625_v10  ;;  %v15637_v10 = vld [vmem:[#allocation204_spill] sm:$0xff] }
 0x596   : > { %15619 = vst [vmem:[#allocation373_spill] sm:$0xff] %v11781_v35  ;;  %v11805_v35 = vadd.f32 %v15629_v52, %v15628_v49  ;;  %v15638_v63 = vrot.slane %v11314_v26, %v11254_v51  ;;  %v15640_v49 = vld [vmem:[#allocation205_spill] sm:$0xff]  ;;  %v15641_v52 = vrot.slane %v11314_v26, %v11257_v33 }
 0x597   : > { %v11643_v25 = vadd.f32 %v15565_v20, %v10409_v1  ;;  %v15569_v1 = vrot.slane %v11248_v27, %v11245_v56  ;;  %15627 = vst [vmem:[#allocation77_spill] sm:$0xff] %v11799_v61 }
 0x598   : > { %15630 = vst [vmem:[#allocation299_spill] sm:$0xff] %v11805_v35  ;;  %v11823_v61 = vadd.f32 %v15638_v63, %v15637_v10  ;;  %v11829_v35 = vadd.f32 %v15641_v52, %v15640_v49  ;;  %v15648_v10 = vld [vmem:[#allocation269_spill] sm:$0xff]  ;;  %v15649_v63 = vrot.slane %v11331_v12, %v15555_v46  ;;  %v15651_v49 = vld [vmem:[#allocation55_spill] sm:$0xff]  ;;  %v15652_v52 = vrot.slane %v11331_v12, %v11242_v22 }
 0x599   : > { %v11667_v20 = vadd.f32 %v15569_v1, %v10449_v42  ;;  %v15575_v42 = vrot.slane %v11248_v27, %v11260_v14  ;;  %v15578_v1 = vrot.slane %v11248_v27, %v11268_v45  ;;  %v15588_v27 = vld [vmem:[#allocation265_spill] sm:$0xff] }
 0x59a   : > { %15639 = vst [vmem:[#allocation436_spill] sm:$0xff] %v11823_v61  ;;  %15642 = vst [vmem:[#allocation147_spill] sm:$0xff] %v11829_v35  ;;  %v11847_v61 = vadd.f32 %v15649_v63, %v15648_v10  ;;  %v11853_v35 = vadd.f32 %v15652_v52, %v15651_v49  ;;  %v15660_v10 = vld [vmem:[#allocation271_spill] sm:$0xff]  ;;  %v15661_v63 = vrot.slane %v11331_v12, %v11254_v51  ;;  %v15663_v49 = vld [vmem:[#allocation57_spill] sm:$0xff] }
 0x59b   : > { %v11691_v59 = vadd.f32 %v15575_v42, %v10457_v28  ;;  %v11697_v19 = vadd.f32 %v15578_v1, %v15577_v15  ;;  %v15585_v28 = vld [vmem:[#allocation264_spill] sm:$0xff]  ;;  %v15586_v42 = vrot.slane %v11271_v8, %v11245_v56  ;;  %v15589_v15 = vrot.slane %v11271_v8, %v11251_v37 }
 0x59c   : > { %15650 = vst [vmem:[#allocation148_spill] sm:$0xff] %v11847_v61  ;;  %15653 = vst [vmem:[#allocation438_spill] sm:$0xff] %v11853_v35  ;;  %v11871_v61 = vadd.f32 %v15661_v63, %v15660_v10  ;;  %v15664_v52 = vrot.slane %v11331_v12, %v11257_v33  ;;  %v15671_v10 = vld [vmem:[#allocation273_spill] sm:$0xff]  ;;  %v15672_v63 = vrot.slane %v11348_v39, %v15555_v46 }
 0x59d   : > { %15576 = vst [vmem:[#allocation217_spill] sm:$0xff] %v11691_v59  ;;  %v11715_v59 = vadd.f32 %v15586_v42, %v15585_v28  ;;  %v11721_v1 = vadd.f32 %v15589_v15, %v15588_v27  ;;  %v15597_v28 = vld [vmem:[#allocation126_spill] sm:$0xff]  ;;  %v15598_v42 = vrot.slane %v11271_v8, %v11260_v14  ;;  %v15600_v27 = vld [vmem:[#allocation127_spill] sm:$0xff]  ;;  %v15601_v15 = vrot.slane %v11271_v8, %v11268_v45 }
 0x59e   : > { %v15611_v8 = vld [vmem:[#allocation131_spill] sm:$0xff]  ;;  %15662 = vst [vmem:[#allocation218_spill] sm:$0xff] %v11871_v61  ;;  %v11877_v35 = vadd.f32 %v15664_v52, %v15663_v49  ;;  %v11895_v61 = vadd.f32 %v15672_v63, %v15671_v10  ;;  %v15675_v52 = vrot.slane %v11348_v39, %v11242_v22  ;;  %v15684_v63 = vrot.slane %v11348_v39, %v11254_v51 }
 0x59f   : > { %15587 = vst [vmem:[#allocation74_spill] sm:$0xff] %v11715_v59  ;;  %15590 = vst [vmem:[#allocation293_spill] sm:$0xff] %v11721_v1  ;;  %v11739_v59 = vadd.f32 %v15598_v42, %v15597_v28  ;;  %v11745_v1 = vadd.f32 %v15601_v15, %v15600_v27  ;;  %v15608_v28 = vld [vmem:[#allocation130_spill] sm:$0xff]  ;;  %v15609_v42 = vrot.slane %v11297_v5, %v11245_v56  ;;  %v15674_v49 = vld [vmem:[#allocation59_spill] sm:$0xff] }
 0x5a0   : > { %v15612_v27 = vrot.slane %v11297_v5, %v11251_v37  ;;  %15665 = vst [vmem:[#allocation501_spill] sm:$0xff] %v11877_v35  ;;  %15673 = vst [vmem:[#allocation502_spill] sm:$0xff] %v11895_v61  ;;  %v11901_v35 = vadd.f32 %v15675_v52, %v15674_v49  ;;  %v15683_v10 = vld [vmem:[#allocation275_spill] sm:$0xff]  ;;  %v15686_v49 = vld [vmem:[#allocation61_spill] sm:$0xff]  ;;  %v15687_v52 = vrot.slane %v11348_v39, %v11257_v33 }
 0x5a1   : > { %15599 = vst [vmem:[#allocation75_spill] sm:$0xff] %v11739_v59  ;;  %v11763_v59 = vadd.f32 %v15609_v42, %v15608_v28  ;;  %v15620_v28 = vld [vmem:[#allocation198_spill] sm:$0xff]  ;;  %v15621_v42 = vrot.slane %v11297_v5, %v11260_v14  ;;  %v11919_v61 = vadd.f32 %v15684_v63, %v15683_v10  ;;  %v15694_v10 = vld [vmem:[#allocation135_spill] sm:$0xff]  ;;  %v15695_v63 = vrot.slane %v11371_v58, %v15555_v46 }
 0x5a2   : > { %v11769_v15 = vadd.f32 %v15612_v27, %v15611_v8  ;;  %v15623_v8 = vld [vmem:[#allocation199_spill] sm:$0xff]  ;;  %v15624_v27 = vrot.slane %v11297_v5, %v11268_v45  ;;  %15676 = vst [vmem:[#allocation220_spill] sm:$0xff] %v11901_v35  ;;  %v11925_v35 = vadd.f32 %v15687_v52, %v15686_v49  ;;  %v15697_v49 = vld [vmem:[#allocation425_spill] sm:$0xff]  ;;  %v15698_v52 = vrot.slane %v11371_v58, %v11242_v22 }
 0x5a3   : > { %15610 = vst [vmem:[#allocation296_spill] sm:$0xff] %v11763_v59  ;;  %v11787_v59 = vadd.f32 %v15621_v42, %v15620_v28  ;;  %v15631_v28 = vld [vmem:[#allocation202_spill] sm:$0xff]  ;;  %v15632_v42 = vrot.slane %v11314_v26, %v11245_v56  ;;  %v15634_v5 = vld [vmem:[#allocation203_spill] sm:$0xff]  ;;  %15685 = vst [vmem:[#allocation504_spill] sm:$0xff] %v11919_v61  ;;  %v11943_v61 = vadd.f32 %v15695_v63, %v15694_v10 }
 0x5a4   : > { %15613 = vst [vmem:[#allocation76_spill] sm:$0xff] %v11769_v15  ;;  %v11793_v15 = vadd.f32 %v15624_v27, %v15623_v8  ;;  %v15635_v8 = vrot.slane %v11314_v26, %v11251_v37  ;;  %15688 = vst [vmem:[#allocation300_spill] sm:$0xff] %v11925_v35  ;;  %v11949_v35 = vadd.f32 %v15698_v52, %v15697_v49  ;;  %v15706_v10 = vld [vmem:[#allocation137_spill] sm:$0xff]  ;;  %v15709_v49 = vld [vmem:[#allocation427_spill] sm:$0xff] }
 0x5a5   : > { %15622 = vst [vmem:[#allocation298_spill] sm:$0xff] %v11787_v59  ;;  %v11811_v59 = vadd.f32 %v15632_v42, %v15631_v28  ;;  %v15643_v28 = vld [vmem:[#allocation268_spill] sm:$0xff]  ;;  %v15644_v42 = vrot.slane %v11314_v26, %v11260_v14  ;;  %15696 = vst [vmem:[#allocation301_spill] sm:$0xff] %v11943_v61  ;;  %v15707_v63 = vrot.slane %v11371_v58, %v11254_v51 }
 0x5a6   : > { %v11817_v27 = vadd.f32 %v15635_v8, %v15634_v5  ;;  %v15646_v5 = vld [vmem:[#allocation54_spill] sm:$0xff]  ;;  %v15647_v8 = vrot.slane %v11314_v26, %v11268_v45  ;;  %v15657_v26 = vld [vmem:[#allocation56_spill] sm:$0xff]  ;;  %15699 = vst [vmem:[#allocation375_spill] sm:$0xff] %v11949_v35  ;;  %v15710_v52 = vrot.slane %v11371_v58, %v11257_v33 }
 0x5a7   : > { %15633 = vst [vmem:[#allocation374_spill] sm:$0xff] %v11811_v59  ;;  %v11835_v59 = vadd.f32 %v15644_v42, %v15643_v28  ;;  %v15654_v28 = vld [vmem:[#allocation270_spill] sm:$0xff]  ;;  %v15655_v42 = vrot.slane %v11331_v12, %v11245_v56  ;;  %v11967_v61 = vadd.f32 %v15707_v63, %v15706_v10  ;;  %v15717_v10 = vld [vmem:[#allocation207_spill] sm:$0xff]  ;;  %v15718_v63 = vrot.slane %v11390_v6, %v15555_v46 }
 0x5a8   : > { %15636 = vst [vmem:[#allocation146_spill] sm:$0xff] %v11817_v27  ;;  %v11841_v27 = vadd.f32 %v15647_v8, %v15646_v5  ;;  %v15658_v5 = vrot.slane %v11331_v12, %v11251_v37  ;;  %v11973_v35 = vadd.f32 %v15710_v52, %v15709_v49  ;;  %v15720_v49 = vld [vmem:[#allocation490_spill] sm:$0xff]  ;;  %v15721_v52 = vrot.slane %v11390_v6, %v11242_v22 }
 0x5a9   : > { %15645 = vst [vmem:[#allocation437_spill] sm:$0xff] %v11835_v59  ;;  %v11859_v59 = vadd.f32 %v15655_v42, %v15654_v28  ;;  %v15666_v28 = vld [vmem:[#allocation272_spill] sm:$0xff]  ;;  %v15667_v42 = vrot.slane %v11331_v12, %v11260_v14  ;;  %15708 = vst [vmem:[#allocation303_spill] sm:$0xff] %v11967_v61  ;;  %v11991_v61 = vadd.f32 %v15718_v63, %v15717_v10  ;;  %v15729_v10 = vld [vmem:[#allocation209_spill] sm:$0xff] }
 0x5aa   : > { %v11865_v8 = vadd.f32 %v15658_v5, %v15657_v26  ;;  %v15669_v26 = vld [vmem:[#allocation58_spill] sm:$0xff]  ;;  %v15670_v5 = vrot.slane %v11331_v12, %v11268_v45  ;;  %v15680_v12 = vld [vmem:[#allocation60_spill] sm:$0xff]  ;;  %15711 = vst [vmem:[#allocation376_spill] sm:$0xff] %v11973_v35  ;;  %v11997_v35 = vadd.f32 %v15721_v52, %v15720_v49  ;;  %v15730_v63 = vrot.slane %v11390_v6, %v11254_v51 }
 0x5ab   : > { %15656 = vst [vmem:[#allocation149_spill] sm:$0xff] %v11859_v59  ;;  %v11883_v59 = vadd.f32 %v15667_v42, %v15666_v28  ;;  %v15677_v28 = vld [vmem:[#allocation274_spill] sm:$0xff]  ;;  %v15678_v42 = vrot.slane %v11348_v39, %v11245_v56  ;;  %15719 = vst [vmem:[#allocation80_spill] sm:$0xff] %v11991_v61  ;;  %v15732_v49 = vld [vmem:[#allocation492_spill] sm:$0xff]  ;;  %v15733_v52 = vrot.slane %v11390_v6, %v11257_v33 }
 0x5ac   : > { %15659 = vst [vmem:[#allocation439_spill] sm:$0xff] %v11865_v8  ;;  %v11889_v8 = vadd.f32 %v15670_v5, %v15669_v26  ;;  %v15681_v26 = vrot.slane %v11348_v39, %v11251_v37  ;;  %15722 = vst [vmem:[#allocation305_spill] sm:$0xff] %v11997_v35  ;;  %v12015_v61 = vadd.f32 %v15730_v63, %v15729_v10  ;;  %v15740_v10 = vld [vmem:[#allocation277_spill] sm:$0xff] }
 0x5ad   : > { %15668 = vst [vmem:[#allocation219_spill] sm:$0xff] %v11883_v59  ;;  %v11907_v59 = vadd.f32 %v15678_v42, %v15677_v28  ;;  %v15689_v28 = vld [vmem:[#allocation134_spill] sm:$0xff]  ;;  %v15690_v42 = vrot.slane %v11348_v39, %v11260_v14  ;;  %v12021_v35 = vadd.f32 %v15733_v52, %v15732_v49  ;;  %v15741_v63 = vrot.slane %v11409_v4, %v15555_v46  ;;  %v15743_v49 = vld [vmem:[#allocation63_spill] sm:$0xff] }
 0x5ae   : > { %v11913_v5 = vadd.f32 %v15681_v26, %v15680_v12  ;;  %v15692_v12 = vld [vmem:[#allocation424_spill] sm:$0xff]  ;;  %v15693_v26 = vrot.slane %v11348_v39, %v11268_v45  ;;  %v15703_v39 = vld [vmem:[#allocation426_spill] sm:$0xff]  ;;  %15731 = vst [vmem:[#allocation81_spill] sm:$0xff] %v12015_v61  ;;  %v15744_v52 = vrot.slane %v11409_v4, %v11242_v22 }
 0x5af   : > { %15679 = vst [vmem:[#allocation503_spill] sm:$0xff] %v11907_v59  ;;  %v11931_v59 = vadd.f32 %v15690_v42, %v15689_v28  ;;  %v15700_v28 = vld [vmem:[#allocation136_spill] sm:$0xff]  ;;  %v15701_v42 = vrot.slane %v11371_v58, %v11245_v56  ;;  %15734 = vst [vmem:[#allocation307_spill] sm:$0xff] %v12021_v35  ;;  %v12039_v61 = vadd.f32 %v15741_v63, %v15740_v10  ;;  %v15752_v10 = vld [vmem:[#allocation279_spill] sm:$0xff] }
 0x5b0   : > { %15682 = vst [vmem:[#allocation221_spill] sm:$0xff] %v11913_v5  ;;  %v11937_v5 = vadd.f32 %v15693_v26, %v15692_v12  ;;  %v15704_v12 = vrot.slane %v11371_v58, %v11251_v37  ;;  %v12045_v35 = vadd.f32 %v15744_v52, %v15743_v49  ;;  %v15753_v63 = vrot.slane %v11409_v4, %v11254_v51  ;;  %v15755_v49 = vld [vmem:[#allocation65_spill] sm:$0xff] }
 0x5b1   : > { %15691 = vst [vmem:[#allocation78_spill] sm:$0xff] %v11931_v59  ;;  %v11955_v59 = vadd.f32 %v15701_v42, %v15700_v28  ;;  %v15712_v28 = vld [vmem:[#allocation206_spill] sm:$0xff]  ;;  %v15713_v42 = vrot.slane %v11371_v58, %v11260_v14  ;;  %15742 = vst [vmem:[#allocation150_spill] sm:$0xff] %v12039_v61  ;;  %v15756_v52 = vrot.slane %v11409_v4, %v11257_v33 }
 0x5b2   : > { %v11961_v26 = vadd.f32 %v15704_v12, %v15703_v39  ;;  %v15715_v39 = vld [vmem:[#allocation489_spill] sm:$0xff]  ;;  %v15716_v12 = vrot.slane %v11371_v58, %v11268_v45  ;;  %v15726_v58 = vld [vmem:[#allocation491_spill] sm:$0xff]  ;;  %15745 = vst [vmem:[#allocation440_spill] sm:$0xff] %v12045_v35  ;;  %v12063_v61 = vadd.f32 %v15753_v63, %v15752_v10  ;;  %v15764_v63 = vrot.slane %v11428_v9, %v15555_v46 }
 0x5b3   : > { %15702 = vst [vmem:[#allocation302_spill] sm:$0xff] %v11955_v59  ;;  %v11979_v59 = vadd.f32 %v15713_v42, %v15712_v28  ;;  %v15723_v28 = vld [vmem:[#allocation208_spill] sm:$0xff]  ;;  %v15724_v42 = vrot.slane %v11390_v6, %v11245_v56  ;;  %v12069_v35 = vadd.f32 %v15756_v52, %v15755_v49  ;;  %v15763_v10 = vld [vmem:[#allocation281_spill] sm:$0xff]  ;;  %v15766_v49 = vld [vmem:[#allocation67_spill] sm:$0xff]  ;;  %v15767_v52 = vrot.slane %v11428_v9, %v11242_v22 }
 0x5b4   : > { %15705 = vst [vmem:[#allocation79_spill] sm:$0xff] %v11961_v26  ;;  %v11985_v26 = vadd.f32 %v15716_v12, %v15715_v39  ;;  %v15727_v39 = vrot.slane %v11390_v6, %v11251_v37  ;;  %15754 = vst [vmem:[#allocation152_spill] sm:$0xff] %v12063_v61  ;;  %v12087_v61 = vadd.f32 %v15764_v63, %v15763_v10  ;;  %v15775_v10 = vld [vmem:[#allocation283_spill] sm:$0xff] }
 0x5b5   : > { %15714 = vst [vmem:[#allocation304_spill] sm:$0xff] %v11979_v59  ;;  %v12003_v59 = vadd.f32 %v15724_v42, %v15723_v28  ;;  %v15735_v28 = vld [vmem:[#allocation276_spill] sm:$0xff]  ;;  %v15736_v42 = vrot.slane %v11390_v6, %v11260_v14  ;;  %15757 = vst [vmem:[#allocation442_spill] sm:$0xff] %v12069_v35  ;;  %v12093_v35 = vadd.f32 %v15767_v52, %v15766_v49  ;;  %v15778_v49 = vld [vmem:[#allocation69_spill] sm:$0xff] }
 0x5b6   : > { %v12009_v12 = vadd.f32 %v15727_v39, %v15726_v58  ;;  %v15738_v58 = vld [vmem:[#allocation62_spill] sm:$0xff]  ;;  %v15739_v39 = vrot.slane %v11390_v6, %v11268_v45  ;;  %v15749_v6 = vld [vmem:[#allocation64_spill] sm:$0xff]  ;;  %15765 = vst [vmem:[#allocation443_spill] sm:$0xff] %v12087_v61  ;;  %v15776_v63 = vrot.slane %v11428_v9, %v11254_v51  ;;  %v15779_v52 = vrot.slane %v11428_v9, %v11257_v33 }
 0x5b7   : > { %15725 = vst [vmem:[#allocation377_spill] sm:$0xff] %v12003_v59  ;;  %v12027_v59 = vadd.f32 %v15736_v42, %v15735_v28  ;;  %v15746_v28 = vld [vmem:[#allocation278_spill] sm:$0xff]  ;;  %v15747_v42 = vrot.slane %v11409_v4, %v11245_v56  ;;  %15768 = vst [vmem:[#allocation222_spill] sm:$0xff] %v12093_v35 }
 0x5b8   : > { %15728 = vst [vmem:[#allocation306_spill] sm:$0xff] %v12009_v12  ;;  %v12033_v12 = vadd.f32 %v15739_v39, %v15738_v58  ;;  %v15750_v58 = vrot.slane %v11409_v4, %v11251_v37  ;;  %v12111_v61 = vadd.f32 %v15776_v63, %v15775_v10  ;;  %v12117_v35 = vadd.f32 %v15779_v52, %v15778_v49  ;;  %v15786_v10 = vld [vmem:[#allocation139_spill] sm:$0xff]  ;;  %v15789_v49 = vld [vmem:[#allocation429_spill] sm:$0xff] }
 0x5b9   : > { %15737 = vst [vmem:[#allocation378_spill] sm:$0xff] %v12027_v59  ;;  %v12051_v59 = vadd.f32 %v15747_v42, %v15746_v28  ;;  %v15758_v28 = vld [vmem:[#allocation280_spill] sm:$0xff]  ;;  %v15759_v42 = vrot.slane %v11409_v4, %v11260_v14  ;;  %v15787_v63 = vrot.slane %v11447_v17, %v15555_v46  ;;  %v15790_v52 = vrot.slane %v11447_v17, %v11242_v22 }
 0x5ba   : > { %v12057_v39 = vadd.f32 %v15750_v58, %v15749_v6  ;;  %v15761_v6 = vld [vmem:[#allocation66_spill] sm:$0xff]  ;;  %v15762_v58 = vrot.slane %v11409_v4, %v11268_v45  ;;  %v15772_v4 = vld [vmem:[#allocation68_spill] sm:$0xff]  ;;  %15777 = vst [vmem:[#allocation506_spill] sm:$0xff] %v12111_v61  ;;  %15780 = vst [vmem:[#allocation224_spill] sm:$0xff] %v12117_v35 }
 0x5bb   : > { %15748 = vst [vmem:[#allocation151_spill] sm:$0xff] %v12051_v59  ;;  %v12075_v59 = vadd.f32 %v15759_v42, %v15758_v28  ;;  %v15769_v28 = vld [vmem:[#allocation282_spill] sm:$0xff]  ;;  %v15770_v42 = vrot.slane %v11428_v9, %v11245_v56  ;;  %v12135_v61 = vadd.f32 %v15787_v63, %v15786_v10  ;;  %v12141_v35 = vadd.f32 %v15790_v52, %v15789_v49  ;;  %v15798_v10 = vld [vmem:[#allocation141_spill] sm:$0xff]  ;;  %v15801_v49 = vld [vmem:[#allocation431_spill] sm:$0xff] }
 0x5bc   : > { %15751 = vst [vmem:[#allocation441_spill] sm:$0xff] %v12057_v39  ;;  %v12081_v39 = vadd.f32 %v15762_v58, %v15761_v6  ;;  %v15773_v6 = vrot.slane %v11428_v9, %v11251_v37  ;;  %v15799_v63 = vrot.slane %v11447_v17, %v11254_v51  ;;  %v15802_v52 = vrot.slane %v11447_v17, %v11257_v33 }
 0x5bd   : > { %15760 = vst [vmem:[#allocation153_spill] sm:$0xff] %v12075_v59  ;;  %v12099_v59 = vadd.f32 %v15770_v42, %v15769_v28  ;;  %v15781_v28 = vld [vmem:[#allocation138_spill] sm:$0xff]  ;;  %v15782_v42 = vrot.slane %v11428_v9, %v11260_v14  ;;  %15788 = vst [vmem:[#allocation225_spill] sm:$0xff] %v12135_v61 }
 0x5be   : > { %v12105_v58 = vadd.f32 %v15773_v6, %v15772_v4  ;;  %v15784_v4 = vld [vmem:[#allocation428_spill] sm:$0xff]  ;;  %v15785_v6 = vrot.slane %v11428_v9, %v11268_v45  ;;  %15791 = vst [vmem:[#allocation508_spill] sm:$0xff] %v12141_v35  ;;  %v15795_v9 = vld [vmem:[#allocation430_spill] sm:$0xff]  ;;  %v12159_v61 = vadd.f32 %v15799_v63, %v15798_v10  ;;  %v12165_v35 = vadd.f32 %v15802_v52, %v15801_v49  ;;  %v15809_v10 = vld [vmem:[#allocation211_spill] sm:$0xff] }
 0x5bf   : > { %15771 = vst [vmem:[#allocation505_spill] sm:$0xff] %v12099_v59  ;;  %v12123_v59 = vadd.f32 %v15782_v42, %v15781_v28  ;;  %v15792_v28 = vld [vmem:[#allocation140_spill] sm:$0xff]  ;;  %v15793_v42 = vrot.slane %v11447_v17, %v11245_v56  ;;  %v15810_v63 = vrot.slane %v11466_v11, %v15555_v46  ;;  %v15812_v49 = vld [vmem:[#allocation494_spill] sm:$0xff]  ;;  %v15813_v52 = vrot.slane %v11466_v11, %v11242_v22 }
 0x5c0   : > { %15774 = vst [vmem:[#allocation223_spill] sm:$0xff] %v12105_v58  ;;  %v12129_v58 = vadd.f32 %v15785_v6, %v15784_v4  ;;  %v15796_v4 = vrot.slane %v11447_v17, %v11251_v37  ;;  %15800 = vst [vmem:[#allocation309_spill] sm:$0xff] %v12159_v61 }
 0x5c1   : > { %15783 = vst [vmem:[#allocation507_spill] sm:$0xff] %v12123_v59  ;;  %v12147_v59 = vadd.f32 %v15793_v42, %v15792_v28  ;;  %15803 = vst [vmem:[#allocation379_spill] sm:$0xff] %v12165_v35  ;;  %v15804_v28 = vld [vmem:[#allocation210_spill] sm:$0xff]  ;;  %v15805_v42 = vrot.slane %v11447_v17, %v11260_v14  ;;  %v12183_v61 = vadd.f32 %v15810_v63, %v15809_v10  ;;  %v15821_v10 = vld [vmem:[#allocation213_spill] sm:$0xff] }
 0x5c2   : > { %v12153_v6 = vadd.f32 %v15796_v4, %v15795_v9  ;;  %v15807_v9 = vld [vmem:[#allocation493_spill] sm:$0xff]  ;;  %v15808_v4 = vrot.slane %v11447_v17, %v11268_v45  ;;  %v12189_v35 = vadd.f32 %v15813_v52, %v15812_v49  ;;  %v15818_v17 = vld [vmem:[#allocation495_spill] sm:$0xff]  ;;  %v15822_v63 = vrot.slane %v11466_v11, %v11254_v51  ;;  %v15823_v49 = vld [vmem:[#allocation496_spill] sm:$0xff] }
 0x5c3   : > { %15794 = vst [vmem:[#allocation308_spill] sm:$0xff] %v12147_v59  ;;  %v12171_v59 = vadd.f32 %v15805_v42, %v15804_v28  ;;  %15811 = vst [vmem:[#allocation83_spill] sm:$0xff] %v12183_v61  ;;  %v15815_v28 = vld [vmem:[#allocation212_spill] sm:$0xff]  ;;  %v15816_v42 = vrot.slane %v11466_v11, %v11245_v56  ;;  %v15824_v52 = vrot.slane %v11466_v11, %v11257_v33 }
 0x5c4   : > { %15797 = vst [vmem:[#allocation82_spill] sm:$0xff] %v12153_v6  ;;  %v12177_v6 = vadd.f32 %v15808_v4, %v15807_v9  ;;  %15814 = vst [vmem:[#allocation311_spill] sm:$0xff] %v12189_v35  ;;  %v15819_v9 = vrot.slane %v11466_v11, %v11251_v37  ;;  %v12207_v61 = vadd.f32 %v15822_v63, %v15821_v10 }
 0x5c5   : > { %15806 = vst [vmem:[#allocation310_spill] sm:$0xff] %v12171_v59  ;;  %v12195_v59 = vadd.f32 %v15816_v42, %v15815_v28  ;;  %v12213_v35 = vadd.f32 %v15824_v52, %v15823_v49  ;;  %v15825_v28 = vld [vmem:[#allocation284_spill] sm:$0xff]  ;;  %v15826_v42 = vrot.slane %v11466_v11, %v11260_v14  ;;  %v15830_v10 = vrot.slane %v11485_v30, %v15555_v46 }
 0x5c6   : > { %v12201_v4 = vadd.f32 %v15819_v9, %v15818_v17  ;;  %v15828_v17 = vld [vmem:[#allocation70_spill] sm:$0xff]  ;;  %v15829_v9 = vrot.slane %v11466_v11, %v11268_v45  ;;  %v15832_v49 = vrot.slane %v11485_v30, %v11242_v22  ;;  %v15837_v11 = vld [vmem:[#allocation367_spill] sm:$0xff] }
 0x5c7   : > { %15817 = vst [vmem:[#allocation380_spill] sm:$0xff] %v12195_v59  ;;  %v12219_v59 = vadd.f32 %v15826_v42, %v15825_v28  ;;  %v12231_v63 = vadd.f32 %v15830_v10, %v11021_v0  ;;  %v15834_v28 = vld [vmem:[#allocation285_spill] sm:$0xff]  ;;  %v15835_v42 = vrot.slane %v11485_v30, %v11245_v56  ;;  %v15840_v0 = vld [vmem:[#allocation286_spill] sm:$0xff]  ;;  %v15841_v10 = vrot.slane %v11485_v30, %v11254_v51 }
 0x5c8   : > { %15820 = vst [vmem:[#allocation312_spill] sm:$0xff] %v12201_v4  ;;  %v12225_v4 = vadd.f32 %v15829_v9, %v15828_v17  ;;  %v12237_v52 = vadd.f32 %v15832_v49, %v11023_v7  ;;  %v15838_v17 = vrot.slane %v11485_v30, %v11251_v37  ;;  %v15842_v7 = vld [vmem:[#allocation71_spill] sm:$0xff]  ;;  %v15843_v49 = vrot.slane %v11485_v30, %v11257_v33 }
 0x5c9   : > { %15827 = vst [vmem:[#allocation84_spill] sm:$0xff] %v12219_v59  ;;  %15831 = vst [vmem:[#allocation313_spill] sm:$0xff] %v12231_v63  ;;  %v12243_v59 = vadd.f32 %v15835_v42, %v15834_v28  ;;  %v12255_v63 = vadd.f32 %v15841_v10, %v15840_v0  ;;  %v15844_v28 = vld [vmem:[#allocation287_spill] sm:$0xff]  ;;  %v15845_v42 = vrot.slane %v11485_v30, %v11260_v14 }
 0x5ca   : > { %15833 = vst [vmem:[#allocation381_spill] sm:$0xff] %v12237_v52  ;;  %v12249_v9 = vadd.f32 %v15838_v17, %v15837_v11  ;;  %v12261_v52 = vadd.f32 %v15843_v49, %v15842_v7  ;;  %v15847_v11 = vld [vmem:[#allocation368_spill] sm:$0xff]  ;;  %v15848_v17 = vrot.slane %v11485_v30, %v11268_v45  ;;  %v15849_v0 = vrot.slane %v11504_v44, %v15555_v46 }
 0x5cb   : > { %15836 = vst [vmem:[#allocation314_spill] sm:$0xff] %v12243_v59  ;;  %v12267_v59 = vadd.f32 %v15845_v42, %v15844_v28  ;;  %v15851_v7 = vrot.slane %v11504_v44, %v11242_v22  ;;  %v15853_v28 = vld [vmem:[#allocation288_spill] sm:$0xff]  ;;  %v15854_v42 = vrot.slane %v11504_v44, %v11245_v56 }
 0x5cc   : > { %15839 = vst [vmem:[#allocation85_spill] sm:$0xff] %v12249_v9  ;;  %v12273_v9 = vadd.f32 %v15848_v17, %v15847_v11  ;;  %v12279_v10 = vadd.f32 %v15849_v0, %v11069_v3  ;;  %v15856_v30 = vld [vmem:[#allocation72_spill] sm:$0xff]  ;;  %v15857_v11 = vrot.slane %v11504_v44, %v11251_v37  ;;  %v15859_v3 = vld [vmem:[#allocation289_spill] sm:$0xff]  ;;  %v15860_v0 = vrot.slane %v11504_v44, %v11254_v51 }
 0x5cd   : > { %15846 = vst [vmem:[#allocation315_spill] sm:$0xff] %v12267_v59  ;;  %v12285_v49 = vadd.f32 %v15851_v7, %v11071_v32  ;;  %v12291_v59 = vadd.f32 %v15854_v42, %v15853_v28  ;;  %v15861_v32 = vld [vmem:[#allocation369_spill] sm:$0xff]  ;;  %v15862_v7 = vrot.slane %v11504_v44, %v11257_v33  ;;  %v15863_v28 = vld [vmem:[#allocation290_spill] sm:$0xff]  ;;  %v15864_v42 = vrot.slane %v11504_v44, %v11260_v14 }
 0x5ce   : > { %15850 = vst [vmem:[#allocation382_spill] sm:$0xff] %v12279_v10  ;;  %v12297_v17 = vadd.f32 %v15857_v11, %v15856_v30  ;;  %v12303_v10 = vadd.f32 %v15860_v0, %v15859_v3  ;;  %v15865_v30 = vld [vmem:[#allocation73_spill] sm:$0xff]  ;;  %v15866_v11 = vrot.slane %v11504_v44, %v11268_v45  ;;  %v15867_v3 = vrot.slane %v11523_v48, %v15555_v46 }
 0x5cf   : > { %15852 = vst [vmem:[#allocation154_spill] sm:$0xff] %v12285_v49  ;;  %15855 = vst [vmem:[#allocation444_spill] sm:$0xff] %v12291_v59  ;;  %v12309_v49 = vadd.f32 %v15862_v7, %v15861_v32  ;;  %v12315_v59 = vadd.f32 %v15864_v42, %v15863_v28  ;;  %v15869_v32 = vrot.slane %v11523_v48, %v11242_v22 }
 0x5d0   : > { %15858 = vst [vmem:[#allocation155_spill] sm:$0xff] %v12297_v17  ;;  %v12321_v17 = vadd.f32 %v15866_v11, %v15865_v30  ;;  %v12327_v0 = vadd.f32 %v15867_v3, %v11117_v34  ;;  %v15870_v28 = vrot.slane %v11523_v48, %v11245_v56  ;;  %v15872_v44 = vrot.slane %v11523_v48, %v11251_v37  ;;  %v15874_v34 = vld [vmem:[#allocation291_spill] sm:$0xff] }
 0x5d1   : > { %v12333_v7 = vadd.f32 %v15869_v32, %v11119_v50  ;;  %v15875_v11 = vrot.slane %v11523_v48, %v11254_v51  ;;  %v15876_v50 = vld [vmem:[#allocation370_spill] sm:$0xff]  ;;  %v15877_v32 = vrot.slane %v11523_v48, %v11257_v33 }
 0x5d2   : > { %15868 = vst [vmem:[#allocation445_spill] sm:$0xff] %v12327_v0  ;;  %v12339_v42 = vadd.f32 %v15870_v28, %v11121_v62  ;;  %v12345_v30 = vadd.f32 %v15872_v44, %v11123_v18  ;;  %v15878_v62 = vld [vmem:[#allocation142_spill] sm:$0xff]  ;;  %v15879_v28 = vrot.slane %v11523_v48, %v11260_v14  ;;  %v15880_v18 = vld [vmem:[#allocation432_spill] sm:$0xff]  ;;  %v15881_v44 = vrot.slane %v11523_v48, %v11268_v45 }
 0x5d3   : > { %v12351_v3 = vadd.f32 %v15875_v11, %v15874_v34  ;;  %v12357_v0 = vadd.f32 %v15877_v32, %v15876_v50  ;;  %v15882_v34 = vrot.slane %v11542_v24, %v15555_v46  ;;  %v15884_v50 = vrot.slane %v11542_v24, %v11242_v22 }
 0x5d4   : > { %15871 = vst [vmem:[#allocation156_spill] sm:$0xff] %v12339_v42  ;;  %15873 = vst [vmem:[#allocation446_spill] sm:$0xff] %v12345_v30  ;;  %v12363_v42 = vadd.f32 %v15879_v28, %v15878_v62  ;;  %v12369_v30 = vadd.f32 %v15881_v44, %v15880_v18  ;;  %v15885_v62 = vrot.slane %v11542_v24, %v11245_v56 }
 0x5d5   : > { %v12375_v11 = vadd.f32 %v15882_v34, %v11165_v53  ;;  %v12381_v32 = vadd.f32 %v15884_v50, %v11167_v29  ;;  %v15887_v48 = vrot.slane %v11542_v24, %v11251_v37  ;;  %v5358_v53 = vld [vmem:[%s11216_s26 + $0x90] ss:$0 sm:$0xff]  ;;  %v15889_v44 = vrot.slane %v11542_v24, %v11254_v51 }
 0x5d6   : > { %v12387_v28 = vadd.f32 %v15885_v62, %v11169_v40  ;;  %v15891_v29 = vld [vmem:[#allocation143_spill] sm:$0xff]  ;;  %v15892_v50 = vrot.slane %v11542_v24, %v11257_v33  ;;  %v15894_v40 = vld [vmem:[#allocation433_spill] sm:$0xff]  ;;  %v15895_v62 = vrot.slane %v11542_v24, %v11260_v14 }
 0x5d7   : > { %15883 = vst [vmem:[#allocation157_spill] sm:$0xff] %v12375_v11  ;;  %v12393_v18 = vadd.f32 %v15887_v48, %v11171_v55  ;;  %v12400_v34 = vadd.f32 %v15889_v44, %v11173_v57  ;;  %v15897_v55 = vld [vmem:[#allocation144_spill] sm:$0xff]  ;;  %v15898_v48 = vrot.slane %v11542_v24, %v11268_v45  ;;  %v15900_v57 = vrot.slane %v11561_v41, %v15555_v46  ;;  %v15907_v24 = vld [vmem:[#allocation145_spill] sm:$0xff] }
 0x5d8   : > { %15886 = vst [vmem:[#allocation447_spill] sm:$0xff] %v12387_v28  ;;  %v12406_v11 = vadd.f32 %v15892_v50, %v15891_v29  ;;  %v12412_v28 = vadd.f32 %v15895_v62, %v15894_v40  ;;  %v15902_v29 = vrot.slane %v11561_v41, %v11242_v22  ;;  %v15904_v40 = vld [vmem:[#allocation434_spill] sm:$0xff]  ;;  %v15905_v62 = vrot.slane %v11561_v41, %v11245_v56  ;;  %v15916_v56 = vld [vmem:[#allocation497_spill] sm:$0xff] }
 0x5d9   : > { %15888 = vst [vmem:[#allocation226_spill] sm:$0xff] %v12393_v18  ;;  %15890 = vst [vmem:[#allocation509_spill] sm:$0xff] %v12400_v34  ;;  %v12418_v18 = vadd.f32 %v15898_v48, %v15897_v55  ;;  %v12424_v44 = vadd.f32 %v15900_v57, %v11221_v21  ;;  %v15908_v55 = vrot.slane %v11561_v41, %v11251_v37  ;;  %v15910_v21 = vld [vmem:[#allocation435_spill] sm:$0xff]  ;;  %v15958_v34 = vld [vmem:[#allocation221_spill] sm:$0xff] }
 0x5da   : > { %15893 = vst [vmem:[#allocation227_spill] sm:$0xff] %v12406_v11  ;;  %15896 = vst [vmem:[#allocation510_spill] sm:$0xff] %v12412_v28  ;;  %v12430_v50 = vadd.f32 %v15902_v29, %v11223_v13  ;;  %v12436_v28 = vadd.f32 %v15905_v62, %v15904_v40  ;;  %v15911_v46 = vrot.slane %v11561_v41, %v11254_v51  ;;  %v15913_v13 = vld [vmem:[#allocation214_spill] sm:$0xff]  ;;  %v15919_v37 = vld [vmem:[#allocation215_spill] sm:$0xff] }
 0x5db   : > { %15899 = vst [vmem:[#allocation228_spill] sm:$0xff] %v12418_v18  ;;  %15901 = vst [vmem:[#allocation511_spill] sm:$0xff] %v12424_v44  ;;  %v12442_v48 = vadd.f32 %v15908_v55, %v15907_v24  ;;  %v15914_v22 = vrot.slane %v11561_v41, %v11257_v33  ;;  %v15917_v40 = vrot.slane %v11561_v41, %v11260_v14  ;;  %v15922_v51 = vld [vmem:[#allocation498_spill] sm:$0xff]  ;;  %v15951_v44 = vld [vmem:[#allocation439_spill] sm:$0xff] }
 0x5dc   : > { %15903 = vst [vmem:[#allocation229_spill] sm:$0xff] %v12430_v50  ;;  %15906 = vst [vmem:[#allocation512_spill] sm:$0xff] %v12436_v28  ;;  %v12448_v57 = vadd.f32 %v15911_v46, %v15910_v21  ;;  %v15920_v24 = vrot.slane %v11561_v41, %v11268_v45  ;;  %v12469_v21 = vadd.f32 %v5358_v53, %v15922_v51  ;;  %v5693_v53 = vmov 1966171168   ;;  %v15932_v51 = vld [vmem:[#allocation371_spill] sm:$0xff]  ;;  %v15953_v50 = vld [vmem:[#allocation501_spill] sm:$0xff] }
 0x5dd   : > { %15909 = vst [vmem:[#allocation316_spill] sm:$0xff] %v12442_v48  ;;  %v12454_v29 = vadd.f32 %v15914_v22, %v15913_v13  ;;  %v12460_v62 = vadd.f32 %v15917_v40, %v15916_v56  ;;  %v4267_v33 = vcombine.low %v11607_v2, %v11613_v31  ;;  %v4268_v46 = vcombine.low %v11619_v36, %v11625_v54  ;;  %v15924_v56 = vld [vmem:[#allocation499_spill] sm:$0xff]  ;;  %v15925_v40 = vld [vmem:[#allocation216_spill] sm:$0xff]  ;;  %v15926_v2 = vld [vmem:[#allocation217_spill] sm:$0xff] }
 0x5de   : > { %15912 = vst [vmem:[#allocation86_spill] sm:$0xff] %v12448_v57  ;;  %v12466_v55 = vadd.f32 %v15920_v24, %v15919_v37  ;;  %15923 = vst [vmem:[#allocation87_spill] sm:$0xff] %v12469_v21  ;;  %v4269_v14 = vcombine.low %v11631_v43, %v11637_v38  ;;  %v4270_v13 = vcombine.low %v11643_v25, %v11649_v23  ;;  %v4272_v22 = vunpack.c.l.s4 %v5693_v53  ;;  %v15927_v36 = vld [vmem:[#allocation292_spill] sm:$0xff]  ;;  %v15929_v38 = vld [vmem:[#allocation293_spill] sm:$0xff] }
 0x5df   : > { %15915 = vst [vmem:[#allocation317_spill] sm:$0xff] %v12454_v29  ;;  %15918 = vst [vmem:[#allocation383_spill] sm:$0xff] %v12460_v62  ;;  %v4316_v41 = vcombine.low %v11655_v16, %v11661_v47  ;;  %v4317_v45 = vcombine.low %v11667_v20, %v11673_v60  ;;  %v4318_v31 = vcombine.low %v15925_v40, %v15924_v56  ;;  %v15928_v37 = vld [vmem:[#allocation500_spill] sm:$0xff]  ;;  %v15930_v24 = vld [vmem:[#allocation74_spill] sm:$0xff] }
 0x5e0   : > { %15921 = vst [vmem:[#allocation318_spill] sm:$0xff] %v12466_v55  ;;  %v4319_v54 = vcombine.low %v15926_v2, %v11697_v19  ;;  %v4365_v43 = vcombine.low %v15928_v37, %v15927_v36  ;;  %v4366_v25 = vcombine.low %v15930_v24, %v15929_v38  ;;  %v15931_v23 = vld [vmem:[#allocation294_spill] sm:$0xff]  ;;  %v15933_v47 = vld [vmem:[#allocation75_spill] sm:$0xff]  ;;  %v15934_v60 = vld [vmem:[#allocation372_spill] sm:$0xff]  ;;  %v4273_v62 = vunpack.c.0.s8 %v4272_v22 }
 0x5e1   : > { %v4367_v16 = vcombine.low %v15932_v51, %v15931_v23  ;;  %v4368_v20 = vcombine.low %v15933_v47, %v11745_v1  ;;  %v15935_v53 = vld [vmem:[#allocation295_spill] sm:$0xff]  ;;  %v15936_v56 = vld [vmem:[#allocation76_spill] sm:$0xff]  ;;  %v15938_v19 = vld [vmem:[#allocation373_spill] sm:$0xff] }
 0x5e2   : > { %v4414_v21 = vcombine.low %v15935_v53, %v15934_v60  ;;  %v15937_v40 = vld [vmem:[#allocation296_spill] sm:$0xff]  ;;  %v15939_v2 = vld [vmem:[#allocation297_spill] sm:$0xff]  ;;  %v15940_v36 = vld [vmem:[#allocation298_spill] sm:$0xff] }
 0x5e3   : > { %v4415_v55 = vcombine.low %v15937_v40, %v15936_v56  ;;  %v4416_v57 = vcombine.low %v15939_v2, %v15938_v19  ;;  %v4417_v37 = vcombine.low %v15940_v36, %v11793_v15  ;;  %v15941_v38 = vld [vmem:[#allocation299_spill] sm:$0xff]  ;;  %v15942_v24 = vld [vmem:[#allocation77_spill] sm:$0xff]  ;;  %v15943_v23 = vld [vmem:[#allocation146_spill] sm:$0xff] }
 0x5e4   : > { %v4463_v29 = vcombine.low %v15942_v24, %v15941_v38  ;;  %v15944_v51 = vld [vmem:[#allocation374_spill] sm:$0xff]  ;;  %v15945_v1 = vld [vmem:[#allocation147_spill] sm:$0xff]  ;;  %v15946_v47 = vld [vmem:[#allocation436_spill] sm:$0xff] }
 0x5e5   : > { %v4464_v28 = vcombine.low %v15944_v51, %v15943_v23  ;;  %v4465_v48 = vcombine.low %v15946_v47, %v15945_v1  ;;  %v15947_v22 = vld [vmem:[#allocation437_spill] sm:$0xff]  ;;  %v15948_v53 = vld [vmem:[#allocation22_spill] sm:$0xff]  ;;  %v15950_v19 = vld [vmem:[#allocation148_spill] sm:$0xff] }
 0x5e6   : > { %v4466_v60 = vcombine.low %v15947_v22, %v11841_v27  ;;  %v12512_v56 = vsub.s32 %v4273_v62, %v15948_v53  ;;  %v15949_v40 = vld [vmem:[#allocation438_spill] sm:$0xff]  ;;  %v15952_v15 = vld [vmem:[#allocation149_spill] sm:$0xff]  ;;  %v15955_v23 = vld [vmem:[#allocation219_spill] sm:$0xff] }
 0x5e7   : > { %v4512_v2 = vcombine.low %v15950_v19, %v15949_v40  ;;  %v4513_v36 = vcombine.low %v15952_v15, %v15951_v44  ;;  %v15954_v38 = vld [vmem:[#allocation218_spill] sm:$0xff]  ;;  %v4515_v51 = vcombine.low %v15955_v23, %v11889_v8  ;;  %v15956_v18 = vld [vmem:[#allocation220_spill] sm:$0xff]  ;;  %v15959_v27 = vld [vmem:[#allocation503_spill] sm:$0xff] }
 0x5e8   : > { %v4514_v24 = vcombine.low %v15954_v38, %v15953_v50  ;;  %v15957_v1 = vld [vmem:[#allocation502_spill] sm:$0xff]  ;;  %v4562_v22 = vcombine.low %v15959_v27, %v15958_v34  ;;  %v15960_v62 = vld [vmem:[#allocation300_spill] sm:$0xff]  ;;  %v4277_v40 = vrot.slane %v4267_v33, %v12512_v56  ;;  %v4284_v19 = vrot.slane %v4268_v46, %v12512_v56 }
 0x5e9   : > { %v4561_v47 = vcombine.low %v15957_v1, %v15956_v18  ;;  %v15961_v53 = vld [vmem:[#allocation504_spill] sm:$0xff]  ;;  %v4291_v44 = vrot.slane %v4269_v14, %v12512_v56  ;;  %v4298_v50 = vrot.slane %v4270_v13, %v12512_v56  ;;  %v4326_v15 = vrot.slane %v4316_v41, %v12512_v56 }
 0x5ea   : > { %v4563_v11 = vcombine.low %v15961_v53, %v15960_v62  ;;  %v4333_v8 = vrot.slane %v4317_v45, %v12512_v56  ;;  %v4340_v18 = vrot.slane %v4318_v31, %v12512_v56  ;;  %v4347_v38 = vrot.slane %v4319_v54, %v12512_v56 }
 0x5eb   : > { %v4299_v34 = vcombine.low %v4277_v40, %v4284_v19  ;;  %v4300_v23 = vcombine.low %v4291_v44, %v4298_v50  ;;  %v4375_v1 = vrot.slane %v4365_v43, %v12512_v56  ;;  %v4382_v33 = vrot.slane %v4366_v25, %v12512_v56 }
 0x5ec   : > { %v4348_v27 = vcombine.low %v4326_v15, %v4333_v8  ;;  %v4349_v46 = vcombine.low %v4340_v18, %v4347_v38  ;;  %v4389_v14 = vrot.slane %v4367_v16, %v12512_v56  ;;  %v4396_v13 = vrot.slane %v4368_v20, %v12512_v56 }
 0x5ed   : > { %v4307_v41 = vrot.slane %v4299_v34, %v12512_v56  ;;  %v4314_v45 = vrot.slane %v4300_v23, %v12512_v56  ;;  %v4397_v62 = vcombine.low %v4375_v1, %v4382_v33  ;;  %v4424_v31 = vrot.slane %v4414_v21, %v12512_v56 }
 0x5ee   : > { %v4356_v54 = vrot.slane %v4348_v27, %v12512_v56  ;;  %v4363_v43 = vrot.slane %v4349_v46, %v12512_v56  ;;  %v4398_v53 = vcombine.low %v4389_v14, %v4396_v13  ;;  %v4431_v25 = vrot.slane %v4415_v55, %v12512_v56  ;;  %v15962_v27 = vld [vmem:[#allocation78_spill] sm:$0xff] }
 0x5ef   : > { %v4315_v40 = vcombine.low %v4307_v41, %v4314_v45  ;;  %v4405_v16 = vrot.slane %v4397_v62, %v12512_v56  ;;  %v4438_v20 = vrot.slane %v4416_v57, %v12512_v56  ;;  %v4445_v19 = vrot.slane %v4417_v37, %v12512_v56 }
 0x5f0   : > { %v4364_v44 = vcombine.low %v4356_v54, %v4363_v43  ;;  %v4412_v50 = vrot.slane %v4398_v53, %v12512_v56  ;;  %v4446_v15 = vcombine.low %v4424_v31, %v4431_v25  ;;  %v4473_v21 = vrot.slane %v4463_v29, %v12512_v56  ;;  %v15963_v54 = vld [vmem:[#allocation375_spill] sm:$0xff]  ;;  %v15966_v25 = vld [vmem:[#allocation302_spill] sm:$0xff] }
 0x5f1   : > { %v4447_v8 = vcombine.low %v4438_v20, %v4445_v19  ;;  %v4480_v18 = vrot.slane %v4464_v28, %v12512_v56  ;;  %v4487_v38 = vrot.slane %v4465_v48, %v12512_v56  ;;  %v4494_v55 = vrot.slane %v4466_v60, %v12512_v56  ;;  %5182 = vst [vmem:[%s12556_s19] sm:$0xff] %v4315_v40  ;;  %v15965_v53 = vld [vmem:[#allocation79_spill] sm:$0xff]  ;;  %v15967_v20 = vld [vmem:[#allocation376_spill] sm:$0xff] }
 0x5f2   : > { %v4413_v57 = vcombine.low %v4405_v16, %v4412_v50  ;;  %v4454_v37 = vrot.slane %v4446_v15, %v12512_v56  ;;  %v4522_v34 = vrot.slane %v4512_v2, %v12512_v56  ;;  %v4529_v29 = vrot.slane %v4513_v36, %v12512_v56  ;;  %5183 = vst [vmem:[%s12556_s19 + $0x8] sm:$0xff] %v4364_v44  ;;  %v15968_v19 = vld [vmem:[#allocation303_spill] sm:$0xff]  ;;  %v15969_v50 = vld [vmem:[#allocation304_spill] sm:$0xff] }
 0x5f3   : > { %v4461_v28 = vrot.slane %v4447_v8, %v12512_v56  ;;  %v4495_v48 = vcombine.low %v4473_v21, %v4480_v18  ;;  %v4496_v23 = vcombine.low %v4487_v38, %v4494_v55  ;;  %v4536_v60 = vrot.slane %v4514_v24, %v12512_v56  ;;  %v15970_v18 = vld [vmem:[#allocation305_spill] sm:$0xff]  ;;  %v15971_v38 = vld [vmem:[#allocation80_spill] sm:$0xff] }
 0x5f4   : > { %v4543_v1 = vrot.slane %v4515_v51, %v12512_v56  ;;  %v4544_v33 = vcombine.low %v4522_v34, %v4529_v29  ;;  %v4564_v46 = vcombine.low %v15962_v27, %v11937_v5  ;;  %v4571_v14 = vrot.slane %v4561_v47, %v12512_v56  ;;  %5184 = vst [vmem:[%s12556_s19 + $0x10] sm:$0xff] %v4413_v57  ;;  %v15964_v47 = vld [vmem:[#allocation301_spill] sm:$0xff]  ;;  %v15976_v27 = vld [vmem:[#allocation378_spill] sm:$0xff] }
 0x5f5   : > { %v4462_v2 = vcombine.low %v4454_v37, %v4461_v28  ;;  %v4503_v36 = vrot.slane %v4495_v48, %v12512_v56  ;;  %v4510_v13 = vrot.slane %v4496_v23, %v12512_v56  ;;  %v4578_v41 = vrot.slane %v4562_v22, %v12512_v56  ;;  %v15973_v48 = vld [vmem:[#allocation377_spill] sm:$0xff] }
 0x5f6   : > { %v4545_v45 = vcombine.low %v4536_v60, %v4543_v1  ;;  %v4552_v24 = vrot.slane %v4544_v33, %v12512_v56  ;;  %v4585_v51 = vrot.slane %v4563_v11, %v12512_v56  ;;  %v4592_v62 = vrot.slane %v4564_v46, %v12512_v56  ;;  %v15974_v60 = vld [vmem:[#allocation307_spill] sm:$0xff]  ;;  %v15975_v1 = vld [vmem:[#allocation81_spill] sm:$0xff] }
 0x5f7   : > { %v4511_v31 = vcombine.low %v4503_v36, %v4510_v13  ;;  %v4593_v5 = vcombine.low %v4571_v14, %v4578_v41  ;;  %v4610_v43 = vcombine.low %v15964_v47, %v15963_v54  ;;  %v4611_v40 = vcombine.low %v15966_v25, %v15965_v53  ;;  %5185 = vst [vmem:[%s12556_s19 + $0x18] sm:$0xff] %v4462_v2  ;;  %v15977_v13 = vld [vmem:[#allocation440_spill] sm:$0xff]  ;;  %v15978_v41 = vld [vmem:[#allocation150_spill] sm:$0xff]  ;;  %v15979_v54 = vld [vmem:[#allocation441_spill] sm:$0xff] }
 0x5f8   : > { %v4559_v16 = vrot.slane %v4545_v45, %v12512_v56  ;;  %v4594_v22 = vcombine.low %v4585_v51, %v4592_v62  ;;  %v4612_v44 = vcombine.low %v15968_v19, %v15967_v20  ;;  %v4613_v11 = vcombine.low %v15969_v50, %v11985_v26  ;;  %v15972_v26 = vld [vmem:[#allocation306_spill] sm:$0xff]  ;;  %v15982_v53 = vld [vmem:[#allocation152_spill] sm:$0xff]  ;;  %v15985_v50 = vld [vmem:[#allocation443_spill] sm:$0xff] }
 0x5f9   : > { %v4601_v15 = vrot.slane %v4593_v5, %v12512_v56  ;;  %v4620_v21 = vrot.slane %v4610_v43, %v12512_v56  ;;  %v4627_v8 = vrot.slane %v4611_v40, %v12512_v56  ;;  %v4659_v55 = vcombine.low %v15971_v38, %v15970_v18  ;;  %5186 = vst [vmem:[%s12556_s19 + $0x20] sm:$0xff] %v4511_v31  ;;  %v15981_v43 = vld [vmem:[#allocation442_spill] sm:$0xff]  ;;  %v15983_v40 = vld [vmem:[#allocation153_spill] sm:$0xff] }
 0x5fa   : > { %v4560_v57 = vcombine.low %v4552_v24, %v4559_v16  ;;  %v4608_v37 = vrot.slane %v4594_v22, %v12512_v56  ;;  %v4634_v34 = vrot.slane %v4612_v44, %v12512_v56  ;;  %v4641_v29 = vrot.slane %v4613_v11, %v12512_v56  ;;  %v15984_v44 = vld [vmem:[#allocation222_spill] sm:$0xff] }
 0x5fb   : > { %v4642_v28 = vcombine.low %v4620_v21, %v4627_v8  ;;  %v4660_v23 = vcombine.low %v15973_v48, %v15972_v26  ;;  %v4661_v33 = vcombine.low %v15975_v1, %v15974_v60  ;;  %v4662_v46 = vcombine.low %v15976_v27, %v12033_v12  ;;  %v15980_v12 = vld [vmem:[#allocation151_spill] sm:$0xff] }
 0x5fc   : > { %v4609_v14 = vcombine.low %v4601_v15, %v4608_v37  ;;  %v4643_v2 = vcombine.low %v4634_v34, %v4641_v29  ;;  %v4669_v36 = vrot.slane %v4659_v55, %v12512_v56  ;;  %v4708_v45 = vcombine.low %v15978_v41, %v15977_v13  ;;  %5187 = vst [vmem:[%s12556_s19 + $0x28] sm:$0xff] %v4560_v57  ;;  %v15986_v55 = vld [vmem:[#allocation223_spill] sm:$0xff]  ;;  %v15987_v57 = vld [vmem:[#allocation505_spill] sm:$0xff]  ;;  %v15988_v34 = vld [vmem:[#allocation224_spill] sm:$0xff] }
 0x5fd   : > { %v4650_v24 = vrot.slane %v4642_v28, %v12512_v56  ;;  %v4676_v51 = vrot.slane %v4660_v23, %v12512_v56  ;;  %v4683_v62 = vrot.slane %v4661_v33, %v12512_v56  ;;  %v4690_v31 = vrot.slane %v4662_v46, %v12512_v56  ;;  %v15989_v29 = vld [vmem:[#allocation506_spill] sm:$0xff]  ;;  %v15990_v23 = vld [vmem:[#allocation507_spill] sm:$0xff] }
 0x5fe   : > { %v4657_v5 = vrot.slane %v4643_v2, %v12512_v56  ;;  %v4709_v47 = vcombine.low %v15980_v12, %v15979_v54  ;;  %v4710_v25 = vcombine.low %v15982_v53, %v15981_v43  ;;  %v4711_v16 = vcombine.low %v15983_v40, %v12081_v39  ;;  %5188 = vst [vmem:[%s12556_s19 + $0x30] sm:$0xff] %v4609_v14  ;;  %v15991_v14 = vld [vmem:[#allocation508_spill] sm:$0xff]  ;;  %v15992_v2 = vld [vmem:[#allocation225_spill] sm:$0xff]  ;;  %v15997_v12 = vld [vmem:[#allocation310_spill] sm:$0xff] }
 0x5ff   : > { %v4691_v22 = vcombine.low %v4669_v36, %v4676_v51  ;;  %v4692_v20 = vcombine.low %v4683_v62, %v4690_v31  ;;  %v4718_v19 = vrot.slane %v4708_v45, %v12512_v56  ;;  %v4757_v11 = vcombine.low %v15985_v50, %v15984_v44  ;;  %v15994_v51 = vld [vmem:[#allocation308_spill] sm:$0xff]  ;;  %v15995_v31 = vld [vmem:[#allocation379_spill] sm:$0xff] }
 0x600   : > { %v4658_v15 = vcombine.low %v4650_v24, %v4657_v5  ;;  %v4725_v21 = vrot.slane %v4709_v47, %v12512_v56  ;;  %v4732_v8 = vrot.slane %v4710_v25, %v12512_v56  ;;  %v4739_v18 = vrot.slane %v4711_v16, %v12512_v56  ;;  %v15993_v24 = vld [vmem:[#allocation82_spill] sm:$0xff]  ;;  %v15996_v5 = vld [vmem:[#allocation309_spill] sm:$0xff]  ;;  %v15998_v16 = vld [vmem:[#allocation311_spill] sm:$0xff] }
 0x601   : > { %v4699_v38 = vrot.slane %v4691_v22, %v12512_v56  ;;  %v4706_v39 = vrot.slane %v4692_v20, %v12512_v56  ;;  %v4758_v37 = vcombine.low %v15987_v57, %v15986_v55  ;;  %v4759_v28 = vcombine.low %v15989_v29, %v15988_v34  ;;  %v15999_v22 = vld [vmem:[#allocation83_spill] sm:$0xff]  ;;  %v16003_v34 = vld [vmem:[#allocation381_spill] sm:$0xff] }
 0x602   : > { %v4740_v26 = vcombine.low %v4718_v19, %v4725_v21  ;;  %v4741_v48 = vcombine.low %v4732_v8, %v4739_v18  ;;  %v4760_v60 = vcombine.low %v15990_v23, %v12129_v58  ;;  %v4767_v1 = vrot.slane %v4757_v11, %v12512_v56  ;;  %5189 = vst [vmem:[%s12556_s19 + $0x38] sm:$0xff] %v4658_v15  ;;  %v16000_v11 = vld [vmem:[#allocation312_spill] sm:$0xff]  ;;  %v16004_v29 = vld [vmem:[#allocation313_spill] sm:$0xff] }
 0x603   : > { %v4707_v33 = vcombine.low %v4699_v38, %v4706_v39  ;;  %v4774_v27 = vrot.slane %v4758_v37, %v12512_v56  ;;  %v4781_v46 = vrot.slane %v4759_v28, %v12512_v56  ;;  %v4806_v36 = vcombine.low %v15992_v2, %v15991_v14  ;;  %v16001_v15 = vld [vmem:[#allocation380_spill] sm:$0xff]  ;;  %v16007_v14 = vld [vmem:[#allocation315_spill] sm:$0xff] }
 0x604   : > { %v4748_v13 = vrot.slane %v4740_v26, %v12512_v56  ;;  %v4755_v41 = vrot.slane %v4741_v48, %v12512_v56  ;;  %v4788_v45 = vrot.slane %v4760_v60, %v12512_v56  ;;  %v4807_v58 = vcombine.low %v15994_v51, %v15993_v24  ;;  %v16002_v38 = vld [vmem:[#allocation84_spill] sm:$0xff]  ;;  %v16005_v60 = vld [vmem:[#allocation85_spill] sm:$0xff] }
 0x605   : > { %v4789_v62 = vcombine.low %v4767_v1, %v4774_v27  ;;  %v4808_v54 = vcombine.low %v15996_v5, %v15995_v31  ;;  %v4809_v47 = vcombine.low %v15997_v12, %v12177_v6  ;;  %v4816_v43 = vrot.slane %v4806_v36, %v12512_v56  ;;  %5190 = vst [vmem:[%s12556_s19 + $0x40] sm:$0xff] %v4707_v33  ;;  %v16006_v1 = vld [vmem:[#allocation314_spill] sm:$0xff]  ;;  %v16010_v31 = vld [vmem:[#allocation155_spill] sm:$0xff] }
 0x606   : > { %v4756_v53 = vcombine.low %v4748_v13, %v4755_v41  ;;  %v4790_v25 = vcombine.low %v4781_v46, %v4788_v45  ;;  %v4823_v40 = vrot.slane %v4807_v58, %v12512_v56  ;;  %v4855_v20 = vcombine.low %v15999_v22, %v15998_v16  ;;  %v16008_v13 = vld [vmem:[#allocation154_spill] sm:$0xff] }
 0x607   : > { %v4797_v19 = vrot.slane %v4789_v62, %v12512_v56  ;;  %v4830_v44 = vrot.slane %v4808_v54, %v12512_v56  ;;  %v4837_v50 = vrot.slane %v4809_v47, %v12512_v56  ;;  %v4856_v21 = vcombine.low %v16001_v15, %v16000_v11  ;;  %v16009_v41 = vld [vmem:[#allocation382_spill] sm:$0xff] }
 0x608   : > { %v4804_v6 = vrot.slane %v4790_v25, %v12512_v56  ;;  %v4838_v8 = vcombine.low %v4816_v43, %v4823_v40  ;;  %v4857_v18 = vcombine.low %v12207_v61, %v12213_v35  ;;  %v4858_v39 = vcombine.low %v16002_v38, %v12225_v4  ;;  %5191 = vst [vmem:[%s12556_s19 + $0x48] sm:$0xff] %v4756_v53  ;;  %v16012_v53 = vld [vmem:[#allocation445_spill] sm:$0xff] }
 0x609   : > { %v4839_v55 = vcombine.low %v4830_v44, %v4837_v50  ;;  %v4865_v57 = vrot.slane %v4855_v20, %v12512_v56  ;;  %v4872_v37 = vrot.slane %v4856_v21, %v12512_v56  ;;  %v4904_v28 = vcombine.low %v16004_v29, %v16003_v34  ;;  %v16014_v44 = vld [vmem:[#allocation156_spill] sm:$0xff]  ;;  %v16018_v34 = vld [vmem:[#allocation227_spill] sm:$0xff]  ;;  %v16019_v29 = vld [vmem:[#allocation509_spill] sm:$0xff] }
 0x60a   : > { %v4805_v26 = vcombine.low %v4797_v19, %v4804_v6  ;;  %v4846_v48 = vrot.slane %v4838_v8, %v12512_v56  ;;  %v4879_v23 = vrot.slane %v4857_v18, %v12512_v56  ;;  %v4886_v61 = vrot.slane %v4858_v39, %v12512_v56  ;;  %v16015_v18 = vld [vmem:[#allocation157_spill] sm:$0xff] }
 0x60b   : > { %v4853_v35 = vrot.slane %v4839_v55, %v12512_v56  ;;  %v4887_v4 = vcombine.low %v4865_v57, %v4872_v37  ;;  %v4905_v33 = vcombine.low %v16006_v1, %v16005_v60  ;;  %v4906_v27 = vcombine.low %v12255_v63, %v12261_v52  ;;  %v16016_v55 = vld [vmem:[#allocation226_spill] sm:$0xff]  ;;  %v16017_v57 = vld [vmem:[#allocation447_spill] sm:$0xff] }
 0x60c   : > { %v4888_v46 = vcombine.low %v4879_v23, %v4886_v61  ;;  %v4907_v2 = vcombine.low %v16007_v14, %v12273_v9  ;;  %v4914_v36 = vrot.slane %v4904_v28, %v12512_v56  ;;  %v4953_v45 = vcombine.low %v16009_v41, %v16008_v13  ;;  %5192 = vst [vmem:[%s12556_s19 + $0x50] sm:$0xff] %v4805_v26  ;;  %v16011_v9 = vld [vmem:[#allocation444_spill] sm:$0xff]  ;;  %v16023_v60 = vld [vmem:[#allocation511_spill] sm:$0xff] }
 0x60d   : > { %v4854_v24 = vcombine.low %v4846_v48, %v4853_v35  ;;  %v4895_v51 = vrot.slane %v4887_v4, %v12512_v56  ;;  %v4921_v58 = vrot.slane %v4905_v33, %v12512_v56  ;;  %v4928_v62 = vrot.slane %v4906_v27, %v12512_v56  ;;  %v16020_v26 = vld [vmem:[#allocation228_spill] sm:$0xff]  ;;  %v16021_v48 = vld [vmem:[#allocation510_spill] sm:$0xff]  ;;  %v16022_v4 = vld [vmem:[#allocation229_spill] sm:$0xff] }
 0x60e   : > { %v4902_v63 = vrot.slane %v4888_v46, %v12512_v56  ;;  %v4935_v52 = vrot.slane %v4907_v2, %v12512_v56  ;;  %v4954_v5 = vcombine.low %v16011_v9, %v16010_v31  ;;  %v4955_v54 = vcombine.low %v12303_v10, %v12309_v49  ;;  %v16013_v49 = vld [vmem:[#allocation446_spill] sm:$0xff]  ;;  %v16024_v13 = vld [vmem:[#allocation316_spill] sm:$0xff] }
 0x60f   : > { %v4936_v12 = vcombine.low %v4914_v36, %v4921_v58  ;;  %v4956_v47 = vcombine.low %v12315_v59, %v12321_v17  ;;  %v4963_v43 = vrot.slane %v4953_v45, %v12512_v56  ;;  %v5002_v25 = vcombine.low %v16012_v53, %v12333_v7  ;;  %5193 = vst [vmem:[%s12556_s19 + $0x58] sm:$0xff] %v4854_v24  ;;  %v16025_v41 = vld [vmem:[#allocation512_spill] sm:$0xff]  ;;  %v16026_v24 = vld [vmem:[#allocation317_spill] sm:$0xff] }
 0x610   : > { %v4903_v40 = vcombine.low %v4895_v51, %v4902_v63  ;;  %v4937_v16 = vcombine.low %v4928_v62, %v4935_v52  ;;  %v4970_v22 = vrot.slane %v4954_v5, %v12512_v56  ;;  %v4977_v20 = vrot.slane %v4955_v54, %v12512_v56  ;;  %v16027_v51 = vld [vmem:[#allocation86_spill] sm:$0xff]  ;;  %v16029_v52 = vld [vmem:[#allocation383_spill] sm:$0xff] }
 0x611   : > { %v4944_v19 = vrot.slane %v4936_v12, %v12512_v56  ;;  %v4984_v10 = vrot.slane %v4956_v47, %v12512_v56  ;;  %v5003_v59 = vcombine.low %v16014_v44, %v16013_v49  ;;  %v5004_v17 = vcombine.low %v12351_v3, %v12357_v0  ;;  %v16028_v63 = vld [vmem:[#allocation318_spill] sm:$0xff]  ;;  %v16030_v5 = vld [vmem:[#allocation87_spill] sm:$0xff] }
 0x612   : > { %v4951_v50 = vrot.slane %v4937_v16, %v12512_v56  ;;  %v4985_v7 = vcombine.low %v4963_v43, %v4970_v22  ;;  %v5005_v11 = vcombine.low %v12363_v42, %v12369_v30  ;;  %v5012_v15 = vrot.slane %v5002_v25, %v12512_v56  ;;  %5194 = vst [vmem:[%s12556_s19 + $0x60] sm:$0xff] %v4903_v40 }
 0x613   : > { %v4986_v21 = vcombine.low %v4977_v20, %v4984_v10  ;;  %v5019_v6 = vrot.slane %v5003_v59, %v12512_v56  ;;  %v5026_v8 = vrot.slane %v5004_v17, %v12512_v56  ;;  %v5051_v38 = vcombine.low %v16015_v18, %v12381_v32 }
 0x614   : > { %v4952_v39 = vcombine.low %v4944_v19, %v4951_v50  ;;  %v4993_v0 = vrot.slane %v4985_v7, %v12512_v56  ;;  %v5033_v3 = vrot.slane %v5005_v11, %v12512_v56  ;;  %v5052_v42 = vcombine.low %v16017_v57, %v16016_v55 }
 0x615   : > { %v5000_v30 = vrot.slane %v4986_v21, %v12512_v56  ;;  %v5034_v37 = vcombine.low %v5012_v15, %v5019_v6  ;;  %v5053_v28 = vcombine.low %v16019_v29, %v16018_v34  ;;  %v5054_v23 = vcombine.low %v16021_v48, %v16020_v26 }
 0x616   : > { %v5035_v61 = vcombine.low %v5026_v8, %v5033_v3  ;;  %v5061_v32 = vrot.slane %v5051_v38, %v12512_v56  ;;  %v5068_v35 = vrot.slane %v5052_v42, %v12512_v56  ;;  %v5100_v1 = vcombine.low %v16023_v60, %v16022_v4  ;;  %5195 = vst [vmem:[%s12556_s19 + $0x68] sm:$0xff] %v4952_v39 }
 0x617   : > { %v5001_v33 = vcombine.low %v4993_v0, %v5000_v30  ;;  %v5042_v27 = vrot.slane %v5034_v37, %v12512_v56  ;;  %v5075_v46 = vrot.slane %v5053_v28, %v12512_v56  ;;  %v5082_v14 = vrot.slane %v5054_v23, %v12512_v56 }
 0x618   : > { %v5049_v2 = vrot.slane %v5035_v61, %v12512_v56  ;;  %v5083_v36 = vcombine.low %v5061_v32, %v5068_v35  ;;  %v5101_v45 = vcombine.low %v16025_v41, %v16024_v13  ;;  %v5102_v58 = vcombine.low %v16027_v51, %v16026_v24 }
 0x619   : > { %v5084_v62 = vcombine.low %v5075_v46, %v5082_v14  ;;  %v5103_v31 = vcombine.low %v16029_v52, %v16028_v63  ;;  %v5110_v9 = vrot.slane %v5100_v1, %v12512_v56  ;;  %v5155_v54 = vrot.slane %v16030_v5, %v12512_v56  ;;  %5196 = vst [vmem:[%s12556_s19 + $0x70] sm:$0xff] %v5001_v33 }
 0x61a   : > { %v5050_v12 = vcombine.low %v5042_v27, %v5049_v2  ;;  %v5091_v47 = vrot.slane %v5083_v36, %v12512_v56  ;;  %v5117_v43 = vrot.slane %v5101_v45, %v12512_v56  ;;  %v5124_v53 = vrot.slane %v5102_v58, %v12512_v56 }
 0x61b   : > { %v5098_v25 = vrot.slane %v5084_v62, %v12512_v56  ;;  %v5131_v40 = vrot.slane %v5103_v31, %v12512_v56  ;;  %v5162_v16 = vrot.slane %v5155_v54, %v12512_v56  ;;  %v16031_v22 = vlaneseq }
 0x61c   : > { %v5132_v20 = vcombine.low %v5110_v9, %v5117_v43  ;;  %5197 = vst [vmem:[%s12556_s19 + $0x78] sm:$0xff] %v5050_v12 }
 0x61d   : > { %vm5202_vm3 = vcmp.lt.s32.totalorder %v16031_v22, 128  ;;  %v5099_v19 = vcombine.low %v5091_v47, %v5098_v25  ;;  %v5133_v10 = vcombine.low %v5124_v53, %v5131_v40 }
 0x61e   : > { %5204 = vst.msk [vmem:[%s12556_s19 + $0x90] sm:$0x1] %vm5202_vm3, %v5162_v16  ;;  %v5140_v49 = vrot.slane %v5132_v20, %v12512_v56 }
 0x61f   : > { %v5147_v44 = vrot.slane %v5133_v10, %v12512_v56  ;;  %5198 = vst [vmem:[%s12556_s19 + $0x80] sm:$0xff] %v5099_v19 }
 0x621   : > { %v5148_v59 = vcombine.low %v5140_v49, %v5147_v44 }
 0x623   : > { %5199 = vst [vmem:[%s12556_s19 + $0x88] sm:$0xff] %v5148_v59 }
 0x624   : > { %5619 = shalt.err (!%p5616_p0)
}
 0x625   : > { %s5620_s13 = scalar_lea.hbm %s12757_s29, 2320  ;;  %s5624_s23 = scalar_lea.hbm %s16032_s6, 4640 }
 0x626   : > { %p5621_p6 = scmp.ne.s32.totalorder %s12757_s29, %s5620_s13  ;;  %p5625_p11 = scmp.lt.u32.totalorder %s12757_s29, %s16032_s6 }
 0x627   : > { %p5626_p8 = scmp.lt.u32.totalorder %s5624_s23, %s5620_s13  ;;  %p5628_p1 = scmp.lt.u32.totalorder %s5620_s13, %s12757_s29 }
 0x628   : > { %p5622_p13 = pnand %p5621_p6, %p16033_p9 }
 0x629   : > { %p5627_p4 = por %p5626_p8, %p5625_p11 }
 0x62a   : > { %p5623_p3 = pneg %p5622_p13 }
 0x62b   : > { %p5629_p5 = por %p5628_p1, %p5627_p4 }
 0x62d   : > { %p5630_p7 = pnand %p5629_p5, %p5623_p3 }
 0x62f   : > { %5633 = shalt.err (!%p5630_p7)
}
 0x630   : > { %5387 = dma.vmem_to_hbm [thread:$0]  (%p16033_p9), %s12759_s21, 2320, %s12757_s29, %s5206_s8  }
 0x631 PF: > { %s16034_s24 = sld [smem:[#allocation18_spill]]  ;;  %s16035_s16 = sld [smem:[#allocation21_spill]] }
 0x632   : > { %p16037_p12 = scmp.ge.s32.totalorder %s5680_s10, 2 }
 0x637   : > { %s5232_s28 = sand.u32 1, %s16034_s24   ;;  %p16036_p2 = scmp.ne.s32.totalorder %s16035_s16, 0 }
 0x638   : > { %s5233_s26 = scalar_lea.sflag [#allocation6], %s5232_s28 }
 0x639   : > { %p5407_p10 = pnand %p16037_p12, %p16036_p2 }
 0x63b   : > { %5663 = dma.done.wait (!%p5407_p10), %s5233_s26, 2320  }
 0x63c   : > { %5665 = vsyncadd (!%p5407_p10), %s5233_s26, 4294964976  ;;  %s16038_s10 = sld [smem:[#allocation19_spill]]  ;;  %s16039_s19 = sld [smem:[#allocation20_spill]] }
 0x63d   : > { %s16040_s29 = smov %s5672_s30  ;;  %s16041_s30 = smov %s5676_s9 }
 0x642   : > { %p24_p0 = scmp.ge.s32.totalorder %s16038_s10, 4   ;;  %s16042_s9 = smov %s16039_s19 }
 0x644   :  { %26 = sbr.rel (!%p24_p0) target bundleno = 12 (0xc), region = 117 }
 0x64b   :  { %5238 = vsyncpa [#allocation5], 1 }
 0x64c   :  { %5240 = vsyncpa [#allocation5 + $0x1], 1 }
 0x64d   :  { %5241 = vsyncpa [#allocation8], 1 }
 0x64e   :  { %5242 = vsyncpa [#allocation11], 1 }
 0x64f   :  { %5244 = vsyncpa [#allocation11 + $0x1], 1 }
 0x650   :  { %5245 = vsyncpa [#allocation6], 1 }
 0x651   :  { %5247 = vsyncpa [#allocation6 + $0x1], 1 }

</bundles_post_ra>
